<compile_context>
chip_gen: v7x
topology: tpu7x:2x2x1
jax: 0.10.0
libtpu: 0.0.40
codegen_flags: <defaults>
</compile_context>

<pallas_src>
import jax
import jax.numpy as jnp
from jax.experimental import pallas as pl
from jax.experimental.pallas import tpu as pltpu


# ----------------------------- Pallas kernels ------------------------------
# bf16 operands -> MXU, f32 accumulate, f32 epilogue on the VPU.

def _matmul_bn_mask_kernel(x_ref, w_ref, s_ref, b_ref, m_ref, o_ref):
    """o = where(mask, relu(x@w*s + b), x@w*s + b)  (per-column ReLU mask).

    Used for the stem conv (mask = all ones) and for the fused
    (3x3 conv1 | 1x1 shortcut) kernel of a basic block, where only the conv1
    half of the output columns gets a ReLU."""
    acc = jnp.dot(x_ref[...], w_ref[...], preferred_element_type=jnp.float32)
    acc = acc * s_ref[...] + b_ref[...]
    o_ref[...] = jnp.where(m_ref[...] > 0.0, jnp.maximum(acc, 0.0), acc)


def _matmul_bn_res_kernel(x_ref, w_ref, s_ref, b_ref, r_ref, o_ref):
    """o = relu(x@w*s + b + residual)   (conv2 + BN + shortcut add + ReLU)."""
    acc = jnp.dot(x_ref[...], w_ref[...], preferred_element_type=jnp.float32)
    o_ref[...] = jnp.maximum(acc * s_ref[...] + b_ref[...] + r_ref[...], 0.0)


def _final_kernel(x_ref, w_ref, s_ref, b_ref, r_ref, p_ref, lw_ref, lb_ref,
                  o_ref):
    """Last conv2 + BN + residual + ReLU + 8x8 global avg-pool + Linear,
    fused into a single pallas_call; writes the logits directly."""
    acc = jnp.dot(x_ref[...], w_ref[...], preferred_element_type=jnp.float32)
    acc = jnp.maximum(acc * s_ref[...] + b_ref[...] + r_ref[...], 0.0)
    # Global average pool as a tiny (N, M) pooling-matrix matmul: avoids
    # in-kernel reshapes / cross-sublane reductions.
    pooled = jnp.dot(p_ref[...], acc, preferred_element_type=jnp.float32)
    o_ref[...] = (jnp.dot(pooled, lw_ref[...],
                          preferred_element_type=jnp.float32) + lb_ref[...])


# --------------------------- Pallas call wrappers ---------------------------

def _pick_tm(m):
    # >= 2 tiles along the parallel M axis so both v7x TensorCores get work;
    # cap tiles at 512 rows (far below the VMEM limit on all generations).
    tm = min(512, max(8, m // 2))
    assert m % tm == 0 and tm % 8 == 0, (m, tm)
    return tm


def _pad_k_to_128(x, w):
    # Lane-align the contraction dim (v6e 256-deep MXU feed); zero padding of
    # both operands is exact.
    k = x.shape[1]
    kp = ((k + 127) // 128) * 128
    if kp != k:
        x = jnp.pad(x, ((0, 0), (0, kp - k)))
        w = jnp.pad(w, ((0, kp - k), (0, 0)))
    return x, w


def fused_matmul(x, w, scale, bias, *, residual=None, relu_mask=None):
    """out = epilogue((x @ w) * scale + bias [+ residual]) in one kernel."""
    x = x.astype(jnp.bfloat16)
    w = w.astype(jnp.bfloat16)
    x, w = _pad_k_to_128(x, w)
    m, k = x.shape
    n = w.shape[1]
    tm = _pick_tm(m)
    grid = (m // tm,)

    scale2 = scale.reshape(1, n).astype(jnp.float32)
    bias2 = bias.reshape(1, n).astype(jnp.float32)

    in_specs = [
        pl.BlockSpec((tm, k), lambda i: (i, 0)),   # activations, tiled over M
        pl.BlockSpec((k, n), lambda i: (0, 0)),    # weights, resident in VMEM
        pl.BlockSpec((1, n), lambda i: (0, 0)),    # folded BN scale
        pl.BlockSpec((1, n), lambda i: (0, 0)),    # folded BN bias
    ]
    args = [x, w, scale2, bias2]

    if residual is not None:
        in_specs.append(pl.BlockSpec((tm, n), lambda i: (i, 0)))
        args.append(residual.astype(jnp.float32))   # residual add stays f32
        kern = _matmul_bn_res_kernel
    else:
        if relu_mask is None:
            relu_mask = jnp.ones((n,), jnp.float32)
        in_specs.append(pl.BlockSpec((1, n), lambda i: (0, 0)))
        args.append(relu_mask.reshape(1, n).astype(jnp.float32))
        kern = _matmul_bn_mask_kernel

    return pl.pallas_call(
        kern,
        out_shape=jax.ShapeDtypeStruct((m, n), jnp.float32),
        grid=grid,
        in_specs=in_specs,
        out_specs=pl.BlockSpec((tm, n), lambda i: (i, 0)),
        compiler_params=pltpu.CompilerParams(dimension_semantics=("parallel",)),
    )(*args)


def final_conv_pool_linear(patches, w_mat, scale, bias, residual, lin_w_t,
                           lin_b, n_images):
    """conv2 + BN + residual + ReLU + global avg-pool + Linear, one call."""
    x = patches.astype(jnp.bfloat16)
    w = w_mat.astype(jnp.bfloat16)
    x, w = _pad_k_to_128(x, w)
    m = x.shape[0]
    c = w.shape[1]
    ncls = lin_w_t.shape[1]
    rows = m // n_images                     # = Ho*Wo = 64 (the 8x8 pool)
    pool_mat = jnp.repeat(jnp.eye(n_images, dtype=jnp.float32),
                          rows, axis=1) / rows            # (N, M)
    # Grid-less call: all operands are tiny and live whole in VMEM.
    return pl.pallas_call(
        _final_kernel,
        out_shape=jax.ShapeDtypeStruct((n_images, ncls), jnp.float32),
    )(x, w,
      scale.reshape(1, c).astype(jnp.float32),
      bias.reshape(1, c).astype(jnp.float32),
      residual.astype(jnp.float32),
      pool_mat,
      lin_w_t.astype(jnp.float32),
      lin_b.reshape(1, ncls).astype(jnp.float32))


# ------------------------------ conv via im2col ------------------------------

def _im2col(x_nhwc, kh, kw, stride, pad):
    n, h, w, c = x_nhwc.shape
    xp = jnp.pad(x_nhwc, ((0, 0), (pad, pad), (pad, pad), (0, 0)))
    ho = (h + 2 * pad - kh) // stride + 1
    wo = (w + 2 * pad - kw) // stride + 1
    cols = []
    for i in range(kh):
        for j in range(kw):
            cols.append(xp[:, i:i + stride * (ho - 1) + 1:stride,
                              j:j + stride * (wo - 1) + 1:stride, :])
    patches = jnp.concatenate(cols, axis=-1)           # (n, ho, wo, kh*kw*c)
    return patches.reshape(n * ho * wo, kh * kw * c), (n, ho, wo)


def _oihw_to_mat(w_oihw):
    # OIHW -> (kh*kw*cin, cout), matching the im2col K ordering (kh, kw, ci).
    cout, cin, kh, kw = w_oihw.shape
    return jnp.transpose(w_oihw, (2, 3, 1, 0)).reshape(kh * kw * cin, cout)


# --------------------------------- model -----------------------------------

def _bn_fold(gamma, beta, mean, var, eps=1e-5):
    scale = gamma / jnp.sqrt(var + eps)
    return scale, beta - mean * scale


def _fuse_conv1_shortcut(p):
    """Fuse a block's 3x3 conv1 and 1x1 shortcut conv along output channels.

    Both read the same stride-2 input; the 1x1/stride-2/pad-0 shortcut samples
    exactly the centre tap (index 4) of the 3x3/stride-2/pad-1 im2col patches,
    so its weight is embedded at rows [4*cin, 5*cin) of a zero matrix.
    Output columns: [conv1+bn1 (ReLU'd) | shortcut+bns (no ReLU)]."""
    cout, cin = p["w1"].shape[0], p["w1"].shape[1]
    w1_mat = _oihw_to_mat(p["w1"])                       # (9*cin, cout)
    ws_mat = _oihw_to_mat(p["ws"])                       # (cin, cout), 1x1
    ws_big = jnp.concatenate([
        jnp.zeros((4 * cin, cout), ws_mat.dtype), ws_mat,
        jnp.zeros((4 * cin, cout), ws_mat.dtype)], axis=0)
    w_fused = jnp.concatenate([w1_mat, ws_big], axis=1)  # (9*cin, 2*cout)
    s1, b1 = p["bn1"]
    ss, bs = p["bns"]
    scale = jnp.concatenate([s1, ss])
    bias = jnp.concatenate([b1, bs])
    relu_mask = jnp.concatenate([jnp.ones((cout,), jnp.float32),
                                 jnp.zeros((cout,), jnp.float32)])
    return w_fused, scale, bias, relu_mask, cout


def _block_conv1_shortcut(x_nhwc, p):
    # Every block uses the layer stride (=2), faithful to model.py; the
    # projection shortcut therefore always exists.
    w_fused, scale, bias, relu_mask, cout = _fuse_conv1_shortcut(p)
    patches, (n, ho, wo) = _im2col(x_nhwc.astype(jnp.bfloat16),
                                   3, 3, stride=2, pad=1)
    out = fused_matmul(patches, w_fused, scale, bias, relu_mask=relu_mask)
    main = out[:, :cout]          # relu(bn1(conv1(x)))
    shortcut = out[:, cout:]      # bns(convs(x))  (no relu)
    return main, shortcut, (n, ho, wo, cout)


def basic_block(x_nhwc, p):
    main, shortcut, (n, ho, wo, cout) = _block_conv1_shortcut(x_nhwc, p)
    patches2, _ = _im2col(main.reshape(n, ho, wo, cout).astype(jnp.bfloat16),
                          3, 3, stride=1, pad=1)
    s2, b2 = p["bn2"]
    out = fused_matmul(patches2, _oihw_to_mat(p["w2"]), s2, b2,
                       residual=shortcut)
    return out.reshape(n, ho, wo, cout)


def final_block(x_nhwc, p, lin_w, lin_b):
    main, shortcut, (n, ho, wo, cout) = _block_conv1_shortcut(x_nhwc, p)
    patches2, _ = _im2col(main.reshape(n, ho, wo, cout).astype(jnp.bfloat16),
                          3, 3, stride=1, pad=1)
    s2, b2 = p["bn2"]
    return final_conv_pool_linear(patches2, _oihw_to_mat(p["w2"]), s2, b2,
                                  shortcut, lin_w.T, lin_b, n_images=n)


def init_params(key, num_classes=10):
    keys = iter(jax.random.split(key, 64))
    nk = lambda: next(keys)

    def conv_w(k, cout, cin, ksz):
        fan_in = cin * ksz * ksz
        return jax.random.normal(k, (cout, cin, ksz, ksz), jnp.float32) * \
            (2.0 / fan_in) ** 0.5 * 0.5

    def bn_p(k, c):
        k1, k2, k3, k4 = jax.random.split(k, 4)
        gamma = 1.0 + 0.1 * jax.random.normal(k1, (c,), jnp.float32)
        beta = 0.1 * jax.random.normal(k2, (c,), jnp.float32)
        mean = 0.1 * jax.random.normal(k3, (c,), jnp.float32)
        var = 1.0 + 0.5 * jax.random.uniform(k4, (c,), jnp.float32)
        return _bn_fold(gamma, beta, mean, var)

    params = {
        "conv1_w": conv_w(nk(), 16, 3, 3),
        "bn1": bn_p(nk(), 16),
        "blocks": [],
    }
    in_c = 16
    for out_c in (16, 32, 64):        # num_blocks = [1,1,1]; stride 2 each
        params["blocks"].append({
            "w1": conv_w(nk(), out_c, in_c, 3), "bn1": bn_p(nk(), out_c),
            "w2": conv_w(nk(), out_c, out_c, 3), "bn2": bn_p(nk(), out_c),
            "ws": conv_w(nk(), out_c, in_c, 1), "bns": bn_p(nk(), out_c),
        })
        in_c = out_c
    params["lin_w"] = 0.1 * jax.random.normal(nk(), (num_classes, 64),
                                              jnp.float32)
    params["lin_b"] = 0.1 * jax.random.normal(nk(), (num_classes,),
                                              jnp.float32)
    return params


@jax.jit
def resnet_forward(params, x_nchw):
    x = jnp.transpose(x_nchw, (0, 2, 3, 1)).astype(jnp.float32)  # NCHW->NHWC
    # Stem: conv3x3 s1 p1 + BN + ReLU (one fused matmul kernel).
    s1, b1 = params["bn1"]
    patches, (n, ho, wo) = _im2col(x.astype(jnp.bfloat16), 3, 3,
                                   stride=1, pad=1)
    out = fused_matmul(patches, _oihw_to_mat(params["conv1_w"]), s1, b1)
    out = out.reshape(n, ho, wo, params["conv1_w"].shape[0])
    # layer1 / layer2: 2 fused pallas_calls each.
    out = basic_block(out, params["blocks"][0])
    out = basic_block(out, params["blocks"][1])
    # layer3 + F.avg_pool2d(·, 8) + dropout2d(training=False)==identity +
    # Linear: the pool and linear are fused into the last conv2 kernel.
    # TODO(synk): the reference's host-side `print(zero_check)` debug prints
    # and training-mode dropout2d randomness are not emitted (inference only).
    logits = final_block(out, params["blocks"][2],
                         params["lin_w"], params["lin_b"])
    return logits                                       # (N, num_classes)


if __name__ == "__main__":
    key = jax.random.PRNGKey(0)
    pkey, xkey = jax.random.split(key)
    params = init_params(pkey, num_classes=10)
    # Implied input: 3 channels, 64x64 (three stride-2 layers + 8x8 pool).
    x = jax.random.normal(xkey, (2, 3, 64, 64), jnp.float32)
    logits = resnet_forward(params, x)
    jax.block_until_ready(logits)
    assert logits.shape == (2, 10) and logits.dtype == jnp.float32
    assert bool(jnp.all(jnp.isfinite(logits)))
    print("KERNEL_OK")
</pallas_src>

<mosaic_0001>
module attributes {stable_mosaic.version = 11 : i64} {
  func.func @_matmul_bn_mask_kernel(%arg0: i32, %arg1: memref<512x128xbf16, #tpu.memory_space<vmem>>, %arg2: memref<128x16xbf16, #tpu.memory_space<vmem>>, %arg3: memref<1x16xf32, #tpu.memory_space<vmem>>, %arg4: memref<1x16xf32, #tpu.memory_space<vmem>>, %arg5: memref<1x16xf32, #tpu.memory_space<vmem>>, %arg6: memref<512x16xf32, #tpu.memory_space<vmem>>) attributes {dimension_semantics = [#tpu.dimension_semantics<parallel>], iteration_bounds = array<i64: 16>, scalar_prefetch = 0 : i64, scratch_operands = 0 : i64, tpu.core_type = #tpu.core_type<tc>, window_params = [{transform_indices = @transform_0, window_bounds = array<i64: 512, 128>}, {pipeline_mode = #tpu.pipeline_mode<synchronous>, transform_indices = @transform_1, window_bounds = array<i64: 128, 16>}, {pipeline_mode = #tpu.pipeline_mode<synchronous>, transform_indices = @transform_2, window_bounds = array<i64: 1, 16>}, {pipeline_mode = #tpu.pipeline_mode<synchronous>, transform_indices = @transform_3, window_bounds = array<i64: 1, 16>}, {pipeline_mode = #tpu.pipeline_mode<synchronous>, transform_indices = @transform_4, window_bounds = array<i64: 1, 16>}, {transform_indices = @transform_5, window_bounds = array<i64: 512, 16>}]} {
    %c0 = arith.constant 0 : index
    %c0_0 = arith.constant 0 : index
    %0 = vector.load %arg1[%c0, %c0_0] : memref<512x128xbf16, #tpu.memory_space<vmem>>, vector<512x128xbf16>
    %c0_1 = arith.constant 0 : index
    %c0_2 = arith.constant 0 : index
    %1 = vector.load %arg2[%c0_1, %c0_2] : memref<128x16xbf16, #tpu.memory_space<vmem>>, vector<128x16xbf16>
    %cst = arith.constant dense<0.000000e+00> : vector<512x16xf32>
    %2 = tpu.matmul %0, %1, %cst {dimension_numbers = #tpu.dot_dimension_numbers<[1], [0], [0], [1], [0, 0, 1, 1], [], []>} : vector<512x128xbf16>, vector<128x16xbf16>, vector<512x16xf32> -> vector<512x16xf32>
    %c0_3 = arith.constant 0 : index
    %c0_4 = arith.constant 0 : index
    %3 = vector.load %arg3[%c0_3, %c0_4] : memref<1x16xf32, #tpu.memory_space<vmem>>, vector<1x16xf32>
    %4 = vector.broadcast %3 : vector<1x16xf32> to vector<512x16xf32>
    %5 = arith.mulf %2, %4 : vector<512x16xf32>
    %c0_5 = arith.constant 0 : index
    %c0_6 = arith.constant 0 : index
    %6 = vector.load %arg4[%c0_5, %c0_6] : memref<1x16xf32, #tpu.memory_space<vmem>>, vector<1x16xf32>
    %7 = vector.broadcast %6 : vector<1x16xf32> to vector<512x16xf32>
    %8 = arith.addf %5, %7 : vector<512x16xf32>
    %c0_7 = arith.constant 0 : index
    %c0_8 = arith.constant 0 : index
    %9 = vector.load %arg5[%c0_7, %c0_8] : memref<1x16xf32, #tpu.memory_space<vmem>>, vector<1x16xf32>
    %cst_9 = arith.constant 0.000000e+00 : f32
    %10 = vector.broadcast %cst_9 : f32 to vector<1x16xf32>
    %11 = arith.cmpf ogt, %9, %10 : vector<1x16xf32>
    %cst_10 = arith.constant 0.000000e+00 : f32
    %12 = vector.broadcast %cst_10 : f32 to vector<512x16xf32>
    %13 = arith.maximumf %8, %12 : vector<512x16xf32>
    %14 = vector.shape_cast %11 : vector<1x16xi1> to vector<1x16xi1>
    %15 = vector.broadcast %14 : vector<1x16xi1> to vector<512x16xi1>
    %16 = arith.select %15, %13, %8 : vector<512x16xi1>, vector<512x16xf32>
    %c0_11 = arith.constant 0 : index
    %c0_12 = arith.constant 0 : index
    %17 = vector.load %arg6[%c0_11, %c0_12] : memref<512x16xf32, #tpu.memory_space<vmem>>, vector<512x16xf32>
    tpu.vector_store %arg6[%c0_11, %c0_12], %16 {strides = array<i32>} : memref<512x16xf32, #tpu.memory_space<vmem>>, vector<512x16xf32>,
    return
  }
  func.func @transform_0(%arg0: i32) -> (i32, i32) {
    %c0_i32 = arith.constant 0 : i32
    %c0_i32_0 = arith.constant 0 : i32
    return %arg0, %c0_i32 : i32, i32
  }
  func.func @transform_1(%arg0: i32) -> (i32, i32) {
    %c0_i32 = arith.constant 0 : i32
    %c0_i32_0 = arith.constant 0 : i32
    %c0_i32_1 = arith.constant 0 : i32
    return %c0_i32, %c0_i32_0 : i32, i32
  }
  func.func @transform_2(%arg0: i32) -> (i32, i32) {
    %c0_i32 = arith.constant 0 : i32
    %c0_i32_0 = arith.constant 0 : i32
    %c0_i32_1 = arith.constant 0 : i32
    return %c0_i32, %c0_i32_0 : i32, i32
  }
  func.func @transform_3(%arg0: i32) -> (i32, i32) {
    %c0_i32 = arith.constant 0 : i32
    %c0_i32_0 = arith.constant 0 : i32
    %c0_i32_1 = arith.constant 0 : i32
    return %c0_i32, %c0_i32_0 : i32, i32
  }
  func.func @transform_4(%arg0: i32) -> (i32, i32) {
    %c0_i32 = arith.constant 0 : i32
    %c0_i32_0 = arith.constant 0 : i32
    %c0_i32_1 = arith.constant 0 : i32
    return %c0_i32, %c0_i32_0 : i32, i32
  }
  func.func @transform_5(%arg0: i32) -> (i32, i32) {
    %c0_i32 = arith.constant 0 : i32
    %c0_i32_0 = arith.constant 0 : i32
    return %arg0, %c0_i32 : i32, i32
  }
}

module attributes {stable_mosaic.version = 11 : i64} {
  func.func @_matmul_bn_mask_kernel(%arg0: i32, %arg1: memref<512x256xbf16, #tpu.memory_space<vmem>>, %arg2: memref<256x32xbf16, #tpu.memory_space<vmem>>, %arg3: memref<1x32xf32, #tpu.memory_space<vmem>>, %arg4: memref<1x32xf32, #tpu.memory_space<vmem>>, %arg5: memref<1x32xf32, #tpu.memory_space<vmem>>, %arg6: memref<512x32xf32, #tpu.memory_space<vmem>>) attributes {dimension_semantics = [#tpu.dimension_semantics<parallel>], iteration_bounds = array<i64: 4>, scalar_prefetch = 0 : i64, scratch_operands = 0 : i64, tpu.core_type = #tpu.core_type<tc>, window_params = [{transform_indices = @transform_0, window_bounds = array<i64: 512, 256>}, {pipeline_mode = #tpu.pipeline_mode<synchronous>, transform_indices = @transform_1, window_bounds = array<i64: 256, 32>}, {pipeline_mode = #tpu.pipeline_mode<synchronous>, transform_indices = @transform_2, window_bounds = array<i64: 1, 32>}, {pipeline_mode = #tpu.pipeline_mode<synchronous>, transform_indices = @transform_3, window_bounds = array<i64: 1, 32>}, {pipeline_mode = #tpu.pipeline_mode<synchronous>, transform_indices = @transform_4, window_bounds = array<i64: 1, 32>}, {transform_indices = @transform_5, window_bounds = array<i64: 512, 32>}]} {
    %c0 = arith.constant 0 : index
    %c0_0 = arith.constant 0 : index
    %0 = vector.load %arg1[%c0, %c0_0] : memref<512x256xbf16, #tpu.memory_space<vmem>>, vector<512x256xbf16>
    %c0_1 = arith.constant 0 : index
    %c0_2 = arith.constant 0 : index
    %1 = vector.load %arg2[%c0_1, %c0_2] : memref<256x32xbf16, #tpu.memory_space<vmem>>, vector<256x32xbf16>
    %cst = arith.constant dense<0.000000e+00> : vector<512x32xf32>
    %2 = tpu.matmul %0, %1, %cst {dimension_numbers = #tpu.dot_dimension_numbers<[1], [0], [0], [1], [0, 0, 1, 1], [], []>} : vector<512x256xbf16>, vector<256x32xbf16>, vector<512x32xf32> -> vector<512x32xf32>
    %c0_3 = arith.constant 0 : index
    %c0_4 = arith.constant 0 : index
    %3 = vector.load %arg3[%c0_3, %c0_4] : memref<1x32xf32, #tpu.memory_space<vmem>>, vector<1x32xf32>
    %4 = vector.broadcast %3 : vector<1x32xf32> to vector<512x32xf32>
    %5 = arith.mulf %2, %4 : vector<512x32xf32>
    %c0_5 = arith.constant 0 : index
    %c0_6 = arith.constant 0 : index
    %6 = vector.load %arg4[%c0_5, %c0_6] : memref<1x32xf32, #tpu.memory_space<vmem>>, vector<1x32xf32>
    %7 = vector.broadcast %6 : vector<1x32xf32> to vector<512x32xf32>
    %8 = arith.addf %5, %7 : vector<512x32xf32>
    %c0_7 = arith.constant 0 : index
    %c0_8 = arith.constant 0 : index
    %9 = vector.load %arg5[%c0_7, %c0_8] : memref<1x32xf32, #tpu.memory_space<vmem>>, vector<1x32xf32>
    %cst_9 = arith.constant 0.000000e+00 : f32
    %10 = vector.broadcast %cst_9 : f32 to vector<1x32xf32>
    %11 = arith.cmpf ogt, %9, %10 : vector<1x32xf32>
    %cst_10 = arith.constant 0.000000e+00 : f32
    %12 = vector.broadcast %cst_10 : f32 to vector<512x32xf32>
    %13 = arith.maximumf %8, %12 : vector<512x32xf32>
    %14 = vector.shape_cast %11 : vector<1x32xi1> to vector<1x32xi1>
    %15 = vector.broadcast %14 : vector<1x32xi1> to vector<512x32xi1>
    %16 = arith.select %15, %13, %8 : vector<512x32xi1>, vector<512x32xf32>
    %c0_11 = arith.constant 0 : index
    %c0_12 = arith.constant 0 : index
    %17 = vector.load %arg6[%c0_11, %c0_12] : memref<512x32xf32, #tpu.memory_space<vmem>>, vector<512x32xf32>
    tpu.vector_store %arg6[%c0_11, %c0_12], %16 {strides = array<i32>} : memref<512x32xf32, #tpu.memory_space<vmem>>, vector<512x32xf32>,
    return
  }
  func.func @transform_0(%arg0: i32) -> (i32, i32) {
    %c0_i32 = arith.constant 0 : i32
    %c0_i32_0 = arith.constant 0 : i32
    return %arg0, %c0_i32 : i32, i32
  }
  func.func @transform_1(%arg0: i32) -> (i32, i32) {
    %c0_i32 = arith.constant 0 : i32
    %c0_i32_0 = arith.constant 0 : i32
    %c0_i32_1 = arith.constant 0 : i32
    return %c0_i32, %c0_i32_0 : i32, i32
  }
  func.func @transform_2(%arg0: i32) -> (i32, i32) {
    %c0_i32 = arith.constant 0 : i32
    %c0_i32_0 = arith.constant 0 : i32
    %c0_i32_1 = arith.constant 0 : i32
    return %c0_i32, %c0_i32_0 : i32, i32
  }
  func.func @transform_3(%arg0: i32) -> (i32, i32) {
    %c0_i32 = arith.constant 0 : i32
    %c0_i32_0 = arith.constant 0 : i32
    %c0_i32_1 = arith.constant 0 : i32
    return %c0_i32, %c0_i32_0 : i32, i32
  }
  func.func @transform_4(%arg0: i32) -> (i32, i32) {
    %c0_i32 = arith.constant 0 : i32
    %c0_i32_0 = arith.constant 0 : i32
    %c0_i32_1 = arith.constant 0 : i32
    return %c0_i32, %c0_i32_0 : i32, i32
  }
  func.func @transform_5(%arg0: i32) -> (i32, i32) {
    %c0_i32 = arith.constant 0 : i32
    %c0_i32_0 = arith.constant 0 : i32
    return %arg0, %c0_i32 : i32, i32
  }
}

module attributes {stable_mosaic.version = 11 : i64} {
  func.func @_matmul_bn_res_kernel(%arg0: i32, %arg1: memref<512x256xbf16, #tpu.memory_space<vmem>>, %arg2: memref<256x16xbf16, #tpu.memory_space<vmem>>, %arg3: memref<1x16xf32, #tpu.memory_space<vmem>>, %arg4: memref<1x16xf32, #tpu.memory_space<vmem>>, %arg5: memref<512x16xf32, #tpu.memory_space<vmem>>, %arg6: memref<512x16xf32, #tpu.memory_space<vmem>>) attributes {dimension_semantics = [#tpu.dimension_semantics<parallel>], iteration_bounds = array<i64: 4>, scalar_prefetch = 0 : i64, scratch_operands = 0 : i64, tpu.core_type = #tpu.core_type<tc>, window_params = [{transform_indices = @transform_0, window_bounds = array<i64: 512, 256>}, {pipeline_mode = #tpu.pipeline_mode<synchronous>, transform_indices = @transform_1, window_bounds = array<i64: 256, 16>}, {pipeline_mode = #tpu.pipeline_mode<synchronous>, transform_indices = @transform_2, window_bounds = array<i64: 1, 16>}, {pipeline_mode = #tpu.pipeline_mode<synchronous>, transform_indices = @transform_3, window_bounds = array<i64: 1, 16>}, {transform_indices = @transform_4, window_bounds = array<i64: 512, 16>}, {transform_indices = @transform_5, window_bounds = array<i64: 512, 16>}]} {
    %c0 = arith.constant 0 : index
    %c0_0 = arith.constant 0 : index
    %0 = vector.load %arg1[%c0, %c0_0] : memref<512x256xbf16, #tpu.memory_space<vmem>>, vector<512x256xbf16>
    %c0_1 = arith.constant 0 : index
    %c0_2 = arith.constant 0 : index
    %1 = vector.load %arg2[%c0_1, %c0_2] : memref<256x16xbf16, #tpu.memory_space<vmem>>, vector<256x16xbf16>
    %cst = arith.constant dense<0.000000e+00> : vector<512x16xf32>
    %2 = tpu.matmul %0, %1, %cst {dimension_numbers = #tpu.dot_dimension_numbers<[1], [0], [0], [1], [0, 0, 1, 1], [], []>} : vector<512x256xbf16>, vector<256x16xbf16>, vector<512x16xf32> -> vector<512x16xf32>
    %c0_3 = arith.constant 0 : index
    %c0_4 = arith.constant 0 : index
    %3 = vector.load %arg3[%c0_3, %c0_4] : memref<1x16xf32, #tpu.memory_space<vmem>>, vector<1x16xf32>
    %4 = vector.broadcast %3 : vector<1x16xf32> to vector<512x16xf32>
    %5 = arith.mulf %2, %4 : vector<512x16xf32>
    %c0_5 = arith.constant 0 : index
    %c0_6 = arith.constant 0 : index
    %6 = vector.load %arg4[%c0_5, %c0_6] : memref<1x16xf32, #tpu.memory_space<vmem>>, vector<1x16xf32>
    %7 = vector.broadcast %6 : vector<1x16xf32> to vector<512x16xf32>
    %8 = arith.addf %5, %7 : vector<512x16xf32>
    %c0_7 = arith.constant 0 : index
    %c0_8 = arith.constant 0 : index
    %9 = vector.load %arg5[%c0_7, %c0_8] : memref<512x16xf32, #tpu.memory_space<vmem>>, vector<512x16xf32>
    %10 = arith.addf %8, %9 : vector<512x16xf32>
    %cst_9 = arith.constant 0.000000e+00 : f32
    %11 = vector.broadcast %cst_9 : f32 to vector<512x16xf32>
    %12 = arith.maximumf %10, %11 : vector<512x16xf32>
    %c0_10 = arith.constant 0 : index
    %c0_11 = arith.constant 0 : index
    %13 = vector.load %arg6[%c0_10, %c0_11] : memref<512x16xf32, #tpu.memory_space<vmem>>, vector<512x16xf32>
    tpu.vector_store %arg6[%c0_10, %c0_11], %12 {strides = array<i32>} : memref<512x16xf32, #tpu.memory_space<vmem>>, vector<512x16xf32>,
    return
  }
  func.func @transform_0(%arg0: i32) -> (i32, i32) {
    %c0_i32 = arith.constant 0 : i32
    %c0_i32_0 = arith.constant 0 : i32
    return %arg0, %c0_i32 : i32, i32
  }
  func.func @transform_1(%arg0: i32) -> (i32, i32) {
    %c0_i32 = arith.constant 0 : i32
    %c0_i32_0 = arith.constant 0 : i32
    %c0_i32_1 = arith.constant 0 : i32
    return %c0_i32, %c0_i32_0 : i32, i32
  }
  func.func @transform_2(%arg0: i32) -> (i32, i32) {
    %c0_i32 = arith.constant 0 : i32
    %c0_i32_0 = arith.constant 0 : i32
    %c0_i32_1 = arith.constant 0 : i32
    return %c0_i32, %c0_i32_0 : i32, i32
  }
  func.func @transform_3(%arg0: i32) -> (i32, i32) {
    %c0_i32 = arith.constant 0 : i32
    %c0_i32_0 = arith.constant 0 : i32
    %c0_i32_1 = arith.constant 0 : i32
    return %c0_i32, %c0_i32_0 : i32, i32
  }
  func.func @transform_4(%arg0: i32) -> (i32, i32) {
    %c0_i32 = arith.constant 0 : i32
    %c0_i32_0 = arith.constant 0 : i32
    return %arg0, %c0_i32 : i32, i32
  }
  func.func @transform_5(%arg0: i32) -> (i32, i32) {
    %c0_i32 = arith.constant 0 : i32
    %c0_i32_0 = arith.constant 0 : i32
    return %arg0, %c0_i32 : i32, i32
  }
}

module attributes {stable_mosaic.version = 11 : i64} {
  func.func @_matmul_bn_mask_kernel(%arg0: i32, %arg1: memref<256x256xbf16, #tpu.memory_space<vmem>>, %arg2: memref<256x64xbf16, #tpu.memory_space<vmem>>, %arg3: memref<1x64xf32, #tpu.memory_space<vmem>>, %arg4: memref<1x64xf32, #tpu.memory_space<vmem>>, %arg5: memref<1x64xf32, #tpu.memory_space<vmem>>, %arg6: memref<256x64xf32, #tpu.memory_space<vmem>>) attributes {dimension_semantics = [#tpu.dimension_semantics<parallel>], iteration_bounds = array<i64: 2>, scalar_prefetch = 0 : i64, scratch_operands = 0 : i64, tpu.core_type = #tpu.core_type<tc>, window_params = [{transform_indices = @transform_0, window_bounds = array<i64: 256, 256>}, {pipeline_mode = #tpu.pipeline_mode<synchronous>, transform_indices = @transform_1, window_bounds = array<i64: 256, 64>}, {pipeline_mode = #tpu.pipeline_mode<synchronous>, transform_indices = @transform_2, window_bounds = array<i64: 1, 64>}, {pipeline_mode = #tpu.pipeline_mode<synchronous>, transform_indices = @transform_3, window_bounds = array<i64: 1, 64>}, {pipeline_mode = #tpu.pipeline_mode<synchronous>, transform_indices = @transform_4, window_bounds = array<i64: 1, 64>}, {transform_indices = @transform_5, window_bounds = array<i64: 256, 64>}]} {
    %c0 = arith.constant 0 : index
    %c0_0 = arith.constant 0 : index
    %0 = vector.load %arg1[%c0, %c0_0] : memref<256x256xbf16, #tpu.memory_space<vmem>>, vector<256x256xbf16>
    %c0_1 = arith.constant 0 : index
    %c0_2 = arith.constant 0 : index
    %1 = vector.load %arg2[%c0_1, %c0_2] : memref<256x64xbf16, #tpu.memory_space<vmem>>, vector<256x64xbf16>
    %cst = arith.constant dense<0.000000e+00> : vector<256x64xf32>
    %2 = tpu.matmul %0, %1, %cst {dimension_numbers = #tpu.dot_dimension_numbers<[1], [0], [0], [1], [0, 0, 1, 1], [], []>} : vector<256x256xbf16>, vector<256x64xbf16>, vector<256x64xf32> -> vector<256x64xf32>
    %c0_3 = arith.constant 0 : index
    %c0_4 = arith.constant 0 : index
    %3 = vector.load %arg3[%c0_3, %c0_4] : memref<1x64xf32, #tpu.memory_space<vmem>>, vector<1x64xf32>
    %4 = vector.broadcast %3 : vector<1x64xf32> to vector<256x64xf32>
    %5 = arith.mulf %2, %4 : vector<256x64xf32>
    %c0_5 = arith.constant 0 : index
    %c0_6 = arith.constant 0 : index
    %6 = vector.load %arg4[%c0_5, %c0_6] : memref<1x64xf32, #tpu.memory_space<vmem>>, vector<1x64xf32>
    %7 = vector.broadcast %6 : vector<1x64xf32> to vector<256x64xf32>
    %8 = arith.addf %5, %7 : vector<256x64xf32>
    %c0_7 = arith.constant 0 : index
    %c0_8 = arith.constant 0 : index
    %9 = vector.load %arg5[%c0_7, %c0_8] : memref<1x64xf32, #tpu.memory_space<vmem>>, vector<1x64xf32>
    %cst_9 = arith.constant 0.000000e+00 : f32
    %10 = vector.broadcast %cst_9 : f32 to vector<1x64xf32>
    %11 = arith.cmpf ogt, %9, %10 : vector<1x64xf32>
    %cst_10 = arith.constant 0.000000e+00 : f32
    %12 = vector.broadcast %cst_10 : f32 to vector<256x64xf32>
    %13 = arith.maximumf %8, %12 : vector<256x64xf32>
    %14 = vector.shape_cast %11 : vector<1x64xi1> to vector<1x64xi1>
    %15 = vector.broadcast %14 : vector<1x64xi1> to vector<256x64xi1>
    %16 = arith.select %15, %13, %8 : vector<256x64xi1>, vector<256x64xf32>
    %c0_11 = arith.constant 0 : index
    %c0_12 = arith.constant 0 : index
    %17 = vector.load %arg6[%c0_11, %c0_12] : memref<256x64xf32, #tpu.memory_space<vmem>>, vector<256x64xf32>
    tpu.vector_store %arg6[%c0_11, %c0_12], %16 {strides = array<i32>} : memref<256x64xf32, #tpu.memory_space<vmem>>, vector<256x64xf32>,
    return
  }
  func.func @transform_0(%arg0: i32) -> (i32, i32) {
    %c0_i32 = arith.constant 0 : i32
    %c0_i32_0 = arith.constant 0 : i32
    return %arg0, %c0_i32 : i32, i32
  }
  func.func @transform_1(%arg0: i32) -> (i32, i32) {
    %c0_i32 = arith.constant 0 : i32
    %c0_i32_0 = arith.constant 0 : i32
    %c0_i32_1 = arith.constant 0 : i32
    return %c0_i32, %c0_i32_0 : i32, i32
  }
  func.func @transform_2(%arg0: i32) -> (i32, i32) {
    %c0_i32 = arith.constant 0 : i32
    %c0_i32_0 = arith.constant 0 : i32
    %c0_i32_1 = arith.constant 0 : i32
    return %c0_i32, %c0_i32_0 : i32, i32
  }
  func.func @transform_3(%arg0: i32) -> (i32, i32) {
    %c0_i32 = arith.constant 0 : i32
    %c0_i32_0 = arith.constant 0 : i32
    %c0_i32_1 = arith.constant 0 : i32
    return %c0_i32, %c0_i32_0 : i32, i32
  }
  func.func @transform_4(%arg0: i32) -> (i32, i32) {
    %c0_i32 = arith.constant 0 : i32
    %c0_i32_0 = arith.constant 0 : i32
    %c0_i32_1 = arith.constant 0 : i32
    return %c0_i32, %c0_i32_0 : i32, i32
  }
  func.func @transform_5(%arg0: i32) -> (i32, i32) {
    %c0_i32 = arith.constant 0 : i32
    %c0_i32_0 = arith.constant 0 : i32
    return %arg0, %c0_i32 : i32, i32
  }
}

module attributes {stable_mosaic.version = 11 : i64} {
  func.func @_matmul_bn_res_kernel(%arg0: i32, %arg1: memref<256x384xbf16, #tpu.memory_space<vmem>>, %arg2: memref<384x32xbf16, #tpu.memory_space<vmem>>, %arg3: memref<1x32xf32, #tpu.memory_space<vmem>>, %arg4: memref<1x32xf32, #tpu.memory_space<vmem>>, %arg5: memref<256x32xf32, #tpu.memory_space<vmem>>, %arg6: memref<256x32xf32, #tpu.memory_space<vmem>>) attributes {dimension_semantics = [#tpu.dimension_semantics<parallel>], iteration_bounds = array<i64: 2>, scalar_prefetch = 0 : i64, scratch_operands = 0 : i64, tpu.core_type = #tpu.core_type<tc>, window_params = [{transform_indices = @transform_0, window_bounds = array<i64: 256, 384>}, {pipeline_mode = #tpu.pipeline_mode<synchronous>, transform_indices = @transform_1, window_bounds = array<i64: 384, 32>}, {pipeline_mode = #tpu.pipeline_mode<synchronous>, transform_indices = @transform_2, window_bounds = array<i64: 1, 32>}, {pipeline_mode = #tpu.pipeline_mode<synchronous>, transform_indices = @transform_3, window_bounds = array<i64: 1, 32>}, {transform_indices = @transform_4, window_bounds = array<i64: 256, 32>}, {transform_indices = @transform_5, window_bounds = array<i64: 256, 32>}]} {
    %c0 = arith.constant 0 : index
    %c0_0 = arith.constant 0 : index
    %0 = vector.load %arg1[%c0, %c0_0] : memref<256x384xbf16, #tpu.memory_space<vmem>>, vector<256x384xbf16>
    %c0_1 = arith.constant 0 : index
    %c0_2 = arith.constant 0 : index
    %1 = vector.load %arg2[%c0_1, %c0_2] : memref<384x32xbf16, #tpu.memory_space<vmem>>, vector<384x32xbf16>
    %cst = arith.constant dense<0.000000e+00> : vector<256x32xf32>
    %2 = tpu.matmul %0, %1, %cst {dimension_numbers = #tpu.dot_dimension_numbers<[1], [0], [0], [1], [0, 0, 1, 1], [], []>} : vector<256x384xbf16>, vector<384x32xbf16>, vector<256x32xf32> -> vector<256x32xf32>
    %c0_3 = arith.constant 0 : index
    %c0_4 = arith.constant 0 : index
    %3 = vector.load %arg3[%c0_3, %c0_4] : memref<1x32xf32, #tpu.memory_space<vmem>>, vector<1x32xf32>
    %4 = vector.broadcast %3 : vector<1x32xf32> to vector<256x32xf32>
    %5 = arith.mulf %2, %4 : vector<256x32xf32>
    %c0_5 = arith.constant 0 : index
    %c0_6 = arith.constant 0 : index
    %6 = vector.load %arg4[%c0_5, %c0_6] : memref<1x32xf32, #tpu.memory_space<vmem>>, vector<1x32xf32>
    %7 = vector.broadcast %6 : vector<1x32xf32> to vector<256x32xf32>
    %8 = arith.addf %5, %7 : vector<256x32xf32>
    %c0_7 = arith.constant 0 : index
    %c0_8 = arith.constant 0 : index
    %9 = vector.load %arg5[%c0_7, %c0_8] : memref<256x32xf32, #tpu.memory_space<vmem>>, vector<256x32xf32>
    %10 = arith.addf %8, %9 : vector<256x32xf32>
    %cst_9 = arith.constant 0.000000e+00 : f32
    %11 = vector.broadcast %cst_9 : f32 to vector<256x32xf32>
    %12 = arith.maximumf %10, %11 : vector<256x32xf32>
    %c0_10 = arith.constant 0 : index
    %c0_11 = arith.constant 0 : index
    %13 = vector.load %arg6[%c0_10, %c0_11] : memref<256x32xf32, #tpu.memory_space<vmem>>, vector<256x32xf32>
    tpu.vector_store %arg6[%c0_10, %c0_11], %12 {strides = array<i32>} : memref<256x32xf32, #tpu.memory_space<vmem>>, vector<256x32xf32>,
    return
  }
  func.func @transform_0(%arg0: i32) -> (i32, i32) {
    %c0_i32 = arith.constant 0 : i32
    %c0_i32_0 = arith.constant 0 : i32
    return %arg0, %c0_i32 : i32, i32
  }
  func.func @transform_1(%arg0: i32) -> (i32, i32) {
    %c0_i32 = arith.constant 0 : i32
    %c0_i32_0 = arith.constant 0 : i32
    %c0_i32_1 = arith.constant 0 : i32
    return %c0_i32, %c0_i32_0 : i32, i32
  }
  func.func @transform_2(%arg0: i32) -> (i32, i32) {
    %c0_i32 = arith.constant 0 : i32
    %c0_i32_0 = arith.constant 0 : i32
    %c0_i32_1 = arith.constant 0 : i32
    return %c0_i32, %c0_i32_0 : i32, i32
  }
  func.func @transform_3(%arg0: i32) -> (i32, i32) {
    %c0_i32 = arith.constant 0 : i32
    %c0_i32_0 = arith.constant 0 : i32
    %c0_i32_1 = arith.constant 0 : i32
    return %c0_i32, %c0_i32_0 : i32, i32
  }
  func.func @transform_4(%arg0: i32) -> (i32, i32) {
    %c0_i32 = arith.constant 0 : i32
    %c0_i32_0 = arith.constant 0 : i32
    return %arg0, %c0_i32 : i32, i32
  }
  func.func @transform_5(%arg0: i32) -> (i32, i32) {
    %c0_i32 = arith.constant 0 : i32
    %c0_i32_0 = arith.constant 0 : i32
    return %arg0, %c0_i32 : i32, i32
  }
}

module attributes {stable_mosaic.version = 11 : i64} {
  func.func @_matmul_bn_mask_kernel(%arg0: i32, %arg1: memref<64x384xbf16, #tpu.memory_space<vmem>>, %arg2: memref<384x128xbf16, #tpu.memory_space<vmem>>, %arg3: memref<1x128xf32, #tpu.memory_space<vmem>>, %arg4: memref<1x128xf32, #tpu.memory_space<vmem>>, %arg5: memref<1x128xf32, #tpu.memory_space<vmem>>, %arg6: memref<64x128xf32, #tpu.memory_space<vmem>>) attributes {dimension_semantics = [#tpu.dimension_semantics<parallel>], iteration_bounds = array<i64: 2>, scalar_prefetch = 0 : i64, scratch_operands = 0 : i64, tpu.core_type = #tpu.core_type<tc>, window_params = [{transform_indices = @transform_0, window_bounds = array<i64: 64, 384>}, {pipeline_mode = #tpu.pipeline_mode<synchronous>, transform_indices = @transform_1, window_bounds = array<i64: 384, 128>}, {pipeline_mode = #tpu.pipeline_mode<synchronous>, transform_indices = @transform_2, window_bounds = array<i64: 1, 128>}, {pipeline_mode = #tpu.pipeline_mode<synchronous>, transform_indices = @transform_3, window_bounds = array<i64: 1, 128>}, {pipeline_mode = #tpu.pipeline_mode<synchronous>, transform_indices = @transform_4, window_bounds = array<i64: 1, 128>}, {transform_indices = @transform_5, window_bounds = array<i64: 64, 128>}]} {
    %c0 = arith.constant 0 : index
    %c0_0 = arith.constant 0 : index
    %0 = vector.load %arg1[%c0, %c0_0] : memref<64x384xbf16, #tpu.memory_space<vmem>>, vector<64x384xbf16>
    %c0_1 = arith.constant 0 : index
    %c0_2 = arith.constant 0 : index
    %1 = vector.load %arg2[%c0_1, %c0_2] : memref<384x128xbf16, #tpu.memory_space<vmem>>, vector<384x128xbf16>
    %cst = arith.constant dense<0.000000e+00> : vector<64x128xf32>
    %2 = tpu.matmul %0, %1, %cst {dimension_numbers = #tpu.dot_dimension_numbers<[1], [0], [0], [1], [0, 0, 1, 1], [], []>} : vector<64x384xbf16>, vector<384x128xbf16>, vector<64x128xf32> -> vector<64x128xf32>
    %c0_3 = arith.constant 0 : index
    %c0_4 = arith.constant 0 : index
    %3 = vector.load %arg3[%c0_3, %c0_4] : memref<1x128xf32, #tpu.memory_space<vmem>>, vector<1x128xf32>
    %4 = vector.broadcast %3 : vector<1x128xf32> to vector<64x128xf32>
    %5 = arith.mulf %2, %4 : vector<64x128xf32>
    %c0_5 = arith.constant 0 : index
    %c0_6 = arith.constant 0 : index
    %6 = vector.load %arg4[%c0_5, %c0_6] : memref<1x128xf32, #tpu.memory_space<vmem>>, vector<1x128xf32>
    %7 = vector.broadcast %6 : vector<1x128xf32> to vector<64x128xf32>
    %8 = arith.addf %5, %7 : vector<64x128xf32>
    %c0_7 = arith.constant 0 : index
    %c0_8 = arith.constant 0 : index
    %9 = vector.load %arg5[%c0_7, %c0_8] : memref<1x128xf32, #tpu.memory_space<vmem>>, vector<1x128xf32>
    %cst_9 = arith.constant 0.000000e+00 : f32
    %10 = vector.broadcast %cst_9 : f32 to vector<1x128xf32>
    %11 = arith.cmpf ogt, %9, %10 : vector<1x128xf32>
    %cst_10 = arith.constant 0.000000e+00 : f32
    %12 = vector.broadcast %cst_10 : f32 to vector<64x128xf32>
    %13 = arith.maximumf %8, %12 : vector<64x128xf32>
    %14 = vector.shape_cast %11 : vector<1x128xi1> to vector<1x128xi1>
    %15 = vector.broadcast %14 : vector<1x128xi1> to vector<64x128xi1>
    %16 = arith.select %15, %13, %8 : vector<64x128xi1>, vector<64x128xf32>
    %c0_11 = arith.constant 0 : index
    %c0_12 = arith.constant 0 : index
    %17 = vector.load %arg6[%c0_11, %c0_12] : memref<64x128xf32, #tpu.memory_space<vmem>>, vector<64x128xf32>
    tpu.vector_store %arg6[%c0_11, %c0_12], %16 {strides = array<i32>} : memref<64x128xf32, #tpu.memory_space<vmem>>, vector<64x128xf32>,
    return
  }
  func.func @transform_0(%arg0: i32) -> (i32, i32) {
    %c0_i32 = arith.constant 0 : i32
    %c0_i32_0 = arith.constant 0 : i32
    return %arg0, %c0_i32 : i32, i32
  }
  func.func @transform_1(%arg0: i32) -> (i32, i32) {
    %c0_i32 = arith.constant 0 : i32
    %c0_i32_0 = arith.constant 0 : i32
    %c0_i32_1 = arith.constant 0 : i32
    return %c0_i32, %c0_i32_0 : i32, i32
  }
  func.func @transform_2(%arg0: i32) -> (i32, i32) {
    %c0_i32 = arith.constant 0 : i32
    %c0_i32_0 = arith.constant 0 : i32
    %c0_i32_1 = arith.constant 0 : i32
    return %c0_i32, %c0_i32_0 : i32, i32
  }
  func.func @transform_3(%arg0: i32) -> (i32, i32) {
    %c0_i32 = arith.constant 0 : i32
    %c0_i32_0 = arith.constant 0 : i32
    %c0_i32_1 = arith.constant 0 : i32
    return %c0_i32, %c0_i32_0 : i32, i32
  }
  func.func @transform_4(%arg0: i32) -> (i32, i32) {
    %c0_i32 = arith.constant 0 : i32
    %c0_i32_0 = arith.constant 0 : i32
    %c0_i32_1 = arith.constant 0 : i32
    return %c0_i32, %c0_i32_0 : i32, i32
  }
  func.func @transform_5(%arg0: i32) -> (i32, i32) {
    %c0_i32 = arith.constant 0 : i32
    %c0_i32_0 = arith.constant 0 : i32
    return %arg0, %c0_i32 : i32, i32
  }
}

module attributes {stable_mosaic.version = 11 : i64} {
  func.func @_final_kernel(%arg0: memref<128x640xbf16, #tpu.memory_space<vmem>>, %arg1: memref<640x64xbf16, #tpu.memory_space<vmem>>, %arg2: memref<1x64xf32, #tpu.memory_space<vmem>>, %arg3: memref<1x64xf32, #tpu.memory_space<vmem>>, %arg4: memref<128x64xf32, #tpu.memory_space<vmem>>, %arg5: memref<2x128xf32, #tpu.memory_space<vmem>>, %arg6: memref<64x10xf32, #tpu.memory_space<vmem>>, %arg7: memref<1x10xf32, #tpu.memory_space<vmem>>, %arg8: memref<2x10xf32, #tpu.memory_space<vmem>>) attributes {dimension_semantics = [], scalar_prefetch = 0 : i64, scratch_operands = 0 : i64, tpu.core_type = #tpu.core_type<tc>} {
    %c0 = arith.constant 0 : index
    %c0_0 = arith.constant 0 : index
    %0 = vector.load %arg0[%c0, %c0_0] : memref<128x640xbf16, #tpu.memory_space<vmem>>, vector<128x640xbf16>
    %c0_1 = arith.constant 0 : index
    %c0_2 = arith.constant 0 : index
    %1 = vector.load %arg1[%c0_1, %c0_2] : memref<640x64xbf16, #tpu.memory_space<vmem>>, vector<640x64xbf16>
    %cst = arith.constant dense<0.000000e+00> : vector<128x64xf32>
    %2 = tpu.matmul %0, %1, %cst {dimension_numbers = #tpu.dot_dimension_numbers<[1], [0], [0], [1], [0, 0, 1, 1], [], []>} : vector<128x640xbf16>, vector<640x64xbf16>, vector<128x64xf32> -> vector<128x64xf32>
    %c0_3 = arith.constant 0 : index
    %c0_4 = arith.constant 0 : index
    %3 = vector.load %arg2[%c0_3, %c0_4] : memref<1x64xf32, #tpu.memory_space<vmem>>, vector<1x64xf32>
    %4 = vector.broadcast %3 : vector<1x64xf32> to vector<128x64xf32>
    %5 = arith.mulf %2, %4 : vector<128x64xf32>
    %c0_5 = arith.constant 0 : index
    %c0_6 = arith.constant 0 : index
    %6 = vector.load %arg3[%c0_5, %c0_6] : memref<1x64xf32, #tpu.memory_space<vmem>>, vector<1x64xf32>
    %7 = vector.broadcast %6 : vector<1x64xf32> to vector<128x64xf32>
    %8 = arith.addf %5, %7 : vector<128x64xf32>
    %c0_7 = arith.constant 0 : index
    %c0_8 = arith.constant 0 : index
    %9 = vector.load %arg4[%c0_7, %c0_8] : memref<128x64xf32, #tpu.memory_space<vmem>>, vector<128x64xf32>
    %10 = arith.addf %8, %9 : vector<128x64xf32>
    %cst_9 = arith.constant 0.000000e+00 : f32
    %11 = vector.broadcast %cst_9 : f32 to vector<128x64xf32>
    %12 = arith.maximumf %10, %11 : vector<128x64xf32>
    %c0_10 = arith.constant 0 : index
    %c0_11 = arith.constant 0 : index
    %13 = vector.load %arg5[%c0_10, %c0_11] : memref<2x128xf32, #tpu.memory_space<vmem>>, vector<2x128xf32>
    %cst_12 = arith.constant dense<0.000000e+00> : vector<2x64xf32>
    %14 = tpu.matmul %13, %12, %cst_12 {dimension_numbers = #tpu.dot_dimension_numbers<[1], [0], [0], [1], [0, 0, 1, 1], [], []>} : vector<2x128xf32>, vector<128x64xf32>, vector<2x64xf32> -> vector<2x64xf32>
    %c0_13 = arith.constant 0 : index
    %c0_14 = arith.constant 0 : index
    %15 = vector.load %arg6[%c0_13, %c0_14] : memref<64x10xf32, #tpu.memory_space<vmem>>, vector<64x10xf32>
    %cst_15 = arith.constant dense<0.000000e+00> : vector<2x10xf32>
    %16 = tpu.matmul %14, %15, %cst_15 {dimension_numbers = #tpu.dot_dimension_numbers<[1], [0], [0], [1], [0, 0, 1, 1], [], []>} : vector<2x64xf32>, vector<64x10xf32>, vector<2x10xf32> -> vector<2x10xf32>
    %c0_16 = arith.constant 0 : index
    %c0_17 = arith.constant 0 : index
    %17 = vector.load %arg7[%c0_16, %c0_17] : memref<1x10xf32, #tpu.memory_space<vmem>>, vector<1x10xf32>
    %18 = vector.broadcast %17 : vector<1x10xf32> to vector<2x10xf32>
    %19 = arith.addf %16, %18 : vector<2x10xf32>
    %c0_18 = arith.constant 0 : index
    %c0_19 = arith.constant 0 : index
    %20 = vector.load %arg8[%c0_18, %c0_19] : memref<2x10xf32, #tpu.memory_space<vmem>>, vector<2x10xf32>
    tpu.vector_store %arg8[%c0_18, %c0_19], %19 {strides = array<i32>} : memref<2x10xf32, #tpu.memory_space<vmem>>, vector<2x10xf32>,
    return
  }
}

</mosaic_0001>

<bundles_post_ra>
// kernel: resnet_forward.7
= control target key start
LH: loop header
LB: loop body
LE: loop exit
PB: predicated region body
PF: predicated region fallthrough
CT: control target
= control target key end

     0   :  { %s1514_s18 = smov 0   ;;  %s1995_s0 = inlined_call_operand.vmem [shape: bf16[8192,128], index: 0, kind: input, shape index: {}]   ;;  %s1996_s1 = inlined_call_operand.vmem [shape: bf16[128,16], index: 1, kind: input, shape index: {}]   ;;  %s1997_s2 = inlined_call_operand.vmem [shape: f32[1,16], index: 2, kind: input, shape index: {}]   ;;  %s1998_s3 = inlined_call_operand.vmem [shape: f32[1,16], index: 3, kind: input, shape index: {}]   ;;  %s1999_s4 = inlined_call_operand.vmem [shape: f32[1,16], index: 4, kind: input, shape index: {}]   ;;  %s2000_s5 = inlined_call_operand.vmem [shape: f32[8192,16], index: 5, kind: output, shape index: {}]  }
   0x1 LB: > { %s1237_s19 = sadd.s32 4294967295, %s1481_s18   ;;  %p1241_p0 = scmp.ge.s32.totalorder %s1481_s18, 1  ;;  %s1481_s18 = sphi %s1514_s18, %s15_s18  }
   0x2   : > { %p188_p1 = scmp.lt.s32.totalorder %s1481_s18, 17 }
   0x4   : > { %p189_p2 = pnand %p1241_p0, %p188_p1 }
   0x5   : > { %v1435_v0 = vld [vmem:[%s1996_s1] sm:$0xff] (!%p189_p2)   ;;  %s1242_s22 = sshll.u32 (!%p189_p2), %s1237_s19, 6  ;;  %v1436_v1 = vld [vmem:[%s1996_s1 + $0x8] sm:$0xff] (!%p189_p2)   ;;  %v1437_v2 = vld [vmem:[%s1996_s1 + $0x10] sm:$0xff] (!%p189_p2)   ;;  %v1047_v40 = vlaneseq (!%p189_p2)  ;;  %v1483_v44 = vmov (!%p189_p2), 0   ;;  %vm1116_vm2 = vcmask (!%p189_p2), 130048  }
   0x6   : > { %192 = sbr.rel (%p189_p2) target bundleno = 322 (0x142), region = 40  ;;  %p217_p3 = scmp.lt.s32.totalorder (!%p189_p2), %s1242_s22, 1023  ;;  %1330 = vmatprep.subr.bf16.mxu0 (!%p189_p2), %v1435_v0  ;;  %1410 = vmatprep.subr.bf16.mxu1 (!%p189_p2), %v1435_v0  ;;  %v1438_v3 = vld [vmem:[%s1996_s1 + $0x18] sm:$0xff] (!%p189_p2)   ;;  %v1439_v6 = vld [vmem:[%s1996_s1 + $0x20] sm:$0xff] (!%p189_p2)   ;;  %v1440_v7 = vld [vmem:[%s1996_s1 + $0x28] sm:$0xff] (!%p189_p2)  }
   0x7   : > { %1331 = vmatpush3.bf16.msra.mxu0 (!%p189_p2), %v1435_v0  ;;  %1418 = vmatpush3.bf16.msra.mxu1 (!%p189_p2), %v1435_v0  ;;  %v1441_v8 = vld [vmem:[%s1996_s1 + $0x30] sm:$0xff] (!%p189_p2)   ;;  %v1442_v9 = vld [vmem:[%s1996_s1 + $0x38] sm:$0xff] (!%p189_p2)   ;;  %v980_v41 = vld [vmem:[%s1999_s4] sm:$0x1] (!%p189_p2)  ;;  %v1048_v42 = vshrl.u32 (!%p189_p2), %v1047_v40, 7 }
   0x8   : > { %1332 = vmatprep.subr.bf16.mxu0 (!%p189_p2), %v1436_v1  ;;  %1411 = vmatprep.subr.bf16.mxu1 (!%p189_p2), %v1436_v1  ;;  %vm981_vm0 = vcmp.gt.f32.partialorder (!%p189_p2), %v980_v41, 0.0  ;;  %v1592_v46 = vld [vmem:[%s1997_s2] ss:$0 sm:$0xff] (!%p189_p2) }
   0x9   : > { %v1049_v43 = vsub.s32 (!%p189_p2), 0, %v1048_v42  ;;  %v1046_v45 = vsel (!%p189_p2), %vm981_vm0, 1, %v1483_v44  ;;  %v1599_v49 = vld [vmem:[%s1998_s3] ss:$0 sm:$0xff] (!%p189_p2) }
   0xb   : > { %1333 = vmatpush3.bf16.msra.mxu0 (!%p189_p2), %v1436_v1  ;;  %1419 = vmatpush3.bf16.msra.mxu1 (!%p189_p2), %v1436_v1  ;;  %v1594_v47 = vrot.slane (!%p189_p2), %v1046_v45, %v1049_v43 }
   0xc   : > { %1334 = vmatprep.subr.bf16.mxu0 (!%p189_p2), %v1437_v2  ;;  %1412 = vmatprep.subr.bf16.mxu1 (!%p189_p2), %v1437_v2 }
   0xd   : > { %s2002_s22 = smov (!%p217_p3, %s1242_s22), 1023  ;;  %vm1051_vm1 = vcmp.eq.s32.totalorder %v1594_v47, 1 }
   0xe   : > { %s1243_s27 = sshll.u32 %s2002_s22, 2  ;;  %s1245_s24 = sshll.u32 %s2002_s22, 3 }
   0xf   : > { %s1537_s30 = scalar_lea.vmem %s1995_s0, %s1243_s27  ;;  %1335 = vmatpush3.bf16.msra.mxu0 %v1437_v2  ;;  %1420 = vmatpush3.bf16.msra.mxu1 %v1437_v2  ;;  %s1618_s26 = scalar_lea.vmem %s2000_s5, %s1245_s24 }
  0x10   : > { %v1443_v4 = vld [vmem:[%s1537_s30] sm:$0xff]   ;;  %1336 = vmatprep.subr.bf16.mxu0 %v1438_v3  ;;  %1413 = vmatprep.subr.bf16.mxu1 %v1438_v3  ;;  %v1445_v10 = vld [vmem:[%s1537_s30 + $0x8] sm:$0xff]   ;;  %v1447_v12 = vld [vmem:[%s1537_s30 + $0x10] sm:$0xff]  }
  0x11   : > { %v1444_v5 = vld [vmem:[%s1537_s30 + $0x80] sm:$0xff]   ;;  %1346 = vmatprep.mubr.bf16.mxu0 %v1443_v4  ;;  %v1446_v11 = vld [vmem:[%s1537_s30 + $0x88] sm:$0xff]   ;;  %v1448_v13 = vld [vmem:[%s1537_s30 + $0x90] sm:$0xff]  }
  0x12   : > { %1378 = vmatprep.mubr.bf16.mxu1 %v1444_v5  ;;  %v1449_v14 = vld [vmem:[%s1537_s30 + $0x18] sm:$0xff]   ;;  %v1451_v16 = vld [vmem:[%s1537_s30 + $0x20] sm:$0xff]   ;;  %v1453_v18 = vld [vmem:[%s1537_s30 + $0x28] sm:$0xff]  }
  0x13   : > { %1337 = vmatpush3.bf16.msra.mxu0 %v1438_v3  ;;  %1421 = vmatpush3.bf16.msra.mxu1 %v1438_v3  ;;  %v1450_v15 = vld [vmem:[%s1537_s30 + $0x98] sm:$0xff]   ;;  %v1452_v17 = vld [vmem:[%s1537_s30 + $0xa0] sm:$0xff]   ;;  %v1454_v19 = vld [vmem:[%s1537_s30 + $0xa8] sm:$0xff]  }
  0x14   : > { %1338 = vmatprep.subr.bf16.mxu0 %v1439_v6  ;;  %1414 = vmatprep.subr.bf16.mxu1 %v1439_v6  ;;  %v1455_v20 = vld [vmem:[%s1537_s30 + $0x30] sm:$0xff]   ;;  %v1457_v22 = vld [vmem:[%s1537_s30 + $0x38] sm:$0xff]   ;;  %v1459_v24 = vld [vmem:[%s1537_s30 + $0x40] sm:$0xff]  }
  0x15   : > { %v1456_v21 = vld [vmem:[%s1537_s30 + $0xb0] sm:$0xff]   ;;  %v1458_v23 = vld [vmem:[%s1537_s30 + $0xb8] sm:$0xff]   ;;  %v1460_v25 = vld [vmem:[%s1537_s30 + $0xc0] sm:$0xff]  }
  0x16   : > { %v1461_v26 = vld [vmem:[%s1537_s30 + $0x48] sm:$0xff]   ;;  %v1463_v28 = vld [vmem:[%s1537_s30 + $0x50] sm:$0xff]   ;;  %v1465_v30 = vld [vmem:[%s1537_s30 + $0x58] sm:$0xff]  }
  0x17   : > { %1339 = vmatpush3.bf16.msra.mxu0 %v1439_v6  ;;  %1422 = vmatpush3.bf16.msra.mxu1 %v1439_v6  ;;  %v1462_v27 = vld [vmem:[%s1537_s30 + $0xc8] sm:$0xff]   ;;  %v1464_v29 = vld [vmem:[%s1537_s30 + $0xd0] sm:$0xff]   ;;  %v1466_v31 = vld [vmem:[%s1537_s30 + $0xd8] sm:$0xff]  }
  0x18   : > { %1340 = vmatprep.subr.bf16.mxu0 %v1440_v7  ;;  %1415 = vmatprep.subr.bf16.mxu1 %v1440_v7  ;;  %v1467_v32 = vld [vmem:[%s1537_s30 + $0x60] sm:$0xff]   ;;  %v1469_v34 = vld [vmem:[%s1537_s30 + $0x68] sm:$0xff]   ;;  %v1471_v36 = vld [vmem:[%s1537_s30 + $0x70] sm:$0xff]  }
  0x19   : > { %v1468_v33 = vld [vmem:[%s1537_s30 + $0xe0] sm:$0xff]   ;;  %v1470_v35 = vld [vmem:[%s1537_s30 + $0xe8] sm:$0xff]   ;;  %v1472_v37 = vld [vmem:[%s1537_s30 + $0xf0] sm:$0xff]  }
  0x1a   : > { %v1473_v38 = vld [vmem:[%s1537_s30 + $0x78] sm:$0xff]  }
  0x1b   : > { %1341 = vmatpush3.bf16.msra.mxu0 %v1440_v7  ;;  %1423 = vmatpush3.bf16.msra.mxu1 %v1440_v7  ;;  %v1474_v39 = vld [vmem:[%s1537_s30 + $0xf8] sm:$0xff]  }
  0x1c   : > { %1342 = vmatprep.subr.bf16.mxu0 %v1441_v8  ;;  %1416 = vmatprep.subr.bf16.mxu1 %v1441_v8 }
  0x1f   : > { %1343 = vmatpush3.bf16.msra.mxu0 %v1441_v8  ;;  %1424 = vmatpush3.bf16.msra.mxu1 %v1441_v8 }
  0x20   : > { %1344 = vmatprep.subr.bf16.mxu0 %v1442_v9  ;;  %1417 = vmatprep.subr.bf16.mxu1 %v1442_v9 }
  0x23   : > { %1345 = vmatpush3.bf16.msra.mxu0 %v1442_v9  ;;  %1425 = vmatpush3.bf16.msra.mxu1 %v1442_v9 }
  0x26   : > { %1347 = vmatmul.mubr.bf16.vlgmr.msra.gmra.mrb[0].mxu0 %v1445_v10  ;;  %1379 = vmatmul.mubr.bf16.vlgmr.msra.gmra.mrb[0].mxu1 %v1446_v11 }
  0x27   : > { %1350 = vmatprep.mubr.bf16.mxu0 %v1447_v12  ;;  %1382 = vmatprep.mubr.bf16.mxu1 %v1448_v13 }
  0x2e   : > { %1351 = vmatmul.mubr.bf16.gmra.mrb[4].mxu0 %v1449_v14  ;;  %1383 = vmatmul.mubr.bf16.gmra.mrb[4].mxu1 %v1450_v15 }
  0x2f   : > { %1354 = vmatprep.mubr.bf16.mxu0 %v1451_v16  ;;  %1386 = vmatprep.mubr.bf16.mxu1 %v1452_v17 }
  0x36   : > { %1355 = vmatmul.mubr.bf16.gmra.mrb[8].mxu0 %v1453_v18  ;;  %1387 = vmatmul.mubr.bf16.gmra.mrb[8].mxu1 %v1454_v19 }
  0x37   : > { %1358 = vmatprep.mubr.bf16.mxu0 %v1455_v20  ;;  %1390 = vmatprep.mubr.bf16.mxu1 %v1456_v21 }
  0x3e   : > { %1359 = vmatmul.mubr.bf16.gmra.mrb[12].mxu0 %v1457_v22  ;;  %1391 = vmatmul.mubr.bf16.gmra.mrb[12].mxu1 %v1458_v23 }
  0x3f   : > { %1362 = vmatprep.mubr.bf16.mxu0 %v1459_v24  ;;  %1394 = vmatprep.mubr.bf16.mxu1 %v1460_v25 }
  0x46   : > { %1363 = vmatmul.mubr.bf16.gmra.mrb[16].mxu0 %v1461_v26  ;;  %1395 = vmatmul.mubr.bf16.gmra.mrb[16].mxu1 %v1462_v27 }
  0x47   : > { %1366 = vmatprep.mubr.bf16.mxu0 %v1463_v28  ;;  %1398 = vmatprep.mubr.bf16.mxu1 %v1464_v29 }
  0x4e   : > { %1367 = vmatmul.mubr.bf16.gmra.mrb[20].mxu0 %v1465_v30  ;;  %1399 = vmatmul.mubr.bf16.gmra.mrb[20].mxu1 %v1466_v31 }
  0x4f   : > { %1370 = vmatprep.mubr.bf16.mxu0 %v1467_v32  ;;  %1402 = vmatprep.mubr.bf16.mxu1 %v1468_v33 }
  0x56   : > { %1371 = vmatmul.mubr.bf16.gmra.mrb[24].mxu0 %v1469_v34  ;;  %1403 = vmatmul.mubr.bf16.gmra.mrb[24].mxu1 %v1470_v35 }
  0x57   : > { %1374 = vmatprep.mubr.bf16.mxu0 %v1471_v36  ;;  %1406 = vmatprep.mubr.bf16.mxu1 %v1472_v37 }
  0x5e   : > { %1375 = vmatmul.mubr.bf16.gmra.mrb[28].mxu0 %v1473_v38  ;;  %1407 = vmatmul.mubr.bf16.gmra.mrb[28].mxu1 %v1474_v39 }
  0xf9   : > { %v1348_v48 = vpop.f32.mrb[0].mxu0  ;;  %v1380_v50 = vpop.f32.mrb[0].mxu1 }
  0xfa   : > { %v847_v51 = vmul.f32 %v1348_v48, %v1592_v46  ;;  %v879_v52 = vmul.f32 %v1380_v50, %v1592_v46  ;;  %v583_v53 = vpop.f32.mrb[1].mxu0  ;;  %v711_v54 = vpop.f32.mrb[1].mxu1 }
  0xfb   : > { %v845_v55 = vmul.f32 %v1592_v46, %v583_v53  ;;  %v877_v56 = vmul.f32 %v1592_v46, %v711_v54  ;;  %v1349_v57 = vpop.f32.mrb[2].mxu0  ;;  %v1381_v58 = vpop.f32.mrb[2].mxu1 }
  0xfc   : > { %v918_v59 = vadd.f32 %v1599_v49, %v847_v51  ;;  %v950_v60 = vadd.f32 %v1599_v49, %v879_v52  ;;  %v848_v61 = vmul.f32 %v1349_v57, %v1592_v46  ;;  %v880_v62 = vmul.f32 %v1381_v58, %v1592_v46  ;;  %v586_v63 = vpop.f32.mrb[3].mxu0  ;;  %v714_v0 = vpop.f32.mrb[3].mxu1 }
  0xfd   : > { %v916_v1 = vadd.f32 %v1599_v49, %v845_v55  ;;  %v948_v2 = vadd.f32 %v1599_v49, %v877_v56  ;;  %v846_v3 = vmul.f32 %v1592_v46, %v586_v63  ;;  %v878_v4 = vmul.f32 %v1592_v46, %v714_v0 }
  0xfe   : > { %v984_v5 = vmax.f32 %v918_v59, 0.0  ;;  %v1016_v6 = vmax.f32 %v950_v60, 0.0  ;;  %v919_v7 = vadd.f32 %v1599_v49, %v848_v61  ;;  %v951_v8 = vadd.f32 %v1599_v49, %v880_v62 }
  0xff   : > { %v982_v9 = vmax.f32 %v916_v1, 0.0  ;;  %v1014_v10 = vmax.f32 %v948_v2, 0.0  ;;  %v917_v11 = vadd.f32 %v1599_v49, %v846_v3  ;;  %v949_v12 = vadd.f32 %v1599_v49, %v878_v4 }
 0x100   : > { %v1054_v13 = vsel %vm1051_vm1, %v984_v5, %v918_v59  ;;  %v1086_v14 = vsel %vm1051_vm1, %v1016_v6, %v950_v60  ;;  %v985_v15 = vmax.f32 %v919_v7, 0.0  ;;  %v1017_v16 = vmax.f32 %v951_v8, 0.0 }
 0x101   : > { %1119 = vst.msk [vmem:[%s1618_s26 + $0x10] sm:$0xff] %vm1116_vm2, %v1054_v13  ;;  %1151 = vst.msk [vmem:[%s1618_s26 + $0x110] sm:$0xff] %vm1116_vm2, %v1086_v14  ;;  %v1052_v17 = vsel %vm1051_vm1, %v982_v9, %v916_v1  ;;  %v1084_v18 = vsel %vm1051_vm1, %v1014_v10, %v948_v2  ;;  %v983_v19 = vmax.f32 %v917_v11, 0.0  ;;  %v1015_v20 = vmax.f32 %v949_v12, 0.0  ;;  %v1352_v21 = vpop.f32.mrb[4].mxu0  ;;  %v1384_v22 = vpop.f32.mrb[4].mxu1 }
 0x102   : > { %1117 = vst.msk [vmem:[%s1618_s26] sm:$0xff] %vm1116_vm2, %v1052_v17  ;;  %1149 = vst.msk [vmem:[%s1618_s26 + $0x100] sm:$0xff] %vm1116_vm2, %v1084_v18  ;;  %v1055_v23 = vsel %vm1051_vm1, %v985_v15, %v919_v7  ;;  %v1087_v24 = vsel %vm1051_vm1, %v1017_v16, %v951_v8  ;;  %v851_v25 = vmul.f32 %v1352_v21, %v1592_v46  ;;  %v599_v27 = vpop.f32.mrb[5].mxu0  ;;  %v727_v28 = vpop.f32.mrb[5].mxu1 }
 0x103   : > { %v883_v26 = vmul.f32 %v1384_v22, %v1592_v46  ;;  %1120 = vst.msk [vmem:[%s1618_s26 + $0x18] sm:$0xff] %vm1116_vm2, %v1055_v23  ;;  %1152 = vst.msk [vmem:[%s1618_s26 + $0x118] sm:$0xff] %vm1116_vm2, %v1087_v24  ;;  %v1053_v29 = vsel %vm1051_vm1, %v983_v19, %v917_v11  ;;  %v1085_v30 = vsel %vm1051_vm1, %v1015_v20, %v949_v12  ;;  %v1353_v33 = vpop.f32.mrb[6].mxu0  ;;  %v1385_v34 = vpop.f32.mrb[6].mxu1 }
 0x104   : > { %v849_v31 = vmul.f32 %v1592_v46, %v599_v27  ;;  %v881_v32 = vmul.f32 %v1592_v46, %v727_v28  ;;  %1118 = vst.msk [vmem:[%s1618_s26 + $0x8] sm:$0xff] %vm1116_vm2, %v1053_v29  ;;  %1150 = vst.msk [vmem:[%s1618_s26 + $0x108] sm:$0xff] %vm1116_vm2, %v1085_v30  ;;  %v922_v35 = vadd.f32 %v1599_v49, %v851_v25  ;;  %v602_v39 = vpop.f32.mrb[7].mxu0  ;;  %v730_v40 = vpop.f32.mrb[7].mxu1 }
 0x105   : > { %v954_v36 = vadd.f32 %v1599_v49, %v883_v26  ;;  %v852_v37 = vmul.f32 %v1353_v33, %v1592_v46  ;;  %v884_v38 = vmul.f32 %v1385_v34, %v1592_v46  ;;  %v850_v43 = vmul.f32 %v1592_v46, %v602_v39 }
 0x106   : > { %v920_v41 = vadd.f32 %v1599_v49, %v849_v31  ;;  %v952_v42 = vadd.f32 %v1599_v49, %v881_v32  ;;  %v882_v44 = vmul.f32 %v1592_v46, %v730_v40  ;;  %v988_v45 = vmax.f32 %v922_v35, 0.0 }
 0x107   : > { %v1020_v48 = vmax.f32 %v954_v36, 0.0  ;;  %v923_v50 = vadd.f32 %v1599_v49, %v852_v37  ;;  %v955_v51 = vadd.f32 %v1599_v49, %v884_v38  ;;  %v921_v54 = vadd.f32 %v1599_v49, %v850_v43 }
 0x108   : > { %v986_v52 = vmax.f32 %v920_v41, 0.0  ;;  %v1018_v53 = vmax.f32 %v952_v42, 0.0  ;;  %v953_v55 = vadd.f32 %v1599_v49, %v882_v44  ;;  %v1058_v56 = vsel %vm1051_vm1, %v988_v45, %v922_v35 }
 0x109   : > { %v1090_v57 = vsel %vm1051_vm1, %v1020_v48, %v954_v36  ;;  %v989_v58 = vmax.f32 %v923_v50, 0.0  ;;  %v1021_v59 = vmax.f32 %v955_v51, 0.0  ;;  %1123 = vst.msk [vmem:[%s1618_s26 + $0x30] sm:$0xff] %vm1116_vm2, %v1058_v56  ;;  %v987_v62 = vmax.f32 %v921_v54, 0.0  ;;  %v1356_v0 = vpop.f32.mrb[8].mxu0  ;;  %v1388_v1 = vpop.f32.mrb[8].mxu1 }
 0x10a   : > { %1155 = vst.msk [vmem:[%s1618_s26 + $0x130] sm:$0xff] %vm1116_vm2, %v1090_v57  ;;  %v1056_v60 = vsel %vm1051_vm1, %v986_v52, %v920_v41  ;;  %v1088_v61 = vsel %vm1051_vm1, %v1018_v53, %v952_v42  ;;  %v1019_v63 = vmax.f32 %v953_v55, 0.0  ;;  %v855_v4 = vmul.f32 %v1356_v0, %v1592_v46  ;;  %v615_v6 = vpop.f32.mrb[9].mxu0  ;;  %v743_v7 = vpop.f32.mrb[9].mxu1 }
 0x10b   : > { %1121 = vst.msk [vmem:[%s1618_s26 + $0x20] sm:$0xff] %vm1116_vm2, %v1056_v60  ;;  %1153 = vst.msk [vmem:[%s1618_s26 + $0x120] sm:$0xff] %vm1116_vm2, %v1088_v61  ;;  %v1059_v2 = vsel %vm1051_vm1, %v989_v58, %v923_v50  ;;  %v1091_v3 = vsel %vm1051_vm1, %v1021_v59, %v955_v51  ;;  %v887_v5 = vmul.f32 %v1388_v1, %v1592_v46  ;;  %v1357_v12 = vpop.f32.mrb[10].mxu0  ;;  %v1389_v13 = vpop.f32.mrb[10].mxu1 }
 0x10c   : > { %1124 = vst.msk [vmem:[%s1618_s26 + $0x38] sm:$0xff] %vm1116_vm2, %v1059_v2  ;;  %1156 = vst.msk [vmem:[%s1618_s26 + $0x138] sm:$0xff] %vm1116_vm2, %v1091_v3  ;;  %v1057_v8 = vsel %vm1051_vm1, %v987_v62, %v921_v54  ;;  %v1089_v9 = vsel %vm1051_vm1, %v1019_v63, %v953_v55  ;;  %v853_v10 = vmul.f32 %v1592_v46, %v615_v6  ;;  %v618_v18 = vpop.f32.mrb[11].mxu0  ;;  %v746_v19 = vpop.f32.mrb[11].mxu1 }
 0x10d   : > { %v885_v11 = vmul.f32 %v1592_v46, %v743_v7  ;;  %1122 = vst.msk [vmem:[%s1618_s26 + $0x28] sm:$0xff] %vm1116_vm2, %v1057_v8  ;;  %1154 = vst.msk [vmem:[%s1618_s26 + $0x128] sm:$0xff] %vm1116_vm2, %v1089_v9  ;;  %v926_v14 = vadd.f32 %v1599_v49, %v855_v4  ;;  %v958_v15 = vadd.f32 %v1599_v49, %v887_v5 }
 0x10e   : > { %v856_v16 = vmul.f32 %v1357_v12, %v1592_v46  ;;  %v888_v17 = vmul.f32 %v1389_v13, %v1592_v46  ;;  %v924_v20 = vadd.f32 %v1599_v49, %v853_v10  ;;  %v854_v22 = vmul.f32 %v1592_v46, %v618_v18 }
 0x10f   : > { %v956_v21 = vadd.f32 %v1599_v49, %v885_v11  ;;  %v886_v23 = vmul.f32 %v1592_v46, %v746_v19  ;;  %v992_v24 = vmax.f32 %v926_v14, 0.0  ;;  %v1024_v25 = vmax.f32 %v958_v15, 0.0 }
 0x110   : > { %v927_v26 = vadd.f32 %v1599_v49, %v856_v16  ;;  %v959_v27 = vadd.f32 %v1599_v49, %v888_v17  ;;  %v990_v28 = vmax.f32 %v924_v20, 0.0  ;;  %v925_v30 = vadd.f32 %v1599_v49, %v854_v22 }
 0x111   : > { %v1022_v29 = vmax.f32 %v956_v21, 0.0  ;;  %v957_v31 = vadd.f32 %v1599_v49, %v886_v23  ;;  %v1062_v32 = vsel %vm1051_vm1, %v992_v24, %v926_v14  ;;  %v1094_v33 = vsel %vm1051_vm1, %v1024_v25, %v958_v15  ;;  %v1360_v40 = vpop.f32.mrb[12].mxu0  ;;  %v1392_v41 = vpop.f32.mrb[12].mxu1 }
 0x112   : > { %v993_v34 = vmax.f32 %v927_v26, 0.0  ;;  %v1025_v35 = vmax.f32 %v959_v27, 0.0  ;;  %1127 = vst.msk [vmem:[%s1618_s26 + $0x50] sm:$0xff] %vm1116_vm2, %v1062_v32  ;;  %1159 = vst.msk [vmem:[%s1618_s26 + $0x150] sm:$0xff] %vm1116_vm2, %v1094_v33  ;;  %v1060_v36 = vsel %vm1051_vm1, %v990_v28, %v924_v20  ;;  %v991_v38 = vmax.f32 %v925_v30, 0.0  ;;  %v631_v48 = vpop.f32.mrb[13].mxu0 }
 0x113   : > { %v1092_v37 = vsel %vm1051_vm1, %v1022_v29, %v956_v21  ;;  %v1023_v39 = vmax.f32 %v957_v31, 0.0  ;;  %1125 = vst.msk [vmem:[%s1618_s26 + $0x40] sm:$0xff] %vm1116_vm2, %v1060_v36  ;;  %v859_v44 = vmul.f32 %v1360_v40, %v1592_v46  ;;  %v891_v45 = vmul.f32 %v1392_v41, %v1592_v46  ;;  %v759_v50 = vpop.f32.mrb[13].mxu1  ;;  %v1361_v55 = vpop.f32.mrb[14].mxu0 }
 0x114   : > { %1157 = vst.msk [vmem:[%s1618_s26 + $0x140] sm:$0xff] %vm1116_vm2, %v1092_v37  ;;  %v1063_v42 = vsel %vm1051_vm1, %v993_v34, %v927_v26  ;;  %v1095_v43 = vsel %vm1051_vm1, %v1025_v35, %v959_v27  ;;  %v1061_v51 = vsel %vm1051_vm1, %v991_v38, %v925_v30  ;;  %v857_v53 = vmul.f32 %v1592_v46, %v631_v48  ;;  %v1393_v56 = vpop.f32.mrb[14].mxu1  ;;  %v634_v61 = vpop.f32.mrb[15].mxu0 }
 0x115   : > { %1128 = vst.msk [vmem:[%s1618_s26 + $0x58] sm:$0xff] %vm1116_vm2, %v1063_v42  ;;  %1160 = vst.msk [vmem:[%s1618_s26 + $0x158] sm:$0xff] %vm1116_vm2, %v1095_v43  ;;  %v1093_v52 = vsel %vm1051_vm1, %v1023_v39, %v957_v31  ;;  %v889_v54 = vmul.f32 %v1592_v46, %v759_v50  ;;  %v930_v57 = vadd.f32 %v1599_v49, %v859_v44  ;;  %v762_v62 = vpop.f32.mrb[15].mxu1 }
 0x116   : > { %1126 = vst.msk [vmem:[%s1618_s26 + $0x48] sm:$0xff] %vm1116_vm2, %v1061_v51  ;;  %1158 = vst.msk [vmem:[%s1618_s26 + $0x148] sm:$0xff] %vm1116_vm2, %v1093_v52  ;;  %v962_v58 = vadd.f32 %v1599_v49, %v891_v45  ;;  %v860_v59 = vmul.f32 %v1361_v55, %v1592_v46  ;;  %v892_v60 = vmul.f32 %v1393_v56, %v1592_v46 }
 0x117   : > { %v928_v63 = vadd.f32 %v1599_v49, %v857_v53  ;;  %v960_v0 = vadd.f32 %v1599_v49, %v889_v54  ;;  %v858_v1 = vmul.f32 %v1592_v46, %v634_v61  ;;  %v890_v2 = vmul.f32 %v1592_v46, %v762_v62 }
 0x118   : > { %v996_v3 = vmax.f32 %v930_v57, 0.0  ;;  %v1028_v4 = vmax.f32 %v962_v58, 0.0  ;;  %v931_v5 = vadd.f32 %v1599_v49, %v860_v59  ;;  %v963_v6 = vadd.f32 %v1599_v49, %v892_v60 }
 0x119   : > { %v994_v7 = vmax.f32 %v928_v63, 0.0  ;;  %v1026_v8 = vmax.f32 %v960_v0, 0.0  ;;  %v929_v9 = vadd.f32 %v1599_v49, %v858_v1  ;;  %v961_v10 = vadd.f32 %v1599_v49, %v890_v2  ;;  %v1364_v19 = vpop.f32.mrb[16].mxu0  ;;  %v1396_v20 = vpop.f32.mrb[16].mxu1 }
 0x11a   : > { %v1066_v11 = vsel %vm1051_vm1, %v996_v3, %v930_v57  ;;  %v1098_v12 = vsel %vm1051_vm1, %v1028_v4, %v962_v58  ;;  %v997_v13 = vmax.f32 %v931_v5, 0.0  ;;  %v1029_v14 = vmax.f32 %v963_v6, 0.0  ;;  %v647_v25 = vpop.f32.mrb[17].mxu0  ;;  %v775_v26 = vpop.f32.mrb[17].mxu1 }
 0x11b   : > { %1131 = vst.msk [vmem:[%s1618_s26 + $0x70] sm:$0xff] %vm1116_vm2, %v1066_v11  ;;  %1163 = vst.msk [vmem:[%s1618_s26 + $0x170] sm:$0xff] %vm1116_vm2, %v1098_v12  ;;  %v1064_v15 = vsel %vm1051_vm1, %v994_v7, %v928_v63  ;;  %v1096_v16 = vsel %vm1051_vm1, %v1026_v8, %v960_v0  ;;  %v995_v17 = vmax.f32 %v929_v9, 0.0  ;;  %v1027_v18 = vmax.f32 %v961_v10, 0.0  ;;  %v1365_v31 = vpop.f32.mrb[18].mxu0  ;;  %v1397_v32 = vpop.f32.mrb[18].mxu1 }
 0x11c   : > { %1129 = vst.msk [vmem:[%s1618_s26 + $0x60] sm:$0xff] %vm1116_vm2, %v1064_v15  ;;  %1161 = vst.msk [vmem:[%s1618_s26 + $0x160] sm:$0xff] %vm1116_vm2, %v1096_v16  ;;  %v1067_v21 = vsel %vm1051_vm1, %v997_v13, %v931_v5  ;;  %v1099_v22 = vsel %vm1051_vm1, %v1029_v14, %v963_v6  ;;  %v863_v23 = vmul.f32 %v1364_v19, %v1592_v46  ;;  %v650_v37 = vpop.f32.mrb[19].mxu0  ;;  %v778_v38 = vpop.f32.mrb[19].mxu1 }
 0x11d   : > { %v895_v24 = vmul.f32 %v1396_v20, %v1592_v46  ;;  %1132 = vst.msk [vmem:[%s1618_s26 + $0x78] sm:$0xff] %vm1116_vm2, %v1067_v21  ;;  %1164 = vst.msk [vmem:[%s1618_s26 + $0x178] sm:$0xff] %vm1116_vm2, %v1099_v22  ;;  %v1065_v27 = vsel %vm1051_vm1, %v995_v17, %v929_v9  ;;  %v1097_v28 = vsel %vm1051_vm1, %v1027_v18, %v961_v10 }
 0x11e   : > { %v861_v29 = vmul.f32 %v1592_v46, %v647_v25  ;;  %v893_v30 = vmul.f32 %v1592_v46, %v775_v26  ;;  %1130 = vst.msk [vmem:[%s1618_s26 + $0x68] sm:$0xff] %vm1116_vm2, %v1065_v27  ;;  %1162 = vst.msk [vmem:[%s1618_s26 + $0x168] sm:$0xff] %vm1116_vm2, %v1097_v28  ;;  %v934_v33 = vadd.f32 %v1599_v49, %v863_v23 }
 0x11f   : > { %v966_v34 = vadd.f32 %v1599_v49, %v895_v24  ;;  %v864_v35 = vmul.f32 %v1365_v31, %v1592_v46  ;;  %v896_v36 = vmul.f32 %v1397_v32, %v1592_v46  ;;  %v862_v41 = vmul.f32 %v1592_v46, %v650_v37 }
 0x120   : > { %v932_v39 = vadd.f32 %v1599_v49, %v861_v29  ;;  %v964_v40 = vadd.f32 %v1599_v49, %v893_v30  ;;  %v894_v42 = vmul.f32 %v1592_v46, %v778_v38  ;;  %v1000_v43 = vmax.f32 %v934_v33, 0.0 }
 0x121   : > { %v1032_v44 = vmax.f32 %v966_v34, 0.0  ;;  %v935_v45 = vadd.f32 %v1599_v49, %v864_v35  ;;  %v967_v48 = vadd.f32 %v1599_v49, %v896_v36  ;;  %v933_v52 = vadd.f32 %v1599_v49, %v862_v41  ;;  %v1368_v62 = vpop.f32.mrb[20].mxu0  ;;  %v1400_v63 = vpop.f32.mrb[20].mxu1 }
 0x122   : > { %v998_v50 = vmax.f32 %v932_v39, 0.0  ;;  %v1030_v51 = vmax.f32 %v964_v40, 0.0  ;;  %v965_v53 = vadd.f32 %v1599_v49, %v894_v42  ;;  %v1070_v54 = vsel %vm1051_vm1, %v1000_v43, %v934_v33  ;;  %v663_v4 = vpop.f32.mrb[21].mxu0  ;;  %v791_v5 = vpop.f32.mrb[21].mxu1 }
 0x123   : > { %v1102_v55 = vsel %vm1051_vm1, %v1032_v44, %v966_v34  ;;  %v1001_v56 = vmax.f32 %v935_v45, 0.0  ;;  %v1033_v57 = vmax.f32 %v967_v48, 0.0  ;;  %1135 = vst.msk [vmem:[%s1618_s26 + $0x90] sm:$0xff] %vm1116_vm2, %v1070_v54  ;;  %v999_v60 = vmax.f32 %v933_v52, 0.0  ;;  %v1369_v10 = vpop.f32.mrb[22].mxu0  ;;  %v1401_v11 = vpop.f32.mrb[22].mxu1 }
 0x124   : > { %1167 = vst.msk [vmem:[%s1618_s26 + $0x190] sm:$0xff] %vm1116_vm2, %v1102_v55  ;;  %v1068_v58 = vsel %vm1051_vm1, %v998_v50, %v932_v39  ;;  %v1100_v59 = vsel %vm1051_vm1, %v1030_v51, %v964_v40  ;;  %v1031_v61 = vmax.f32 %v965_v53, 0.0  ;;  %v867_v2 = vmul.f32 %v1368_v62, %v1592_v46  ;;  %v666_v16 = vpop.f32.mrb[23].mxu0  ;;  %v794_v17 = vpop.f32.mrb[23].mxu1 }
 0x125   : > { %1133 = vst.msk [vmem:[%s1618_s26 + $0x80] sm:$0xff] %vm1116_vm2, %v1068_v58  ;;  %1165 = vst.msk [vmem:[%s1618_s26 + $0x180] sm:$0xff] %vm1116_vm2, %v1100_v59  ;;  %v1071_v0 = vsel %vm1051_vm1, %v1001_v56, %v935_v45  ;;  %v1103_v1 = vsel %vm1051_vm1, %v1033_v57, %v967_v48  ;;  %v899_v3 = vmul.f32 %v1400_v63, %v1592_v46 }
 0x126   : > { %1136 = vst.msk [vmem:[%s1618_s26 + $0x98] sm:$0xff] %vm1116_vm2, %v1071_v0  ;;  %1168 = vst.msk [vmem:[%s1618_s26 + $0x198] sm:$0xff] %vm1116_vm2, %v1103_v1  ;;  %v1069_v6 = vsel %vm1051_vm1, %v999_v60, %v933_v52  ;;  %v1101_v7 = vsel %vm1051_vm1, %v1031_v61, %v965_v53  ;;  %v865_v8 = vmul.f32 %v1592_v46, %v663_v4 }
 0x127   : > { %v897_v9 = vmul.f32 %v1592_v46, %v791_v5  ;;  %1134 = vst.msk [vmem:[%s1618_s26 + $0x88] sm:$0xff] %vm1116_vm2, %v1069_v6  ;;  %1166 = vst.msk [vmem:[%s1618_s26 + $0x188] sm:$0xff] %vm1116_vm2, %v1101_v7  ;;  %v938_v12 = vadd.f32 %v1599_v49, %v867_v2  ;;  %v970_v13 = vadd.f32 %v1599_v49, %v899_v3 }
 0x128   : > { %v868_v14 = vmul.f32 %v1369_v10, %v1592_v46  ;;  %v900_v15 = vmul.f32 %v1401_v11, %v1592_v46  ;;  %v936_v18 = vadd.f32 %v1599_v49, %v865_v8  ;;  %v866_v20 = vmul.f32 %v1592_v46, %v666_v16 }
 0x129   : > { %v968_v19 = vadd.f32 %v1599_v49, %v897_v9  ;;  %v898_v21 = vmul.f32 %v1592_v46, %v794_v17  ;;  %v1004_v22 = vmax.f32 %v938_v12, 0.0  ;;  %v1036_v23 = vmax.f32 %v970_v13, 0.0  ;;  %v1372_v38 = vpop.f32.mrb[24].mxu0  ;;  %v1404_v39 = vpop.f32.mrb[24].mxu1 }
 0x12a   : > { %v939_v24 = vadd.f32 %v1599_v49, %v868_v14  ;;  %v971_v25 = vadd.f32 %v1599_v49, %v900_v15  ;;  %v1002_v26 = vmax.f32 %v936_v18, 0.0  ;;  %v937_v28 = vadd.f32 %v1599_v49, %v866_v20  ;;  %v679_v44 = vpop.f32.mrb[25].mxu0  ;;  %v807_v45 = vpop.f32.mrb[25].mxu1 }
 0x12b   : > { %v1034_v27 = vmax.f32 %v968_v19, 0.0  ;;  %v969_v29 = vadd.f32 %v1599_v49, %v898_v21  ;;  %v1074_v30 = vsel %vm1051_vm1, %v1004_v22, %v938_v12  ;;  %v1106_v31 = vsel %vm1051_vm1, %v1036_v23, %v970_v13  ;;  %v1373_v53 = vpop.f32.mrb[26].mxu0  ;;  %v1405_v54 = vpop.f32.mrb[26].mxu1 }
 0x12c   : > { %v1005_v32 = vmax.f32 %v939_v24, 0.0  ;;  %v1037_v33 = vmax.f32 %v971_v25, 0.0  ;;  %1139 = vst.msk [vmem:[%s1618_s26 + $0xb0] sm:$0xff] %vm1116_vm2, %v1074_v30  ;;  %1171 = vst.msk [vmem:[%s1618_s26 + $0x1b0] sm:$0xff] %vm1116_vm2, %v1106_v31  ;;  %v1072_v34 = vsel %vm1051_vm1, %v1002_v26, %v936_v18  ;;  %v1003_v36 = vmax.f32 %v937_v28, 0.0  ;;  %v682_v59 = vpop.f32.mrb[27].mxu0 }
 0x12d   : > { %v1104_v35 = vsel %vm1051_vm1, %v1034_v27, %v968_v19  ;;  %v1035_v37 = vmax.f32 %v969_v29, 0.0  ;;  %1137 = vst.msk [vmem:[%s1618_s26 + $0xa0] sm:$0xff] %vm1116_vm2, %v1072_v34  ;;  %v871_v42 = vmul.f32 %v1372_v38, %v1592_v46  ;;  %v903_v43 = vmul.f32 %v1404_v39, %v1592_v46  ;;  %v810_v60 = vpop.f32.mrb[27].mxu1 }
 0x12e   : > { %1169 = vst.msk [vmem:[%s1618_s26 + $0x1a0] sm:$0xff] %vm1116_vm2, %v1104_v35  ;;  %v1075_v40 = vsel %vm1051_vm1, %v1005_v32, %v939_v24  ;;  %v1107_v41 = vsel %vm1051_vm1, %v1037_v33, %v971_v25  ;;  %v1073_v48 = vsel %vm1051_vm1, %v1003_v36, %v937_v28  ;;  %v869_v51 = vmul.f32 %v1592_v46, %v679_v44 }
 0x12f   : > { %1140 = vst.msk [vmem:[%s1618_s26 + $0xb8] sm:$0xff] %vm1116_vm2, %v1075_v40  ;;  %1172 = vst.msk [vmem:[%s1618_s26 + $0x1b8] sm:$0xff] %vm1116_vm2, %v1107_v41  ;;  %v1105_v50 = vsel %vm1051_vm1, %v1035_v37, %v969_v29  ;;  %v901_v52 = vmul.f32 %v1592_v46, %v807_v45  ;;  %v942_v55 = vadd.f32 %v1599_v49, %v871_v42 }
 0x130   : > { %1138 = vst.msk [vmem:[%s1618_s26 + $0xa8] sm:$0xff] %vm1116_vm2, %v1073_v48  ;;  %1170 = vst.msk [vmem:[%s1618_s26 + $0x1a8] sm:$0xff] %vm1116_vm2, %v1105_v50  ;;  %v974_v56 = vadd.f32 %v1599_v49, %v903_v43  ;;  %v872_v57 = vmul.f32 %v1373_v53, %v1592_v46  ;;  %v904_v58 = vmul.f32 %v1405_v54, %v1592_v46 }
 0x131   : > { %v940_v61 = vadd.f32 %v1599_v49, %v869_v51  ;;  %v972_v62 = vadd.f32 %v1599_v49, %v901_v52  ;;  %v870_v63 = vmul.f32 %v1592_v46, %v682_v59  ;;  %v902_v0 = vmul.f32 %v1592_v46, %v810_v60  ;;  %v1376_v17 = vpop.f32.mrb[28].mxu0  ;;  %v1408_v18 = vpop.f32.mrb[28].mxu1 }
 0x132   : > { %v1008_v1 = vmax.f32 %v942_v55, 0.0  ;;  %v1040_v2 = vmax.f32 %v974_v56, 0.0  ;;  %v943_v3 = vadd.f32 %v1599_v49, %v872_v57  ;;  %v975_v4 = vadd.f32 %v1599_v49, %v904_v58  ;;  %v695_v23 = vpop.f32.mrb[29].mxu0  ;;  %v823_v24 = vpop.f32.mrb[29].mxu1 }
 0x133   : > { %v1006_v5 = vmax.f32 %v940_v61, 0.0  ;;  %v1038_v6 = vmax.f32 %v972_v62, 0.0  ;;  %v941_v7 = vadd.f32 %v1599_v49, %v870_v63  ;;  %v973_v8 = vadd.f32 %v1599_v49, %v902_v0  ;;  %v1377_v29 = vpop.f32.mrb[30].mxu0  ;;  %v1409_v30 = vpop.f32.mrb[30].mxu1 }
 0x134   : > { %v1078_v9 = vsel %vm1051_vm1, %v1008_v1, %v942_v55  ;;  %v1110_v10 = vsel %vm1051_vm1, %v1040_v2, %v974_v56  ;;  %v1009_v11 = vmax.f32 %v943_v3, 0.0  ;;  %v1041_v12 = vmax.f32 %v975_v4, 0.0  ;;  %v698_v35 = vpop.f32.mrb[31].mxu0  ;;  %v826_v36 = vpop.f32.mrb[31].mxu1 }
 0x135   : > { %1143 = vst.msk [vmem:[%s1618_s26 + $0xd0] sm:$0xff] %vm1116_vm2, %v1078_v9  ;;  %1175 = vst.msk [vmem:[%s1618_s26 + $0x1d0] sm:$0xff] %vm1116_vm2, %v1110_v10  ;;  %v1076_v13 = vsel %vm1051_vm1, %v1006_v5, %v940_v61  ;;  %v1108_v14 = vsel %vm1051_vm1, %v1038_v6, %v972_v62  ;;  %v1007_v15 = vmax.f32 %v941_v7, 0.0  ;;  %v1039_v16 = vmax.f32 %v973_v8, 0.0 }
 0x136   : > { %1141 = vst.msk [vmem:[%s1618_s26 + $0xc0] sm:$0xff] %vm1116_vm2, %v1076_v13  ;;  %1173 = vst.msk [vmem:[%s1618_s26 + $0x1c0] sm:$0xff] %vm1116_vm2, %v1108_v14  ;;  %v1079_v19 = vsel %vm1051_vm1, %v1009_v11, %v943_v3  ;;  %v1111_v20 = vsel %vm1051_vm1, %v1041_v12, %v975_v4  ;;  %v875_v21 = vmul.f32 %v1376_v17, %v1592_v46 }
 0x137   : > { %v907_v22 = vmul.f32 %v1408_v18, %v1592_v46  ;;  %1144 = vst.msk [vmem:[%s1618_s26 + $0xd8] sm:$0xff] %vm1116_vm2, %v1079_v19  ;;  %1176 = vst.msk [vmem:[%s1618_s26 + $0x1d8] sm:$0xff] %vm1116_vm2, %v1111_v20  ;;  %v1077_v25 = vsel %vm1051_vm1, %v1007_v15, %v941_v7  ;;  %v1109_v26 = vsel %vm1051_vm1, %v1039_v16, %v973_v8 }
 0x138   : > { %v873_v27 = vmul.f32 %v1592_v46, %v695_v23  ;;  %v905_v28 = vmul.f32 %v1592_v46, %v823_v24  ;;  %1142 = vst.msk [vmem:[%s1618_s26 + $0xc8] sm:$0xff] %vm1116_vm2, %v1077_v25  ;;  %1174 = vst.msk [vmem:[%s1618_s26 + $0x1c8] sm:$0xff] %vm1116_vm2, %v1109_v26  ;;  %v946_v31 = vadd.f32 %v1599_v49, %v875_v21 }
 0x139   : > { %v978_v32 = vadd.f32 %v1599_v49, %v907_v22  ;;  %v876_v33 = vmul.f32 %v1377_v29, %v1592_v46  ;;  %v908_v34 = vmul.f32 %v1409_v30, %v1592_v46  ;;  %v874_v39 = vmul.f32 %v1592_v46, %v698_v35 }
 0x13a   : > { %v944_v37 = vadd.f32 %v1599_v49, %v873_v27  ;;  %v976_v38 = vadd.f32 %v1599_v49, %v905_v28  ;;  %v906_v40 = vmul.f32 %v1592_v46, %v826_v36  ;;  %v1012_v41 = vmax.f32 %v946_v31, 0.0 }
 0x13b   : > { %v1044_v42 = vmax.f32 %v978_v32, 0.0  ;;  %v947_v43 = vadd.f32 %v1599_v49, %v876_v33  ;;  %v979_v44 = vadd.f32 %v1599_v49, %v908_v34  ;;  %v945_v50 = vadd.f32 %v1599_v49, %v874_v39 }
 0x13c   : > { %v1010_v45 = vmax.f32 %v944_v37, 0.0  ;;  %v1042_v48 = vmax.f32 %v976_v38, 0.0  ;;  %v977_v51 = vadd.f32 %v1599_v49, %v906_v40  ;;  %v1082_v52 = vsel %vm1051_vm1, %v1012_v41, %v946_v31 }
 0x13d   : > { %v1114_v46 = vsel %vm1051_vm1, %v1044_v42, %v978_v32  ;;  %v1013_v53 = vmax.f32 %v947_v43, 0.0  ;;  %v1045_v54 = vmax.f32 %v979_v44, 0.0  ;;  %1147 = vst.msk [vmem:[%s1618_s26 + $0xf0] sm:$0xff] %vm1116_vm2, %v1082_v52  ;;  %v1011_v56 = vmax.f32 %v945_v50, 0.0 }
 0x13e   : > { %1179 = vst.msk [vmem:[%s1618_s26 + $0x1f0] sm:$0xff] %vm1116_vm2, %v1114_v46  ;;  %v1080_v55 = vsel %vm1051_vm1, %v1010_v45, %v944_v37  ;;  %v1112_v49 = vsel %vm1051_vm1, %v1042_v48, %v976_v38  ;;  %v1043_v57 = vmax.f32 %v977_v51, 0.0 }
 0x13f   : > { %1145 = vst.msk [vmem:[%s1618_s26 + $0xe0] sm:$0xff] %vm1116_vm2, %v1080_v55  ;;  %1177 = vst.msk [vmem:[%s1618_s26 + $0x1e0] sm:$0xff] %vm1116_vm2, %v1112_v49  ;;  %v1083_v58 = vsel %vm1051_vm1, %v1013_v53, %v947_v43  ;;  %v1115_v59 = vsel %vm1051_vm1, %v1045_v54, %v979_v44  ;;  %v1081_v60 = vsel %vm1051_vm1, %v1011_v56, %v945_v50 }
 0x140   : > { %1148 = vst.msk [vmem:[%s1618_s26 + $0xf8] sm:$0xff] %vm1116_vm2, %v1083_v58  ;;  %1180 = vst.msk [vmem:[%s1618_s26 + $0x1f8] sm:$0xff] %vm1116_vm2, %v1115_v59  ;;  %v1113_v61 = vsel %vm1051_vm1, %v1043_v57, %v977_v51 }
 0x141   : > { %1146 = vst.msk [vmem:[%s1618_s26 + $0xe8] sm:$0xff] %vm1116_vm2, %v1081_v60  ;;  %1178 = vst.msk [vmem:[%s1618_s26 + $0x1e8] sm:$0xff] %vm1116_vm2, %v1113_v61 }
 0x142 PF: > { %s15_s18 = sadd.s32 1, %s1481_s18  }
 0x143   : > { %p12_p4 = scmp.ge.s32.totalorder %s15_s18, 18  }
 0x145   :  { %14 = sbr.rel (!%p12_p4) target bundleno = 1 (0x1), region = 70 }

// kernel: resnet_forward.8
= control target key start
LH: loop header
LB: loop body
LE: loop exit
PB: predicated region body
PF: predicated region fallthrough
CT: control target
= control target key end

     0   :  { %s1719_s18 = smov 0   ;;  %s2292_s0 = inlined_call_operand.vmem [shape: bf16[2048,256], index: 0, kind: input, shape index: {}]   ;;  %s2293_s1 = inlined_call_operand.vmem [shape: bf16[256,32], index: 1, kind: input, shape index: {}]   ;;  %s2294_s2 = inlined_call_operand.vmem [shape: f32[1,32], index: 2, kind: input, shape index: {}]   ;;  %s2295_s3 = inlined_call_operand.vmem [shape: f32[1,32], index: 3, kind: input, shape index: {}]   ;;  %s2296_s4 = inlined_call_operand.vmem [shape: f32[1,32], index: 4, kind: input, shape index: {}]   ;;  %s2297_s5 = inlined_call_operand.vmem [shape: f32[2048,32], index: 5, kind: output, shape index: {}]  }
   0x1 LB: > { %s1432_s19 = sadd.s32 4294967295, %s1686_s18   ;;  %p1436_p0 = scmp.ge.s32.totalorder %s1686_s18, 1  ;;  %s1686_s18 = sphi %s1719_s18, %s15_s18  }
   0x2   : > { %p189_p1 = scmp.lt.s32.totalorder %s1686_s18, 5 }
   0x4   : > { %p190_p2 = pnand %p1436_p0, %p189_p1 }
   0x5   : > { %v1568_v0 = vld [vmem:[%s2293_s1] sm:$0xff] (!%p190_p2)   ;;  %v1688_v1 = vmov (!%p190_p2), 0   ;;  %s1437_s22 = sshll.u32 (!%p190_p2), %s1432_s19, 6  ;;  %v1569_v2 = vld [vmem:[%s2293_s1 + $0x8] sm:$0xff] (!%p190_p2)   ;;  %v1570_v3 = vld [vmem:[%s2293_s1 + $0x10] sm:$0xff] (!%p190_p2)   ;;  %vm1311_vm2 = vcmask (!%p190_p2), 261120  }
   0x6   : > { %193 = sbr.rel (%p190_p2) target bundleno = 412 (0x19c), region = 40  ;;  %744 = vmatprep.subr.bf16.mxu0 (!%p190_p2), %v1688_v1  ;;  %1527 = vmatprep.subr.bf16.mxu1 (!%p190_p2), %v1688_v1  ;;  %p219_p3 = scmp.lt.s32.totalorder (!%p190_p2), %s1437_s22, 255  ;;  %v1571_v4 = vld [vmem:[%s2293_s1 + $0x18] sm:$0xff] (!%p190_p2)   ;;  %v1572_v5 = vld [vmem:[%s2293_s1 + $0x20] sm:$0xff] (!%p190_p2)   ;;  %v1573_v7 = vld [vmem:[%s2293_s1 + $0x28] sm:$0xff] (!%p190_p2)  }
   0x7   : > { %745 = vmatpush1.bf16.msra.mxu0 (!%p190_p2), %v1568_v0  ;;  %1543 = vmatpush1.bf16.msra.mxu1 (!%p190_p2), %v1568_v0  ;;  %v1574_v9 = vld [vmem:[%s2293_s1 + $0x30] sm:$0xff] (!%p190_p2)   ;;  %v1575_v10 = vld [vmem:[%s2293_s1 + $0x38] sm:$0xff] (!%p190_p2)   ;;  %v1576_v11 = vld [vmem:[%s2293_s1 + $0x40] sm:$0xff] (!%p190_p2)  }
   0x8   : > { %746 = vmatprep.subr.bf16.mxu0 (!%p190_p2), %v1688_v1  ;;  %1528 = vmatprep.subr.bf16.mxu1 (!%p190_p2), %v1688_v1  ;;  %v1577_v12 = vld [vmem:[%s2293_s1 + $0x48] sm:$0xff] (!%p190_p2)   ;;  %v1578_v13 = vld [vmem:[%s2293_s1 + $0x50] sm:$0xff] (!%p190_p2)   ;;  %v1579_v14 = vld [vmem:[%s2293_s1 + $0x58] sm:$0xff] (!%p190_p2)  }
   0x9   : > { %v1580_v15 = vld [vmem:[%s2293_s1 + $0x60] sm:$0xff] (!%p190_p2)   ;;  %v1581_v16 = vld [vmem:[%s2293_s1 + $0x68] sm:$0xff] (!%p190_p2)   ;;  %v1582_v17 = vld [vmem:[%s2293_s1 + $0x70] sm:$0xff] (!%p190_p2)  }
   0xa   : > { %v1583_v18 = vld [vmem:[%s2293_s1 + $0x78] sm:$0xff] (!%p190_p2)  }
   0xb   : > { %747 = vmatpush1.bf16.msra.mxu0 (!%p190_p2), %v1569_v2  ;;  %1544 = vmatpush1.bf16.msra.mxu1 (!%p190_p2), %v1569_v2 }
   0xc   : > { %748 = vmatprep.subr.bf16.mxu0 (!%p190_p2), %v1688_v1  ;;  %1529 = vmatprep.subr.bf16.mxu1 (!%p190_p2), %v1688_v1 }
   0xd   : > { %s2299_s22 = smov (!%p219_p3, %s1437_s22), 255 }
   0xe   : > { %s1526_s29 = sshll.u32 %s2299_s22, 3 }
   0xf   : > { %749 = vmatpush1.bf16.msra.mxu0 %v1570_v3  ;;  %1545 = vmatpush1.bf16.msra.mxu1 %v1570_v3  ;;  %s1758_s9 = scalar_lea.vmem %s2292_s0, %s1526_s29  ;;  %s1909_s19 = scalar_lea.vmem %s2297_s5, %s1526_s29 }
  0x10   : > { %750 = vmatprep.subr.bf16.mxu0 %v1688_v1  ;;  %1530 = vmatprep.subr.bf16.mxu1 %v1688_v1  ;;  %v1586_v6 = vld [vmem:[%s1758_s9 + $0x4] ss:$8 sps:$4 sm:$0xff]   ;;  %v1584_v19 = vld [vmem:[%s1758_s9] ss:$8 sps:$4 sm:$0xff]   ;;  %v1590_v21 = vld [vmem:[%s1758_s9 + $0x14] ss:$8 sps:$4 sm:$0xff]  }
  0x11   : > { %v1589_v8 = vld [vmem:[%s1758_s9 + $0x104] ss:$8 sps:$4 sm:$0xff]   ;;  %776 = vmatprep.mubr.bf16.mxu0 %v1586_v6  ;;  %v1587_v20 = vld [vmem:[%s1758_s9 + $0x100] ss:$8 sps:$4 sm:$0xff]   ;;  %v1592_v22 = vld [vmem:[%s1758_s9 + $0x114] ss:$8 sps:$4 sm:$0xff]  }
  0x12   : > { %904 = vmatprep.mubr.bf16.mxu1 %v1589_v8  ;;  %v1594_v23 = vld [vmem:[%s1758_s9 + $0x10] ss:$8 sps:$4 sm:$0xff]   ;;  %v1596_v25 = vld [vmem:[%s1758_s9 + $0x24] ss:$8 sps:$4 sm:$0xff]   ;;  %v1600_v27 = vld [vmem:[%s1758_s9 + $0x20] ss:$8 sps:$4 sm:$0xff]  }
  0x13   : > { %751 = vmatpush1.bf16.msra.mxu0 %v1571_v4  ;;  %1546 = vmatpush1.bf16.msra.mxu1 %v1571_v4  ;;  %v1595_v24 = vld [vmem:[%s1758_s9 + $0x110] ss:$8 sps:$4 sm:$0xff]   ;;  %v1598_v26 = vld [vmem:[%s1758_s9 + $0x124] ss:$8 sps:$4 sm:$0xff]   ;;  %v1601_v28 = vld [vmem:[%s1758_s9 + $0x120] ss:$8 sps:$4 sm:$0xff]  }
  0x14   : > { %752 = vmatprep.subr.bf16.mxu0 %v1688_v1  ;;  %1531 = vmatprep.subr.bf16.mxu1 %v1688_v1  ;;  %v1602_v29 = vld [vmem:[%s1758_s9 + $0x34] ss:$8 sps:$4 sm:$0xff]   ;;  %v1606_v31 = vld [vmem:[%s1758_s9 + $0x30] ss:$8 sps:$4 sm:$0xff]   ;;  %v1608_v33 = vld [vmem:[%s1758_s9 + $0x44] ss:$8 sps:$4 sm:$0xff]  }
  0x15   : > { %v1604_v30 = vld [vmem:[%s1758_s9 + $0x134] ss:$8 sps:$4 sm:$0xff]   ;;  %v1607_v32 = vld [vmem:[%s1758_s9 + $0x130] ss:$8 sps:$4 sm:$0xff]   ;;  %v1610_v34 = vld [vmem:[%s1758_s9 + $0x144] ss:$8 sps:$4 sm:$0xff]  }
  0x16   : > { %v1612_v35 = vld [vmem:[%s1758_s9 + $0x40] ss:$8 sps:$4 sm:$0xff]   ;;  %v1614_v37 = vld [vmem:[%s1758_s9 + $0x54] ss:$8 sps:$4 sm:$0xff]   ;;  %v1618_v39 = vld [vmem:[%s1758_s9 + $0x50] ss:$8 sps:$4 sm:$0xff]  }
  0x17   : > { %753 = vmatpush1.bf16.msra.mxu0 %v1572_v5  ;;  %1547 = vmatpush1.bf16.msra.mxu1 %v1572_v5  ;;  %v1613_v36 = vld [vmem:[%s1758_s9 + $0x140] ss:$8 sps:$4 sm:$0xff]   ;;  %v1616_v38 = vld [vmem:[%s1758_s9 + $0x154] ss:$8 sps:$4 sm:$0xff]   ;;  %v1619_v40 = vld [vmem:[%s1758_s9 + $0x150] ss:$8 sps:$4 sm:$0xff]  }
  0x18   : > { %754 = vmatprep.subr.bf16.mxu0 %v1688_v1  ;;  %1532 = vmatprep.subr.bf16.mxu1 %v1688_v1  ;;  %v1620_v41 = vld [vmem:[%s1758_s9 + $0x64] ss:$8 sps:$4 sm:$0xff]   ;;  %v1624_v43 = vld [vmem:[%s1758_s9 + $0x60] ss:$8 sps:$4 sm:$0xff]   ;;  %v1626_v45 = vld [vmem:[%s1758_s9 + $0x74] ss:$8 sps:$4 sm:$0xff]  }
  0x19   : > { %v1622_v42 = vld [vmem:[%s1758_s9 + $0x164] ss:$8 sps:$4 sm:$0xff]   ;;  %v1625_v44 = vld [vmem:[%s1758_s9 + $0x160] ss:$8 sps:$4 sm:$0xff]   ;;  %v1628_v46 = vld [vmem:[%s1758_s9 + $0x174] ss:$8 sps:$4 sm:$0xff]  }
  0x1a   : > { %v1630_v47 = vld [vmem:[%s1758_s9 + $0x70] ss:$8 sps:$4 sm:$0xff]   ;;  %v1632_v49 = vld [vmem:[%s1758_s9 + $0x84] ss:$8 sps:$4 sm:$0xff]   ;;  %v1636_v51 = vld [vmem:[%s1758_s9 + $0x80] ss:$8 sps:$4 sm:$0xff]  }
  0x1b   : > { %755 = vmatpush1.bf16.msra.mxu0 %v1573_v7  ;;  %1548 = vmatpush1.bf16.msra.mxu1 %v1573_v7  ;;  %v1631_v48 = vld [vmem:[%s1758_s9 + $0x170] ss:$8 sps:$4 sm:$0xff]   ;;  %v1634_v50 = vld [vmem:[%s1758_s9 + $0x184] ss:$8 sps:$4 sm:$0xff]   ;;  %v1637_v52 = vld [vmem:[%s1758_s9 + $0x180] ss:$8 sps:$4 sm:$0xff]  }
  0x1c   : > { %756 = vmatprep.subr.bf16.mxu0 %v1688_v1  ;;  %1533 = vmatprep.subr.bf16.mxu1 %v1688_v1  ;;  %v1638_v53 = vld [vmem:[%s1758_s9 + $0x94] ss:$8 sps:$4 sm:$0xff]   ;;  %v1642_v55 = vld [vmem:[%s1758_s9 + $0x90] ss:$8 sps:$4 sm:$0xff]   ;;  %v1644_v57 = vld [vmem:[%s1758_s9 + $0xa4] ss:$8 sps:$4 sm:$0xff]  }
  0x1d   : > { %v1640_v54 = vld [vmem:[%s1758_s9 + $0x194] ss:$8 sps:$4 sm:$0xff]   ;;  %v1643_v56 = vld [vmem:[%s1758_s9 + $0x190] ss:$8 sps:$4 sm:$0xff]   ;;  %v1646_v58 = vld [vmem:[%s1758_s9 + $0x1a4] ss:$8 sps:$4 sm:$0xff]  }
  0x1e   : > { %v1648_v59 = vld [vmem:[%s1758_s9 + $0xa0] ss:$8 sps:$4 sm:$0xff]   ;;  %v1650_v61 = vld [vmem:[%s1758_s9 + $0xb4] ss:$8 sps:$4 sm:$0xff]   ;;  %v1654_v63 = vld [vmem:[%s1758_s9 + $0xb0] ss:$8 sps:$4 sm:$0xff]  }
  0x1f   : > { %757 = vmatpush1.bf16.msra.mxu0 %v1574_v9  ;;  %1549 = vmatpush1.bf16.msra.mxu1 %v1574_v9  ;;  %v1649_v60 = vld [vmem:[%s1758_s9 + $0x1a0] ss:$8 sps:$4 sm:$0xff]   ;;  %v1652_v62 = vld [vmem:[%s1758_s9 + $0x1b4] ss:$8 sps:$4 sm:$0xff]   ;;  %v1655_v0 = vld [vmem:[%s1758_s9 + $0x1b0] ss:$8 sps:$4 sm:$0xff]  }
  0x20   : > { %758 = vmatprep.subr.bf16.mxu0 %v1688_v1  ;;  %1534 = vmatprep.subr.bf16.mxu1 %v1688_v1  ;;  %v1656_v2 = vld [vmem:[%s1758_s9 + $0xc4] ss:$8 sps:$4 sm:$0xff]   ;;  %v1660_v4 = vld [vmem:[%s1758_s9 + $0xc0] ss:$8 sps:$4 sm:$0xff]   ;;  %v1662_v6 = vld [vmem:[%s1758_s9 + $0xd4] ss:$8 sps:$4 sm:$0xff]  }
  0x21   : > { %v1658_v3 = vld [vmem:[%s1758_s9 + $0x1c4] ss:$8 sps:$4 sm:$0xff]   ;;  %v1661_v5 = vld [vmem:[%s1758_s9 + $0x1c0] ss:$8 sps:$4 sm:$0xff]   ;;  %v1664_v7 = vld [vmem:[%s1758_s9 + $0x1d4] ss:$8 sps:$4 sm:$0xff]  }
  0x22   : > { %v1666_v8 = vld [vmem:[%s1758_s9 + $0xd0] ss:$8 sps:$4 sm:$0xff]  }
  0x23   : > { %759 = vmatpush1.bf16.msra.mxu0 %v1575_v10  ;;  %1550 = vmatpush1.bf16.msra.mxu1 %v1575_v10  ;;  %v1667_v9 = vld [vmem:[%s1758_s9 + $0x1d0] ss:$8 sps:$4 sm:$0xff]   ;;  %v1668_v10 = vld [vmem:[%s1758_s9 + $0xe4] ss:$8 sps:$4 sm:$0xff]  }
  0x24   : > { %760 = vmatprep.subr.bf16.mxu0 %v1688_v1  ;;  %1535 = vmatprep.subr.bf16.mxu1 %v1688_v1 }
  0x27   : > { %761 = vmatpush1.bf16.msra.mxu0 %v1576_v11  ;;  %1551 = vmatpush1.bf16.msra.mxu1 %v1576_v11  ;;  %v1670_v11 = vld [vmem:[%s1758_s9 + $0x1e4] ss:$8 sps:$4 sm:$0xff]  }
  0x28   : > { %762 = vmatprep.subr.bf16.mxu0 %v1688_v1  ;;  %1536 = vmatprep.subr.bf16.mxu1 %v1688_v1 }
  0x2b   : > { %763 = vmatpush1.bf16.msra.mxu0 %v1577_v12  ;;  %1552 = vmatpush1.bf16.msra.mxu1 %v1577_v12  ;;  %v1672_v12 = vld [vmem:[%s1758_s9 + $0xe0] ss:$8 sps:$4 sm:$0xff]  }
  0x2c   : > { %764 = vmatprep.subr.bf16.mxu0 %v1688_v1  ;;  %1537 = vmatprep.subr.bf16.mxu1 %v1688_v1 }
  0x2f   : > { %765 = vmatpush1.bf16.msra.mxu0 %v1578_v13  ;;  %1553 = vmatpush1.bf16.msra.mxu1 %v1578_v13  ;;  %v1673_v13 = vld [vmem:[%s1758_s9 + $0x1e0] ss:$8 sps:$4 sm:$0xff]  }
  0x30   : > { %766 = vmatprep.subr.bf16.mxu0 %v1688_v1  ;;  %1538 = vmatprep.subr.bf16.mxu1 %v1688_v1 }
  0x33   : > { %767 = vmatpush1.bf16.msra.mxu0 %v1579_v14  ;;  %1554 = vmatpush1.bf16.msra.mxu1 %v1579_v14  ;;  %v1674_v14 = vld [vmem:[%s1758_s9 + $0xf4] ss:$8 sps:$4 sm:$0xff]  }
  0x34   : > { %768 = vmatprep.subr.bf16.mxu0 %v1688_v1  ;;  %1539 = vmatprep.subr.bf16.mxu1 %v1688_v1 }
  0x37   : > { %769 = vmatpush1.bf16.msra.mxu0 %v1580_v15  ;;  %1555 = vmatpush1.bf16.msra.mxu1 %v1580_v15  ;;  %v1676_v15 = vld [vmem:[%s1758_s9 + $0x1f4] ss:$8 sps:$4 sm:$0xff]  }
  0x38   : > { %770 = vmatprep.subr.bf16.mxu0 %v1688_v1  ;;  %1540 = vmatprep.subr.bf16.mxu1 %v1688_v1 }
  0x3b   : > { %771 = vmatpush1.bf16.msra.mxu0 %v1581_v16  ;;  %1556 = vmatpush1.bf16.msra.mxu1 %v1581_v16  ;;  %v1678_v16 = vld [vmem:[%s1758_s9 + $0xf0] ss:$8 sps:$4 sm:$0xff]  }
  0x3c   : > { %772 = vmatprep.subr.bf16.mxu0 %v1688_v1  ;;  %1541 = vmatprep.subr.bf16.mxu1 %v1688_v1 }
  0x3f   : > { %773 = vmatpush1.bf16.msra.mxu0 %v1582_v17  ;;  %1557 = vmatpush1.bf16.msra.mxu1 %v1582_v17  ;;  %v1679_v17 = vld [vmem:[%s1758_s9 + $0x1f0] ss:$8 sps:$4 sm:$0xff]  }
  0x40   : > { %774 = vmatprep.subr.bf16.mxu0 %v1688_v1  ;;  %1542 = vmatprep.subr.bf16.mxu1 %v1688_v1 }
  0x43   : > { %775 = vmatpush1.bf16.msra.mxu0 %v1583_v18  ;;  %1558 = vmatpush1.bf16.msra.mxu1 %v1583_v18  ;;  %v1242_v18 = vlaneseq }
  0x46   : > { %777 = vmatmul.mubr.bf16.vlgmr.msra.gmra.mrb[0].mxu0 %v1584_v19  ;;  %905 = vmatmul.mubr.bf16.vlgmr.msra.gmra.mrb[0].mxu1 %v1587_v20  ;;  %v1175_v19 = vld [vmem:[%s2296_s4] sm:$0x1]  ;;  %v1243_v20 = vshrl.u32 %v1242_v18, 7 }
  0x47   : > { %784 = vmatprep.mubr.bf16.mxu0 %v1590_v21  ;;  %912 = vmatprep.mubr.bf16.mxu1 %v1592_v22  ;;  %vm1176_vm0 = vcmp.gt.f32.partialorder %v1175_v19, 0.0 }
  0x48   : > { %v1244_v21 = vsub.s32 0, %v1243_v20  ;;  %v1241_v22 = vsel %vm1176_vm0, 1, %v1688_v1 }
  0x4e   : > { %785 = vmatmul.mubr.bf16.gmra.mrb[4].mxu0 %v1594_v23  ;;  %913 = vmatmul.mubr.bf16.gmra.mrb[4].mxu1 %v1595_v24  ;;  %v1888_v23 = vld [vmem:[%s2294_s2] ss:$0 sm:$0xff] }
  0x4f   : > { %792 = vmatprep.mubr.bf16.mxu0 %v1596_v25  ;;  %920 = vmatprep.mubr.bf16.mxu1 %v1598_v26  ;;  %v1893_v25 = vld [vmem:[%s2295_s3] ss:$0 sm:$0xff]  ;;  %v1895_v26 = vrot.slane %v1241_v22, %v1244_v21 }
  0x51   : > { %vm1246_vm1 = vcmp.eq.s32.totalorder %v1895_v26, 1 }
  0x56   : > { %793 = vmatmul.mubr.bf16.gmra.mrb[8].mxu0 %v1600_v27  ;;  %921 = vmatmul.mubr.bf16.gmra.mrb[8].mxu1 %v1601_v28 }
  0x57   : > { %800 = vmatprep.mubr.bf16.mxu0 %v1602_v29  ;;  %928 = vmatprep.mubr.bf16.mxu1 %v1604_v30 }
  0x5e   : > { %801 = vmatmul.mubr.bf16.gmra.mrb[12].mxu0 %v1606_v31  ;;  %929 = vmatmul.mubr.bf16.gmra.mrb[12].mxu1 %v1607_v32 }
  0x5f   : > { %808 = vmatprep.mubr.bf16.mxu0 %v1608_v33  ;;  %936 = vmatprep.mubr.bf16.mxu1 %v1610_v34 }
  0x66   : > { %809 = vmatmul.mubr.bf16.gmra.mrb[16].mxu0 %v1612_v35  ;;  %937 = vmatmul.mubr.bf16.gmra.mrb[16].mxu1 %v1613_v36 }
  0x67   : > { %816 = vmatprep.mubr.bf16.mxu0 %v1614_v37  ;;  %944 = vmatprep.mubr.bf16.mxu1 %v1616_v38 }
  0x6e   : > { %817 = vmatmul.mubr.bf16.gmra.mrb[20].mxu0 %v1618_v39  ;;  %945 = vmatmul.mubr.bf16.gmra.mrb[20].mxu1 %v1619_v40 }
  0x6f   : > { %824 = vmatprep.mubr.bf16.mxu0 %v1620_v41  ;;  %952 = vmatprep.mubr.bf16.mxu1 %v1622_v42 }
  0x76   : > { %825 = vmatmul.mubr.bf16.gmra.mrb[24].mxu0 %v1624_v43  ;;  %953 = vmatmul.mubr.bf16.gmra.mrb[24].mxu1 %v1625_v44 }
  0x77   : > { %832 = vmatprep.mubr.bf16.mxu0 %v1626_v45  ;;  %960 = vmatprep.mubr.bf16.mxu1 %v1628_v46 }
  0x7e   : > { %833 = vmatmul.mubr.bf16.gmra.mrb[28].mxu0 %v1630_v47  ;;  %961 = vmatmul.mubr.bf16.gmra.mrb[28].mxu1 %v1631_v48 }
  0x7f   : > { %840 = vmatprep.mubr.bf16.mxu0 %v1632_v49  ;;  %968 = vmatprep.mubr.bf16.mxu1 %v1634_v50 }
  0x86   : > { %841 = vmatmul.mubr.bf16.gmra.mrb[32].mxu0 %v1636_v51  ;;  %969 = vmatmul.mubr.bf16.gmra.mrb[32].mxu1 %v1637_v52 }
  0x87   : > { %848 = vmatprep.mubr.bf16.mxu0 %v1638_v53  ;;  %976 = vmatprep.mubr.bf16.mxu1 %v1640_v54 }
  0x8e   : > { %849 = vmatmul.mubr.bf16.gmra.mrb[36].mxu0 %v1642_v55  ;;  %977 = vmatmul.mubr.bf16.gmra.mrb[36].mxu1 %v1643_v56 }
  0x8f   : > { %856 = vmatprep.mubr.bf16.mxu0 %v1644_v57  ;;  %984 = vmatprep.mubr.bf16.mxu1 %v1646_v58 }
  0x96   : > { %857 = vmatmul.mubr.bf16.gmra.mrb[40].mxu0 %v1648_v59  ;;  %985 = vmatmul.mubr.bf16.gmra.mrb[40].mxu1 %v1649_v60 }
  0x97   : > { %864 = vmatprep.mubr.bf16.mxu0 %v1650_v61  ;;  %992 = vmatprep.mubr.bf16.mxu1 %v1652_v62 }
  0x9e   : > { %865 = vmatmul.mubr.bf16.gmra.mrb[44].mxu0 %v1654_v63  ;;  %993 = vmatmul.mubr.bf16.gmra.mrb[44].mxu1 %v1655_v0 }
  0x9f   : > { %872 = vmatprep.mubr.bf16.mxu0 %v1656_v2  ;;  %1000 = vmatprep.mubr.bf16.mxu1 %v1658_v3 }
  0xa6   : > { %873 = vmatmul.mubr.bf16.gmra.mrb[48].mxu0 %v1660_v4  ;;  %1001 = vmatmul.mubr.bf16.gmra.mrb[48].mxu1 %v1661_v5 }
  0xa7   : > { %880 = vmatprep.mubr.bf16.mxu0 %v1662_v6  ;;  %1008 = vmatprep.mubr.bf16.mxu1 %v1664_v7 }
  0xae   : > { %881 = vmatmul.mubr.bf16.gmra.mrb[52].mxu0 %v1666_v8  ;;  %1009 = vmatmul.mubr.bf16.gmra.mrb[52].mxu1 %v1667_v9 }
  0xaf   : > { %888 = vmatprep.mubr.bf16.mxu0 %v1668_v10  ;;  %1016 = vmatprep.mubr.bf16.mxu1 %v1670_v11 }
  0xb6   : > { %889 = vmatmul.mubr.bf16.gmra.mrb[56].mxu0 %v1672_v12  ;;  %1017 = vmatmul.mubr.bf16.gmra.mrb[56].mxu1 %v1673_v13 }
  0xb7   : > { %896 = vmatprep.mubr.bf16.mxu0 %v1674_v14  ;;  %1024 = vmatprep.mubr.bf16.mxu1 %v1676_v15 }
  0xbe   : > { %897 = vmatmul.mubr.bf16.gmra.mrb[60].mxu0 %v1678_v16  ;;  %1025 = vmatmul.mubr.bf16.gmra.mrb[60].mxu1 %v1679_v17 }
 0x119   : > { %v778_v24 = vpop.f32.mrb[0].mxu0  ;;  %v906_v27 = vpop.f32.mrb[0].mxu1 }
 0x11a   : > { %v1040_v28 = vmul.f32 %v1888_v23, %v778_v24  ;;  %v1072_v29 = vmul.f32 %v1888_v23, %v906_v27  ;;  %v780_v1 = vpop.f32.mrb[1].mxu0  ;;  %v908_v30 = vpop.f32.mrb[1].mxu1 }
 0x11b   : > { %v781_v31 = vpop.f32.mrb[2].mxu0  ;;  %v909_v32 = vpop.f32.mrb[2].mxu1 }
 0x11c   : > { %v1111_v33 = vadd.f32 %v1893_v25, %v1040_v28  ;;  %v1143_v34 = vadd.f32 %v1893_v25, %v1072_v29  ;;  %v1041_v35 = vmul.f32 %v1888_v23, %v781_v31  ;;  %v1073_v36 = vmul.f32 %v1888_v23, %v909_v32  ;;  %v783_v37 = vpop.f32.mrb[3].mxu0  ;;  %v911_v38 = vpop.f32.mrb[3].mxu1 }
 0x11e   : > { %v1177_v39 = vmax.f32 %v1111_v33, 0.0  ;;  %v1209_v40 = vmax.f32 %v1143_v34, 0.0  ;;  %v1112_v41 = vadd.f32 %v1893_v25, %v1041_v35  ;;  %v1144_v42 = vadd.f32 %v1893_v25, %v1073_v36 }
 0x120   : > { %v1247_v43 = vsel %vm1246_vm1, %v1177_v39, %v1111_v33  ;;  %v1279_v44 = vsel %vm1246_vm1, %v1209_v40, %v1143_v34  ;;  %v1178_v45 = vmax.f32 %v1112_v41, 0.0  ;;  %v1210_v46 = vmax.f32 %v1144_v42, 0.0 }
 0x121   : > { %1312 = vst.msk [vmem:[%s1909_s19] sm:$0xff] %vm1311_vm2, %v1247_v43  ;;  %1344 = vst.msk [vmem:[%s1909_s19 + $0x100] sm:$0xff] %vm1311_vm2, %v1279_v44  ;;  %v786_v47 = vpop.f32.mrb[4].mxu0  ;;  %v914_v48 = vpop.f32.mrb[4].mxu1 }
 0x122   : > { %v1248_v49 = vsel %vm1246_vm1, %v1178_v45, %v1112_v41  ;;  %v1280_v50 = vsel %vm1246_vm1, %v1210_v46, %v1144_v42  ;;  %v1042_v51 = vmul.f32 %v1888_v23, %v786_v47  ;;  %v1074_v52 = vmul.f32 %v1888_v23, %v914_v48  ;;  %v788_v53 = vpop.f32.mrb[5].mxu0  ;;  %v916_v54 = vpop.f32.mrb[5].mxu1 }
 0x123   : > { %1313 = vst.msk [vmem:[%s1909_s19 + $0x8] sm:$0xff] %vm1311_vm2, %v1248_v49  ;;  %1345 = vst.msk [vmem:[%s1909_s19 + $0x108] sm:$0xff] %vm1311_vm2, %v1280_v50  ;;  %v789_v55 = vpop.f32.mrb[6].mxu0  ;;  %v917_v56 = vpop.f32.mrb[6].mxu1 }
 0x124   : > { %v1113_v57 = vadd.f32 %v1893_v25, %v1042_v51  ;;  %v1145_v58 = vadd.f32 %v1893_v25, %v1074_v52  ;;  %v1043_v59 = vmul.f32 %v1888_v23, %v789_v55  ;;  %v1075_v60 = vmul.f32 %v1888_v23, %v917_v56  ;;  %v791_v61 = vpop.f32.mrb[7].mxu0  ;;  %v919_v62 = vpop.f32.mrb[7].mxu1 }
 0x126   : > { %v1179_v63 = vmax.f32 %v1113_v57, 0.0  ;;  %v1211_v0 = vmax.f32 %v1145_v58, 0.0  ;;  %v1114_v2 = vadd.f32 %v1893_v25, %v1043_v59  ;;  %v1146_v3 = vadd.f32 %v1893_v25, %v1075_v60 }
 0x128   : > { %v1249_v4 = vsel %vm1246_vm1, %v1179_v63, %v1113_v57  ;;  %v1281_v5 = vsel %vm1246_vm1, %v1211_v0, %v1145_v58  ;;  %v1180_v6 = vmax.f32 %v1114_v2, 0.0  ;;  %v1212_v7 = vmax.f32 %v1146_v3, 0.0 }
 0x129   : > { %1314 = vst.msk [vmem:[%s1909_s19 + $0x10] sm:$0xff] %vm1311_vm2, %v1249_v4  ;;  %1346 = vst.msk [vmem:[%s1909_s19 + $0x110] sm:$0xff] %vm1311_vm2, %v1281_v5  ;;  %v794_v8 = vpop.f32.mrb[8].mxu0  ;;  %v922_v9 = vpop.f32.mrb[8].mxu1 }
 0x12a   : > { %v1250_v10 = vsel %vm1246_vm1, %v1180_v6, %v1114_v2  ;;  %v1282_v11 = vsel %vm1246_vm1, %v1212_v7, %v1146_v3  ;;  %v1044_v12 = vmul.f32 %v1888_v23, %v794_v8  ;;  %v1076_v13 = vmul.f32 %v1888_v23, %v922_v9  ;;  %v796_v14 = vpop.f32.mrb[9].mxu0  ;;  %v924_v15 = vpop.f32.mrb[9].mxu1 }
 0x12b   : > { %1315 = vst.msk [vmem:[%s1909_s19 + $0x18] sm:$0xff] %vm1311_vm2, %v1250_v10  ;;  %1347 = vst.msk [vmem:[%s1909_s19 + $0x118] sm:$0xff] %vm1311_vm2, %v1282_v11  ;;  %v797_v16 = vpop.f32.mrb[10].mxu0  ;;  %v925_v17 = vpop.f32.mrb[10].mxu1 }
 0x12c   : > { %v1115_v18 = vadd.f32 %v1893_v25, %v1044_v12  ;;  %v1147_v19 = vadd.f32 %v1893_v25, %v1076_v13  ;;  %v1045_v20 = vmul.f32 %v1888_v23, %v797_v16  ;;  %v1077_v21 = vmul.f32 %v1888_v23, %v925_v17  ;;  %v799_v22 = vpop.f32.mrb[11].mxu0  ;;  %v927_v24 = vpop.f32.mrb[11].mxu1 }
 0x12e   : > { %v1181_v27 = vmax.f32 %v1115_v18, 0.0  ;;  %v1213_v28 = vmax.f32 %v1147_v19, 0.0  ;;  %v1116_v29 = vadd.f32 %v1893_v25, %v1045_v20  ;;  %v1148_v1 = vadd.f32 %v1893_v25, %v1077_v21 }
 0x130   : > { %v1251_v30 = vsel %vm1246_vm1, %v1181_v27, %v1115_v18  ;;  %v1283_v31 = vsel %vm1246_vm1, %v1213_v28, %v1147_v19  ;;  %v1182_v32 = vmax.f32 %v1116_v29, 0.0  ;;  %v1214_v33 = vmax.f32 %v1148_v1, 0.0 }
 0x131   : > { %1316 = vst.msk [vmem:[%s1909_s19 + $0x20] sm:$0xff] %vm1311_vm2, %v1251_v30  ;;  %1348 = vst.msk [vmem:[%s1909_s19 + $0x120] sm:$0xff] %vm1311_vm2, %v1283_v31  ;;  %v802_v34 = vpop.f32.mrb[12].mxu0  ;;  %v930_v35 = vpop.f32.mrb[12].mxu1 }
 0x132   : > { %v1252_v36 = vsel %vm1246_vm1, %v1182_v32, %v1116_v29  ;;  %v1284_v37 = vsel %vm1246_vm1, %v1214_v33, %v1148_v1  ;;  %v1046_v38 = vmul.f32 %v1888_v23, %v802_v34  ;;  %v1078_v39 = vmul.f32 %v1888_v23, %v930_v35  ;;  %v804_v40 = vpop.f32.mrb[13].mxu0  ;;  %v932_v41 = vpop.f32.mrb[13].mxu1 }
 0x133   : > { %1317 = vst.msk [vmem:[%s1909_s19 + $0x28] sm:$0xff] %vm1311_vm2, %v1252_v36  ;;  %1349 = vst.msk [vmem:[%s1909_s19 + $0x128] sm:$0xff] %vm1311_vm2, %v1284_v37  ;;  %v805_v42 = vpop.f32.mrb[14].mxu0  ;;  %v933_v43 = vpop.f32.mrb[14].mxu1 }
 0x134   : > { %v1117_v44 = vadd.f32 %v1893_v25, %v1046_v38  ;;  %v1149_v45 = vadd.f32 %v1893_v25, %v1078_v39  ;;  %v1047_v46 = vmul.f32 %v1888_v23, %v805_v42  ;;  %v1079_v47 = vmul.f32 %v1888_v23, %v933_v43  ;;  %v807_v48 = vpop.f32.mrb[15].mxu0  ;;  %v935_v49 = vpop.f32.mrb[15].mxu1 }
 0x136   : > { %v1183_v50 = vmax.f32 %v1117_v44, 0.0  ;;  %v1215_v51 = vmax.f32 %v1149_v45, 0.0  ;;  %v1118_v52 = vadd.f32 %v1893_v25, %v1047_v46  ;;  %v1150_v53 = vadd.f32 %v1893_v25, %v1079_v47 }
 0x138   : > { %v1253_v54 = vsel %vm1246_vm1, %v1183_v50, %v1117_v44  ;;  %v1285_v55 = vsel %vm1246_vm1, %v1215_v51, %v1149_v45  ;;  %v1184_v56 = vmax.f32 %v1118_v52, 0.0  ;;  %v1216_v57 = vmax.f32 %v1150_v53, 0.0 }
 0x139   : > { %1318 = vst.msk [vmem:[%s1909_s19 + $0x30] sm:$0xff] %vm1311_vm2, %v1253_v54  ;;  %1350 = vst.msk [vmem:[%s1909_s19 + $0x130] sm:$0xff] %vm1311_vm2, %v1285_v55  ;;  %v810_v58 = vpop.f32.mrb[16].mxu0  ;;  %v938_v59 = vpop.f32.mrb[16].mxu1 }
 0x13a   : > { %v1254_v60 = vsel %vm1246_vm1, %v1184_v56, %v1118_v52  ;;  %v1286_v61 = vsel %vm1246_vm1, %v1216_v57, %v1150_v53  ;;  %v1048_v62 = vmul.f32 %v1888_v23, %v810_v58  ;;  %v1080_v63 = vmul.f32 %v1888_v23, %v938_v59  ;;  %v812_v0 = vpop.f32.mrb[17].mxu0  ;;  %v940_v2 = vpop.f32.mrb[17].mxu1 }
 0x13b   : > { %1319 = vst.msk [vmem:[%s1909_s19 + $0x38] sm:$0xff] %vm1311_vm2, %v1254_v60  ;;  %1351 = vst.msk [vmem:[%s1909_s19 + $0x138] sm:$0xff] %vm1311_vm2, %v1286_v61  ;;  %v813_v3 = vpop.f32.mrb[18].mxu0  ;;  %v941_v4 = vpop.f32.mrb[18].mxu1 }
 0x13c   : > { %v1119_v5 = vadd.f32 %v1893_v25, %v1048_v62  ;;  %v1151_v6 = vadd.f32 %v1893_v25, %v1080_v63  ;;  %v1049_v7 = vmul.f32 %v1888_v23, %v813_v3  ;;  %v1081_v8 = vmul.f32 %v1888_v23, %v941_v4  ;;  %v815_v9 = vpop.f32.mrb[19].mxu0  ;;  %v943_v10 = vpop.f32.mrb[19].mxu1 }
 0x13e   : > { %v1185_v11 = vmax.f32 %v1119_v5, 0.0  ;;  %v1217_v12 = vmax.f32 %v1151_v6, 0.0  ;;  %v1120_v13 = vadd.f32 %v1893_v25, %v1049_v7  ;;  %v1152_v14 = vadd.f32 %v1893_v25, %v1081_v8 }
 0x140   : > { %v1255_v15 = vsel %vm1246_vm1, %v1185_v11, %v1119_v5  ;;  %v1287_v16 = vsel %vm1246_vm1, %v1217_v12, %v1151_v6  ;;  %v1186_v17 = vmax.f32 %v1120_v13, 0.0  ;;  %v1218_v18 = vmax.f32 %v1152_v14, 0.0 }
 0x141   : > { %1320 = vst.msk [vmem:[%s1909_s19 + $0x40] sm:$0xff] %vm1311_vm2, %v1255_v15  ;;  %1352 = vst.msk [vmem:[%s1909_s19 + $0x140] sm:$0xff] %vm1311_vm2, %v1287_v16  ;;  %v818_v19 = vpop.f32.mrb[20].mxu0  ;;  %v946_v20 = vpop.f32.mrb[20].mxu1 }
 0x142   : > { %v1256_v21 = vsel %vm1246_vm1, %v1186_v17, %v1120_v13  ;;  %v1288_v22 = vsel %vm1246_vm1, %v1218_v18, %v1152_v14  ;;  %v1050_v24 = vmul.f32 %v1888_v23, %v818_v19  ;;  %v1082_v27 = vmul.f32 %v1888_v23, %v946_v20  ;;  %v820_v28 = vpop.f32.mrb[21].mxu0  ;;  %v948_v29 = vpop.f32.mrb[21].mxu1 }
 0x143   : > { %1321 = vst.msk [vmem:[%s1909_s19 + $0x48] sm:$0xff] %vm1311_vm2, %v1256_v21  ;;  %1353 = vst.msk [vmem:[%s1909_s19 + $0x148] sm:$0xff] %vm1311_vm2, %v1288_v22  ;;  %v821_v1 = vpop.f32.mrb[22].mxu0  ;;  %v949_v30 = vpop.f32.mrb[22].mxu1 }
 0x144   : > { %v1121_v31 = vadd.f32 %v1893_v25, %v1050_v24  ;;  %v1153_v32 = vadd.f32 %v1893_v25, %v1082_v27  ;;  %v1051_v33 = vmul.f32 %v1888_v23, %v821_v1  ;;  %v1083_v34 = vmul.f32 %v1888_v23, %v949_v30  ;;  %v823_v35 = vpop.f32.mrb[23].mxu0  ;;  %v951_v36 = vpop.f32.mrb[23].mxu1 }
 0x146   : > { %v1187_v37 = vmax.f32 %v1121_v31, 0.0  ;;  %v1219_v38 = vmax.f32 %v1153_v32, 0.0  ;;  %v1122_v39 = vadd.f32 %v1893_v25, %v1051_v33  ;;  %v1154_v40 = vadd.f32 %v1893_v25, %v1083_v34 }
 0x148   : > { %v1257_v41 = vsel %vm1246_vm1, %v1187_v37, %v1121_v31  ;;  %v1289_v42 = vsel %vm1246_vm1, %v1219_v38, %v1153_v32  ;;  %v1188_v43 = vmax.f32 %v1122_v39, 0.0  ;;  %v1220_v44 = vmax.f32 %v1154_v40, 0.0 }
 0x149   : > { %1322 = vst.msk [vmem:[%s1909_s19 + $0x50] sm:$0xff] %vm1311_vm2, %v1257_v41  ;;  %1354 = vst.msk [vmem:[%s1909_s19 + $0x150] sm:$0xff] %vm1311_vm2, %v1289_v42  ;;  %v826_v45 = vpop.f32.mrb[24].mxu0  ;;  %v954_v46 = vpop.f32.mrb[24].mxu1 }
 0x14a   : > { %v1258_v47 = vsel %vm1246_vm1, %v1188_v43, %v1122_v39  ;;  %v1290_v48 = vsel %vm1246_vm1, %v1220_v44, %v1154_v40  ;;  %v1052_v49 = vmul.f32 %v1888_v23, %v826_v45  ;;  %v1084_v50 = vmul.f32 %v1888_v23, %v954_v46  ;;  %v828_v51 = vpop.f32.mrb[25].mxu0  ;;  %v956_v52 = vpop.f32.mrb[25].mxu1 }
 0x14b   : > { %1323 = vst.msk [vmem:[%s1909_s19 + $0x58] sm:$0xff] %vm1311_vm2, %v1258_v47  ;;  %1355 = vst.msk [vmem:[%s1909_s19 + $0x158] sm:$0xff] %vm1311_vm2, %v1290_v48  ;;  %v829_v53 = vpop.f32.mrb[26].mxu0  ;;  %v957_v54 = vpop.f32.mrb[26].mxu1 }
 0x14c   : > { %v1123_v55 = vadd.f32 %v1893_v25, %v1052_v49  ;;  %v1155_v56 = vadd.f32 %v1893_v25, %v1084_v50  ;;  %v1053_v57 = vmul.f32 %v1888_v23, %v829_v53  ;;  %v1085_v58 = vmul.f32 %v1888_v23, %v957_v54  ;;  %v831_v59 = vpop.f32.mrb[27].mxu0  ;;  %v959_v60 = vpop.f32.mrb[27].mxu1 }
 0x14e   : > { %v1189_v61 = vmax.f32 %v1123_v55, 0.0  ;;  %v1221_v62 = vmax.f32 %v1155_v56, 0.0  ;;  %v1124_v63 = vadd.f32 %v1893_v25, %v1053_v57  ;;  %v1156_v0 = vadd.f32 %v1893_v25, %v1085_v58 }
 0x150   : > { %v1259_v2 = vsel %vm1246_vm1, %v1189_v61, %v1123_v55  ;;  %v1291_v3 = vsel %vm1246_vm1, %v1221_v62, %v1155_v56  ;;  %v1190_v4 = vmax.f32 %v1124_v63, 0.0  ;;  %v1222_v5 = vmax.f32 %v1156_v0, 0.0 }
 0x151   : > { %1324 = vst.msk [vmem:[%s1909_s19 + $0x60] sm:$0xff] %vm1311_vm2, %v1259_v2  ;;  %1356 = vst.msk [vmem:[%s1909_s19 + $0x160] sm:$0xff] %vm1311_vm2, %v1291_v3  ;;  %v834_v6 = vpop.f32.mrb[28].mxu0  ;;  %v962_v7 = vpop.f32.mrb[28].mxu1 }
 0x152   : > { %v1260_v8 = vsel %vm1246_vm1, %v1190_v4, %v1124_v63  ;;  %v1292_v9 = vsel %vm1246_vm1, %v1222_v5, %v1156_v0  ;;  %v1054_v10 = vmul.f32 %v1888_v23, %v834_v6  ;;  %v1086_v11 = vmul.f32 %v1888_v23, %v962_v7  ;;  %v836_v12 = vpop.f32.mrb[29].mxu0  ;;  %v964_v13 = vpop.f32.mrb[29].mxu1 }
 0x153   : > { %1325 = vst.msk [vmem:[%s1909_s19 + $0x68] sm:$0xff] %vm1311_vm2, %v1260_v8  ;;  %1357 = vst.msk [vmem:[%s1909_s19 + $0x168] sm:$0xff] %vm1311_vm2, %v1292_v9  ;;  %v837_v14 = vpop.f32.mrb[30].mxu0  ;;  %v965_v15 = vpop.f32.mrb[30].mxu1 }
 0x154   : > { %v1125_v16 = vadd.f32 %v1893_v25, %v1054_v10  ;;  %v1157_v17 = vadd.f32 %v1893_v25, %v1086_v11  ;;  %v1055_v18 = vmul.f32 %v1888_v23, %v837_v14  ;;  %v1087_v19 = vmul.f32 %v1888_v23, %v965_v15  ;;  %v839_v20 = vpop.f32.mrb[31].mxu0  ;;  %v967_v21 = vpop.f32.mrb[31].mxu1 }
 0x156   : > { %v1191_v22 = vmax.f32 %v1125_v16, 0.0  ;;  %v1223_v24 = vmax.f32 %v1157_v17, 0.0  ;;  %v1126_v27 = vadd.f32 %v1893_v25, %v1055_v18  ;;  %v1158_v28 = vadd.f32 %v1893_v25, %v1087_v19 }
 0x158   : > { %v1261_v29 = vsel %vm1246_vm1, %v1191_v22, %v1125_v16  ;;  %v1293_v1 = vsel %vm1246_vm1, %v1223_v24, %v1157_v17  ;;  %v1192_v30 = vmax.f32 %v1126_v27, 0.0  ;;  %v1224_v31 = vmax.f32 %v1158_v28, 0.0 }
 0x159   : > { %1326 = vst.msk [vmem:[%s1909_s19 + $0x70] sm:$0xff] %vm1311_vm2, %v1261_v29  ;;  %1358 = vst.msk [vmem:[%s1909_s19 + $0x170] sm:$0xff] %vm1311_vm2, %v1293_v1  ;;  %v842_v32 = vpop.f32.mrb[32].mxu0  ;;  %v970_v33 = vpop.f32.mrb[32].mxu1 }
 0x15a   : > { %v1262_v34 = vsel %vm1246_vm1, %v1192_v30, %v1126_v27  ;;  %v1294_v35 = vsel %vm1246_vm1, %v1224_v31, %v1158_v28  ;;  %v1056_v36 = vmul.f32 %v1888_v23, %v842_v32  ;;  %v1088_v37 = vmul.f32 %v1888_v23, %v970_v33  ;;  %v844_v38 = vpop.f32.mrb[33].mxu0  ;;  %v972_v39 = vpop.f32.mrb[33].mxu1 }
 0x15b   : > { %1327 = vst.msk [vmem:[%s1909_s19 + $0x78] sm:$0xff] %vm1311_vm2, %v1262_v34  ;;  %1359 = vst.msk [vmem:[%s1909_s19 + $0x178] sm:$0xff] %vm1311_vm2, %v1294_v35  ;;  %v845_v40 = vpop.f32.mrb[34].mxu0  ;;  %v973_v41 = vpop.f32.mrb[34].mxu1 }
 0x15c   : > { %v1127_v42 = vadd.f32 %v1893_v25, %v1056_v36  ;;  %v1159_v43 = vadd.f32 %v1893_v25, %v1088_v37  ;;  %v1057_v44 = vmul.f32 %v1888_v23, %v845_v40  ;;  %v1089_v45 = vmul.f32 %v1888_v23, %v973_v41  ;;  %v847_v46 = vpop.f32.mrb[35].mxu0  ;;  %v975_v47 = vpop.f32.mrb[35].mxu1 }
 0x15e   : > { %v1193_v48 = vmax.f32 %v1127_v42, 0.0  ;;  %v1225_v49 = vmax.f32 %v1159_v43, 0.0  ;;  %v1128_v50 = vadd.f32 %v1893_v25, %v1057_v44  ;;  %v1160_v51 = vadd.f32 %v1893_v25, %v1089_v45 }
 0x160   : > { %v1263_v52 = vsel %vm1246_vm1, %v1193_v48, %v1127_v42  ;;  %v1295_v53 = vsel %vm1246_vm1, %v1225_v49, %v1159_v43  ;;  %v1194_v54 = vmax.f32 %v1128_v50, 0.0  ;;  %v1226_v55 = vmax.f32 %v1160_v51, 0.0 }
 0x161   : > { %1328 = vst.msk [vmem:[%s1909_s19 + $0x80] sm:$0xff] %vm1311_vm2, %v1263_v52  ;;  %1360 = vst.msk [vmem:[%s1909_s19 + $0x180] sm:$0xff] %vm1311_vm2, %v1295_v53  ;;  %v850_v56 = vpop.f32.mrb[36].mxu0  ;;  %v978_v57 = vpop.f32.mrb[36].mxu1 }
 0x162   : > { %v1264_v58 = vsel %vm1246_vm1, %v1194_v54, %v1128_v50  ;;  %v1296_v59 = vsel %vm1246_vm1, %v1226_v55, %v1160_v51  ;;  %v1058_v60 = vmul.f32 %v1888_v23, %v850_v56  ;;  %v1090_v61 = vmul.f32 %v1888_v23, %v978_v57  ;;  %v852_v62 = vpop.f32.mrb[37].mxu0  ;;  %v980_v63 = vpop.f32.mrb[37].mxu1 }
 0x163   : > { %1329 = vst.msk [vmem:[%s1909_s19 + $0x88] sm:$0xff] %vm1311_vm2, %v1264_v58  ;;  %1361 = vst.msk [vmem:[%s1909_s19 + $0x188] sm:$0xff] %vm1311_vm2, %v1296_v59  ;;  %v853_v0 = vpop.f32.mrb[38].mxu0  ;;  %v981_v2 = vpop.f32.mrb[38].mxu1 }
 0x164   : > { %v1129_v3 = vadd.f32 %v1893_v25, %v1058_v60  ;;  %v1161_v4 = vadd.f32 %v1893_v25, %v1090_v61  ;;  %v1059_v5 = vmul.f32 %v1888_v23, %v853_v0  ;;  %v1091_v6 = vmul.f32 %v1888_v23, %v981_v2  ;;  %v855_v7 = vpop.f32.mrb[39].mxu0  ;;  %v983_v8 = vpop.f32.mrb[39].mxu1 }
 0x166   : > { %v1195_v9 = vmax.f32 %v1129_v3, 0.0  ;;  %v1227_v10 = vmax.f32 %v1161_v4, 0.0  ;;  %v1130_v11 = vadd.f32 %v1893_v25, %v1059_v5  ;;  %v1162_v12 = vadd.f32 %v1893_v25, %v1091_v6 }
 0x168   : > { %v1265_v13 = vsel %vm1246_vm1, %v1195_v9, %v1129_v3  ;;  %v1297_v14 = vsel %vm1246_vm1, %v1227_v10, %v1161_v4  ;;  %v1196_v15 = vmax.f32 %v1130_v11, 0.0  ;;  %v1228_v16 = vmax.f32 %v1162_v12, 0.0 }
 0x169   : > { %1330 = vst.msk [vmem:[%s1909_s19 + $0x90] sm:$0xff] %vm1311_vm2, %v1265_v13  ;;  %1362 = vst.msk [vmem:[%s1909_s19 + $0x190] sm:$0xff] %vm1311_vm2, %v1297_v14  ;;  %v858_v17 = vpop.f32.mrb[40].mxu0  ;;  %v986_v18 = vpop.f32.mrb[40].mxu1 }
 0x16a   : > { %v1266_v19 = vsel %vm1246_vm1, %v1196_v15, %v1130_v11  ;;  %v1298_v20 = vsel %vm1246_vm1, %v1228_v16, %v1162_v12  ;;  %v1060_v21 = vmul.f32 %v1888_v23, %v858_v17  ;;  %v1092_v22 = vmul.f32 %v1888_v23, %v986_v18  ;;  %v860_v24 = vpop.f32.mrb[41].mxu0  ;;  %v988_v27 = vpop.f32.mrb[41].mxu1 }
 0x16b   : > { %1331 = vst.msk [vmem:[%s1909_s19 + $0x98] sm:$0xff] %vm1311_vm2, %v1266_v19  ;;  %1363 = vst.msk [vmem:[%s1909_s19 + $0x198] sm:$0xff] %vm1311_vm2, %v1298_v20  ;;  %v861_v28 = vpop.f32.mrb[42].mxu0  ;;  %v989_v29 = vpop.f32.mrb[42].mxu1 }
 0x16c   : > { %v1131_v1 = vadd.f32 %v1893_v25, %v1060_v21  ;;  %v1163_v30 = vadd.f32 %v1893_v25, %v1092_v22  ;;  %v1061_v31 = vmul.f32 %v1888_v23, %v861_v28  ;;  %v1093_v32 = vmul.f32 %v1888_v23, %v989_v29  ;;  %v863_v33 = vpop.f32.mrb[43].mxu0  ;;  %v991_v34 = vpop.f32.mrb[43].mxu1 }
 0x16e   : > { %v1197_v35 = vmax.f32 %v1131_v1, 0.0  ;;  %v1229_v36 = vmax.f32 %v1163_v30, 0.0  ;;  %v1132_v37 = vadd.f32 %v1893_v25, %v1061_v31  ;;  %v1164_v38 = vadd.f32 %v1893_v25, %v1093_v32 }
 0x170   : > { %v1267_v39 = vsel %vm1246_vm1, %v1197_v35, %v1131_v1  ;;  %v1299_v40 = vsel %vm1246_vm1, %v1229_v36, %v1163_v30  ;;  %v1198_v41 = vmax.f32 %v1132_v37, 0.0  ;;  %v1230_v42 = vmax.f32 %v1164_v38, 0.0 }
 0x171   : > { %1332 = vst.msk [vmem:[%s1909_s19 + $0xa0] sm:$0xff] %vm1311_vm2, %v1267_v39  ;;  %1364 = vst.msk [vmem:[%s1909_s19 + $0x1a0] sm:$0xff] %vm1311_vm2, %v1299_v40  ;;  %v866_v43 = vpop.f32.mrb[44].mxu0  ;;  %v994_v44 = vpop.f32.mrb[44].mxu1 }
 0x172   : > { %v1268_v45 = vsel %vm1246_vm1, %v1198_v41, %v1132_v37  ;;  %v1300_v46 = vsel %vm1246_vm1, %v1230_v42, %v1164_v38  ;;  %v1062_v47 = vmul.f32 %v1888_v23, %v866_v43  ;;  %v1094_v48 = vmul.f32 %v1888_v23, %v994_v44  ;;  %v868_v49 = vpop.f32.mrb[45].mxu0  ;;  %v996_v50 = vpop.f32.mrb[45].mxu1 }
 0x173   : > { %1333 = vst.msk [vmem:[%s1909_s19 + $0xa8] sm:$0xff] %vm1311_vm2, %v1268_v45  ;;  %1365 = vst.msk [vmem:[%s1909_s19 + $0x1a8] sm:$0xff] %vm1311_vm2, %v1300_v46  ;;  %v869_v51 = vpop.f32.mrb[46].mxu0  ;;  %v997_v52 = vpop.f32.mrb[46].mxu1 }
 0x174   : > { %v1133_v53 = vadd.f32 %v1893_v25, %v1062_v47  ;;  %v1165_v54 = vadd.f32 %v1893_v25, %v1094_v48  ;;  %v1063_v55 = vmul.f32 %v1888_v23, %v869_v51  ;;  %v1095_v56 = vmul.f32 %v1888_v23, %v997_v52  ;;  %v871_v57 = vpop.f32.mrb[47].mxu0  ;;  %v999_v58 = vpop.f32.mrb[47].mxu1 }
 0x176   : > { %v1199_v59 = vmax.f32 %v1133_v53, 0.0  ;;  %v1231_v60 = vmax.f32 %v1165_v54, 0.0  ;;  %v1134_v61 = vadd.f32 %v1893_v25, %v1063_v55  ;;  %v1166_v62 = vadd.f32 %v1893_v25, %v1095_v56 }
 0x178   : > { %v1269_v63 = vsel %vm1246_vm1, %v1199_v59, %v1133_v53  ;;  %v1301_v0 = vsel %vm1246_vm1, %v1231_v60, %v1165_v54  ;;  %v1200_v2 = vmax.f32 %v1134_v61, 0.0  ;;  %v1232_v3 = vmax.f32 %v1166_v62, 0.0 }
 0x179   : > { %1334 = vst.msk [vmem:[%s1909_s19 + $0xb0] sm:$0xff] %vm1311_vm2, %v1269_v63  ;;  %1366 = vst.msk [vmem:[%s1909_s19 + $0x1b0] sm:$0xff] %vm1311_vm2, %v1301_v0  ;;  %v874_v4 = vpop.f32.mrb[48].mxu0  ;;  %v1002_v5 = vpop.f32.mrb[48].mxu1 }
 0x17a   : > { %v1270_v6 = vsel %vm1246_vm1, %v1200_v2, %v1134_v61  ;;  %v1302_v7 = vsel %vm1246_vm1, %v1232_v3, %v1166_v62  ;;  %v1064_v8 = vmul.f32 %v1888_v23, %v874_v4  ;;  %v1096_v9 = vmul.f32 %v1888_v23, %v1002_v5  ;;  %v876_v10 = vpop.f32.mrb[49].mxu0  ;;  %v1004_v11 = vpop.f32.mrb[49].mxu1 }
 0x17b   : > { %1335 = vst.msk [vmem:[%s1909_s19 + $0xb8] sm:$0xff] %vm1311_vm2, %v1270_v6  ;;  %1367 = vst.msk [vmem:[%s1909_s19 + $0x1b8] sm:$0xff] %vm1311_vm2, %v1302_v7  ;;  %v877_v12 = vpop.f32.mrb[50].mxu0  ;;  %v1005_v13 = vpop.f32.mrb[50].mxu1 }
 0x17c   : > { %v1135_v14 = vadd.f32 %v1893_v25, %v1064_v8  ;;  %v1167_v15 = vadd.f32 %v1893_v25, %v1096_v9  ;;  %v1065_v16 = vmul.f32 %v1888_v23, %v877_v12  ;;  %v1097_v17 = vmul.f32 %v1888_v23, %v1005_v13  ;;  %v879_v18 = vpop.f32.mrb[51].mxu0  ;;  %v1007_v19 = vpop.f32.mrb[51].mxu1 }
 0x17e   : > { %v1201_v20 = vmax.f32 %v1135_v14, 0.0  ;;  %v1233_v21 = vmax.f32 %v1167_v15, 0.0  ;;  %v1136_v22 = vadd.f32 %v1893_v25, %v1065_v16  ;;  %v1168_v24 = vadd.f32 %v1893_v25, %v1097_v17 }
 0x180   : > { %v1271_v27 = vsel %vm1246_vm1, %v1201_v20, %v1135_v14  ;;  %v1303_v28 = vsel %vm1246_vm1, %v1233_v21, %v1167_v15  ;;  %v1202_v29 = vmax.f32 %v1136_v22, 0.0  ;;  %v1234_v1 = vmax.f32 %v1168_v24, 0.0 }
 0x181   : > { %1336 = vst.msk [vmem:[%s1909_s19 + $0xc0] sm:$0xff] %vm1311_vm2, %v1271_v27  ;;  %1368 = vst.msk [vmem:[%s1909_s19 + $0x1c0] sm:$0xff] %vm1311_vm2, %v1303_v28  ;;  %v882_v30 = vpop.f32.mrb[52].mxu0  ;;  %v1010_v31 = vpop.f32.mrb[52].mxu1 }
 0x182   : > { %v1272_v32 = vsel %vm1246_vm1, %v1202_v29, %v1136_v22  ;;  %v1304_v33 = vsel %vm1246_vm1, %v1234_v1, %v1168_v24  ;;  %v1066_v34 = vmul.f32 %v1888_v23, %v882_v30  ;;  %v1098_v35 = vmul.f32 %v1888_v23, %v1010_v31  ;;  %v884_v36 = vpop.f32.mrb[53].mxu0  ;;  %v1012_v37 = vpop.f32.mrb[53].mxu1 }
 0x183   : > { %1337 = vst.msk [vmem:[%s1909_s19 + $0xc8] sm:$0xff] %vm1311_vm2, %v1272_v32  ;;  %1369 = vst.msk [vmem:[%s1909_s19 + $0x1c8] sm:$0xff] %vm1311_vm2, %v1304_v33  ;;  %v885_v38 = vpop.f32.mrb[54].mxu0  ;;  %v1013_v39 = vpop.f32.mrb[54].mxu1 }
 0x184   : > { %v1137_v40 = vadd.f32 %v1893_v25, %v1066_v34  ;;  %v1169_v41 = vadd.f32 %v1893_v25, %v1098_v35  ;;  %v1067_v42 = vmul.f32 %v1888_v23, %v885_v38  ;;  %v1099_v43 = vmul.f32 %v1888_v23, %v1013_v39  ;;  %v887_v44 = vpop.f32.mrb[55].mxu0  ;;  %v1015_v45 = vpop.f32.mrb[55].mxu1 }
 0x186   : > { %v1203_v46 = vmax.f32 %v1137_v40, 0.0  ;;  %v1235_v47 = vmax.f32 %v1169_v41, 0.0  ;;  %v1138_v48 = vadd.f32 %v1893_v25, %v1067_v42  ;;  %v1170_v49 = vadd.f32 %v1893_v25, %v1099_v43 }
 0x188   : > { %v1273_v50 = vsel %vm1246_vm1, %v1203_v46, %v1137_v40  ;;  %v1305_v51 = vsel %vm1246_vm1, %v1235_v47, %v1169_v41  ;;  %v1204_v52 = vmax.f32 %v1138_v48, 0.0  ;;  %v1236_v53 = vmax.f32 %v1170_v49, 0.0 }
 0x189   : > { %1338 = vst.msk [vmem:[%s1909_s19 + $0xd0] sm:$0xff] %vm1311_vm2, %v1273_v50  ;;  %1370 = vst.msk [vmem:[%s1909_s19 + $0x1d0] sm:$0xff] %vm1311_vm2, %v1305_v51  ;;  %v890_v54 = vpop.f32.mrb[56].mxu0  ;;  %v1018_v55 = vpop.f32.mrb[56].mxu1 }
 0x18a   : > { %v1274_v56 = vsel %vm1246_vm1, %v1204_v52, %v1138_v48  ;;  %v1306_v57 = vsel %vm1246_vm1, %v1236_v53, %v1170_v49  ;;  %v1068_v58 = vmul.f32 %v1888_v23, %v890_v54  ;;  %v1100_v59 = vmul.f32 %v1888_v23, %v1018_v55  ;;  %v892_v60 = vpop.f32.mrb[57].mxu0  ;;  %v1020_v61 = vpop.f32.mrb[57].mxu1 }
 0x18b   : > { %1339 = vst.msk [vmem:[%s1909_s19 + $0xd8] sm:$0xff] %vm1311_vm2, %v1274_v56  ;;  %1371 = vst.msk [vmem:[%s1909_s19 + $0x1d8] sm:$0xff] %vm1311_vm2, %v1306_v57  ;;  %v893_v62 = vpop.f32.mrb[58].mxu0  ;;  %v1021_v63 = vpop.f32.mrb[58].mxu1 }
 0x18c   : > { %v1139_v0 = vadd.f32 %v1893_v25, %v1068_v58  ;;  %v1171_v2 = vadd.f32 %v1893_v25, %v1100_v59  ;;  %v1069_v3 = vmul.f32 %v1888_v23, %v893_v62  ;;  %v1101_v4 = vmul.f32 %v1888_v23, %v1021_v63  ;;  %v895_v5 = vpop.f32.mrb[59].mxu0  ;;  %v1023_v6 = vpop.f32.mrb[59].mxu1 }
 0x18e   : > { %v1205_v7 = vmax.f32 %v1139_v0, 0.0  ;;  %v1237_v8 = vmax.f32 %v1171_v2, 0.0  ;;  %v1140_v9 = vadd.f32 %v1893_v25, %v1069_v3  ;;  %v1172_v10 = vadd.f32 %v1893_v25, %v1101_v4 }
 0x190   : > { %v1275_v11 = vsel %vm1246_vm1, %v1205_v7, %v1139_v0  ;;  %v1307_v12 = vsel %vm1246_vm1, %v1237_v8, %v1171_v2  ;;  %v1206_v13 = vmax.f32 %v1140_v9, 0.0  ;;  %v1238_v14 = vmax.f32 %v1172_v10, 0.0 }
 0x191   : > { %1340 = vst.msk [vmem:[%s1909_s19 + $0xe0] sm:$0xff] %vm1311_vm2, %v1275_v11  ;;  %1372 = vst.msk [vmem:[%s1909_s19 + $0x1e0] sm:$0xff] %vm1311_vm2, %v1307_v12  ;;  %v898_v15 = vpop.f32.mrb[60].mxu0  ;;  %v1026_v16 = vpop.f32.mrb[60].mxu1 }
 0x192   : > { %v1276_v17 = vsel %vm1246_vm1, %v1206_v13, %v1140_v9  ;;  %v1308_v18 = vsel %vm1246_vm1, %v1238_v14, %v1172_v10  ;;  %v1070_v19 = vmul.f32 %v1888_v23, %v898_v15  ;;  %v1102_v20 = vmul.f32 %v1888_v23, %v1026_v16  ;;  %v900_v21 = vpop.f32.mrb[61].mxu0  ;;  %v1028_v22 = vpop.f32.mrb[61].mxu1 }
 0x193   : > { %1341 = vst.msk [vmem:[%s1909_s19 + $0xe8] sm:$0xff] %vm1311_vm2, %v1276_v17  ;;  %1373 = vst.msk [vmem:[%s1909_s19 + $0x1e8] sm:$0xff] %vm1311_vm2, %v1308_v18  ;;  %v901_v24 = vpop.f32.mrb[62].mxu0  ;;  %v1029_v27 = vpop.f32.mrb[62].mxu1 }
 0x194   : > { %v1141_v28 = vadd.f32 %v1893_v25, %v1070_v19  ;;  %v1173_v29 = vadd.f32 %v1893_v25, %v1102_v20  ;;  %v1071_v1 = vmul.f32 %v1888_v23, %v901_v24  ;;  %v1103_v30 = vmul.f32 %v1888_v23, %v1029_v27  ;;  %v903_v31 = vpop.f32.mrb[63].mxu0  ;;  %v1031_v32 = vpop.f32.mrb[63].mxu1 }
 0x196   : > { %v1207_v33 = vmax.f32 %v1141_v28, 0.0  ;;  %v1239_v34 = vmax.f32 %v1173_v29, 0.0  ;;  %v1142_v35 = vadd.f32 %v1893_v25, %v1071_v1  ;;  %v1174_v36 = vadd.f32 %v1893_v25, %v1103_v30 }
 0x198   : > { %v1277_v37 = vsel %vm1246_vm1, %v1207_v33, %v1141_v28  ;;  %v1309_v38 = vsel %vm1246_vm1, %v1239_v34, %v1173_v29  ;;  %v1208_v39 = vmax.f32 %v1142_v35, 0.0  ;;  %v1240_v40 = vmax.f32 %v1174_v36, 0.0 }
 0x199   : > { %1342 = vst.msk [vmem:[%s1909_s19 + $0xf0] sm:$0xff] %vm1311_vm2, %v1277_v37  ;;  %1374 = vst.msk [vmem:[%s1909_s19 + $0x1f0] sm:$0xff] %vm1311_vm2, %v1309_v38 }
 0x19a   : > { %v1278_v23 = vsel %vm1246_vm1, %v1208_v39, %v1142_v35  ;;  %v1310_v41 = vsel %vm1246_vm1, %v1240_v40, %v1174_v36 }
 0x19b   : > { %1343 = vst.msk [vmem:[%s1909_s19 + $0xf8] sm:$0xff] %vm1311_vm2, %v1278_v23  ;;  %1375 = vst.msk [vmem:[%s1909_s19 + $0x1f8] sm:$0xff] %vm1311_vm2, %v1310_v41 }
 0x19c PF: > { %s15_s18 = sadd.s32 1, %s1686_s18  }
 0x19d   : > { %p12_p4 = scmp.ge.s32.totalorder %s15_s18, 6  }
 0x19f   :  { %14 = sbr.rel (!%p12_p4) target bundleno = 1 (0x1), region = 70 }

// kernel: resnet_forward.9
= control target key start
LH: loop header
LB: loop body
LE: loop exit
PB: predicated region body
PF: predicated region fallthrough
CT: control target
= control target key end

     0   :  { %s1811_s18 = smov 0   ;;  %s2316_s0 = inlined_call_operand.vmem [shape: bf16[2048,256], index: 0, kind: input, shape index: {}]   ;;  %s2317_s1 = inlined_call_operand.vmem [shape: bf16[256,16], index: 1, kind: input, shape index: {}]   ;;  %s2318_s2 = inlined_call_operand.vmem [shape: f32[1,16], index: 2, kind: input, shape index: {}]   ;;  %s2319_s3 = inlined_call_operand.vmem [shape: f32[1,16], index: 3, kind: input, shape index: {}]   ;;  %s2320_s4 = inlined_call_operand.vmem [shape: f32[2048,16], index: 4, kind: input, shape index: {}]   ;;  %s2321_s5 = inlined_call_operand.vmem [shape: f32[2048,16], index: 5, kind: output, shape index: {}]  }
   0x1 LB: > { %s1522_s19 = sadd.s32 4294967295, %s1778_s18   ;;  %p1526_p0 = scmp.ge.s32.totalorder %s1778_s18, 1  ;;  %s1778_s18 = sphi %s1811_s18, %s15_s18  }
   0x2   : > { %p200_p1 = scmp.lt.s32.totalorder %s1778_s18, 5 }
   0x4   : > { %p201_p2 = pnand %p1526_p0, %p200_p1 }
   0x5   : > { %v1660_v0 = vld [vmem:[%s2317_s1] sm:$0xff] (!%p201_p2)   ;;  %v1780_v1 = vmov (!%p201_p2), 0   ;;  %s1527_s22 = sshll.u32 (!%p201_p2), %s1522_s19, 6  ;;  %v1661_v2 = vld [vmem:[%s2317_s1 + $0x8] sm:$0xff] (!%p201_p2)   ;;  %v1662_v3 = vld [vmem:[%s2317_s1 + $0x10] sm:$0xff] (!%p201_p2)   ;;  %vm1389_vm0 = vcmask (!%p201_p2), 130048  }
   0x6   : > { %204 = sbr.rel (%p201_p2) target bundleno = 414 (0x19e), region = 40  ;;  %766 = vmatprep.subr.bf16.mxu0 (!%p201_p2), %v1780_v1  ;;  %1619 = vmatprep.subr.bf16.mxu1 (!%p201_p2), %v1780_v1  ;;  %p235_p3 = scmp.lt.s32.totalorder (!%p201_p2), %s1527_s22, 255  ;;  %v1663_v4 = vld [vmem:[%s2317_s1 + $0x18] sm:$0xff] (!%p201_p2)   ;;  %v1664_v5 = vld [vmem:[%s2317_s1 + $0x20] sm:$0xff] (!%p201_p2)   ;;  %v1665_v7 = vld [vmem:[%s2317_s1 + $0x28] sm:$0xff] (!%p201_p2)  }
   0x7   : > { %767 = vmatpush1.bf16.msra.mxu0 (!%p201_p2), %v1660_v0  ;;  %1635 = vmatpush1.bf16.msra.mxu1 (!%p201_p2), %v1660_v0  ;;  %v1666_v9 = vld [vmem:[%s2317_s1 + $0x30] sm:$0xff] (!%p201_p2)   ;;  %v1667_v10 = vld [vmem:[%s2317_s1 + $0x38] sm:$0xff] (!%p201_p2)   ;;  %v1668_v11 = vld [vmem:[%s2317_s1 + $0x40] sm:$0xff] (!%p201_p2)  }
   0x8   : > { %768 = vmatprep.subr.bf16.mxu0 (!%p201_p2), %v1780_v1  ;;  %1620 = vmatprep.subr.bf16.mxu1 (!%p201_p2), %v1780_v1  ;;  %v1669_v12 = vld [vmem:[%s2317_s1 + $0x48] sm:$0xff] (!%p201_p2)   ;;  %v1670_v13 = vld [vmem:[%s2317_s1 + $0x50] sm:$0xff] (!%p201_p2)   ;;  %v1671_v14 = vld [vmem:[%s2317_s1 + $0x58] sm:$0xff] (!%p201_p2)  }
   0x9   : > { %v1672_v15 = vld [vmem:[%s2317_s1 + $0x60] sm:$0xff] (!%p201_p2)   ;;  %v1673_v16 = vld [vmem:[%s2317_s1 + $0x68] sm:$0xff] (!%p201_p2)   ;;  %v1674_v17 = vld [vmem:[%s2317_s1 + $0x70] sm:$0xff] (!%p201_p2)  }
   0xa   : > { %v1675_v18 = vld [vmem:[%s2317_s1 + $0x78] sm:$0xff] (!%p201_p2)  }
   0xb   : > { %769 = vmatpush1.bf16.msra.mxu0 (!%p201_p2), %v1661_v2  ;;  %1636 = vmatpush1.bf16.msra.mxu1 (!%p201_p2), %v1661_v2 }
   0xc   : > { %770 = vmatprep.subr.bf16.mxu0 (!%p201_p2), %v1780_v1  ;;  %1621 = vmatprep.subr.bf16.mxu1 (!%p201_p2), %v1780_v1 }
   0xd   : > { %s2323_s22 = smov (!%p235_p3, %s1527_s22), 255 }
   0xe   : > { %s1839_s29 = sshll.u32 %s2323_s22, 3 }
   0xf   : > { %771 = vmatpush1.bf16.msra.mxu0 %v1662_v3  ;;  %1637 = vmatpush1.bf16.msra.mxu1 %v1662_v3  ;;  %s1848_s9 = scalar_lea.vmem %s2316_s0, %s1839_s29  ;;  %s1980_s14 = scalar_lea.vmem %s2320_s4, %s1839_s29 }
  0x10   : > { %772 = vmatprep.subr.bf16.mxu0 %v1780_v1  ;;  %1622 = vmatprep.subr.bf16.mxu1 %v1780_v1  ;;  %v1678_v6 = vld [vmem:[%s1848_s9 + $0x4] ss:$8 sps:$4 sm:$0xff]   ;;  %v1676_v19 = vld [vmem:[%s1848_s9] ss:$8 sps:$4 sm:$0xff]   ;;  %v1682_v21 = vld [vmem:[%s1848_s9 + $0x14] ss:$8 sps:$4 sm:$0xff]   ;;  %s2003_s19 = scalar_lea.vmem %s2321_s5, %s1839_s29 }
  0x11   : > { %v1681_v8 = vld [vmem:[%s1848_s9 + $0x104] ss:$8 sps:$4 sm:$0xff]   ;;  %798 = vmatprep.mubr.bf16.mxu0 %v1678_v6  ;;  %v1679_v20 = vld [vmem:[%s1848_s9 + $0x100] ss:$8 sps:$4 sm:$0xff]   ;;  %v1684_v22 = vld [vmem:[%s1848_s9 + $0x114] ss:$8 sps:$4 sm:$0xff]  }
  0x12   : > { %926 = vmatprep.mubr.bf16.mxu1 %v1681_v8  ;;  %v1686_v23 = vld [vmem:[%s1848_s9 + $0x10] ss:$8 sps:$4 sm:$0xff]   ;;  %v1688_v25 = vld [vmem:[%s1848_s9 + $0x24] ss:$8 sps:$4 sm:$0xff]   ;;  %v1692_v27 = vld [vmem:[%s1848_s9 + $0x20] ss:$8 sps:$4 sm:$0xff]  }
  0x13   : > { %773 = vmatpush1.bf16.msra.mxu0 %v1663_v4  ;;  %1638 = vmatpush1.bf16.msra.mxu1 %v1663_v4  ;;  %v1687_v24 = vld [vmem:[%s1848_s9 + $0x110] ss:$8 sps:$4 sm:$0xff]   ;;  %v1690_v26 = vld [vmem:[%s1848_s9 + $0x124] ss:$8 sps:$4 sm:$0xff]   ;;  %v1693_v28 = vld [vmem:[%s1848_s9 + $0x120] ss:$8 sps:$4 sm:$0xff]  }
  0x14   : > { %774 = vmatprep.subr.bf16.mxu0 %v1780_v1  ;;  %1623 = vmatprep.subr.bf16.mxu1 %v1780_v1  ;;  %v1694_v29 = vld [vmem:[%s1848_s9 + $0x34] ss:$8 sps:$4 sm:$0xff]   ;;  %v1698_v31 = vld [vmem:[%s1848_s9 + $0x30] ss:$8 sps:$4 sm:$0xff]   ;;  %v1700_v33 = vld [vmem:[%s1848_s9 + $0x44] ss:$8 sps:$4 sm:$0xff]  }
  0x15   : > { %v1696_v30 = vld [vmem:[%s1848_s9 + $0x134] ss:$8 sps:$4 sm:$0xff]   ;;  %v1699_v32 = vld [vmem:[%s1848_s9 + $0x130] ss:$8 sps:$4 sm:$0xff]   ;;  %v1702_v34 = vld [vmem:[%s1848_s9 + $0x144] ss:$8 sps:$4 sm:$0xff]  }
  0x16   : > { %v1704_v35 = vld [vmem:[%s1848_s9 + $0x40] ss:$8 sps:$4 sm:$0xff]   ;;  %v1706_v37 = vld [vmem:[%s1848_s9 + $0x54] ss:$8 sps:$4 sm:$0xff]   ;;  %v1710_v39 = vld [vmem:[%s1848_s9 + $0x50] ss:$8 sps:$4 sm:$0xff]  }
  0x17   : > { %775 = vmatpush1.bf16.msra.mxu0 %v1664_v5  ;;  %1639 = vmatpush1.bf16.msra.mxu1 %v1664_v5  ;;  %v1705_v36 = vld [vmem:[%s1848_s9 + $0x140] ss:$8 sps:$4 sm:$0xff]   ;;  %v1708_v38 = vld [vmem:[%s1848_s9 + $0x154] ss:$8 sps:$4 sm:$0xff]   ;;  %v1711_v40 = vld [vmem:[%s1848_s9 + $0x150] ss:$8 sps:$4 sm:$0xff]  }
  0x18   : > { %776 = vmatprep.subr.bf16.mxu0 %v1780_v1  ;;  %1624 = vmatprep.subr.bf16.mxu1 %v1780_v1  ;;  %v1712_v41 = vld [vmem:[%s1848_s9 + $0x64] ss:$8 sps:$4 sm:$0xff]   ;;  %v1716_v43 = vld [vmem:[%s1848_s9 + $0x60] ss:$8 sps:$4 sm:$0xff]   ;;  %v1718_v45 = vld [vmem:[%s1848_s9 + $0x74] ss:$8 sps:$4 sm:$0xff]  }
  0x19   : > { %v1714_v42 = vld [vmem:[%s1848_s9 + $0x164] ss:$8 sps:$4 sm:$0xff]   ;;  %v1717_v44 = vld [vmem:[%s1848_s9 + $0x160] ss:$8 sps:$4 sm:$0xff]   ;;  %v1720_v46 = vld [vmem:[%s1848_s9 + $0x174] ss:$8 sps:$4 sm:$0xff]  }
  0x1a   : > { %v1722_v47 = vld [vmem:[%s1848_s9 + $0x70] ss:$8 sps:$4 sm:$0xff]   ;;  %v1724_v49 = vld [vmem:[%s1848_s9 + $0x84] ss:$8 sps:$4 sm:$0xff]   ;;  %v1728_v51 = vld [vmem:[%s1848_s9 + $0x80] ss:$8 sps:$4 sm:$0xff]  }
  0x1b   : > { %777 = vmatpush1.bf16.msra.mxu0 %v1665_v7  ;;  %1640 = vmatpush1.bf16.msra.mxu1 %v1665_v7  ;;  %v1723_v48 = vld [vmem:[%s1848_s9 + $0x170] ss:$8 sps:$4 sm:$0xff]   ;;  %v1726_v50 = vld [vmem:[%s1848_s9 + $0x184] ss:$8 sps:$4 sm:$0xff]   ;;  %v1729_v52 = vld [vmem:[%s1848_s9 + $0x180] ss:$8 sps:$4 sm:$0xff]  }
  0x1c   : > { %778 = vmatprep.subr.bf16.mxu0 %v1780_v1  ;;  %1625 = vmatprep.subr.bf16.mxu1 %v1780_v1  ;;  %v1730_v53 = vld [vmem:[%s1848_s9 + $0x94] ss:$8 sps:$4 sm:$0xff]   ;;  %v1734_v55 = vld [vmem:[%s1848_s9 + $0x90] ss:$8 sps:$4 sm:$0xff]   ;;  %v1736_v57 = vld [vmem:[%s1848_s9 + $0xa4] ss:$8 sps:$4 sm:$0xff]  }
  0x1d   : > { %v1732_v54 = vld [vmem:[%s1848_s9 + $0x194] ss:$8 sps:$4 sm:$0xff]   ;;  %v1735_v56 = vld [vmem:[%s1848_s9 + $0x190] ss:$8 sps:$4 sm:$0xff]   ;;  %v1738_v58 = vld [vmem:[%s1848_s9 + $0x1a4] ss:$8 sps:$4 sm:$0xff]  }
  0x1e   : > { %v1740_v59 = vld [vmem:[%s1848_s9 + $0xa0] ss:$8 sps:$4 sm:$0xff]   ;;  %v1742_v61 = vld [vmem:[%s1848_s9 + $0xb4] ss:$8 sps:$4 sm:$0xff]   ;;  %v1746_v63 = vld [vmem:[%s1848_s9 + $0xb0] ss:$8 sps:$4 sm:$0xff]  }
  0x1f   : > { %779 = vmatpush1.bf16.msra.mxu0 %v1666_v9  ;;  %1641 = vmatpush1.bf16.msra.mxu1 %v1666_v9  ;;  %v1741_v60 = vld [vmem:[%s1848_s9 + $0x1a0] ss:$8 sps:$4 sm:$0xff]   ;;  %v1744_v62 = vld [vmem:[%s1848_s9 + $0x1b4] ss:$8 sps:$4 sm:$0xff]   ;;  %v1747_v0 = vld [vmem:[%s1848_s9 + $0x1b0] ss:$8 sps:$4 sm:$0xff]  }
  0x20   : > { %780 = vmatprep.subr.bf16.mxu0 %v1780_v1  ;;  %1626 = vmatprep.subr.bf16.mxu1 %v1780_v1  ;;  %v1750_v2 = vld [vmem:[%s1848_s9 + $0x1c4] ss:$8 sps:$4 sm:$0xff]   ;;  %v1752_v3 = vld [vmem:[%s1848_s9 + $0xc0] ss:$8 sps:$4 sm:$0xff]   ;;  %v1754_v5 = vld [vmem:[%s1848_s9 + $0xd4] ss:$8 sps:$4 sm:$0xff]  }
  0x21   : > { %v1753_v4 = vld [vmem:[%s1848_s9 + $0x1c0] ss:$8 sps:$4 sm:$0xff]   ;;  %v1756_v6 = vld [vmem:[%s1848_s9 + $0x1d4] ss:$8 sps:$4 sm:$0xff]   ;;  %v1758_v7 = vld [vmem:[%s1848_s9 + $0xd0] ss:$8 sps:$4 sm:$0xff]  }
  0x22   : > { %v1759_v8 = vld [vmem:[%s1848_s9 + $0x1d0] ss:$8 sps:$4 sm:$0xff]   ;;  %v1760_v9 = vld [vmem:[%s1848_s9 + $0xe4] ss:$8 sps:$4 sm:$0xff]  }
  0x23   : > { %781 = vmatpush1.bf16.msra.mxu0 %v1667_v10  ;;  %1642 = vmatpush1.bf16.msra.mxu1 %v1667_v10  ;;  %v1762_v10 = vld [vmem:[%s1848_s9 + $0x1e4] ss:$8 sps:$4 sm:$0xff]  }
  0x24   : > { %782 = vmatprep.subr.bf16.mxu0 %v1780_v1  ;;  %1627 = vmatprep.subr.bf16.mxu1 %v1780_v1 }
  0x27   : > { %783 = vmatpush1.bf16.msra.mxu0 %v1668_v11  ;;  %1643 = vmatpush1.bf16.msra.mxu1 %v1668_v11  ;;  %v1764_v11 = vld [vmem:[%s1848_s9 + $0xe0] ss:$8 sps:$4 sm:$0xff]  }
  0x28   : > { %784 = vmatprep.subr.bf16.mxu0 %v1780_v1  ;;  %1628 = vmatprep.subr.bf16.mxu1 %v1780_v1 }
  0x2b   : > { %785 = vmatpush1.bf16.msra.mxu0 %v1669_v12  ;;  %1644 = vmatpush1.bf16.msra.mxu1 %v1669_v12  ;;  %v1765_v12 = vld [vmem:[%s1848_s9 + $0x1e0] ss:$8 sps:$4 sm:$0xff]  }
  0x2c   : > { %786 = vmatprep.subr.bf16.mxu0 %v1780_v1  ;;  %1629 = vmatprep.subr.bf16.mxu1 %v1780_v1 }
  0x2f   : > { %787 = vmatpush1.bf16.msra.mxu0 %v1670_v13  ;;  %1645 = vmatpush1.bf16.msra.mxu1 %v1670_v13  ;;  %v1766_v13 = vld [vmem:[%s1848_s9 + $0xf4] ss:$8 sps:$4 sm:$0xff]  }
  0x30   : > { %788 = vmatprep.subr.bf16.mxu0 %v1780_v1  ;;  %1630 = vmatprep.subr.bf16.mxu1 %v1780_v1 }
  0x33   : > { %789 = vmatpush1.bf16.msra.mxu0 %v1671_v14  ;;  %1646 = vmatpush1.bf16.msra.mxu1 %v1671_v14  ;;  %v1768_v14 = vld [vmem:[%s1848_s9 + $0x1f4] ss:$8 sps:$4 sm:$0xff]  }
  0x34   : > { %790 = vmatprep.subr.bf16.mxu0 %v1780_v1  ;;  %1631 = vmatprep.subr.bf16.mxu1 %v1780_v1 }
  0x37   : > { %791 = vmatpush1.bf16.msra.mxu0 %v1672_v15  ;;  %1647 = vmatpush1.bf16.msra.mxu1 %v1672_v15  ;;  %v1770_v15 = vld [vmem:[%s1848_s9 + $0xf0] ss:$8 sps:$4 sm:$0xff]  }
  0x38   : > { %792 = vmatprep.subr.bf16.mxu0 %v1780_v1  ;;  %1632 = vmatprep.subr.bf16.mxu1 %v1780_v1 }
  0x3b   : > { %793 = vmatpush1.bf16.msra.mxu0 %v1673_v16  ;;  %1648 = vmatpush1.bf16.msra.mxu1 %v1673_v16  ;;  %v1771_v16 = vld [vmem:[%s1848_s9 + $0x1f0] ss:$8 sps:$4 sm:$0xff]  }
  0x3c   : > { %794 = vmatprep.subr.bf16.mxu0 %v1780_v1  ;;  %1633 = vmatprep.subr.bf16.mxu1 %v1780_v1 }
  0x3f   : > { %795 = vmatpush1.bf16.msra.mxu0 %v1674_v17  ;;  %1649 = vmatpush1.bf16.msra.mxu1 %v1674_v17  ;;  %v1974_v17 = vld [vmem:[%s2318_s2] ss:$0 sm:$0xff] }
  0x40   : > { %796 = vmatprep.subr.bf16.mxu0 %v1780_v1  ;;  %1634 = vmatprep.subr.bf16.mxu1 %v1780_v1  ;;  %v1748_v1 = vld [vmem:[%s1848_s9 + $0xc4] ss:$8 sps:$4 sm:$0xff]  }
  0x43   : > { %797 = vmatpush1.bf16.msra.mxu0 %v1675_v18  ;;  %1650 = vmatpush1.bf16.msra.mxu1 %v1675_v18 }
  0x46   : > { %799 = vmatmul.mubr.bf16.vlgmr.msra.gmra.mrb[0].mxu0 %v1676_v19  ;;  %927 = vmatmul.mubr.bf16.vlgmr.msra.gmra.mrb[0].mxu1 %v1679_v20  ;;  %v1985_v19 = vld [vmem:[%s2319_s3] ss:$0 sm:$0xff] }
  0x47   : > { %806 = vmatprep.mubr.bf16.mxu0 %v1682_v21  ;;  %934 = vmatprep.mubr.bf16.mxu1 %v1684_v22 }
  0x4e   : > { %807 = vmatmul.mubr.bf16.gmra.mrb[4].mxu0 %v1686_v23  ;;  %935 = vmatmul.mubr.bf16.gmra.mrb[4].mxu1 %v1687_v24 }
  0x4f   : > { %814 = vmatprep.mubr.bf16.mxu0 %v1688_v25  ;;  %942 = vmatprep.mubr.bf16.mxu1 %v1690_v26  ;;  %v1197_v25 = vld [vmem:[%s1980_s14] sm:$0xff] }
  0x50   : > { %v1229_v26 = vld [vmem:[%s1980_s14 + $0x100] sm:$0xff] }
  0x56   : > { %815 = vmatmul.mubr.bf16.gmra.mrb[8].mxu0 %v1692_v27  ;;  %943 = vmatmul.mubr.bf16.gmra.mrb[8].mxu1 %v1693_v28 }
  0x57   : > { %822 = vmatprep.mubr.bf16.mxu0 %v1694_v29  ;;  %950 = vmatprep.mubr.bf16.mxu1 %v1696_v30 }
  0x5e   : > { %823 = vmatmul.mubr.bf16.gmra.mrb[12].mxu0 %v1698_v31  ;;  %951 = vmatmul.mubr.bf16.gmra.mrb[12].mxu1 %v1699_v32 }
  0x5f   : > { %830 = vmatprep.mubr.bf16.mxu0 %v1700_v33  ;;  %958 = vmatprep.mubr.bf16.mxu1 %v1702_v34 }
  0x66   : > { %831 = vmatmul.mubr.bf16.gmra.mrb[16].mxu0 %v1704_v35  ;;  %959 = vmatmul.mubr.bf16.gmra.mrb[16].mxu1 %v1705_v36  ;;  %v1198_v35 = vld [vmem:[%s1980_s14 + $0x8] sm:$0xff] }
  0x67   : > { %838 = vmatprep.mubr.bf16.mxu0 %v1706_v37  ;;  %966 = vmatprep.mubr.bf16.mxu1 %v1708_v38  ;;  %v1230_v36 = vld [vmem:[%s1980_s14 + $0x108] sm:$0xff] }
  0x6e   : > { %839 = vmatmul.mubr.bf16.gmra.mrb[20].mxu0 %v1710_v39  ;;  %967 = vmatmul.mubr.bf16.gmra.mrb[20].mxu1 %v1711_v40 }
  0x6f   : > { %846 = vmatprep.mubr.bf16.mxu0 %v1712_v41  ;;  %974 = vmatprep.mubr.bf16.mxu1 %v1714_v42 }
  0x76   : > { %847 = vmatmul.mubr.bf16.gmra.mrb[24].mxu0 %v1716_v43  ;;  %975 = vmatmul.mubr.bf16.gmra.mrb[24].mxu1 %v1717_v44 }
  0x77   : > { %854 = vmatprep.mubr.bf16.mxu0 %v1718_v45  ;;  %982 = vmatprep.mubr.bf16.mxu1 %v1720_v46 }
  0x7e   : > { %855 = vmatmul.mubr.bf16.gmra.mrb[28].mxu0 %v1722_v47  ;;  %983 = vmatmul.mubr.bf16.gmra.mrb[28].mxu1 %v1723_v48 }
  0x7f   : > { %862 = vmatprep.mubr.bf16.mxu0 %v1724_v49  ;;  %990 = vmatprep.mubr.bf16.mxu1 %v1726_v50 }
  0x86   : > { %863 = vmatmul.mubr.bf16.gmra.mrb[32].mxu0 %v1728_v51  ;;  %991 = vmatmul.mubr.bf16.gmra.mrb[32].mxu1 %v1729_v52 }
  0x87   : > { %870 = vmatprep.mubr.bf16.mxu0 %v1730_v53  ;;  %998 = vmatprep.mubr.bf16.mxu1 %v1732_v54  ;;  %v1199_v53 = vld [vmem:[%s1980_s14 + $0x10] sm:$0xff] }
  0x88   : > { %v1231_v54 = vld [vmem:[%s1980_s14 + $0x110] sm:$0xff] }
  0x8e   : > { %871 = vmatmul.mubr.bf16.gmra.mrb[36].mxu0 %v1734_v55  ;;  %999 = vmatmul.mubr.bf16.gmra.mrb[36].mxu1 %v1735_v56 }
  0x8f   : > { %878 = vmatprep.mubr.bf16.mxu0 %v1736_v57  ;;  %1006 = vmatprep.mubr.bf16.mxu1 %v1738_v58 }
  0x96   : > { %879 = vmatmul.mubr.bf16.gmra.mrb[40].mxu0 %v1740_v59  ;;  %1007 = vmatmul.mubr.bf16.gmra.mrb[40].mxu1 %v1741_v60 }
  0x97   : > { %886 = vmatprep.mubr.bf16.mxu0 %v1742_v61  ;;  %1014 = vmatprep.mubr.bf16.mxu1 %v1744_v62 }
  0x9e   : > { %887 = vmatmul.mubr.bf16.gmra.mrb[44].mxu0 %v1746_v63  ;;  %1015 = vmatmul.mubr.bf16.gmra.mrb[44].mxu1 %v1747_v0  ;;  %v1200_v63 = vld [vmem:[%s1980_s14 + $0x18] sm:$0xff] }
  0x9f   : > { %894 = vmatprep.mubr.bf16.mxu0 %v1748_v1  ;;  %1022 = vmatprep.mubr.bf16.mxu1 %v1750_v2  ;;  %v1232_v0 = vld [vmem:[%s1980_s14 + $0x118] sm:$0xff] }
  0xa6   : > { %895 = vmatmul.mubr.bf16.gmra.mrb[48].mxu0 %v1752_v3  ;;  %1023 = vmatmul.mubr.bf16.gmra.mrb[48].mxu1 %v1753_v4 }
  0xa7   : > { %902 = vmatprep.mubr.bf16.mxu0 %v1754_v5  ;;  %1030 = vmatprep.mubr.bf16.mxu1 %v1756_v6 }
  0xae   : > { %903 = vmatmul.mubr.bf16.gmra.mrb[52].mxu0 %v1758_v7  ;;  %1031 = vmatmul.mubr.bf16.gmra.mrb[52].mxu1 %v1759_v8 }
  0xaf   : > { %910 = vmatprep.mubr.bf16.mxu0 %v1760_v9  ;;  %1038 = vmatprep.mubr.bf16.mxu1 %v1762_v10 }
  0xb6   : > { %911 = vmatmul.mubr.bf16.gmra.mrb[56].mxu0 %v1764_v11  ;;  %1039 = vmatmul.mubr.bf16.gmra.mrb[56].mxu1 %v1765_v12 }
  0xb7   : > { %918 = vmatprep.mubr.bf16.mxu0 %v1766_v13  ;;  %1046 = vmatprep.mubr.bf16.mxu1 %v1768_v14 }
  0xbe   : > { %919 = vmatmul.mubr.bf16.gmra.mrb[60].mxu0 %v1770_v15  ;;  %1047 = vmatmul.mubr.bf16.gmra.mrb[60].mxu1 %v1771_v16 }
 0x119   : > { %v800_v18 = vpop.f32.mrb[0].mxu0  ;;  %v928_v20 = vpop.f32.mrb[0].mxu1 }
 0x11a   : > { %v1062_v21 = vmul.f32 %v1974_v17, %v800_v18  ;;  %v1094_v22 = vmul.f32 %v1974_v17, %v928_v20  ;;  %v802_v23 = vpop.f32.mrb[1].mxu0  ;;  %v930_v24 = vpop.f32.mrb[1].mxu1  ;;  %v1201_v18 = vld [vmem:[%s1980_s14 + $0x20] sm:$0xff] }
 0x11b   : > { %v803_v27 = vpop.f32.mrb[2].mxu0  ;;  %v931_v28 = vpop.f32.mrb[2].mxu1  ;;  %v1233_v20 = vld [vmem:[%s1980_s14 + $0x120] sm:$0xff] }
 0x11c   : > { %v1133_v29 = vadd.f32 %v1985_v19, %v1062_v21  ;;  %v1165_v30 = vadd.f32 %v1985_v19, %v1094_v22  ;;  %v1063_v31 = vmul.f32 %v1974_v17, %v803_v27  ;;  %v1095_v32 = vmul.f32 %v1974_v17, %v931_v28  ;;  %v805_v33 = vpop.f32.mrb[3].mxu0  ;;  %v933_v34 = vpop.f32.mrb[3].mxu1 }
 0x11e   : > { %v1261_v37 = vadd.f32 %v1197_v25, %v1133_v29  ;;  %v1293_v38 = vadd.f32 %v1229_v26, %v1165_v30  ;;  %v1134_v39 = vadd.f32 %v1985_v19, %v1063_v31  ;;  %v1166_v40 = vadd.f32 %v1985_v19, %v1095_v32  ;;  %v1202_v29 = vld [vmem:[%s1980_s14 + $0x28] sm:$0xff] }
 0x11f   : > { %v1234_v30 = vld [vmem:[%s1980_s14 + $0x128] sm:$0xff] }
 0x120   : > { %v1325_v41 = vmax.f32 %v1261_v37, 0.0  ;;  %v1357_v42 = vmax.f32 %v1293_v38, 0.0  ;;  %v1262_v43 = vadd.f32 %v1198_v35, %v1134_v39  ;;  %v1294_v44 = vadd.f32 %v1230_v36, %v1166_v40 }
 0x121   : > { %v808_v45 = vpop.f32.mrb[4].mxu0  ;;  %v936_v46 = vpop.f32.mrb[4].mxu1 }
 0x122   : > { %1390 = vst.msk [vmem:[%s2003_s19] sm:$0xff] %vm1389_vm0, %v1325_v41  ;;  %1422 = vst.msk [vmem:[%s2003_s19 + $0x100] sm:$0xff] %vm1389_vm0, %v1357_v42  ;;  %v1326_v47 = vmax.f32 %v1262_v43, 0.0  ;;  %v1358_v48 = vmax.f32 %v1294_v44, 0.0  ;;  %v1064_v49 = vmul.f32 %v1974_v17, %v808_v45  ;;  %v1096_v50 = vmul.f32 %v1974_v17, %v936_v46  ;;  %v810_v51 = vpop.f32.mrb[5].mxu0  ;;  %v938_v52 = vpop.f32.mrb[5].mxu1 }
 0x123   : > { %v811_v55 = vpop.f32.mrb[6].mxu0  ;;  %v939_v56 = vpop.f32.mrb[6].mxu1 }
 0x124   : > { %1391 = vst.msk [vmem:[%s2003_s19 + $0x8] sm:$0xff] %vm1389_vm0, %v1326_v47  ;;  %1423 = vst.msk [vmem:[%s2003_s19 + $0x108] sm:$0xff] %vm1389_vm0, %v1358_v48  ;;  %v1135_v57 = vadd.f32 %v1985_v19, %v1064_v49  ;;  %v1167_v58 = vadd.f32 %v1985_v19, %v1096_v50  ;;  %v1065_v59 = vmul.f32 %v1974_v17, %v811_v55  ;;  %v813_v61 = vpop.f32.mrb[7].mxu0  ;;  %v941_v62 = vpop.f32.mrb[7].mxu1  ;;  %v1203_v47 = vld [vmem:[%s1980_s14 + $0x30] sm:$0xff] }
 0x125   : > { %v1097_v60 = vmul.f32 %v1974_v17, %v939_v56  ;;  %v1235_v48 = vld [vmem:[%s1980_s14 + $0x130] sm:$0xff] }
 0x126   : > { %v1263_v1 = vadd.f32 %v1199_v53, %v1135_v57  ;;  %v1295_v2 = vadd.f32 %v1231_v54, %v1167_v58  ;;  %v1136_v3 = vadd.f32 %v1985_v19, %v1065_v59  ;;  %v1204_v57 = vld [vmem:[%s1980_s14 + $0x38] sm:$0xff] }
 0x127   : > { %v1168_v4 = vadd.f32 %v1985_v19, %v1097_v60  ;;  %v1236_v58 = vld [vmem:[%s1980_s14 + $0x138] sm:$0xff] }
 0x128   : > { %v1327_v5 = vmax.f32 %v1263_v1, 0.0  ;;  %v1359_v6 = vmax.f32 %v1295_v2, 0.0  ;;  %v1264_v7 = vadd.f32 %v1200_v63, %v1136_v3 }
 0x129   : > { %v1296_v8 = vadd.f32 %v1232_v0, %v1168_v4  ;;  %v816_v9 = vpop.f32.mrb[8].mxu0  ;;  %v944_v10 = vpop.f32.mrb[8].mxu1 }
 0x12a   : > { %1392 = vst.msk [vmem:[%s2003_s19 + $0x10] sm:$0xff] %vm1389_vm0, %v1327_v5  ;;  %1424 = vst.msk [vmem:[%s2003_s19 + $0x110] sm:$0xff] %vm1389_vm0, %v1359_v6  ;;  %v1328_v11 = vmax.f32 %v1264_v7, 0.0  ;;  %v1066_v13 = vmul.f32 %v1974_v17, %v816_v9  ;;  %v1098_v14 = vmul.f32 %v1974_v17, %v944_v10  ;;  %v818_v15 = vpop.f32.mrb[9].mxu0  ;;  %v946_v16 = vpop.f32.mrb[9].mxu1 }
 0x12b   : > { %v1360_v12 = vmax.f32 %v1296_v8, 0.0  ;;  %v819_v21 = vpop.f32.mrb[10].mxu0  ;;  %v947_v22 = vpop.f32.mrb[10].mxu1 }
 0x12c   : > { %1393 = vst.msk [vmem:[%s2003_s19 + $0x18] sm:$0xff] %vm1389_vm0, %v1328_v11  ;;  %v1137_v23 = vadd.f32 %v1985_v19, %v1066_v13  ;;  %v1169_v24 = vadd.f32 %v1985_v19, %v1098_v14  ;;  %v1067_v25 = vmul.f32 %v1974_v17, %v819_v21  ;;  %v1099_v26 = vmul.f32 %v1974_v17, %v947_v22  ;;  %v821_v27 = vpop.f32.mrb[11].mxu0  ;;  %v949_v28 = vpop.f32.mrb[11].mxu1  ;;  %v1205_v11 = vld [vmem:[%s1980_s14 + $0x40] sm:$0xff] }
 0x12d   : > { %1425 = vst.msk [vmem:[%s2003_s19 + $0x118] sm:$0xff] %vm1389_vm0, %v1360_v12  ;;  %v1237_v12 = vld [vmem:[%s1980_s14 + $0x140] sm:$0xff] }
 0x12e   : > { %v1265_v31 = vadd.f32 %v1201_v18, %v1137_v23  ;;  %v1297_v32 = vadd.f32 %v1233_v20, %v1169_v24  ;;  %v1138_v33 = vadd.f32 %v1985_v19, %v1067_v25  ;;  %v1170_v34 = vadd.f32 %v1985_v19, %v1099_v26  ;;  %v1206_v23 = vld [vmem:[%s1980_s14 + $0x48] sm:$0xff] }
 0x12f   : > { %v1238_v24 = vld [vmem:[%s1980_s14 + $0x148] sm:$0xff] }
 0x130   : > { %v1329_v35 = vmax.f32 %v1265_v31, 0.0  ;;  %v1361_v36 = vmax.f32 %v1297_v32, 0.0  ;;  %v1266_v37 = vadd.f32 %v1202_v29, %v1138_v33  ;;  %v1298_v38 = vadd.f32 %v1234_v30, %v1170_v34 }
 0x131   : > { %v824_v39 = vpop.f32.mrb[12].mxu0  ;;  %v952_v40 = vpop.f32.mrb[12].mxu1 }
 0x132   : > { %1394 = vst.msk [vmem:[%s2003_s19 + $0x20] sm:$0xff] %vm1389_vm0, %v1329_v35  ;;  %1426 = vst.msk [vmem:[%s2003_s19 + $0x120] sm:$0xff] %vm1389_vm0, %v1361_v36  ;;  %v1330_v41 = vmax.f32 %v1266_v37, 0.0  ;;  %v1362_v42 = vmax.f32 %v1298_v38, 0.0  ;;  %v1068_v43 = vmul.f32 %v1974_v17, %v824_v39  ;;  %v1100_v44 = vmul.f32 %v1974_v17, %v952_v40  ;;  %v826_v45 = vpop.f32.mrb[13].mxu0  ;;  %v954_v46 = vpop.f32.mrb[13].mxu1 }
 0x133   : > { %v827_v49 = vpop.f32.mrb[14].mxu0  ;;  %v955_v50 = vpop.f32.mrb[14].mxu1 }
 0x134   : > { %1395 = vst.msk [vmem:[%s2003_s19 + $0x28] sm:$0xff] %vm1389_vm0, %v1330_v41  ;;  %1427 = vst.msk [vmem:[%s2003_s19 + $0x128] sm:$0xff] %vm1389_vm0, %v1362_v42  ;;  %v1139_v51 = vadd.f32 %v1985_v19, %v1068_v43  ;;  %v1171_v52 = vadd.f32 %v1985_v19, %v1100_v44  ;;  %v1069_v53 = vmul.f32 %v1974_v17, %v827_v49  ;;  %v829_v55 = vpop.f32.mrb[15].mxu0  ;;  %v957_v56 = vpop.f32.mrb[15].mxu1  ;;  %v1207_v41 = vld [vmem:[%s1980_s14 + $0x50] sm:$0xff] }
 0x135   : > { %v1101_v54 = vmul.f32 %v1974_v17, %v955_v50  ;;  %v1239_v42 = vld [vmem:[%s1980_s14 + $0x150] sm:$0xff] }
 0x136   : > { %v1267_v59 = vadd.f32 %v1203_v47, %v1139_v51  ;;  %v1299_v60 = vadd.f32 %v1235_v48, %v1171_v52  ;;  %v1140_v61 = vadd.f32 %v1985_v19, %v1069_v53  ;;  %v1208_v51 = vld [vmem:[%s1980_s14 + $0x58] sm:$0xff] }
 0x137   : > { %v1172_v62 = vadd.f32 %v1985_v19, %v1101_v54  ;;  %v1240_v52 = vld [vmem:[%s1980_s14 + $0x158] sm:$0xff] }
 0x138   : > { %v1331_v63 = vmax.f32 %v1267_v59, 0.0  ;;  %v1363_v0 = vmax.f32 %v1299_v60, 0.0  ;;  %v1268_v1 = vadd.f32 %v1204_v57, %v1140_v61 }
 0x139   : > { %v1300_v2 = vadd.f32 %v1236_v58, %v1172_v62  ;;  %v832_v3 = vpop.f32.mrb[16].mxu0  ;;  %v960_v4 = vpop.f32.mrb[16].mxu1 }
 0x13a   : > { %1396 = vst.msk [vmem:[%s2003_s19 + $0x30] sm:$0xff] %vm1389_vm0, %v1331_v63  ;;  %1428 = vst.msk [vmem:[%s2003_s19 + $0x130] sm:$0xff] %vm1389_vm0, %v1363_v0  ;;  %v1332_v5 = vmax.f32 %v1268_v1, 0.0  ;;  %v1070_v7 = vmul.f32 %v1974_v17, %v832_v3  ;;  %v1102_v8 = vmul.f32 %v1974_v17, %v960_v4  ;;  %v834_v9 = vpop.f32.mrb[17].mxu0  ;;  %v962_v10 = vpop.f32.mrb[17].mxu1 }
 0x13b   : > { %v1364_v6 = vmax.f32 %v1300_v2, 0.0  ;;  %v835_v13 = vpop.f32.mrb[18].mxu0  ;;  %v963_v14 = vpop.f32.mrb[18].mxu1 }
 0x13c   : > { %1397 = vst.msk [vmem:[%s2003_s19 + $0x38] sm:$0xff] %vm1389_vm0, %v1332_v5  ;;  %v1141_v15 = vadd.f32 %v1985_v19, %v1070_v7  ;;  %v1173_v16 = vadd.f32 %v1985_v19, %v1102_v8  ;;  %v1071_v18 = vmul.f32 %v1974_v17, %v835_v13  ;;  %v1103_v20 = vmul.f32 %v1974_v17, %v963_v14  ;;  %v837_v21 = vpop.f32.mrb[19].mxu0  ;;  %v965_v22 = vpop.f32.mrb[19].mxu1  ;;  %v1209_v5 = vld [vmem:[%s1980_s14 + $0x60] sm:$0xff] }
 0x13d   : > { %1429 = vst.msk [vmem:[%s2003_s19 + $0x138] sm:$0xff] %vm1389_vm0, %v1364_v6  ;;  %v1241_v6 = vld [vmem:[%s1980_s14 + $0x160] sm:$0xff] }
 0x13e   : > { %v1269_v25 = vadd.f32 %v1205_v11, %v1141_v15  ;;  %v1301_v26 = vadd.f32 %v1237_v12, %v1173_v16  ;;  %v1142_v27 = vadd.f32 %v1985_v19, %v1071_v18  ;;  %v1174_v28 = vadd.f32 %v1985_v19, %v1103_v20  ;;  %v1210_v15 = vld [vmem:[%s1980_s14 + $0x68] sm:$0xff] }
 0x13f   : > { %v1242_v16 = vld [vmem:[%s1980_s14 + $0x168] sm:$0xff] }
 0x140   : > { %v1333_v29 = vmax.f32 %v1269_v25, 0.0  ;;  %v1365_v30 = vmax.f32 %v1301_v26, 0.0  ;;  %v1270_v31 = vadd.f32 %v1206_v23, %v1142_v27  ;;  %v1302_v32 = vadd.f32 %v1238_v24, %v1174_v28 }
 0x141   : > { %v840_v33 = vpop.f32.mrb[20].mxu0  ;;  %v968_v34 = vpop.f32.mrb[20].mxu1 }
 0x142   : > { %1398 = vst.msk [vmem:[%s2003_s19 + $0x40] sm:$0xff] %vm1389_vm0, %v1333_v29  ;;  %1430 = vst.msk [vmem:[%s2003_s19 + $0x140] sm:$0xff] %vm1389_vm0, %v1365_v30  ;;  %v1334_v35 = vmax.f32 %v1270_v31, 0.0  ;;  %v1366_v36 = vmax.f32 %v1302_v32, 0.0  ;;  %v1072_v37 = vmul.f32 %v1974_v17, %v840_v33  ;;  %v1104_v38 = vmul.f32 %v1974_v17, %v968_v34  ;;  %v842_v39 = vpop.f32.mrb[21].mxu0  ;;  %v970_v40 = vpop.f32.mrb[21].mxu1 }
 0x143   : > { %v843_v43 = vpop.f32.mrb[22].mxu0  ;;  %v971_v44 = vpop.f32.mrb[22].mxu1 }
 0x144   : > { %1399 = vst.msk [vmem:[%s2003_s19 + $0x48] sm:$0xff] %vm1389_vm0, %v1334_v35  ;;  %1431 = vst.msk [vmem:[%s2003_s19 + $0x148] sm:$0xff] %vm1389_vm0, %v1366_v36  ;;  %v1143_v45 = vadd.f32 %v1985_v19, %v1072_v37  ;;  %v1175_v46 = vadd.f32 %v1985_v19, %v1104_v38  ;;  %v1073_v47 = vmul.f32 %v1974_v17, %v843_v43  ;;  %v845_v49 = vpop.f32.mrb[23].mxu0  ;;  %v973_v50 = vpop.f32.mrb[23].mxu1  ;;  %v1211_v35 = vld [vmem:[%s1980_s14 + $0x70] sm:$0xff] }
 0x145   : > { %v1105_v48 = vmul.f32 %v1974_v17, %v971_v44  ;;  %v1243_v36 = vld [vmem:[%s1980_s14 + $0x170] sm:$0xff] }
 0x146   : > { %v1271_v53 = vadd.f32 %v1207_v41, %v1143_v45  ;;  %v1303_v54 = vadd.f32 %v1239_v42, %v1175_v46  ;;  %v1144_v55 = vadd.f32 %v1985_v19, %v1073_v47  ;;  %v1212_v45 = vld [vmem:[%s1980_s14 + $0x78] sm:$0xff] }
 0x147   : > { %v1176_v56 = vadd.f32 %v1985_v19, %v1105_v48  ;;  %v1244_v46 = vld [vmem:[%s1980_s14 + $0x178] sm:$0xff] }
 0x148   : > { %v1335_v57 = vmax.f32 %v1271_v53, 0.0  ;;  %v1367_v58 = vmax.f32 %v1303_v54, 0.0  ;;  %v1272_v59 = vadd.f32 %v1208_v51, %v1144_v55 }
 0x149   : > { %v1304_v60 = vadd.f32 %v1240_v52, %v1176_v56  ;;  %v848_v61 = vpop.f32.mrb[24].mxu0  ;;  %v976_v62 = vpop.f32.mrb[24].mxu1 }
 0x14a   : > { %1400 = vst.msk [vmem:[%s2003_s19 + $0x50] sm:$0xff] %vm1389_vm0, %v1335_v57  ;;  %1432 = vst.msk [vmem:[%s2003_s19 + $0x150] sm:$0xff] %vm1389_vm0, %v1367_v58  ;;  %v1336_v63 = vmax.f32 %v1272_v59, 0.0  ;;  %v1074_v1 = vmul.f32 %v1974_v17, %v848_v61  ;;  %v1106_v2 = vmul.f32 %v1974_v17, %v976_v62  ;;  %v850_v3 = vpop.f32.mrb[25].mxu0  ;;  %v978_v4 = vpop.f32.mrb[25].mxu1 }
 0x14b   : > { %v1368_v0 = vmax.f32 %v1304_v60, 0.0  ;;  %v851_v7 = vpop.f32.mrb[26].mxu0  ;;  %v979_v8 = vpop.f32.mrb[26].mxu1 }
 0x14c   : > { %1401 = vst.msk [vmem:[%s2003_s19 + $0x58] sm:$0xff] %vm1389_vm0, %v1336_v63  ;;  %v1145_v9 = vadd.f32 %v1985_v19, %v1074_v1  ;;  %v1177_v10 = vadd.f32 %v1985_v19, %v1106_v2  ;;  %v1075_v11 = vmul.f32 %v1974_v17, %v851_v7  ;;  %v1107_v12 = vmul.f32 %v1974_v17, %v979_v8  ;;  %v853_v13 = vpop.f32.mrb[27].mxu0  ;;  %v981_v14 = vpop.f32.mrb[27].mxu1  ;;  %v1213_v63 = vld [vmem:[%s1980_s14 + $0x80] sm:$0xff] }
 0x14d   : > { %1433 = vst.msk [vmem:[%s2003_s19 + $0x158] sm:$0xff] %vm1389_vm0, %v1368_v0  ;;  %v1245_v0 = vld [vmem:[%s1980_s14 + $0x180] sm:$0xff] }
 0x14e   : > { %v1273_v18 = vadd.f32 %v1209_v5, %v1145_v9  ;;  %v1305_v20 = vadd.f32 %v1241_v6, %v1177_v10  ;;  %v1146_v21 = vadd.f32 %v1985_v19, %v1075_v11  ;;  %v1178_v22 = vadd.f32 %v1985_v19, %v1107_v12  ;;  %v1214_v9 = vld [vmem:[%s1980_s14 + $0x88] sm:$0xff] }
 0x14f   : > { %v1246_v10 = vld [vmem:[%s1980_s14 + $0x188] sm:$0xff] }
 0x150   : > { %v1337_v23 = vmax.f32 %v1273_v18, 0.0  ;;  %v1369_v24 = vmax.f32 %v1305_v20, 0.0  ;;  %v1274_v25 = vadd.f32 %v1210_v15, %v1146_v21  ;;  %v1306_v26 = vadd.f32 %v1242_v16, %v1178_v22 }
 0x151   : > { %v856_v27 = vpop.f32.mrb[28].mxu0  ;;  %v984_v28 = vpop.f32.mrb[28].mxu1 }
 0x152   : > { %1402 = vst.msk [vmem:[%s2003_s19 + $0x60] sm:$0xff] %vm1389_vm0, %v1337_v23  ;;  %1434 = vst.msk [vmem:[%s2003_s19 + $0x160] sm:$0xff] %vm1389_vm0, %v1369_v24  ;;  %v1338_v29 = vmax.f32 %v1274_v25, 0.0  ;;  %v1370_v30 = vmax.f32 %v1306_v26, 0.0  ;;  %v1076_v31 = vmul.f32 %v1974_v17, %v856_v27  ;;  %v1108_v32 = vmul.f32 %v1974_v17, %v984_v28  ;;  %v858_v33 = vpop.f32.mrb[29].mxu0  ;;  %v986_v34 = vpop.f32.mrb[29].mxu1 }
 0x153   : > { %v859_v37 = vpop.f32.mrb[30].mxu0  ;;  %v987_v38 = vpop.f32.mrb[30].mxu1 }
 0x154   : > { %1403 = vst.msk [vmem:[%s2003_s19 + $0x68] sm:$0xff] %vm1389_vm0, %v1338_v29  ;;  %1435 = vst.msk [vmem:[%s2003_s19 + $0x168] sm:$0xff] %vm1389_vm0, %v1370_v30  ;;  %v1147_v39 = vadd.f32 %v1985_v19, %v1076_v31  ;;  %v1179_v40 = vadd.f32 %v1985_v19, %v1108_v32  ;;  %v1077_v41 = vmul.f32 %v1974_v17, %v859_v37  ;;  %v861_v43 = vpop.f32.mrb[31].mxu0  ;;  %v989_v44 = vpop.f32.mrb[31].mxu1  ;;  %v1215_v29 = vld [vmem:[%s1980_s14 + $0x90] sm:$0xff] }
 0x155   : > { %v1109_v42 = vmul.f32 %v1974_v17, %v987_v38  ;;  %v1247_v30 = vld [vmem:[%s1980_s14 + $0x190] sm:$0xff] }
 0x156   : > { %v1275_v47 = vadd.f32 %v1211_v35, %v1147_v39  ;;  %v1307_v48 = vadd.f32 %v1243_v36, %v1179_v40  ;;  %v1148_v49 = vadd.f32 %v1985_v19, %v1077_v41  ;;  %v1216_v39 = vld [vmem:[%s1980_s14 + $0x98] sm:$0xff] }
 0x157   : > { %v1180_v50 = vadd.f32 %v1985_v19, %v1109_v42  ;;  %v1248_v40 = vld [vmem:[%s1980_s14 + $0x198] sm:$0xff] }
 0x158   : > { %v1339_v51 = vmax.f32 %v1275_v47, 0.0  ;;  %v1371_v52 = vmax.f32 %v1307_v48, 0.0  ;;  %v1276_v53 = vadd.f32 %v1212_v45, %v1148_v49 }
 0x159   : > { %v1308_v54 = vadd.f32 %v1244_v46, %v1180_v50  ;;  %v864_v55 = vpop.f32.mrb[32].mxu0  ;;  %v992_v56 = vpop.f32.mrb[32].mxu1 }
 0x15a   : > { %1404 = vst.msk [vmem:[%s2003_s19 + $0x70] sm:$0xff] %vm1389_vm0, %v1339_v51  ;;  %1436 = vst.msk [vmem:[%s2003_s19 + $0x170] sm:$0xff] %vm1389_vm0, %v1371_v52  ;;  %v1340_v57 = vmax.f32 %v1276_v53, 0.0  ;;  %v1078_v59 = vmul.f32 %v1974_v17, %v864_v55  ;;  %v1110_v60 = vmul.f32 %v1974_v17, %v992_v56  ;;  %v866_v61 = vpop.f32.mrb[33].mxu0  ;;  %v994_v62 = vpop.f32.mrb[33].mxu1 }
 0x15b   : > { %v1372_v58 = vmax.f32 %v1308_v54, 0.0  ;;  %v867_v1 = vpop.f32.mrb[34].mxu0  ;;  %v995_v2 = vpop.f32.mrb[34].mxu1 }
 0x15c   : > { %1405 = vst.msk [vmem:[%s2003_s19 + $0x78] sm:$0xff] %vm1389_vm0, %v1340_v57  ;;  %v1149_v3 = vadd.f32 %v1985_v19, %v1078_v59  ;;  %v1181_v4 = vadd.f32 %v1985_v19, %v1110_v60  ;;  %v1079_v5 = vmul.f32 %v1974_v17, %v867_v1  ;;  %v1111_v6 = vmul.f32 %v1974_v17, %v995_v2  ;;  %v869_v7 = vpop.f32.mrb[35].mxu0  ;;  %v997_v8 = vpop.f32.mrb[35].mxu1  ;;  %v1217_v57 = vld [vmem:[%s1980_s14 + $0xa0] sm:$0xff] }
 0x15d   : > { %1437 = vst.msk [vmem:[%s2003_s19 + $0x178] sm:$0xff] %vm1389_vm0, %v1372_v58  ;;  %v1249_v58 = vld [vmem:[%s1980_s14 + $0x1a0] sm:$0xff] }
 0x15e   : > { %v1277_v11 = vadd.f32 %v1213_v63, %v1149_v3  ;;  %v1309_v12 = vadd.f32 %v1245_v0, %v1181_v4  ;;  %v1150_v13 = vadd.f32 %v1985_v19, %v1079_v5  ;;  %v1182_v14 = vadd.f32 %v1985_v19, %v1111_v6  ;;  %v1218_v3 = vld [vmem:[%s1980_s14 + $0xa8] sm:$0xff] }
 0x15f   : > { %v1250_v4 = vld [vmem:[%s1980_s14 + $0x1a8] sm:$0xff] }
 0x160   : > { %v1341_v15 = vmax.f32 %v1277_v11, 0.0  ;;  %v1373_v16 = vmax.f32 %v1309_v12, 0.0  ;;  %v1278_v18 = vadd.f32 %v1214_v9, %v1150_v13  ;;  %v1310_v20 = vadd.f32 %v1246_v10, %v1182_v14 }
 0x161   : > { %v872_v21 = vpop.f32.mrb[36].mxu0  ;;  %v1000_v22 = vpop.f32.mrb[36].mxu1 }
 0x162   : > { %1406 = vst.msk [vmem:[%s2003_s19 + $0x80] sm:$0xff] %vm1389_vm0, %v1341_v15  ;;  %1438 = vst.msk [vmem:[%s2003_s19 + $0x180] sm:$0xff] %vm1389_vm0, %v1373_v16  ;;  %v1342_v23 = vmax.f32 %v1278_v18, 0.0  ;;  %v1374_v24 = vmax.f32 %v1310_v20, 0.0  ;;  %v1080_v25 = vmul.f32 %v1974_v17, %v872_v21  ;;  %v1112_v26 = vmul.f32 %v1974_v17, %v1000_v22  ;;  %v874_v27 = vpop.f32.mrb[37].mxu0  ;;  %v1002_v28 = vpop.f32.mrb[37].mxu1 }
 0x163   : > { %v875_v31 = vpop.f32.mrb[38].mxu0  ;;  %v1003_v32 = vpop.f32.mrb[38].mxu1 }
 0x164   : > { %1407 = vst.msk [vmem:[%s2003_s19 + $0x88] sm:$0xff] %vm1389_vm0, %v1342_v23  ;;  %1439 = vst.msk [vmem:[%s2003_s19 + $0x188] sm:$0xff] %vm1389_vm0, %v1374_v24  ;;  %v1151_v33 = vadd.f32 %v1985_v19, %v1080_v25  ;;  %v1183_v34 = vadd.f32 %v1985_v19, %v1112_v26  ;;  %v1081_v35 = vmul.f32 %v1974_v17, %v875_v31  ;;  %v877_v37 = vpop.f32.mrb[39].mxu0  ;;  %v1005_v38 = vpop.f32.mrb[39].mxu1  ;;  %v1219_v23 = vld [vmem:[%s1980_s14 + $0xb0] sm:$0xff] }
 0x165   : > { %v1113_v36 = vmul.f32 %v1974_v17, %v1003_v32  ;;  %v1251_v24 = vld [vmem:[%s1980_s14 + $0x1b0] sm:$0xff] }
 0x166   : > { %v1279_v41 = vadd.f32 %v1215_v29, %v1151_v33  ;;  %v1311_v42 = vadd.f32 %v1247_v30, %v1183_v34  ;;  %v1152_v43 = vadd.f32 %v1985_v19, %v1081_v35  ;;  %v1220_v33 = vld [vmem:[%s1980_s14 + $0xb8] sm:$0xff] }
 0x167   : > { %v1184_v44 = vadd.f32 %v1985_v19, %v1113_v36  ;;  %v1252_v34 = vld [vmem:[%s1980_s14 + $0x1b8] sm:$0xff] }
 0x168   : > { %v1343_v45 = vmax.f32 %v1279_v41, 0.0  ;;  %v1375_v46 = vmax.f32 %v1311_v42, 0.0  ;;  %v1280_v47 = vadd.f32 %v1216_v39, %v1152_v43 }
 0x169   : > { %v1312_v48 = vadd.f32 %v1248_v40, %v1184_v44  ;;  %v880_v49 = vpop.f32.mrb[40].mxu0  ;;  %v1008_v50 = vpop.f32.mrb[40].mxu1 }
 0x16a   : > { %1408 = vst.msk [vmem:[%s2003_s19 + $0x90] sm:$0xff] %vm1389_vm0, %v1343_v45  ;;  %1440 = vst.msk [vmem:[%s2003_s19 + $0x190] sm:$0xff] %vm1389_vm0, %v1375_v46  ;;  %v1344_v51 = vmax.f32 %v1280_v47, 0.0  ;;  %v1082_v53 = vmul.f32 %v1974_v17, %v880_v49  ;;  %v1114_v54 = vmul.f32 %v1974_v17, %v1008_v50  ;;  %v882_v55 = vpop.f32.mrb[41].mxu0  ;;  %v1010_v56 = vpop.f32.mrb[41].mxu1 }
 0x16b   : > { %v1376_v52 = vmax.f32 %v1312_v48, 0.0  ;;  %v883_v59 = vpop.f32.mrb[42].mxu0  ;;  %v1011_v60 = vpop.f32.mrb[42].mxu1 }
 0x16c   : > { %1409 = vst.msk [vmem:[%s2003_s19 + $0x98] sm:$0xff] %vm1389_vm0, %v1344_v51  ;;  %v1153_v61 = vadd.f32 %v1985_v19, %v1082_v53  ;;  %v1185_v62 = vadd.f32 %v1985_v19, %v1114_v54  ;;  %v1083_v63 = vmul.f32 %v1974_v17, %v883_v59  ;;  %v1115_v0 = vmul.f32 %v1974_v17, %v1011_v60  ;;  %v885_v1 = vpop.f32.mrb[43].mxu0  ;;  %v1013_v2 = vpop.f32.mrb[43].mxu1  ;;  %v1221_v51 = vld [vmem:[%s1980_s14 + $0xc0] sm:$0xff] }
 0x16d   : > { %1441 = vst.msk [vmem:[%s2003_s19 + $0x198] sm:$0xff] %vm1389_vm0, %v1376_v52  ;;  %v1253_v52 = vld [vmem:[%s1980_s14 + $0x1c0] sm:$0xff] }
 0x16e   : > { %v1281_v5 = vadd.f32 %v1217_v57, %v1153_v61  ;;  %v1313_v6 = vadd.f32 %v1249_v58, %v1185_v62  ;;  %v1154_v7 = vadd.f32 %v1985_v19, %v1083_v63  ;;  %v1186_v8 = vadd.f32 %v1985_v19, %v1115_v0  ;;  %v1222_v61 = vld [vmem:[%s1980_s14 + $0xc8] sm:$0xff] }
 0x16f   : > { %v1254_v62 = vld [vmem:[%s1980_s14 + $0x1c8] sm:$0xff] }
 0x170   : > { %v1345_v9 = vmax.f32 %v1281_v5, 0.0  ;;  %v1377_v10 = vmax.f32 %v1313_v6, 0.0  ;;  %v1282_v11 = vadd.f32 %v1218_v3, %v1154_v7  ;;  %v1314_v12 = vadd.f32 %v1250_v4, %v1186_v8 }
 0x171   : > { %v888_v13 = vpop.f32.mrb[44].mxu0  ;;  %v1016_v14 = vpop.f32.mrb[44].mxu1 }
 0x172   : > { %1410 = vst.msk [vmem:[%s2003_s19 + $0xa0] sm:$0xff] %vm1389_vm0, %v1345_v9  ;;  %1442 = vst.msk [vmem:[%s2003_s19 + $0x1a0] sm:$0xff] %vm1389_vm0, %v1377_v10  ;;  %v1346_v15 = vmax.f32 %v1282_v11, 0.0  ;;  %v1378_v16 = vmax.f32 %v1314_v12, 0.0  ;;  %v1084_v18 = vmul.f32 %v1974_v17, %v888_v13  ;;  %v1116_v20 = vmul.f32 %v1974_v17, %v1016_v14  ;;  %v890_v21 = vpop.f32.mrb[45].mxu0  ;;  %v1018_v22 = vpop.f32.mrb[45].mxu1 }
 0x173   : > { %v891_v25 = vpop.f32.mrb[46].mxu0  ;;  %v1019_v26 = vpop.f32.mrb[46].mxu1 }
 0x174   : > { %1411 = vst.msk [vmem:[%s2003_s19 + $0xa8] sm:$0xff] %vm1389_vm0, %v1346_v15  ;;  %1443 = vst.msk [vmem:[%s2003_s19 + $0x1a8] sm:$0xff] %vm1389_vm0, %v1378_v16  ;;  %v1155_v27 = vadd.f32 %v1985_v19, %v1084_v18  ;;  %v1187_v28 = vadd.f32 %v1985_v19, %v1116_v20  ;;  %v1085_v29 = vmul.f32 %v1974_v17, %v891_v25  ;;  %v893_v31 = vpop.f32.mrb[47].mxu0  ;;  %v1021_v32 = vpop.f32.mrb[47].mxu1  ;;  %v1223_v15 = vld [vmem:[%s1980_s14 + $0xd0] sm:$0xff] }
 0x175   : > { %v1117_v30 = vmul.f32 %v1974_v17, %v1019_v26  ;;  %v1255_v16 = vld [vmem:[%s1980_s14 + $0x1d0] sm:$0xff] }
 0x176   : > { %v1283_v35 = vadd.f32 %v1219_v23, %v1155_v27  ;;  %v1315_v36 = vadd.f32 %v1251_v24, %v1187_v28  ;;  %v1156_v37 = vadd.f32 %v1985_v19, %v1085_v29  ;;  %v1224_v27 = vld [vmem:[%s1980_s14 + $0xd8] sm:$0xff] }
 0x177   : > { %v1188_v38 = vadd.f32 %v1985_v19, %v1117_v30  ;;  %v1256_v28 = vld [vmem:[%s1980_s14 + $0x1d8] sm:$0xff] }
 0x178   : > { %v1347_v39 = vmax.f32 %v1283_v35, 0.0  ;;  %v1379_v40 = vmax.f32 %v1315_v36, 0.0  ;;  %v1284_v41 = vadd.f32 %v1220_v33, %v1156_v37 }
 0x179   : > { %v1316_v42 = vadd.f32 %v1252_v34, %v1188_v38  ;;  %v896_v43 = vpop.f32.mrb[48].mxu0  ;;  %v1024_v44 = vpop.f32.mrb[48].mxu1 }
 0x17a   : > { %1412 = vst.msk [vmem:[%s2003_s19 + $0xb0] sm:$0xff] %vm1389_vm0, %v1347_v39  ;;  %1444 = vst.msk [vmem:[%s2003_s19 + $0x1b0] sm:$0xff] %vm1389_vm0, %v1379_v40  ;;  %v1348_v45 = vmax.f32 %v1284_v41, 0.0  ;;  %v1086_v47 = vmul.f32 %v1974_v17, %v896_v43  ;;  %v1118_v48 = vmul.f32 %v1974_v17, %v1024_v44  ;;  %v898_v49 = vpop.f32.mrb[49].mxu0  ;;  %v1026_v50 = vpop.f32.mrb[49].mxu1 }
 0x17b   : > { %v1380_v46 = vmax.f32 %v1316_v42, 0.0  ;;  %v899_v53 = vpop.f32.mrb[50].mxu0  ;;  %v1027_v54 = vpop.f32.mrb[50].mxu1 }
 0x17c   : > { %1413 = vst.msk [vmem:[%s2003_s19 + $0xb8] sm:$0xff] %vm1389_vm0, %v1348_v45  ;;  %v1157_v55 = vadd.f32 %v1985_v19, %v1086_v47  ;;  %v1189_v56 = vadd.f32 %v1985_v19, %v1118_v48  ;;  %v1087_v57 = vmul.f32 %v1974_v17, %v899_v53  ;;  %v1119_v58 = vmul.f32 %v1974_v17, %v1027_v54  ;;  %v901_v59 = vpop.f32.mrb[51].mxu0  ;;  %v1029_v60 = vpop.f32.mrb[51].mxu1  ;;  %v1225_v45 = vld [vmem:[%s1980_s14 + $0xe0] sm:$0xff] }
 0x17d   : > { %1445 = vst.msk [vmem:[%s2003_s19 + $0x1b8] sm:$0xff] %vm1389_vm0, %v1380_v46  ;;  %v1257_v46 = vld [vmem:[%s1980_s14 + $0x1e0] sm:$0xff] }
 0x17e   : > { %v1285_v63 = vadd.f32 %v1221_v51, %v1157_v55  ;;  %v1317_v0 = vadd.f32 %v1253_v52, %v1189_v56  ;;  %v1158_v1 = vadd.f32 %v1985_v19, %v1087_v57  ;;  %v1190_v2 = vadd.f32 %v1985_v19, %v1119_v58  ;;  %v1226_v55 = vld [vmem:[%s1980_s14 + $0xe8] sm:$0xff] }
 0x17f   : > { %v1258_v56 = vld [vmem:[%s1980_s14 + $0x1e8] sm:$0xff] }
 0x180   : > { %v1349_v3 = vmax.f32 %v1285_v63, 0.0  ;;  %v1381_v4 = vmax.f32 %v1317_v0, 0.0  ;;  %v1286_v5 = vadd.f32 %v1222_v61, %v1158_v1  ;;  %v1318_v6 = vadd.f32 %v1254_v62, %v1190_v2 }
 0x181   : > { %v904_v7 = vpop.f32.mrb[52].mxu0  ;;  %v1032_v8 = vpop.f32.mrb[52].mxu1 }
 0x182   : > { %1414 = vst.msk [vmem:[%s2003_s19 + $0xc0] sm:$0xff] %vm1389_vm0, %v1349_v3  ;;  %1446 = vst.msk [vmem:[%s2003_s19 + $0x1c0] sm:$0xff] %vm1389_vm0, %v1381_v4  ;;  %v1350_v9 = vmax.f32 %v1286_v5, 0.0  ;;  %v1382_v10 = vmax.f32 %v1318_v6, 0.0  ;;  %v1088_v11 = vmul.f32 %v1974_v17, %v904_v7  ;;  %v1120_v12 = vmul.f32 %v1974_v17, %v1032_v8  ;;  %v906_v13 = vpop.f32.mrb[53].mxu0  ;;  %v1034_v14 = vpop.f32.mrb[53].mxu1 }
 0x183   : > { %v907_v18 = vpop.f32.mrb[54].mxu0  ;;  %v1035_v20 = vpop.f32.mrb[54].mxu1 }
 0x184   : > { %1415 = vst.msk [vmem:[%s2003_s19 + $0xc8] sm:$0xff] %vm1389_vm0, %v1350_v9  ;;  %1447 = vst.msk [vmem:[%s2003_s19 + $0x1c8] sm:$0xff] %vm1389_vm0, %v1382_v10  ;;  %v1159_v21 = vadd.f32 %v1985_v19, %v1088_v11  ;;  %v1191_v22 = vadd.f32 %v1985_v19, %v1120_v12  ;;  %v1089_v23 = vmul.f32 %v1974_v17, %v907_v18  ;;  %v909_v25 = vpop.f32.mrb[55].mxu0  ;;  %v1037_v26 = vpop.f32.mrb[55].mxu1  ;;  %v1227_v9 = vld [vmem:[%s1980_s14 + $0xf0] sm:$0xff] }
 0x185   : > { %v1121_v24 = vmul.f32 %v1974_v17, %v1035_v20  ;;  %v1259_v10 = vld [vmem:[%s1980_s14 + $0x1f0] sm:$0xff] }
 0x186   : > { %v1287_v29 = vadd.f32 %v1223_v15, %v1159_v21  ;;  %v1319_v30 = vadd.f32 %v1255_v16, %v1191_v22  ;;  %v1160_v31 = vadd.f32 %v1985_v19, %v1089_v23  ;;  %v1228_v21 = vld [vmem:[%s1980_s14 + $0xf8] sm:$0xff] }
 0x187   : > { %v1192_v32 = vadd.f32 %v1985_v19, %v1121_v24  ;;  %v1260_v22 = vld [vmem:[%s1980_s14 + $0x1f8] sm:$0xff] }
 0x188   : > { %v1351_v33 = vmax.f32 %v1287_v29, 0.0  ;;  %v1383_v34 = vmax.f32 %v1319_v30, 0.0  ;;  %v1288_v35 = vadd.f32 %v1224_v27, %v1160_v31 }
 0x189   : > { %v1320_v36 = vadd.f32 %v1256_v28, %v1192_v32  ;;  %v912_v37 = vpop.f32.mrb[56].mxu0  ;;  %v1040_v38 = vpop.f32.mrb[56].mxu1 }
 0x18a   : > { %1416 = vst.msk [vmem:[%s2003_s19 + $0xd0] sm:$0xff] %vm1389_vm0, %v1351_v33  ;;  %1448 = vst.msk [vmem:[%s2003_s19 + $0x1d0] sm:$0xff] %vm1389_vm0, %v1383_v34  ;;  %v1352_v39 = vmax.f32 %v1288_v35, 0.0  ;;  %v1090_v41 = vmul.f32 %v1974_v17, %v912_v37  ;;  %v1122_v42 = vmul.f32 %v1974_v17, %v1040_v38  ;;  %v914_v43 = vpop.f32.mrb[57].mxu0  ;;  %v1042_v44 = vpop.f32.mrb[57].mxu1 }
 0x18b   : > { %v1384_v40 = vmax.f32 %v1320_v36, 0.0  ;;  %v915_v47 = vpop.f32.mrb[58].mxu0  ;;  %v1043_v48 = vpop.f32.mrb[58].mxu1 }
 0x18c   : > { %1417 = vst.msk [vmem:[%s2003_s19 + $0xd8] sm:$0xff] %vm1389_vm0, %v1352_v39  ;;  %v1161_v49 = vadd.f32 %v1985_v19, %v1090_v41  ;;  %v1193_v50 = vadd.f32 %v1985_v19, %v1122_v42  ;;  %v1091_v51 = vmul.f32 %v1974_v17, %v915_v47  ;;  %v1123_v52 = vmul.f32 %v1974_v17, %v1043_v48  ;;  %v917_v53 = vpop.f32.mrb[59].mxu0  ;;  %v1045_v54 = vpop.f32.mrb[59].mxu1 }
 0x18d   : > { %1449 = vst.msk [vmem:[%s2003_s19 + $0x1d8] sm:$0xff] %vm1389_vm0, %v1384_v40 }
 0x18e   : > { %v1289_v57 = vadd.f32 %v1225_v45, %v1161_v49  ;;  %v1321_v58 = vadd.f32 %v1257_v46, %v1193_v50  ;;  %v1162_v59 = vadd.f32 %v1985_v19, %v1091_v51  ;;  %v1194_v60 = vadd.f32 %v1985_v19, %v1123_v52 }
 0x190   : > { %v1353_v61 = vmax.f32 %v1289_v57, 0.0  ;;  %v1385_v62 = vmax.f32 %v1321_v58, 0.0  ;;  %v1290_v63 = vadd.f32 %v1226_v55, %v1162_v59  ;;  %v1322_v0 = vadd.f32 %v1258_v56, %v1194_v60 }
 0x191   : > { %v920_v1 = vpop.f32.mrb[60].mxu0  ;;  %v1048_v2 = vpop.f32.mrb[60].mxu1 }
 0x192   : > { %1418 = vst.msk [vmem:[%s2003_s19 + $0xe0] sm:$0xff] %vm1389_vm0, %v1353_v61  ;;  %1450 = vst.msk [vmem:[%s2003_s19 + $0x1e0] sm:$0xff] %vm1389_vm0, %v1385_v62  ;;  %v1354_v3 = vmax.f32 %v1290_v63, 0.0  ;;  %v1386_v4 = vmax.f32 %v1322_v0, 0.0  ;;  %v1092_v5 = vmul.f32 %v1974_v17, %v920_v1  ;;  %v1124_v6 = vmul.f32 %v1974_v17, %v1048_v2  ;;  %v922_v7 = vpop.f32.mrb[61].mxu0  ;;  %v1050_v8 = vpop.f32.mrb[61].mxu1 }
 0x193   : > { %v923_v11 = vpop.f32.mrb[62].mxu0  ;;  %v1051_v12 = vpop.f32.mrb[62].mxu1 }
 0x194   : > { %1419 = vst.msk [vmem:[%s2003_s19 + $0xe8] sm:$0xff] %vm1389_vm0, %v1354_v3  ;;  %1451 = vst.msk [vmem:[%s2003_s19 + $0x1e8] sm:$0xff] %vm1389_vm0, %v1386_v4  ;;  %v1163_v13 = vadd.f32 %v1985_v19, %v1092_v5  ;;  %v1195_v14 = vadd.f32 %v1985_v19, %v1124_v6  ;;  %v1093_v15 = vmul.f32 %v1974_v17, %v923_v11  ;;  %v925_v18 = vpop.f32.mrb[63].mxu0  ;;  %v1053_v20 = vpop.f32.mrb[63].mxu1 }
 0x195   : > { %v1125_v16 = vmul.f32 %v1974_v17, %v1051_v12 }
 0x196   : > { %v1291_v23 = vadd.f32 %v1227_v9, %v1163_v13  ;;  %v1323_v24 = vadd.f32 %v1259_v10, %v1195_v14  ;;  %v1164_v25 = vadd.f32 %v1985_v19, %v1093_v15 }
 0x197   : > { %v1196_v26 = vadd.f32 %v1985_v19, %v1125_v16 }
 0x198   : > { %v1355_v27 = vmax.f32 %v1291_v23, 0.0  ;;  %v1387_v28 = vmax.f32 %v1323_v24, 0.0  ;;  %v1292_v29 = vadd.f32 %v1228_v21, %v1164_v25 }
 0x199   : > { %v1324_v30 = vadd.f32 %v1260_v22, %v1196_v26 }
 0x19a   : > { %1420 = vst.msk [vmem:[%s2003_s19 + $0xf0] sm:$0xff] %vm1389_vm0, %v1355_v27  ;;  %1452 = vst.msk [vmem:[%s2003_s19 + $0x1f0] sm:$0xff] %vm1389_vm0, %v1387_v28  ;;  %v1356_v17 = vmax.f32 %v1292_v29, 0.0 }
 0x19b   : > { %v1388_v31 = vmax.f32 %v1324_v30, 0.0 }
 0x19c   : > { %1421 = vst.msk [vmem:[%s2003_s19 + $0xf8] sm:$0xff] %vm1389_vm0, %v1356_v17 }
 0x19d   : > { %1453 = vst.msk [vmem:[%s2003_s19 + $0x1f8] sm:$0xff] %vm1389_vm0, %v1388_v31 }
 0x19e PF: > { %s15_s18 = sadd.s32 1, %s1778_s18  }
 0x19f   : > { %p12_p4 = scmp.ge.s32.totalorder %s15_s18, 6  }
 0x1a1   :  { %14 = sbr.rel (!%p12_p4) target bundleno = 1 (0x1), region = 73 }

// kernel: resnet_forward.10
= control target key start
LH: loop header
LB: loop body
LE: loop exit
PB: predicated region body
PF: predicated region fallthrough
CT: control target
= control target key end

     0   :  { %s1255_s18 = smov 0   ;;  %s1571_s0 = inlined_call_operand.vmem [shape: bf16[512,256], index: 0, kind: input, shape index: {}]   ;;  %s1572_s1 = inlined_call_operand.vmem [shape: bf16[256,64], index: 1, kind: input, shape index: {}]   ;;  %s1573_s2 = inlined_call_operand.vmem [shape: f32[1,64], index: 2, kind: input, shape index: {}]   ;;  %s1574_s3 = inlined_call_operand.vmem [shape: f32[1,64], index: 3, kind: input, shape index: {}]   ;;  %s1575_s4 = inlined_call_operand.vmem [shape: f32[1,64], index: 4, kind: input, shape index: {}]   ;;  %s1576_s5 = inlined_call_operand.vmem [shape: f32[512,64], index: 5, kind: output, shape index: {}]  }
   0x1 LB: > { %s952_s19 = sadd.s32 4294967295, %s1222_s18   ;;  %p956_p0 = scmp.ge.s32.totalorder %s1222_s18, 1  ;;  %s1222_s18 = sphi %s1255_s18, %s15_s18  }
   0x2   : > { %p189_p1 = scmp.lt.s32.totalorder %s1222_s18, 3 }
   0x4   : > { %p190_p2 = pnand %p956_p0, %p189_p1 }
   0x5   : > { %v1152_v0 = vld [vmem:[%s1572_s1 + $0x40] sm:$0xff] (!%p190_p2)   ;;  %s957_s22 = sshll.u32 (!%p190_p2), %s952_s19, 5  ;;  %v1154_v2 = vld [vmem:[%s1572_s1 + $0x48] sm:$0xff] (!%p190_p2)   ;;  %v1156_v4 = vld [vmem:[%s1572_s1 + $0x50] sm:$0xff] (!%p190_p2)   ;;  %v826_v48 = vlaneseq (!%p190_p2)  ;;  %v1224_v54 = vmov (!%p190_p2), 0   ;;  %vm863_vm2 = vcmask (!%p190_p2), 523264  }
   0x6   : > { %193 = sbr.rel (%p190_p2) target bundleno = 319 (0x13f), region = 40  ;;  %v1153_v1 = vld [vmem:[%s1572_s1] sm:$0xff] (!%p190_p2)   ;;  %1015 = vmatprep.subr.bf16.mxu0 (!%p190_p2), %v1152_v0  ;;  %1127 = vmatprep.subr.bf16.mxu1 (!%p190_p2), %v1152_v0  ;;  %v1155_v3 = vld [vmem:[%s1572_s1 + $0x8] sm:$0xff] (!%p190_p2)   ;;  %p219_p3 = scmp.lt.s32.totalorder (!%p190_p2), %s957_s22, 63  ;;  %v1157_v5 = vld [vmem:[%s1572_s1 + $0x10] sm:$0xff] (!%p190_p2)  }
   0x7   : > { %1016 = vmatpush3.bf16.msra.mxu0 (!%p190_p2), %v1153_v1  ;;  %1135 = vmatpush3.bf16.msra.mxu1 (!%p190_p2), %v1153_v1  ;;  %v1158_v6 = vld [vmem:[%s1572_s1 + $0x58] sm:$0xff] (!%p190_p2)   ;;  %v1160_v8 = vld [vmem:[%s1572_s1 + $0x60] sm:$0xff] (!%p190_p2)   ;;  %v1162_v10 = vld [vmem:[%s1572_s1 + $0x68] sm:$0xff] (!%p190_p2)   ;;  %v827_v50 = vshrl.u32 (!%p190_p2), %v826_v48, 7 }
   0x8   : > { %1017 = vmatprep.subr.bf16.mxu0 (!%p190_p2), %v1154_v2  ;;  %1128 = vmatprep.subr.bf16.mxu1 (!%p190_p2), %v1154_v2  ;;  %v1159_v7 = vld [vmem:[%s1572_s1 + $0x18] sm:$0xff] (!%p190_p2)   ;;  %v1161_v9 = vld [vmem:[%s1572_s1 + $0x20] sm:$0xff] (!%p190_p2)   ;;  %v1163_v13 = vld [vmem:[%s1572_s1 + $0x28] sm:$0xff] (!%p190_p2)  }
   0x9   : > { %v1164_v14 = vld [vmem:[%s1572_s1 + $0x70] sm:$0xff] (!%p190_p2)   ;;  %v1166_v16 = vld [vmem:[%s1572_s1 + $0x78] sm:$0xff] (!%p190_p2)   ;;  %v791_v49 = vld [vmem:[%s1575_s4] sm:$0x1] (!%p190_p2)  ;;  %v828_v51 = vsub.s32 (!%p190_p2), 0, %v827_v50 }
   0xa   : > { %v1165_v15 = vld [vmem:[%s1572_s1 + $0x30] sm:$0xff] (!%p190_p2)   ;;  %v1167_v17 = vld [vmem:[%s1572_s1 + $0x38] sm:$0xff] (!%p190_p2)   ;;  %vm792_vm0 = vcmp.gt.f32.partialorder (!%p190_p2), %v791_v49, 0.0  ;;  %v1359_v57 = vld [vmem:[%s1573_s2] ss:$0 sm:$0xff] (!%p190_p2) }
   0xb   : > { %1018 = vmatpush3.bf16.msra.mxu0 (!%p190_p2), %v1155_v3  ;;  %1136 = vmatpush3.bf16.msra.mxu1 (!%p190_p2), %v1155_v3  ;;  %v825_v55 = vsel (!%p190_p2), %vm792_vm0, 1, %v1224_v54  ;;  %v1364_v63 = vld [vmem:[%s1574_s3] ss:$0 sm:$0xff] (!%p190_p2) }
   0xc   : > { %1019 = vmatprep.subr.bf16.mxu0 (!%p190_p2), %v1156_v4  ;;  %1129 = vmatprep.subr.bf16.mxu1 (!%p190_p2), %v1156_v4  ;;  %v1366_v0 = vrot.slane (!%p190_p2), %v825_v55, %v828_v51 }
   0xd   : > { %s1578_s22 = smov (!%p219_p3, %s957_s22), 63 }
   0xe   : > { %s1014_s12 = sshll.u32 %s1578_s22, 3  ;;  %vm830_vm1 = vcmp.eq.s32.totalorder %v1366_v0, 1 }
   0xf   : > { %1020 = vmatpush3.bf16.msra.mxu0 %v1157_v5  ;;  %1137 = vmatpush3.bf16.msra.mxu1 %v1157_v5  ;;  %s1298_s17 = scalar_lea.vmem %s1571_s0, %s1014_s12  ;;  %s1380_s19 = scalar_lea.vmem %s1576_s5, %s1014_s12 }
  0x10   : > { %1021 = vmatprep.subr.bf16.mxu0 %v1158_v6  ;;  %1130 = vmatprep.subr.bf16.mxu1 %v1158_v6  ;;  %v1170_v11 = vld [vmem:[%s1298_s17 + $0x4] ss:$8 sps:$4 sm:$0xff]   ;;  %v1168_v18 = vld [vmem:[%s1298_s17] ss:$8 sps:$4 sm:$0xff]   ;;  %v1174_v20 = vld [vmem:[%s1298_s17 + $0x14] ss:$8 sps:$4 sm:$0xff]  }
  0x11   : > { %v1173_v12 = vld [vmem:[%s1298_s17 + $0x84] ss:$8 sps:$4 sm:$0xff]   ;;  %584 = vmatprep.mubr.bf16.mxu0 %v1170_v11  ;;  %v1171_v19 = vld [vmem:[%s1298_s17 + $0x80] ss:$8 sps:$4 sm:$0xff]   ;;  %v1176_v21 = vld [vmem:[%s1298_s17 + $0x94] ss:$8 sps:$4 sm:$0xff]  }
  0x12   : > { %648 = vmatprep.mubr.bf16.mxu1 %v1173_v12  ;;  %v1178_v22 = vld [vmem:[%s1298_s17 + $0x10] ss:$8 sps:$4 sm:$0xff]   ;;  %v1180_v24 = vld [vmem:[%s1298_s17 + $0x24] ss:$8 sps:$4 sm:$0xff]   ;;  %v1184_v26 = vld [vmem:[%s1298_s17 + $0x20] ss:$8 sps:$4 sm:$0xff]  }
  0x13   : > { %1022 = vmatpush3.bf16.msra.mxu0 %v1159_v7  ;;  %1138 = vmatpush3.bf16.msra.mxu1 %v1159_v7  ;;  %v1179_v23 = vld [vmem:[%s1298_s17 + $0x90] ss:$8 sps:$4 sm:$0xff]   ;;  %v1182_v25 = vld [vmem:[%s1298_s17 + $0xa4] ss:$8 sps:$4 sm:$0xff]   ;;  %v1185_v27 = vld [vmem:[%s1298_s17 + $0xa0] ss:$8 sps:$4 sm:$0xff]  }
  0x14   : > { %1023 = vmatprep.subr.bf16.mxu0 %v1160_v8  ;;  %1131 = vmatprep.subr.bf16.mxu1 %v1160_v8  ;;  %v1186_v28 = vld [vmem:[%s1298_s17 + $0x34] ss:$8 sps:$4 sm:$0xff]   ;;  %v1190_v30 = vld [vmem:[%s1298_s17 + $0x30] ss:$8 sps:$4 sm:$0xff]   ;;  %v1192_v32 = vld [vmem:[%s1298_s17 + $0x44] ss:$8 sps:$4 sm:$0xff]  }
  0x15   : > { %v1188_v29 = vld [vmem:[%s1298_s17 + $0xb4] ss:$8 sps:$4 sm:$0xff]   ;;  %v1191_v31 = vld [vmem:[%s1298_s17 + $0xb0] ss:$8 sps:$4 sm:$0xff]   ;;  %v1194_v33 = vld [vmem:[%s1298_s17 + $0xc4] ss:$8 sps:$4 sm:$0xff]  }
  0x16   : > { %v1196_v34 = vld [vmem:[%s1298_s17 + $0x40] ss:$8 sps:$4 sm:$0xff]   ;;  %v1198_v36 = vld [vmem:[%s1298_s17 + $0x54] ss:$8 sps:$4 sm:$0xff]   ;;  %v1202_v38 = vld [vmem:[%s1298_s17 + $0x50] ss:$8 sps:$4 sm:$0xff]  }
  0x17   : > { %1024 = vmatpush3.bf16.msra.mxu0 %v1161_v9  ;;  %1139 = vmatpush3.bf16.msra.mxu1 %v1161_v9  ;;  %v1197_v35 = vld [vmem:[%s1298_s17 + $0xc0] ss:$8 sps:$4 sm:$0xff]   ;;  %v1200_v37 = vld [vmem:[%s1298_s17 + $0xd4] ss:$8 sps:$4 sm:$0xff]   ;;  %v1203_v39 = vld [vmem:[%s1298_s17 + $0xd0] ss:$8 sps:$4 sm:$0xff]  }
  0x18   : > { %1025 = vmatprep.subr.bf16.mxu0 %v1162_v10  ;;  %1132 = vmatprep.subr.bf16.mxu1 %v1162_v10  ;;  %v1204_v40 = vld [vmem:[%s1298_s17 + $0x64] ss:$8 sps:$4 sm:$0xff]   ;;  %v1208_v42 = vld [vmem:[%s1298_s17 + $0x60] ss:$8 sps:$4 sm:$0xff]   ;;  %v1210_v44 = vld [vmem:[%s1298_s17 + $0x74] ss:$8 sps:$4 sm:$0xff]  }
  0x19   : > { %v1206_v41 = vld [vmem:[%s1298_s17 + $0xe4] ss:$8 sps:$4 sm:$0xff]   ;;  %v1209_v43 = vld [vmem:[%s1298_s17 + $0xe0] ss:$8 sps:$4 sm:$0xff]   ;;  %v1212_v45 = vld [vmem:[%s1298_s17 + $0xf4] ss:$8 sps:$4 sm:$0xff]  }
  0x1a   : > { %v1214_v46 = vld [vmem:[%s1298_s17 + $0x70] ss:$8 sps:$4 sm:$0xff]  }
  0x1b   : > { %1026 = vmatpush3.bf16.msra.mxu0 %v1163_v13  ;;  %1140 = vmatpush3.bf16.msra.mxu1 %v1163_v13  ;;  %v1215_v47 = vld [vmem:[%s1298_s17 + $0xf0] ss:$8 sps:$4 sm:$0xff]  }
  0x1c   : > { %1027 = vmatprep.subr.bf16.mxu0 %v1164_v14  ;;  %1133 = vmatprep.subr.bf16.mxu1 %v1164_v14 }
  0x1f   : > { %1028 = vmatpush3.bf16.msra.mxu0 %v1165_v15  ;;  %1141 = vmatpush3.bf16.msra.mxu1 %v1165_v15 }
  0x20   : > { %1029 = vmatprep.subr.bf16.mxu0 %v1166_v16  ;;  %1134 = vmatprep.subr.bf16.mxu1 %v1166_v16 }
  0x23   : > { %1030 = vmatpush3.bf16.msra.mxu0 %v1167_v17  ;;  %1142 = vmatpush3.bf16.msra.mxu1 %v1167_v17 }
  0x26   : > { %585 = vmatmul.mubr.bf16.vlgmr.msra.gmra.mrb[0].mxu0 %v1168_v18  ;;  %649 = vmatmul.mubr.bf16.vlgmr.msra.gmra.mrb[0].mxu1 %v1171_v19 }
  0x27   : > { %592 = vmatprep.mubr.bf16.mxu0 %v1174_v20  ;;  %656 = vmatprep.mubr.bf16.mxu1 %v1176_v21 }
  0x2e   : > { %593 = vmatmul.mubr.bf16.gmra.mrb[4].mxu0 %v1178_v22  ;;  %657 = vmatmul.mubr.bf16.gmra.mrb[4].mxu1 %v1179_v23 }
  0x2f   : > { %600 = vmatprep.mubr.bf16.mxu0 %v1180_v24  ;;  %664 = vmatprep.mubr.bf16.mxu1 %v1182_v25 }
  0x36   : > { %601 = vmatmul.mubr.bf16.gmra.mrb[8].mxu0 %v1184_v26  ;;  %665 = vmatmul.mubr.bf16.gmra.mrb[8].mxu1 %v1185_v27 }
  0x37   : > { %608 = vmatprep.mubr.bf16.mxu0 %v1186_v28  ;;  %672 = vmatprep.mubr.bf16.mxu1 %v1188_v29 }
  0x3e   : > { %609 = vmatmul.mubr.bf16.gmra.mrb[12].mxu0 %v1190_v30  ;;  %673 = vmatmul.mubr.bf16.gmra.mrb[12].mxu1 %v1191_v31 }
  0x3f   : > { %616 = vmatprep.mubr.bf16.mxu0 %v1192_v32  ;;  %680 = vmatprep.mubr.bf16.mxu1 %v1194_v33 }
  0x46   : > { %617 = vmatmul.mubr.bf16.gmra.mrb[16].mxu0 %v1196_v34  ;;  %681 = vmatmul.mubr.bf16.gmra.mrb[16].mxu1 %v1197_v35 }
  0x47   : > { %624 = vmatprep.mubr.bf16.mxu0 %v1198_v36  ;;  %688 = vmatprep.mubr.bf16.mxu1 %v1200_v37 }
  0x4e   : > { %625 = vmatmul.mubr.bf16.gmra.mrb[20].mxu0 %v1202_v38  ;;  %689 = vmatmul.mubr.bf16.gmra.mrb[20].mxu1 %v1203_v39 }
  0x4f   : > { %632 = vmatprep.mubr.bf16.mxu0 %v1204_v40  ;;  %696 = vmatprep.mubr.bf16.mxu1 %v1206_v41 }
  0x56   : > { %633 = vmatmul.mubr.bf16.gmra.mrb[24].mxu0 %v1208_v42  ;;  %697 = vmatmul.mubr.bf16.gmra.mrb[24].mxu1 %v1209_v43 }
  0x57   : > { %640 = vmatprep.mubr.bf16.mxu0 %v1210_v44  ;;  %704 = vmatprep.mubr.bf16.mxu1 %v1212_v45 }
  0x5e   : > { %641 = vmatmul.mubr.bf16.gmra.mrb[28].mxu0 %v1214_v46  ;;  %705 = vmatmul.mubr.bf16.gmra.mrb[28].mxu1 %v1215_v47 }
  0xf9   : > { %v1031_v52 = vpop.f32.mrb[0].mxu0  ;;  %v1079_v53 = vpop.f32.mrb[0].mxu1 }
  0xfa   : > { %v1032_v56 = vpop.f32.mrb[1].mxu0  ;;  %v1080_v58 = vpop.f32.mrb[1].mxu1 }
  0xfb   : > { %v1033_v59 = vadd.f32 %v1032_v56, %v1031_v52  ;;  %v1081_v60 = vadd.f32 %v1080_v58, %v1079_v53  ;;  %v1034_v61 = vpop.f32.mrb[2].mxu0  ;;  %v1082_v62 = vpop.f32.mrb[2].mxu1 }
  0xfc   : > { %v1035_v1 = vpop.f32.mrb[3].mxu0  ;;  %v1083_v2 = vpop.f32.mrb[3].mxu1 }
  0xfd   : > { %v720_v3 = vmul.f32 %v1033_v59, %v1359_v57  ;;  %v736_v4 = vmul.f32 %v1081_v60, %v1359_v57  ;;  %v1036_v5 = vadd.f32 %v1035_v1, %v1034_v61  ;;  %v1084_v6 = vadd.f32 %v1083_v2, %v1082_v62 }
  0xff   : > { %v759_v7 = vadd.f32 %v1364_v63, %v720_v3  ;;  %v775_v8 = vadd.f32 %v1364_v63, %v736_v4  ;;  %v721_v9 = vmul.f32 %v1036_v5, %v1359_v57  ;;  %v737_v10 = vmul.f32 %v1084_v6, %v1359_v57 }
 0x101   : > { %v793_v11 = vmax.f32 %v759_v7, 0.0  ;;  %v809_v12 = vmax.f32 %v775_v8, 0.0  ;;  %v760_v13 = vadd.f32 %v1364_v63, %v721_v9  ;;  %v776_v14 = vadd.f32 %v1364_v63, %v737_v10  ;;  %v1037_v15 = vpop.f32.mrb[4].mxu0  ;;  %v1085_v16 = vpop.f32.mrb[4].mxu1 }
 0x102   : > { %v1038_v17 = vpop.f32.mrb[5].mxu0  ;;  %v1086_v18 = vpop.f32.mrb[5].mxu1 }
 0x103   : > { %v831_v19 = vsel %vm830_vm1, %v793_v11, %v759_v7  ;;  %v847_v20 = vsel %vm830_vm1, %v809_v12, %v775_v8  ;;  %v794_v21 = vmax.f32 %v760_v13, 0.0  ;;  %v810_v22 = vmax.f32 %v776_v14, 0.0  ;;  %v1040_v23 = vpop.f32.mrb[6].mxu0  ;;  %v1088_v24 = vpop.f32.mrb[6].mxu1 }
 0x104   : > { %864 = vst.msk [vmem:[%s1380_s19] sm:$0xff] %vm863_vm2, %v831_v19  ;;  %880 = vst.msk [vmem:[%s1380_s19 + $0x80] sm:$0xff] %vm863_vm2, %v847_v20  ;;  %v1039_v25 = vadd.f32 %v1038_v17, %v1037_v15  ;;  %v1087_v26 = vadd.f32 %v1086_v18, %v1085_v16  ;;  %v1041_v27 = vpop.f32.mrb[7].mxu0  ;;  %v1089_v28 = vpop.f32.mrb[7].mxu1 }
 0x105   : > { %v832_v29 = vsel %vm830_vm1, %v794_v21, %v760_v13  ;;  %v848_v30 = vsel %vm830_vm1, %v810_v22, %v776_v14  ;;  %v1042_v31 = vadd.f32 %v1041_v27, %v1040_v23  ;;  %v1090_v32 = vadd.f32 %v1089_v28, %v1088_v24 }
 0x106   : > { %865 = vst.msk [vmem:[%s1380_s19 + $0x8] sm:$0xff] %vm863_vm2, %v832_v29  ;;  %881 = vst.msk [vmem:[%s1380_s19 + $0x88] sm:$0xff] %vm863_vm2, %v848_v30  ;;  %v722_v33 = vmul.f32 %v1039_v25, %v1359_v57  ;;  %v738_v34 = vmul.f32 %v1087_v26, %v1359_v57 }
 0x107   : > { %v723_v35 = vmul.f32 %v1042_v31, %v1359_v57  ;;  %v739_v36 = vmul.f32 %v1090_v32, %v1359_v57 }
 0x108   : > { %v761_v37 = vadd.f32 %v1364_v63, %v722_v33  ;;  %v777_v38 = vadd.f32 %v1364_v63, %v738_v34 }
 0x109   : > { %v762_v39 = vadd.f32 %v1364_v63, %v723_v35  ;;  %v778_v40 = vadd.f32 %v1364_v63, %v739_v36  ;;  %v1043_v41 = vpop.f32.mrb[8].mxu0  ;;  %v1091_v42 = vpop.f32.mrb[8].mxu1 }
 0x10a   : > { %v795_v43 = vmax.f32 %v761_v37, 0.0  ;;  %v811_v44 = vmax.f32 %v777_v38, 0.0  ;;  %v1044_v45 = vpop.f32.mrb[9].mxu0  ;;  %v1092_v46 = vpop.f32.mrb[9].mxu1 }
 0x10b   : > { %v796_v47 = vmax.f32 %v762_v39, 0.0  ;;  %v812_v48 = vmax.f32 %v778_v40, 0.0  ;;  %v1045_v49 = vadd.f32 %v1044_v45, %v1043_v41  ;;  %v1093_v50 = vadd.f32 %v1092_v46, %v1091_v42  ;;  %v1046_v51 = vpop.f32.mrb[10].mxu0  ;;  %v1094_v52 = vpop.f32.mrb[10].mxu1 }
 0x10c   : > { %v833_v53 = vsel %vm830_vm1, %v795_v43, %v761_v37  ;;  %v849_v54 = vsel %vm830_vm1, %v811_v44, %v777_v38  ;;  %v1047_v55 = vpop.f32.mrb[11].mxu0  ;;  %v1095_v56 = vpop.f32.mrb[11].mxu1 }
 0x10d   : > { %866 = vst.msk [vmem:[%s1380_s19 + $0x10] sm:$0xff] %vm863_vm2, %v833_v53  ;;  %882 = vst.msk [vmem:[%s1380_s19 + $0x90] sm:$0xff] %vm863_vm2, %v849_v54  ;;  %v834_v58 = vsel %vm830_vm1, %v796_v47, %v762_v39  ;;  %v850_v59 = vsel %vm830_vm1, %v812_v48, %v778_v40  ;;  %v724_v60 = vmul.f32 %v1045_v49, %v1359_v57 }
 0x10e   : > { %v740_v61 = vmul.f32 %v1093_v50, %v1359_v57  ;;  %867 = vst.msk [vmem:[%s1380_s19 + $0x18] sm:$0xff] %vm863_vm2, %v834_v58  ;;  %883 = vst.msk [vmem:[%s1380_s19 + $0x98] sm:$0xff] %vm863_vm2, %v850_v59  ;;  %v1048_v62 = vadd.f32 %v1047_v55, %v1046_v51  ;;  %v1096_v1 = vadd.f32 %v1095_v56, %v1094_v52 }
 0x10f   : > { %v763_v2 = vadd.f32 %v1364_v63, %v724_v60 }
 0x110   : > { %v779_v3 = vadd.f32 %v1364_v63, %v740_v61  ;;  %v725_v4 = vmul.f32 %v1048_v62, %v1359_v57  ;;  %v741_v5 = vmul.f32 %v1096_v1, %v1359_v57 }
 0x111   : > { %v797_v6 = vmax.f32 %v763_v2, 0.0  ;;  %v1049_v8 = vpop.f32.mrb[12].mxu0  ;;  %v1097_v9 = vpop.f32.mrb[12].mxu1 }
 0x112   : > { %v813_v7 = vmax.f32 %v779_v3, 0.0  ;;  %v764_v10 = vadd.f32 %v1364_v63, %v725_v4  ;;  %v780_v11 = vadd.f32 %v1364_v63, %v741_v5  ;;  %v1050_v12 = vpop.f32.mrb[13].mxu0  ;;  %v1098_v13 = vpop.f32.mrb[13].mxu1 }
 0x113   : > { %v835_v14 = vsel %vm830_vm1, %v797_v6, %v763_v2  ;;  %v1051_v16 = vadd.f32 %v1050_v12, %v1049_v8  ;;  %v1099_v17 = vadd.f32 %v1098_v13, %v1097_v9  ;;  %v1052_v18 = vpop.f32.mrb[14].mxu0  ;;  %v1100_v19 = vpop.f32.mrb[14].mxu1 }
 0x114   : > { %v851_v15 = vsel %vm830_vm1, %v813_v7, %v779_v3  ;;  %868 = vst.msk [vmem:[%s1380_s19 + $0x20] sm:$0xff] %vm863_vm2, %v835_v14  ;;  %v798_v20 = vmax.f32 %v764_v10, 0.0  ;;  %v814_v21 = vmax.f32 %v780_v11, 0.0  ;;  %v1053_v22 = vpop.f32.mrb[15].mxu0  ;;  %v1101_v23 = vpop.f32.mrb[15].mxu1 }
 0x115   : > { %884 = vst.msk [vmem:[%s1380_s19 + $0xa0] sm:$0xff] %vm863_vm2, %v851_v15  ;;  %v726_v24 = vmul.f32 %v1051_v16, %v1359_v57  ;;  %v742_v25 = vmul.f32 %v1099_v17, %v1359_v57  ;;  %v1054_v26 = vadd.f32 %v1053_v22, %v1052_v18  ;;  %v1102_v27 = vadd.f32 %v1101_v23, %v1100_v19 }
 0x116   : > { %v836_v28 = vsel %vm830_vm1, %v798_v20, %v764_v10  ;;  %v852_v29 = vsel %vm830_vm1, %v814_v21, %v780_v11 }
 0x117   : > { %869 = vst.msk [vmem:[%s1380_s19 + $0x28] sm:$0xff] %vm863_vm2, %v836_v28  ;;  %885 = vst.msk [vmem:[%s1380_s19 + $0xa8] sm:$0xff] %vm863_vm2, %v852_v29  ;;  %v765_v30 = vadd.f32 %v1364_v63, %v726_v24  ;;  %v781_v31 = vadd.f32 %v1364_v63, %v742_v25  ;;  %v727_v32 = vmul.f32 %v1054_v26, %v1359_v57 }
 0x118   : > { %v743_v33 = vmul.f32 %v1102_v27, %v1359_v57 }
 0x119   : > { %v799_v34 = vmax.f32 %v765_v30, 0.0  ;;  %v815_v35 = vmax.f32 %v781_v31, 0.0  ;;  %v766_v36 = vadd.f32 %v1364_v63, %v727_v32  ;;  %v1055_v38 = vpop.f32.mrb[16].mxu0  ;;  %v1103_v39 = vpop.f32.mrb[16].mxu1 }
 0x11a   : > { %v782_v37 = vadd.f32 %v1364_v63, %v743_v33  ;;  %v1056_v40 = vpop.f32.mrb[17].mxu0  ;;  %v1104_v41 = vpop.f32.mrb[17].mxu1 }
 0x11b   : > { %v837_v42 = vsel %vm830_vm1, %v799_v34, %v765_v30  ;;  %v853_v43 = vsel %vm830_vm1, %v815_v35, %v781_v31  ;;  %v800_v44 = vmax.f32 %v766_v36, 0.0  ;;  %v1058_v46 = vpop.f32.mrb[18].mxu0  ;;  %v1106_v47 = vpop.f32.mrb[18].mxu1  ;;  %v1057_v48 = vadd.f32 %v1056_v40, %v1055_v38 }
 0x11c   : > { %v816_v45 = vmax.f32 %v782_v37, 0.0  ;;  %870 = vst.msk [vmem:[%s1380_s19 + $0x30] sm:$0xff] %vm863_vm2, %v837_v42  ;;  %886 = vst.msk [vmem:[%s1380_s19 + $0xb0] sm:$0xff] %vm863_vm2, %v853_v43  ;;  %v1105_v49 = vadd.f32 %v1104_v41, %v1103_v39  ;;  %v1059_v50 = vpop.f32.mrb[19].mxu0  ;;  %v1107_v51 = vpop.f32.mrb[19].mxu1 }
 0x11d   : > { %v838_v52 = vsel %vm830_vm1, %v800_v44, %v766_v36  ;;  %v1060_v54 = vadd.f32 %v1059_v50, %v1058_v46  ;;  %v1108_v55 = vadd.f32 %v1107_v51, %v1106_v47  ;;  %v728_v56 = vmul.f32 %v1057_v48, %v1359_v57 }
 0x11e   : > { %v854_v53 = vsel %vm830_vm1, %v816_v45, %v782_v37  ;;  %871 = vst.msk [vmem:[%s1380_s19 + $0x38] sm:$0xff] %vm863_vm2, %v838_v52  ;;  %v744_v58 = vmul.f32 %v1105_v49, %v1359_v57 }
 0x11f   : > { %887 = vst.msk [vmem:[%s1380_s19 + $0xb8] sm:$0xff] %vm863_vm2, %v854_v53  ;;  %v729_v59 = vmul.f32 %v1060_v54, %v1359_v57  ;;  %v745_v60 = vmul.f32 %v1108_v55, %v1359_v57  ;;  %v767_v61 = vadd.f32 %v1364_v63, %v728_v56 }
 0x120   : > { %v783_v62 = vadd.f32 %v1364_v63, %v744_v58 }
 0x121   : > { %v768_v1 = vadd.f32 %v1364_v63, %v729_v59  ;;  %v784_v2 = vadd.f32 %v1364_v63, %v745_v60  ;;  %v1061_v3 = vpop.f32.mrb[20].mxu0  ;;  %v1109_v4 = vpop.f32.mrb[20].mxu1  ;;  %v801_v5 = vmax.f32 %v767_v61, 0.0 }
 0x122   : > { %v817_v6 = vmax.f32 %v783_v62, 0.0  ;;  %v1062_v7 = vpop.f32.mrb[21].mxu0  ;;  %v1110_v8 = vpop.f32.mrb[21].mxu1 }
 0x123   : > { %v802_v9 = vmax.f32 %v768_v1, 0.0  ;;  %v818_v10 = vmax.f32 %v784_v2, 0.0  ;;  %v1063_v11 = vadd.f32 %v1062_v7, %v1061_v3  ;;  %v1111_v12 = vadd.f32 %v1110_v8, %v1109_v4  ;;  %v1064_v13 = vpop.f32.mrb[22].mxu0  ;;  %v1112_v14 = vpop.f32.mrb[22].mxu1 }
 0x124   : > { %v839_v15 = vsel %vm830_vm1, %v801_v5, %v767_v61  ;;  %v855_v16 = vsel %vm830_vm1, %v817_v6, %v783_v62  ;;  %v1065_v17 = vpop.f32.mrb[23].mxu0  ;;  %v1113_v18 = vpop.f32.mrb[23].mxu1 }
 0x125   : > { %872 = vst.msk [vmem:[%s1380_s19 + $0x40] sm:$0xff] %vm863_vm2, %v839_v15  ;;  %888 = vst.msk [vmem:[%s1380_s19 + $0xc0] sm:$0xff] %vm863_vm2, %v855_v16  ;;  %v840_v19 = vsel %vm830_vm1, %v802_v9, %v768_v1  ;;  %v856_v20 = vsel %vm830_vm1, %v818_v10, %v784_v2  ;;  %v730_v21 = vmul.f32 %v1063_v11, %v1359_v57 }
 0x126   : > { %v746_v22 = vmul.f32 %v1111_v12, %v1359_v57  ;;  %873 = vst.msk [vmem:[%s1380_s19 + $0x48] sm:$0xff] %vm863_vm2, %v840_v19  ;;  %889 = vst.msk [vmem:[%s1380_s19 + $0xc8] sm:$0xff] %vm863_vm2, %v856_v20  ;;  %v1066_v23 = vadd.f32 %v1065_v17, %v1064_v13  ;;  %v1114_v24 = vadd.f32 %v1113_v18, %v1112_v14 }
 0x127   : > { %v769_v25 = vadd.f32 %v1364_v63, %v730_v21 }
 0x128   : > { %v785_v26 = vadd.f32 %v1364_v63, %v746_v22  ;;  %v731_v27 = vmul.f32 %v1066_v23, %v1359_v57  ;;  %v747_v28 = vmul.f32 %v1114_v24, %v1359_v57 }
 0x129   : > { %v803_v29 = vmax.f32 %v769_v25, 0.0  ;;  %v1067_v31 = vpop.f32.mrb[24].mxu0  ;;  %v1115_v32 = vpop.f32.mrb[24].mxu1 }
 0x12a   : > { %v819_v30 = vmax.f32 %v785_v26, 0.0  ;;  %v770_v33 = vadd.f32 %v1364_v63, %v731_v27  ;;  %v786_v34 = vadd.f32 %v1364_v63, %v747_v28  ;;  %v1068_v35 = vpop.f32.mrb[25].mxu0  ;;  %v1116_v36 = vpop.f32.mrb[25].mxu1 }
 0x12b   : > { %v841_v37 = vsel %vm830_vm1, %v803_v29, %v769_v25  ;;  %v1069_v39 = vadd.f32 %v1068_v35, %v1067_v31  ;;  %v1117_v40 = vadd.f32 %v1116_v36, %v1115_v32  ;;  %v1070_v41 = vpop.f32.mrb[26].mxu0  ;;  %v1118_v42 = vpop.f32.mrb[26].mxu1 }
 0x12c   : > { %v857_v38 = vsel %vm830_vm1, %v819_v30, %v785_v26  ;;  %874 = vst.msk [vmem:[%s1380_s19 + $0x50] sm:$0xff] %vm863_vm2, %v841_v37  ;;  %v804_v43 = vmax.f32 %v770_v33, 0.0  ;;  %v820_v44 = vmax.f32 %v786_v34, 0.0  ;;  %v1071_v45 = vpop.f32.mrb[27].mxu0  ;;  %v1119_v46 = vpop.f32.mrb[27].mxu1 }
 0x12d   : > { %890 = vst.msk [vmem:[%s1380_s19 + $0xd0] sm:$0xff] %vm863_vm2, %v857_v38  ;;  %v732_v47 = vmul.f32 %v1069_v39, %v1359_v57  ;;  %v748_v48 = vmul.f32 %v1117_v40, %v1359_v57  ;;  %v1072_v49 = vadd.f32 %v1071_v45, %v1070_v41  ;;  %v1120_v50 = vadd.f32 %v1119_v46, %v1118_v42 }
 0x12e   : > { %v842_v51 = vsel %vm830_vm1, %v804_v43, %v770_v33  ;;  %v858_v52 = vsel %vm830_vm1, %v820_v44, %v786_v34 }
 0x12f   : > { %875 = vst.msk [vmem:[%s1380_s19 + $0x58] sm:$0xff] %vm863_vm2, %v842_v51  ;;  %891 = vst.msk [vmem:[%s1380_s19 + $0xd8] sm:$0xff] %vm863_vm2, %v858_v52  ;;  %v771_v53 = vadd.f32 %v1364_v63, %v732_v47  ;;  %v787_v54 = vadd.f32 %v1364_v63, %v748_v48  ;;  %v733_v55 = vmul.f32 %v1072_v49, %v1359_v57 }
 0x130   : > { %v749_v56 = vmul.f32 %v1120_v50, %v1359_v57 }
 0x131   : > { %v805_v58 = vmax.f32 %v771_v53, 0.0  ;;  %v821_v59 = vmax.f32 %v787_v54, 0.0  ;;  %v772_v60 = vadd.f32 %v1364_v63, %v733_v55  ;;  %v1073_v62 = vpop.f32.mrb[28].mxu0  ;;  %v1121_v1 = vpop.f32.mrb[28].mxu1 }
 0x132   : > { %v788_v61 = vadd.f32 %v1364_v63, %v749_v56  ;;  %v1074_v2 = vpop.f32.mrb[29].mxu0  ;;  %v1122_v3 = vpop.f32.mrb[29].mxu1 }
 0x133   : > { %v843_v4 = vsel %vm830_vm1, %v805_v58, %v771_v53  ;;  %v859_v5 = vsel %vm830_vm1, %v821_v59, %v787_v54  ;;  %v806_v6 = vmax.f32 %v772_v60, 0.0  ;;  %v1076_v8 = vpop.f32.mrb[30].mxu0  ;;  %v1124_v9 = vpop.f32.mrb[30].mxu1  ;;  %v1075_v10 = vadd.f32 %v1074_v2, %v1073_v62 }
 0x134   : > { %v822_v7 = vmax.f32 %v788_v61, 0.0  ;;  %876 = vst.msk [vmem:[%s1380_s19 + $0x60] sm:$0xff] %vm863_vm2, %v843_v4  ;;  %892 = vst.msk [vmem:[%s1380_s19 + $0xe0] sm:$0xff] %vm863_vm2, %v859_v5  ;;  %v1123_v11 = vadd.f32 %v1122_v3, %v1121_v1  ;;  %v1077_v12 = vpop.f32.mrb[31].mxu0  ;;  %v1125_v13 = vpop.f32.mrb[31].mxu1 }
 0x135   : > { %v844_v14 = vsel %vm830_vm1, %v806_v6, %v772_v60  ;;  %v1078_v16 = vadd.f32 %v1077_v12, %v1076_v8  ;;  %v1126_v17 = vadd.f32 %v1125_v13, %v1124_v9  ;;  %v734_v18 = vmul.f32 %v1075_v10, %v1359_v57 }
 0x136   : > { %v860_v15 = vsel %vm830_vm1, %v822_v7, %v788_v61  ;;  %877 = vst.msk [vmem:[%s1380_s19 + $0x68] sm:$0xff] %vm863_vm2, %v844_v14  ;;  %v750_v19 = vmul.f32 %v1123_v11, %v1359_v57 }
 0x137   : > { %893 = vst.msk [vmem:[%s1380_s19 + $0xe8] sm:$0xff] %vm863_vm2, %v860_v15  ;;  %v735_v20 = vmul.f32 %v1078_v16, %v1359_v57  ;;  %v751_v21 = vmul.f32 %v1126_v17, %v1359_v57  ;;  %v773_v22 = vadd.f32 %v1364_v63, %v734_v18 }
 0x138   : > { %v789_v23 = vadd.f32 %v1364_v63, %v750_v19 }
 0x139   : > { %v774_v24 = vadd.f32 %v1364_v63, %v735_v20  ;;  %v790_v25 = vadd.f32 %v1364_v63, %v751_v21  ;;  %v807_v26 = vmax.f32 %v773_v22, 0.0 }
 0x13a   : > { %v823_v27 = vmax.f32 %v789_v23, 0.0 }
 0x13b   : > { %v808_v28 = vmax.f32 %v774_v24, 0.0  ;;  %v824_v29 = vmax.f32 %v790_v25, 0.0  ;;  %v845_v30 = vsel %vm830_vm1, %v807_v26, %v773_v22 }
 0x13c   : > { %v861_v31 = vsel %vm830_vm1, %v823_v27, %v789_v23  ;;  %878 = vst.msk [vmem:[%s1380_s19 + $0x70] sm:$0xff] %vm863_vm2, %v845_v30 }
 0x13d   : > { %894 = vst.msk [vmem:[%s1380_s19 + $0xf0] sm:$0xff] %vm863_vm2, %v861_v31  ;;  %v846_v57 = vsel %vm830_vm1, %v808_v28, %v774_v24  ;;  %v862_v63 = vsel %vm830_vm1, %v824_v29, %v790_v25 }
 0x13e   : > { %879 = vst.msk [vmem:[%s1380_s19 + $0x78] sm:$0xff] %vm863_vm2, %v846_v57  ;;  %895 = vst.msk [vmem:[%s1380_s19 + $0xf8] sm:$0xff] %vm863_vm2, %v862_v63 }
 0x13f PF: > { %s15_s18 = sadd.s32 1, %s1222_s18  }
 0x140   : > { %p12_p4 = scmp.ge.s32.totalorder %s15_s18, 4  }
 0x142   :  { %14 = sbr.rel (!%p12_p4) target bundleno = 1 (0x1), region = 70 }

// kernel: resnet_forward.11
= control target key start
LH: loop header
LB: loop body
LE: loop exit
PB: predicated region body
PF: predicated region fallthrough
CT: control target
= control target key end

     0   :  { %s1785_s18 = smov 0   ;;  %s2151_s0 = inlined_call_operand.vmem [shape: bf16[512,384], index: 0, kind: input, shape index: {}]   ;;  %s2152_s1 = inlined_call_operand.vmem [shape: bf16[384,32], index: 1, kind: input, shape index: {}]   ;;  %s2153_s2 = inlined_call_operand.vmem [shape: f32[1,32], index: 2, kind: input, shape index: {}]   ;;  %s2154_s3 = inlined_call_operand.vmem [shape: f32[1,32], index: 3, kind: input, shape index: {}]   ;;  %s2155_s4 = inlined_call_operand.vmem [shape: f32[512,32], index: 4, kind: input, shape index: {}]   ;;  %s2156_s5 = inlined_call_operand.vmem [shape: f32[512,32], index: 5, kind: output, shape index: {}]  }
   0x1 LB: > { %s1363_s19 = sadd.s32 4294967295, %s1753_s18   ;;  %p1367_p0 = scmp.ge.s32.totalorder %s1753_s18, 1  ;;  %s1753_s18 = sphi %s1785_s18, %s15_s18  }
   0x2   : > { %p200_p1 = scmp.lt.s32.totalorder %s1753_s18, 3 }
   0x4   : > { %p201_p2 = pnand %p1367_p0, %p200_p1 }
   0x5   : > { %v1659_v0 = vld [vmem:[%s2152_s1 + $0x40] sm:$0xff] (!%p201_p2)   ;;  %s1368_s22 = sshll.u32 (!%p201_p2), %s1363_s19, 5  ;;  %v1661_v2 = vld [vmem:[%s2152_s1 + $0x48] sm:$0xff] (!%p201_p2)   ;;  %v1663_v4 = vld [vmem:[%s2152_s1 + $0x50] sm:$0xff] (!%p201_p2)   ;;  %vm1262_vm0 = vcmask (!%p201_p2), 261120  }
   0x6   : > { %204 = sbr.rel (%p201_p2) target bundleno = 355 (0x163), region = 40  ;;  %v1660_v1 = vld [vmem:[%s2152_s1] sm:$0xff] (!%p201_p2)   ;;  %1450 = vmatprep.subr.bf16.mxu0 (!%p201_p2), %v1659_v0  ;;  %1634 = vmatprep.subr.bf16.mxu1 (!%p201_p2), %v1659_v0  ;;  %p235_p3 = scmp.lt.s32.totalorder (!%p201_p2), %s1368_s22, 63  ;;  %v1662_v3 = vld [vmem:[%s2152_s1 + $0x8] sm:$0xff] (!%p201_p2)   ;;  %v1664_v5 = vld [vmem:[%s2152_s1 + $0x10] sm:$0xff] (!%p201_p2)  }
   0x7   : > { %1451 = vmatpush3.bf16.msra.mxu0 (!%p201_p2), %v1660_v1  ;;  %1642 = vmatpush3.bf16.msra.mxu1 (!%p201_p2), %v1660_v1  ;;  %v1665_v6 = vld [vmem:[%s2152_s1 + $0x58] sm:$0xff] (!%p201_p2)   ;;  %v1667_v8 = vld [vmem:[%s2152_s1 + $0x60] sm:$0xff] (!%p201_p2)   ;;  %v1669_v10 = vld [vmem:[%s2152_s1 + $0x68] sm:$0xff] (!%p201_p2)  }
   0x8   : > { %1452 = vmatprep.subr.bf16.mxu0 (!%p201_p2), %v1661_v2  ;;  %1635 = vmatprep.subr.bf16.mxu1 (!%p201_p2), %v1661_v2  ;;  %v1666_v7 = vld [vmem:[%s2152_s1 + $0x18] sm:$0xff] (!%p201_p2)   ;;  %v1668_v9 = vld [vmem:[%s2152_s1 + $0x20] sm:$0xff] (!%p201_p2)   ;;  %v1670_v13 = vld [vmem:[%s2152_s1 + $0x28] sm:$0xff] (!%p201_p2)  }
   0x9   : > { %v1671_v14 = vld [vmem:[%s2152_s1 + $0x70] sm:$0xff] (!%p201_p2)   ;;  %v1673_v16 = vld [vmem:[%s2152_s1 + $0x78] sm:$0xff] (!%p201_p2)   ;;  %v1681_v18 = vld [vmem:[%s2152_s1 + $0x80] sm:$0xff] (!%p201_p2)  }
   0xa   : > { %v1672_v15 = vld [vmem:[%s2152_s1 + $0x30] sm:$0xff] (!%p201_p2)   ;;  %v1674_v17 = vld [vmem:[%s2152_s1 + $0x38] sm:$0xff] (!%p201_p2)   ;;  %v1682_v22 = vld [vmem:[%s2152_s1 + $0x88] sm:$0xff] (!%p201_p2)  }
   0xb   : > { %1453 = vmatpush3.bf16.msra.mxu0 (!%p201_p2), %v1662_v3  ;;  %1643 = vmatpush3.bf16.msra.mxu1 (!%p201_p2), %v1662_v3  ;;  %v1689_v25 = vld [vmem:[%s2152_s1 + $0x90] sm:$0xff] (!%p201_p2)   ;;  %v1690_v27 = vld [vmem:[%s2152_s1 + $0x98] sm:$0xff] (!%p201_p2)   ;;  %v1697_v30 = vld [vmem:[%s2152_s1 + $0xa0] sm:$0xff] (!%p201_p2)  }
   0xc   : > { %1454 = vmatprep.subr.bf16.mxu0 (!%p201_p2), %v1663_v4  ;;  %1636 = vmatprep.subr.bf16.mxu1 (!%p201_p2), %v1663_v4  ;;  %v1698_v33 = vld [vmem:[%s2152_s1 + $0xa8] sm:$0xff] (!%p201_p2)   ;;  %v1705_v36 = vld [vmem:[%s2152_s1 + $0xb0] sm:$0xff] (!%p201_p2)   ;;  %v1706_v40 = vld [vmem:[%s2152_s1 + $0xb8] sm:$0xff] (!%p201_p2)  }
   0xd   : > { %s2158_s22 = smov (!%p235_p3, %s1368_s22), 63 }
   0xe   : > { %s1650_s10 = smul.u32 12, %s2158_s22 }
   0xf   : > { %1455 = vmatpush3.bf16.msra.mxu0 %v1664_v5  ;;  %1644 = vmatpush3.bf16.msra.mxu1 %v1664_v5 }
  0x10   : > { %1456 = vmatprep.subr.bf16.mxu0 %v1665_v6  ;;  %1637 = vmatprep.subr.bf16.mxu1 %v1665_v6  ;;  %s1826_s17 = scalar_lea.vmem %s2151_s0, %s1650_s10 }
  0x11   : > { %v1677_v11 = vld [vmem:[%s1826_s17 + $0x4] ss:$12 sps:$4 sm:$0xff]   ;;  %v1675_v19 = vld [vmem:[%s1826_s17] ss:$12 sps:$4 sm:$0xff]   ;;  %v1683_v21 = vld [vmem:[%s1826_s17 + $0x1c] ss:$12 sps:$4 sm:$0xff]  }
  0x12   : > { %v1680_v12 = vld [vmem:[%s1826_s17 + $0x124] ss:$12 sps:$4 sm:$0xff]   ;;  %798 = vmatprep.mubr.bf16.mxu0 %v1677_v11  ;;  %v1678_v20 = vld [vmem:[%s1826_s17 + $0x120] ss:$12 sps:$4 sm:$0xff]   ;;  %v1685_v23 = vld [vmem:[%s1826_s17 + $0x13c] ss:$12 sps:$4 sm:$0xff]  }
  0x13   : > { %1457 = vmatpush3.bf16.msra.mxu0 %v1666_v7  ;;  %1645 = vmatpush3.bf16.msra.mxu1 %v1666_v7  ;;  %v1687_v24 = vld [vmem:[%s1826_s17 + $0x18] ss:$12 sps:$4 sm:$0xff]   ;;  %v1691_v28 = vld [vmem:[%s1826_s17 + $0x34] ss:$12 sps:$4 sm:$0xff]   ;;  %v1695_v31 = vld [vmem:[%s1826_s17 + $0x30] ss:$12 sps:$4 sm:$0xff]  }
  0x14   : > { %1458 = vmatprep.subr.bf16.mxu0 %v1667_v8  ;;  %1638 = vmatprep.subr.bf16.mxu1 %v1667_v8  ;;  %v1688_v26 = vld [vmem:[%s1826_s17 + $0x138] ss:$12 sps:$4 sm:$0xff]   ;;  %v1693_v29 = vld [vmem:[%s1826_s17 + $0x154] ss:$12 sps:$4 sm:$0xff]   ;;  %v1696_v32 = vld [vmem:[%s1826_s17 + $0x150] ss:$12 sps:$4 sm:$0xff]  }
  0x15   : > { %894 = vmatprep.mubr.bf16.mxu1 %v1680_v12  ;;  %v1699_v34 = vld [vmem:[%s1826_s17 + $0x4c] ss:$12 sps:$4 sm:$0xff]   ;;  %v1703_v37 = vld [vmem:[%s1826_s17 + $0x48] ss:$12 sps:$4 sm:$0xff]   ;;  %v1707_v39 = vld [vmem:[%s1826_s17 + $0x64] ss:$12 sps:$4 sm:$0xff]  }
  0x16   : > { %v1701_v35 = vld [vmem:[%s1826_s17 + $0x16c] ss:$12 sps:$4 sm:$0xff]   ;;  %v1704_v38 = vld [vmem:[%s1826_s17 + $0x168] ss:$12 sps:$4 sm:$0xff]   ;;  %v1716_v47 = vld [vmem:[%s1826_s17 + $0x50] ss:$12 sps:$4 sm:$0xff]  }
  0x17   : > { %1459 = vmatpush3.bf16.msra.mxu0 %v1668_v9  ;;  %1646 = vmatpush3.bf16.msra.mxu1 %v1668_v9  ;;  %v1709_v41 = vld [vmem:[%s1826_s17 + $0x8] ss:$12 sps:$4 sm:$0xff]   ;;  %v1710_v42 = vld [vmem:[%s1826_s17 + $0x60] ss:$12 sps:$4 sm:$0xff]   ;;  %v1714_v45 = vld [vmem:[%s1826_s17 + $0x38] ss:$12 sps:$4 sm:$0xff]  }
  0x18   : > { %1460 = vmatprep.subr.bf16.mxu0 %v1669_v10  ;;  %1639 = vmatprep.subr.bf16.mxu1 %v1669_v10  ;;  %v1711_v43 = vld [vmem:[%s1826_s17 + $0x20] ss:$12 sps:$4 sm:$0xff]   ;;  %v1712_v44 = vld [vmem:[%s1826_s17 + $0x7c] ss:$12 sps:$4 sm:$0xff]   ;;  %v1715_v46 = vld [vmem:[%s1826_s17 + $0x78] ss:$12 sps:$4 sm:$0xff]  }
  0x19   : > { %v1717_v48 = vld [vmem:[%s1826_s17 + $0x94] ss:$12 sps:$4 sm:$0xff]   ;;  %v1720_v50 = vld [vmem:[%s1826_s17 + $0x90] ss:$12 sps:$4 sm:$0xff]   ;;  %v1722_v52 = vld [vmem:[%s1826_s17 + $0xac] ss:$12 sps:$4 sm:$0xff]  }
  0x1a   : > { %v1719_v49 = vld [vmem:[%s1826_s17 + $0x68] ss:$12 sps:$4 sm:$0xff]   ;;  %v1721_v51 = vld [vmem:[%s1826_s17 + $0x80] ss:$12 sps:$4 sm:$0xff]   ;;  %v1724_v53 = vld [vmem:[%s1826_s17 + $0x98] ss:$12 sps:$4 sm:$0xff]  }
  0x1b   : > { %1461 = vmatpush3.bf16.msra.mxu0 %v1670_v13  ;;  %1647 = vmatpush3.bf16.msra.mxu1 %v1670_v13  ;;  %v1725_v54 = vld [vmem:[%s1826_s17 + $0xa8] ss:$12 sps:$4 sm:$0xff]   ;;  %v1726_v55 = vld [vmem:[%s1826_s17 + $0xb0] ss:$12 sps:$4 sm:$0xff]   ;;  %v1730_v58 = vld [vmem:[%s1826_s17 + $0xc0] ss:$12 sps:$4 sm:$0xff]  }
  0x1c   : > { %1462 = vmatprep.subr.bf16.mxu0 %v1671_v14  ;;  %1640 = vmatprep.subr.bf16.mxu1 %v1671_v14  ;;  %v1727_v56 = vld [vmem:[%s1826_s17 + $0xc4] ss:$12 sps:$4 sm:$0xff]   ;;  %v1729_v57 = vld [vmem:[%s1826_s17 + $0xc8] ss:$12 sps:$4 sm:$0xff]   ;;  %v1731_v59 = vld [vmem:[%s1826_s17 + $0xe0] ss:$12 sps:$4 sm:$0xff]  }
  0x1d   : > { %v1732_v60 = vld [vmem:[%s1826_s17 + $0xdc] ss:$12 sps:$4 sm:$0xff]   ;;  %v1734_v61 = vld [vmem:[%s1826_s17 + $0xf8] ss:$12 sps:$4 sm:$0xff]   ;;  %v1737_v0 = vld [vmem:[%s1826_s17 + $0xf4] ss:$12 sps:$4 sm:$0xff]  }
  0x1e   : > { %v1735_v62 = vld [vmem:[%s1826_s17 + $0xd8] ss:$12 sps:$4 sm:$0xff]   ;;  %v1736_v63 = vld [vmem:[%s1826_s17 + $0x110] ss:$12 sps:$4 sm:$0xff]   ;;  %v1739_v1 = vld [vmem:[%s1826_s17 + $0x128] ss:$12 sps:$4 sm:$0xff]  }
  0x1f   : > { %1463 = vmatpush3.bf16.msra.mxu0 %v1672_v15  ;;  %1648 = vmatpush3.bf16.msra.mxu1 %v1672_v15  ;;  %v1740_v2 = vld [vmem:[%s1826_s17 + $0xf0] ss:$12 sps:$4 sm:$0xff]   ;;  %v1741_v3 = vld [vmem:[%s1826_s17 + $0x140] ss:$12 sps:$4 sm:$0xff]   ;;  %v1744_v5 = vld [vmem:[%s1826_s17 + $0x158] ss:$12 sps:$4 sm:$0xff]  }
  0x20   : > { %1464 = vmatprep.subr.bf16.mxu0 %v1673_v16  ;;  %1641 = vmatprep.subr.bf16.mxu1 %v1673_v16  ;;  %v1742_v4 = vld [vmem:[%s1826_s17 + $0x10c] ss:$12 sps:$4 sm:$0xff]   ;;  %v1745_v6 = vld [vmem:[%s1826_s17 + $0x108] ss:$12 sps:$4 sm:$0xff]   ;;  %v1746_v7 = vld [vmem:[%s1826_s17 + $0x170] ss:$12 sps:$4 sm:$0xff]  }
  0x21   : > { %s1371_s17 = sshll.u32 %s2158_s22, 3 }
  0x22   : > { %s1952_s7 = scalar_lea.vmem %s2155_s4, %s1371_s17  ;;  %s1979_s12 = scalar_lea.vmem %s2156_s5, %s1371_s17 }
  0x23   : > { %1465 = vmatpush3.bf16.msra.mxu0 %v1674_v17  ;;  %1649 = vmatpush3.bf16.msra.mxu1 %v1674_v17 }
  0x24   : > { %1586 = vmatprep.subr.bf16.mxu1 %v1681_v18 }
  0x26   : > { %799 = vmatmul.mubr.bf16.vlgmr.msra.gmra.mrb[0].mxu0 %v1675_v19  ;;  %895 = vmatmul.mubr.bf16.vlgmr.msra.gmra.mrb[0].mxu1 %v1678_v20 }
  0x27   : > { %1587 = vmatpush3.bf16.msra.mxu1 %v1681_v18  ;;  %806 = vmatprep.mubr.bf16.mxu0 %v1683_v21 }
  0x28   : > { %1588 = vmatprep.subr.bf16.mxu1 %v1682_v22  ;;  %902 = vmatprep.mubr.bf16.mxu1 %v1685_v23 }
  0x2b   : > { %1589 = vmatpush3.bf16.msra.mxu1 %v1682_v22 }
  0x2c   : > { %1590 = vmatprep.subr.bf16.mxu1 %v1689_v25 }
  0x2e   : > { %807 = vmatmul.mubr.bf16.gmra.mrb[4].mxu0 %v1687_v24  ;;  %903 = vmatmul.mubr.bf16.gmra.mrb[4].mxu1 %v1688_v26 }
  0x2f   : > { %1591 = vmatpush3.bf16.msra.mxu1 %v1689_v25  ;;  %814 = vmatprep.mubr.bf16.mxu0 %v1691_v28 }
  0x30   : > { %1592 = vmatprep.subr.bf16.mxu1 %v1690_v27  ;;  %910 = vmatprep.mubr.bf16.mxu1 %v1693_v29 }
  0x33   : > { %1593 = vmatpush3.bf16.msra.mxu1 %v1690_v27 }
  0x34   : > { %1594 = vmatprep.subr.bf16.mxu1 %v1697_v30 }
  0x36   : > { %815 = vmatmul.mubr.bf16.gmra.mrb[8].mxu0 %v1695_v31  ;;  %911 = vmatmul.mubr.bf16.gmra.mrb[8].mxu1 %v1696_v32 }
  0x37   : > { %1595 = vmatpush3.bf16.msra.mxu1 %v1697_v30  ;;  %822 = vmatprep.mubr.bf16.mxu0 %v1699_v34 }
  0x38   : > { %1596 = vmatprep.subr.bf16.mxu1 %v1698_v33  ;;  %918 = vmatprep.mubr.bf16.mxu1 %v1701_v35 }
  0x3b   : > { %1597 = vmatpush3.bf16.msra.mxu1 %v1698_v33 }
  0x3c   : > { %1598 = vmatprep.subr.bf16.mxu1 %v1705_v36 }
  0x3e   : > { %823 = vmatmul.mubr.bf16.gmra.mrb[12].mxu0 %v1703_v37  ;;  %919 = vmatmul.mubr.bf16.gmra.mrb[12].mxu1 %v1704_v38 }
  0x3f   : > { %1599 = vmatpush3.bf16.msra.mxu1 %v1705_v36  ;;  %830 = vmatprep.mubr.bf16.mxu0 %v1707_v39 }
  0x40   : > { %1600 = vmatprep.subr.bf16.mxu1 %v1706_v40  ;;  %1602 = vmatprep.mubr.bf16.mxu1 %v1709_v41 }
  0x43   : > { %1601 = vmatpush3.bf16.msra.mxu1 %v1706_v40 }
  0x46   : > { %831 = vmatmul.mubr.bf16.gmra.mrb[16].mxu0 %v1710_v42  ;;  %1603 = vmatmul.mubr.bf16.vlgmr.msra.gmra.mrb[16].mxu1 %v1711_v43 }
  0x47   : > { %838 = vmatprep.mubr.bf16.mxu0 %v1712_v44  ;;  %1606 = vmatprep.mubr.bf16.mxu1 %v1714_v45 }
  0x4e   : > { %839 = vmatmul.mubr.bf16.gmra.mrb[20].mxu0 %v1715_v46  ;;  %1607 = vmatmul.mubr.bf16.gmra.mrb[20].mxu1 %v1716_v47 }
  0x4f   : > { %846 = vmatprep.mubr.bf16.mxu0 %v1717_v48  ;;  %1610 = vmatprep.mubr.bf16.mxu1 %v1719_v49 }
  0x56   : > { %847 = vmatmul.mubr.bf16.gmra.mrb[24].mxu0 %v1720_v50  ;;  %1611 = vmatmul.mubr.bf16.gmra.mrb[24].mxu1 %v1721_v51 }
  0x57   : > { %854 = vmatprep.mubr.bf16.mxu0 %v1722_v52  ;;  %1614 = vmatprep.mubr.bf16.mxu1 %v1724_v53 }
  0x5e   : > { %855 = vmatmul.mubr.bf16.gmra.mrb[28].mxu0 %v1725_v54  ;;  %1615 = vmatmul.mubr.bf16.gmra.mrb[28].mxu1 %v1726_v55 }
  0x5f   : > { %862 = vmatprep.mubr.bf16.mxu0 %v1727_v56  ;;  %1618 = vmatprep.mubr.bf16.mxu1 %v1729_v57 }
  0x66   : > { %863 = vmatmul.mubr.bf16.gmra.mrb[32].mxu0 %v1730_v58  ;;  %1619 = vmatmul.mubr.bf16.gmra.mrb[32].mxu1 %v1731_v59  ;;  %v1945_v58 = vld [vmem:[%s2153_s2] ss:$0 sm:$0xff] }
  0x67   : > { %870 = vmatprep.mubr.bf16.mxu0 %v1732_v60  ;;  %1622 = vmatprep.mubr.bf16.mxu1 %v1734_v61 }
  0x6e   : > { %871 = vmatmul.mubr.bf16.gmra.mrb[36].mxu0 %v1735_v62  ;;  %1623 = vmatmul.mubr.bf16.gmra.mrb[36].mxu1 %v1736_v63  ;;  %v1957_v62 = vld [vmem:[%s2154_s3] ss:$0 sm:$0xff] }
  0x6f   : > { %878 = vmatprep.mubr.bf16.mxu0 %v1737_v0  ;;  %1626 = vmatprep.mubr.bf16.mxu1 %v1739_v1 }
  0x76   : > { %879 = vmatmul.mubr.bf16.gmra.mrb[40].mxu0 %v1740_v2  ;;  %1627 = vmatmul.mubr.bf16.gmra.mrb[40].mxu1 %v1741_v3 }
  0x77   : > { %886 = vmatprep.mubr.bf16.mxu0 %v1742_v4  ;;  %1630 = vmatprep.mubr.bf16.mxu1 %v1744_v5 }
  0x7e   : > { %887 = vmatmul.mubr.bf16.gmra.mrb[44].mxu0 %v1745_v6  ;;  %1631 = vmatmul.mubr.bf16.gmra.mrb[44].mxu1 %v1746_v7  ;;  %v1168_v7 = vld [vmem:[%s1952_s7 + $0x10] sm:$0xff] }
  0xf9   : > { %v1466_v8 = vpop.f32.mrb[0].mxu0  ;;  %v1538_v9 = vpop.f32.mrb[0].mxu1 }
  0xfa   : > { %v1467_v10 = vpop.f32.mrb[1].mxu0  ;;  %v1539_v11 = vpop.f32.mrb[1].mxu1 }
  0xfb   : > { %v1468_v12 = vadd.f32 %v1467_v10, %v1466_v8  ;;  %v1921_v13 = vadd.f32 %v1539_v11, %v1538_v9  ;;  %v1469_v14 = vpop.f32.mrb[2].mxu0  ;;  %v1541_v15 = vpop.f32.mrb[2].mxu1 }
  0xfc   : > { %v1470_v16 = vpop.f32.mrb[3].mxu0  ;;  %v1542_v17 = vpop.f32.mrb[3].mxu1 }
  0xfd   : > { %v1471_v18 = vadd.f32 %v1470_v16, %v1469_v14  ;;  %v1923_v19 = vadd.f32 %v1542_v17, %v1541_v15  ;;  %v1166_v14 = vld [vmem:[%s1952_s7] sm:$0xff]  ;;  %v1169_v16 = vld [vmem:[%s1952_s7 + $0x18] sm:$0xff] }
 0x101   : > { %v1472_v20 = vpop.f32.mrb[4].mxu0  ;;  %v1544_v21 = vpop.f32.mrb[4].mxu1 }
 0x102   : > { %v1473_v22 = vpop.f32.mrb[5].mxu0  ;;  %v1545_v23 = vpop.f32.mrb[5].mxu1 }
 0x103   : > { %v1474_v24 = vadd.f32 %v1473_v22, %v1472_v20  ;;  %v1925_v25 = vadd.f32 %v1545_v23, %v1544_v21  ;;  %v1475_v26 = vpop.f32.mrb[6].mxu0  ;;  %v1547_v27 = vpop.f32.mrb[6].mxu1  ;;  %v1167_v22 = vld [vmem:[%s1952_s7 + $0x8] sm:$0xff] }
 0x104   : > { %v1476_v28 = vpop.f32.mrb[7].mxu0  ;;  %v1548_v29 = vpop.f32.mrb[7].mxu1 }
 0x105   : > { %v1477_v30 = vadd.f32 %v1476_v28, %v1475_v26  ;;  %v1927_v31 = vadd.f32 %v1548_v29, %v1547_v27 }
 0x109   : > { %v1478_v32 = vpop.f32.mrb[8].mxu0  ;;  %v1550_v33 = vpop.f32.mrb[8].mxu1 }
 0x10a   : > { %v1479_v34 = vpop.f32.mrb[9].mxu0  ;;  %v1551_v35 = vpop.f32.mrb[9].mxu1 }
 0x10b   : > { %v1929_v36 = vadd.f32 %v1479_v34, %v1478_v32  ;;  %v1931_v37 = vadd.f32 %v1551_v35, %v1550_v33  ;;  %v1481_v38 = vpop.f32.mrb[10].mxu0  ;;  %v1553_v39 = vpop.f32.mrb[10].mxu1 }
 0x10c   : > { %v1482_v40 = vpop.f32.mrb[11].mxu0  ;;  %v1554_v41 = vpop.f32.mrb[11].mxu1 }
 0x10d   : > { %v1933_v42 = vadd.f32 %v1482_v40, %v1481_v38  ;;  %v1935_v43 = vadd.f32 %v1554_v41, %v1553_v39 }
 0x111   : > { %v1484_v44 = vpop.f32.mrb[12].mxu0  ;;  %v1556_v45 = vpop.f32.mrb[12].mxu1 }
 0x112   : > { %v1485_v46 = vpop.f32.mrb[13].mxu0  ;;  %v1557_v47 = vpop.f32.mrb[13].mxu1 }
 0x113   : > { %v1486_v48 = vadd.f32 %v1485_v46, %v1484_v44  ;;  %v1937_v49 = vadd.f32 %v1557_v47, %v1556_v45  ;;  %v1487_v50 = vpop.f32.mrb[14].mxu0  ;;  %v1559_v51 = vpop.f32.mrb[14].mxu1 }
 0x114   : > { %v1488_v52 = vpop.f32.mrb[15].mxu0  ;;  %v1560_v53 = vpop.f32.mrb[15].mxu1 }
 0x115   : > { %v1489_v54 = vadd.f32 %v1488_v52, %v1487_v50  ;;  %v1939_v55 = vadd.f32 %v1560_v53, %v1559_v51  ;;  %v1172_v50 = vld [vmem:[%s1952_s7 + $0x30] sm:$0xff] }
 0x119   : > { %v1490_v56 = vpop.f32.mrb[16].mxu0  ;;  %v1604_v57 = vpop.f32.mrb[16].mxu1 }
 0x11a   : > { %v970_v59 = vadd.f32 %v1604_v57, %v1474_v24  ;;  %v1491_v60 = vpop.f32.mrb[17].mxu0  ;;  %v961_v61 = vpop.f32.mrb[17].mxu1 }
 0x11b   : > { %v1959_v63 = vadd.f32 %v1491_v60, %v1490_v56  ;;  %v962_v0 = vadd.f32 %v1468_v12, %v961_v61  ;;  %v1493_v1 = vpop.f32.mrb[18].mxu0  ;;  %v1605_v2 = vpop.f32.mrb[18].mxu1  ;;  %v1170_v56 = vld [vmem:[%s1952_s7 + $0x20] sm:$0xff] }
 0x11c   : > { %v1097_v3 = vmul.f32 %v1945_v58, %v970_v59  ;;  %v973_v4 = vadd.f32 %v1605_v2, %v1477_v30  ;;  %v1494_v5 = vpop.f32.mrb[19].mxu0  ;;  %v964_v6 = vpop.f32.mrb[19].mxu1  ;;  %v1173_v59 = vld [vmem:[%s1952_s7 + $0x38] sm:$0xff] }
 0x11d   : > { %v1095_v8 = vmul.f32 %v1945_v58, %v962_v0  ;;  %v1964_v9 = vadd.f32 %v1494_v5, %v1493_v1  ;;  %v965_v10 = vadd.f32 %v1471_v18, %v964_v6  ;;  %v1171_v1 = vld [vmem:[%s1952_s7 + $0x28] sm:$0xff] }
 0x11e   : > { %v1136_v11 = vadd.f32 %v1957_v62, %v1097_v3  ;;  %v1098_v12 = vmul.f32 %v1945_v58, %v973_v4 }
 0x11f   : > { %v1134_v15 = vadd.f32 %v1957_v62, %v1095_v8  ;;  %v1096_v17 = vmul.f32 %v1945_v58, %v965_v10 }
 0x120   : > { %v1200_v20 = vadd.f32 %v1168_v7, %v1136_v11  ;;  %v1137_v21 = vadd.f32 %v1957_v62, %v1098_v12 }
 0x121   : > { %v1198_v18 = vadd.f32 %v1166_v14, %v1134_v15  ;;  %v1135_v23 = vadd.f32 %v1957_v62, %v1096_v17  ;;  %v1496_v24 = vpop.f32.mrb[20].mxu0  ;;  %v1608_v26 = vpop.f32.mrb[20].mxu1 }
 0x122   : > { %v1232_v27 = vmax.f32 %v1200_v20, 0.0  ;;  %v1201_v28 = vadd.f32 %v1169_v16, %v1137_v21  ;;  %v986_v29 = vadd.f32 %v1608_v26, %v1486_v48  ;;  %v1497_v30 = vpop.f32.mrb[21].mxu0  ;;  %v977_v32 = vpop.f32.mrb[21].mxu1  ;;  %v1176_v26 = vld [vmem:[%s1952_s7 + $0x50] sm:$0xff] }
 0x123   : > { %v1230_v33 = vmax.f32 %v1198_v18, 0.0  ;;  %v1199_v34 = vadd.f32 %v1167_v22, %v1135_v23  ;;  %v1498_v35 = vadd.f32 %v1497_v30, %v1496_v24  ;;  %v978_v38 = vadd.f32 %v1929_v36, %v977_v32  ;;  %v1499_v39 = vpop.f32.mrb[22].mxu0  ;;  %v1609_v40 = vpop.f32.mrb[22].mxu1  ;;  %v1174_v30 = vld [vmem:[%s1952_s7 + $0x40] sm:$0xff] }
 0x124   : > { %1265 = vst.msk [vmem:[%s1979_s12 + $0x10] sm:$0xff] %vm1262_vm0, %v1232_v27  ;;  %v1233_v41 = vmax.f32 %v1201_v28, 0.0  ;;  %v1101_v44 = vmul.f32 %v1945_v58, %v986_v29  ;;  %v989_v45 = vadd.f32 %v1609_v40, %v1489_v54  ;;  %v1500_v46 = vpop.f32.mrb[23].mxu0  ;;  %v980_v47 = vpop.f32.mrb[23].mxu1  ;;  %v1175_v40 = vld [vmem:[%s1952_s7 + $0x48] sm:$0xff] }
 0x125   : > { %1263 = vst.msk [vmem:[%s1979_s12] sm:$0xff] %vm1262_vm0, %v1230_v33  ;;  %v1231_v48 = vmax.f32 %v1199_v34, 0.0  ;;  %v1099_v36 = vmul.f32 %v1945_v58, %v978_v38  ;;  %v1501_v51 = vadd.f32 %v1500_v46, %v1499_v39  ;;  %v981_v52 = vadd.f32 %v1933_v42, %v980_v47  ;;  %v1177_v34 = vld [vmem:[%s1952_s7 + $0x58] sm:$0xff] }
 0x126   : > { %1266 = vst.msk [vmem:[%s1979_s12 + $0x18] sm:$0xff] %vm1262_vm0, %v1233_v41  ;;  %v1140_v53 = vadd.f32 %v1957_v62, %v1101_v44  ;;  %v1102_v57 = vmul.f32 %v1945_v58, %v989_v45 }
 0x127   : > { %1264 = vst.msk [vmem:[%s1979_s12 + $0x8] sm:$0xff] %vm1262_vm0, %v1231_v48  ;;  %v1138_v54 = vadd.f32 %v1957_v62, %v1099_v36  ;;  %v1100_v60 = vmul.f32 %v1945_v58, %v981_v52 }
 0x128   : > { %v1204_v61 = vadd.f32 %v1172_v50, %v1140_v53  ;;  %v1141_v0 = vadd.f32 %v1957_v62, %v1102_v57 }
 0x129   : > { %v1202_v42 = vadd.f32 %v1170_v56, %v1138_v54  ;;  %v1139_v2 = vadd.f32 %v1957_v62, %v1100_v60  ;;  %v1502_v3 = vpop.f32.mrb[24].mxu0  ;;  %v1612_v4 = vpop.f32.mrb[24].mxu1 }
 0x12a   : > { %v1236_v5 = vmax.f32 %v1204_v61, 0.0  ;;  %v1205_v6 = vadd.f32 %v1173_v59, %v1141_v0  ;;  %v1002_v7 = vadd.f32 %v1612_v4, %v1498_v35  ;;  %v1503_v8 = vpop.f32.mrb[25].mxu0  ;;  %v993_v10 = vpop.f32.mrb[25].mxu1 }
 0x12b   : > { %v1234_v11 = vmax.f32 %v1202_v42, 0.0  ;;  %v1203_v14 = vadd.f32 %v1171_v1, %v1139_v2  ;;  %v1504_v12 = vadd.f32 %v1503_v8, %v1502_v3  ;;  %v994_v15 = vadd.f32 %v1959_v63, %v993_v10  ;;  %v1505_v16 = vpop.f32.mrb[26].mxu0  ;;  %v1613_v17 = vpop.f32.mrb[26].mxu1  ;;  %v1178_v2 = vld [vmem:[%s1952_s7 + $0x60] sm:$0xff] }
 0x12c   : > { %1269 = vst.msk [vmem:[%s1979_s12 + $0x30] sm:$0xff] %vm1262_vm0, %v1236_v5  ;;  %v1237_v20 = vmax.f32 %v1205_v6, 0.0  ;;  %v1105_v21 = vmul.f32 %v1945_v58, %v1002_v7  ;;  %v1005_v22 = vadd.f32 %v1613_v17, %v1501_v51  ;;  %v1506_v18 = vpop.f32.mrb[27].mxu0  ;;  %v996_v23 = vpop.f32.mrb[27].mxu1  ;;  %v1180_v7 = vld [vmem:[%s1952_s7 + $0x70] sm:$0xff]  ;;  %v1181_v17 = vld [vmem:[%s1952_s7 + $0x78] sm:$0xff] }
 0x12d   : > { %1267 = vst.msk [vmem:[%s1979_s12 + $0x20] sm:$0xff] %vm1262_vm0, %v1234_v11  ;;  %v1235_v24 = vmax.f32 %v1203_v14, 0.0  ;;  %v1103_v63 = vmul.f32 %v1945_v58, %v994_v15  ;;  %v1507_v27 = vadd.f32 %v1506_v18, %v1505_v16  ;;  %v997_v28 = vadd.f32 %v1964_v9, %v996_v23 }
 0x12e   : > { %1270 = vst.msk [vmem:[%s1979_s12 + $0x38] sm:$0xff] %vm1262_vm0, %v1237_v20  ;;  %v1144_v29 = vadd.f32 %v1957_v62, %v1105_v21  ;;  %v1106_v32 = vmul.f32 %v1945_v58, %v1005_v22 }
 0x12f   : > { %1268 = vst.msk [vmem:[%s1979_s12 + $0x28] sm:$0xff] %vm1262_vm0, %v1235_v24  ;;  %v1142_v33 = vadd.f32 %v1957_v62, %v1103_v63  ;;  %v1104_v35 = vmul.f32 %v1945_v58, %v997_v28 }
 0x130   : > { %v1208_v38 = vadd.f32 %v1176_v26, %v1144_v29  ;;  %v1145_v39 = vadd.f32 %v1957_v62, %v1106_v32 }
 0x131   : > { %v1206_v9 = vadd.f32 %v1174_v30, %v1142_v33  ;;  %v1143_v41 = vadd.f32 %v1957_v62, %v1104_v35  ;;  %v1508_v44 = vpop.f32.mrb[28].mxu0  ;;  %v1616_v45 = vpop.f32.mrb[28].mxu1 }
 0x132   : > { %v1240_v46 = vmax.f32 %v1208_v38, 0.0  ;;  %v1209_v47 = vadd.f32 %v1177_v34, %v1145_v39  ;;  %v1509_v48 = vpop.f32.mrb[29].mxu0  ;;  %v1009_v50 = vpop.f32.mrb[29].mxu1 }
 0x133   : > { %v1238_v36 = vmax.f32 %v1206_v9, 0.0  ;;  %v1207_v51 = vadd.f32 %v1175_v40, %v1143_v41  ;;  %v1510_v52 = vadd.f32 %v1509_v48, %v1508_v44  ;;  %v1010_v53 = vadd.f32 %v1504_v12, %v1009_v50  ;;  %v1511_v56 = vpop.f32.mrb[30].mxu0  ;;  %v1617_v57 = vpop.f32.mrb[30].mxu1  ;;  %v1179_v12 = vld [vmem:[%s1952_s7 + $0x68] sm:$0xff]  ;;  %v1182_v41 = vld [vmem:[%s1952_s7 + $0x80] sm:$0xff] }
 0x134   : > { %1273 = vst.msk [vmem:[%s1979_s12 + $0x50] sm:$0xff] %vm1262_vm0, %v1240_v46  ;;  %v1241_v54 = vmax.f32 %v1209_v47, 0.0  ;;  %v1512_v59 = vpop.f32.mrb[31].mxu0  ;;  %v1012_v60 = vpop.f32.mrb[31].mxu1  ;;  %v1183_v48 = vld [vmem:[%s1952_s7 + $0x88] sm:$0xff] }
 0x135   : > { %1271 = vst.msk [vmem:[%s1979_s12 + $0x40] sm:$0xff] %vm1262_vm0, %v1238_v36  ;;  %v1239_v61 = vmax.f32 %v1207_v51, 0.0  ;;  %v1018_v0 = vadd.f32 %v1616_v45, %v1510_v52  ;;  %v1107_v1 = vmul.f32 %v1945_v58, %v1010_v53  ;;  %v1513_v42 = vadd.f32 %v1512_v59, %v1511_v56 }
 0x136   : > { %1274 = vst.msk [vmem:[%s1979_s12 + $0x58] sm:$0xff] %vm1262_vm0, %v1241_v54  ;;  %v1013_v3 = vadd.f32 %v1507_v27, %v1012_v60 }
 0x137   : > { %1272 = vst.msk [vmem:[%s1979_s12 + $0x48] sm:$0xff] %vm1262_vm0, %v1239_v61  ;;  %v1109_v4 = vmul.f32 %v1945_v58, %v1018_v0  ;;  %v1146_v5 = vadd.f32 %v1957_v62, %v1107_v1  ;;  %v1021_v6 = vadd.f32 %v1617_v57, %v1513_v42 }
 0x138   : > { %v1108_v8 = vmul.f32 %v1945_v58, %v1013_v3 }
 0x139   : > { %v1148_v10 = vadd.f32 %v1957_v62, %v1109_v4  ;;  %v1210_v11 = vadd.f32 %v1178_v2, %v1146_v5  ;;  %v1110_v14 = vmul.f32 %v1945_v58, %v1021_v6  ;;  %v1514_v15 = vpop.f32.mrb[32].mxu0  ;;  %v1620_v16 = vpop.f32.mrb[32].mxu1  ;;  %v1184_v4 = vld [vmem:[%s1952_s7 + $0x90] sm:$0xff] }
 0x13a   : > { %v1147_v20 = vadd.f32 %v1957_v62, %v1108_v8  ;;  %v1515_v21 = vpop.f32.mrb[33].mxu0  ;;  %v1025_v22 = vpop.f32.mrb[33].mxu1 }
 0x13b   : > { %v1212_v18 = vadd.f32 %v1180_v7, %v1148_v10  ;;  %v1242_v23 = vmax.f32 %v1210_v11, 0.0  ;;  %v1149_v24 = vadd.f32 %v1957_v62, %v1110_v14  ;;  %v1516_v26 = vadd.f32 %v1515_v21, %v1514_v15  ;;  %v1517_v63 = vpop.f32.mrb[34].mxu0  ;;  %v1621_v27 = vpop.f32.mrb[34].mxu1  ;;  %v1185_v10 = vld [vmem:[%s1952_s7 + $0x98] sm:$0xff] }
 0x13c   : > { %v1211_v28 = vadd.f32 %v1179_v12, %v1147_v20  ;;  %v1518_v29 = vpop.f32.mrb[35].mxu0  ;;  %v1028_v30 = vpop.f32.mrb[35].mxu1 }
 0x13d   : > { %v1244_v32 = vmax.f32 %v1212_v18, 0.0  ;;  %1275 = vst.msk [vmem:[%s1979_s12 + $0x60] sm:$0xff] %vm1262_vm0, %v1242_v23  ;;  %v1213_v33 = vadd.f32 %v1181_v17, %v1149_v24  ;;  %v1026_v34 = vadd.f32 %v1516_v26, %v1025_v22  ;;  %v1519_v35 = vadd.f32 %v1518_v29, %v1517_v63 }
 0x13e   : > { %v1243_v38 = vmax.f32 %v1211_v28, 0.0 }
 0x13f   : > { %1277 = vst.msk [vmem:[%s1979_s12 + $0x70] sm:$0xff] %vm1262_vm0, %v1244_v32  ;;  %v1245_v39 = vmax.f32 %v1213_v33, 0.0  ;;  %v1111_v40 = vmul.f32 %v1945_v58, %v1026_v34  ;;  %v1029_v9 = vadd.f32 %v1519_v35, %v1028_v30  ;;  %v1190_v30 = vld [vmem:[%s1952_s7 + $0xc0] sm:$0xff] }
 0x140   : > { %1276 = vst.msk [vmem:[%s1979_s12 + $0x68] sm:$0xff] %vm1262_vm0, %v1243_v38 }
 0x141   : > { %1278 = vst.msk [vmem:[%s1979_s12 + $0x78] sm:$0xff] %vm1262_vm0, %v1245_v39  ;;  %v1150_v44 = vadd.f32 %v1957_v62, %v1111_v40  ;;  %v1112_v45 = vmul.f32 %v1945_v58, %v1029_v9  ;;  %v1520_v46 = vpop.f32.mrb[36].mxu0  ;;  %v2058_v47 = vpop.f32.mrb[36].mxu1  ;;  %v1193_v39 = vld [vmem:[%s1952_s7 + $0xd8] sm:$0xff]  ;;  %v1186_v9 = vld [vmem:[%s1952_s7 + $0xa0] sm:$0xff] }
 0x142   : > { %v1521_v50 = vpop.f32.mrb[37].mxu0  ;;  %v1041_v36 = vpop.f32.mrb[37].mxu1 }
 0x143   : > { %v1214_v51 = vadd.f32 %v1182_v41, %v1150_v44  ;;  %v1151_v52 = vadd.f32 %v1957_v62, %v1112_v45  ;;  %v1522_v53 = vadd.f32 %v1521_v50, %v1520_v46  ;;  %v1523_v56 = vpop.f32.mrb[38].mxu0  ;;  %v2062_v57 = vpop.f32.mrb[38].mxu1 }
 0x144   : > { %v1524_v54 = vpop.f32.mrb[39].mxu0  ;;  %v1044_v59 = vpop.f32.mrb[39].mxu1 }
 0x145   : > { %v1246_v60 = vmax.f32 %v1214_v51, 0.0  ;;  %v1215_v61 = vadd.f32 %v1183_v48, %v1151_v52  ;;  %v1034_v0 = vadd.f32 %v1620_v16, %v1522_v53  ;;  %v1525_v1 = vadd.f32 %v1524_v54, %v1523_v56  ;;  %v1191_v48 = vld [vmem:[%s1952_s7 + $0xc8] sm:$0xff] }
 0x147   : > { %1279 = vst.msk [vmem:[%s1979_s12 + $0x80] sm:$0xff] %vm1262_vm0, %v1246_v60  ;;  %v1247_v42 = vmax.f32 %v1215_v61, 0.0  ;;  %v1113_v2 = vmul.f32 %v1945_v58, %v1034_v0  ;;  %v1037_v3 = vadd.f32 %v1621_v27, %v1525_v1  ;;  %v1192_v27 = vld [vmem:[%s1952_s7 + $0xd0] sm:$0xff]  ;;  %v1187_v0 = vld [vmem:[%s1952_s7 + $0xa8] sm:$0xff] }
 0x149   : > { %1280 = vst.msk [vmem:[%s1979_s12 + $0x88] sm:$0xff] %vm1262_vm0, %v1247_v42  ;;  %v1152_v5 = vadd.f32 %v1957_v62, %v1113_v2  ;;  %v1114_v6 = vmul.f32 %v1945_v58, %v1037_v3  ;;  %v1526_v7 = vpop.f32.mrb[40].mxu0  ;;  %v1628_v8 = vpop.f32.mrb[40].mxu1 }
 0x14a   : > { %v1066_v11 = vadd.f32 %v1628_v8, %v1925_v25  ;;  %v1527_v14 = vpop.f32.mrb[41].mxu0  ;;  %v1057_v12 = vpop.f32.mrb[41].mxu1 }
 0x14b   : > { %v1216_v15 = vadd.f32 %v1184_v4, %v1152_v5  ;;  %v1153_v16 = vadd.f32 %v1957_v62, %v1114_v6  ;;  %v1528_v17 = vadd.f32 %v1527_v14, %v1526_v7  ;;  %v1058_v20 = vadd.f32 %v1921_v13, %v1057_v12  ;;  %v1529_v21 = vpop.f32.mrb[42].mxu0  ;;  %v1629_v22 = vpop.f32.mrb[42].mxu1 }
 0x14c   : > { %v1121_v18 = vmul.f32 %v1945_v58, %v1066_v11  ;;  %v1069_v23 = vadd.f32 %v1629_v22, %v1927_v31  ;;  %v1530_v24 = vpop.f32.mrb[43].mxu0  ;;  %v1060_v26 = vpop.f32.mrb[43].mxu1 }
 0x14d   : > { %v1248_v25 = vmax.f32 %v1216_v15, 0.0  ;;  %v1217_v63 = vadd.f32 %v1185_v10, %v1153_v16  ;;  %v1042_v28 = vadd.f32 %v1528_v17, %v1041_v36  ;;  %v1119_v29 = vmul.f32 %v1945_v58, %v1058_v20 }
 0x14e   : > { %v1160_v13 = vadd.f32 %v1957_v62, %v1121_v18  ;;  %v1122_v32 = vmul.f32 %v1945_v58, %v1069_v23  ;;  %v1531_v33 = vadd.f32 %v1530_v24, %v1529_v21  ;;  %v1061_v31 = vadd.f32 %v1923_v19, %v1060_v26  ;;  %v1188_v24 = vld [vmem:[%s1952_s7 + $0xb0] sm:$0xff] }
 0x14f   : > { %1281 = vst.msk [vmem:[%s1979_s12 + $0x90] sm:$0xff] %vm1262_vm0, %v1248_v25  ;;  %v1249_v34 = vmax.f32 %v1217_v63, 0.0  ;;  %v1115_v35 = vmul.f32 %v1945_v58, %v1042_v28  ;;  %v1158_v38 = vadd.f32 %v1957_v62, %v1119_v29  ;;  %v1197_v25 = vld [vmem:[%s1952_s7 + $0xf8] sm:$0xff] }
 0x150   : > { %v1224_v40 = vadd.f32 %v1192_v27, %v1160_v13  ;;  %v1161_v41 = vadd.f32 %v1957_v62, %v1122_v32  ;;  %v1045_v44 = vadd.f32 %v1531_v33, %v1044_v59  ;;  %v1120_v45 = vmul.f32 %v1945_v58, %v1061_v31  ;;  %v1195_v32 = vld [vmem:[%s1952_s7 + $0xe8] sm:$0xff] }
 0x151   : > { %1282 = vst.msk [vmem:[%s1979_s12 + $0x98] sm:$0xff] %vm1262_vm0, %v1249_v34  ;;  %v1154_v19 = vadd.f32 %v1957_v62, %v1115_v35  ;;  %v1222_v46 = vadd.f32 %v1190_v30, %v1158_v38  ;;  %v1532_v50 = vpop.f32.mrb[44].mxu0  ;;  %v1632_v36 = vpop.f32.mrb[44].mxu1  ;;  %v1189_v34 = vld [vmem:[%s1952_s7 + $0xb8] sm:$0xff] }
 0x152   : > { %v1256_v51 = vmax.f32 %v1224_v40, 0.0  ;;  %v1225_v52 = vadd.f32 %v1193_v39, %v1161_v41  ;;  %v1116_v53 = vmul.f32 %v1945_v58, %v1045_v44  ;;  %v1159_v56 = vadd.f32 %v1957_v62, %v1120_v45  ;;  %v1533_v54 = vpop.f32.mrb[45].mxu0  ;;  %v1073_v59 = vpop.f32.mrb[45].mxu1 }
 0x153   : > { %v1218_v60 = vadd.f32 %v1186_v9, %v1154_v19  ;;  %v1254_v61 = vmax.f32 %v1222_v46, 0.0  ;;  %v1082_v1 = vadd.f32 %v1632_v36, %v1937_v49  ;;  %v1534_v42 = vadd.f32 %v1533_v54, %v1532_v50  ;;  %v1535_v2 = vpop.f32.mrb[46].mxu0  ;;  %v1633_v3 = vpop.f32.mrb[46].mxu1 }
 0x154   : > { %1289 = vst.msk [vmem:[%s1979_s12 + $0xd0] sm:$0xff] %vm1262_vm0, %v1256_v51  ;;  %v1257_v4 = vmax.f32 %v1225_v52, 0.0  ;;  %v1155_v5 = vadd.f32 %v1957_v62, %v1116_v53  ;;  %v1223_v6 = vadd.f32 %v1191_v48, %v1159_v56  ;;  %v1074_v7 = vadd.f32 %v1931_v37, %v1073_v59  ;;  %v1536_v8 = vpop.f32.mrb[47].mxu0  ;;  %v1076_v10 = vpop.f32.mrb[47].mxu1  ;;  %v1196_v37 = vld [vmem:[%s1952_s7 + $0xf0] sm:$0xff] }
 0x155   : > { %v1250_v11 = vmax.f32 %v1218_v60, 0.0  ;;  %1287 = vst.msk [vmem:[%s1979_s12 + $0xc0] sm:$0xff] %vm1262_vm0, %v1254_v61  ;;  %v1125_v49 = vmul.f32 %v1945_v58, %v1082_v1  ;;  %v1050_v14 = vadd.f32 %v2058_v47, %v1534_v42  ;;  %v1085_v12 = vadd.f32 %v1633_v3, %v1939_v55  ;;  %v1194_v47 = vld [vmem:[%s1952_s7 + $0xe0] sm:$0xff] }
 0x156   : > { %1290 = vst.msk [vmem:[%s1979_s12 + $0xd8] sm:$0xff] %vm1262_vm0, %v1257_v4  ;;  %v1219_v15 = vadd.f32 %v1187_v0, %v1155_v5  ;;  %v1255_v16 = vmax.f32 %v1223_v6, 0.0  ;;  %v1123_v17 = vmul.f32 %v1945_v58, %v1074_v7  ;;  %v1537_v20 = vadd.f32 %v1536_v8, %v1535_v2 }
 0x157   : > { %1283 = vst.msk [vmem:[%s1979_s12 + $0xa0] sm:$0xff] %vm1262_vm0, %v1250_v11  ;;  %v1164_v21 = vadd.f32 %v1957_v62, %v1125_v49  ;;  %v1117_v22 = vmul.f32 %v1945_v58, %v1050_v14  ;;  %v1126_v55 = vmul.f32 %v1945_v58, %v1085_v12  ;;  %v1077_v18 = vadd.f32 %v1935_v43, %v1076_v10 }
 0x158   : > { %v1251_v23 = vmax.f32 %v1219_v15, 0.0  ;;  %1288 = vst.msk [vmem:[%s1979_s12 + $0xc8] sm:$0xff] %vm1262_vm0, %v1255_v16  ;;  %v1162_v26 = vadd.f32 %v1957_v62, %v1123_v17  ;;  %v1053_v63 = vadd.f32 %v2062_v57, %v1537_v20 }
 0x159   : > { %v1228_v27 = vadd.f32 %v1196_v37, %v1164_v21  ;;  %v1156_v28 = vadd.f32 %v1957_v62, %v1117_v22  ;;  %v1165_v29 = vadd.f32 %v1957_v62, %v1126_v55  ;;  %v1124_v13 = vmul.f32 %v1945_v58, %v1077_v18 }
 0x15a   : > { %1284 = vst.msk [vmem:[%s1979_s12 + $0xa8] sm:$0xff] %vm1262_vm0, %v1251_v23  ;;  %v1226_v43 = vadd.f32 %v1194_v47, %v1162_v26  ;;  %v1118_v30 = vmul.f32 %v1945_v58, %v1053_v63 }
 0x15b   : > { %v1260_v33 = vmax.f32 %v1228_v27, 0.0  ;;  %v1220_v31 = vadd.f32 %v1188_v24, %v1156_v28  ;;  %v1229_v57 = vadd.f32 %v1197_v25, %v1165_v29  ;;  %v1163_v35 = vadd.f32 %v1957_v62, %v1124_v13 }
 0x15c   : > { %v1258_v38 = vmax.f32 %v1226_v43, 0.0  ;;  %v1157_v39 = vadd.f32 %v1957_v62, %v1118_v30 }
 0x15d   : > { %1293 = vst.msk [vmem:[%s1979_s12 + $0xf0] sm:$0xff] %vm1262_vm0, %v1260_v33  ;;  %v1252_v40 = vmax.f32 %v1220_v31, 0.0  ;;  %v1261_v9 = vmax.f32 %v1229_v57, 0.0  ;;  %v1227_v41 = vadd.f32 %v1195_v32, %v1163_v35 }
 0x15e   : > { %1291 = vst.msk [vmem:[%s1979_s12 + $0xe0] sm:$0xff] %vm1262_vm0, %v1258_v38  ;;  %v1221_v58 = vadd.f32 %v1189_v34, %v1157_v39 }
 0x15f   : > { %1285 = vst.msk [vmem:[%s1979_s12 + $0xb0] sm:$0xff] %vm1262_vm0, %v1252_v40  ;;  %1294 = vst.msk [vmem:[%s1979_s12 + $0xf8] sm:$0xff] %vm1262_vm0, %v1261_v9  ;;  %v1259_v44 = vmax.f32 %v1227_v41, 0.0 }
 0x160   : > { %v1253_v45 = vmax.f32 %v1221_v58, 0.0 }
 0x161   : > { %1292 = vst.msk [vmem:[%s1979_s12 + $0xe8] sm:$0xff] %vm1262_vm0, %v1259_v44 }
 0x162   : > { %1286 = vst.msk [vmem:[%s1979_s12 + $0xb8] sm:$0xff] %vm1262_vm0, %v1253_v45 }
 0x163 PF: > { %s15_s18 = sadd.s32 1, %s1753_s18  }
 0x164   : > { %p12_p4 = scmp.ge.s32.totalorder %s15_s18, 4  }
 0x166   :  { %14 = sbr.rel (!%p12_p4) target bundleno = 1 (0x1), region = 73 }

// kernel: resnet_forward.12
= control target key start
LH: loop header
LB: loop body
LE: loop exit
PB: predicated region body
PF: predicated region fallthrough
CT: control target
= control target key end

     0   :  { %s966_s18 = smov 0   ;;  %s1131_s0 = inlined_call_operand.vmem [shape: bf16[128,384], index: 0, kind: input, shape index: {}]   ;;  %s1132_s1 = inlined_call_operand.vmem [shape: bf16[384,128], index: 1, kind: input, shape index: {}]   ;;  %s1133_s2 = inlined_call_operand.vmem [shape: f32[1,128], index: 2, kind: input, shape index: {}]   ;;  %s1134_s3 = inlined_call_operand.vmem [shape: f32[1,128], index: 3, kind: input, shape index: {}]   ;;  %s1135_s4 = inlined_call_operand.vmem [shape: f32[1,128], index: 4, kind: input, shape index: {}]   ;;  %s1136_s5 = inlined_call_operand.vmem [shape: f32[128,128], index: 5, kind: output, shape index: {}]  }
   0x1 LB: > { %s752_s19 = sadd.s32 4294967295, %s933_s18   ;;  %p756_p0 = scmp.ge.s32.totalorder %s933_s18, 1  ;;  %s933_s18 = sphi %s966_s18, %s15_s18  }
   0x2   : > { %p189_p1 = scmp.lt.s32.totalorder %s933_s18, 3 }
   0x4   : > { %p190_p2 = pnand %p756_p0, %p189_p1 }
   0x5   : > { %v887_v0 = vld [vmem:[%s1132_s1 + $0x40] sm:$0xff] (!%p190_p2)   ;;  %v890_v3 = vld [vmem:[%s1132_s1 + $0x48] sm:$0xff] (!%p190_p2)   ;;  %v893_v6 = vld [vmem:[%s1132_s1 + $0x50] sm:$0xff] (!%p190_p2)   ;;  %s757_s11 = sshll.u32 (!%p190_p2), %s752_s19, 3  ;;  %v675_v36 = vlaneseq (!%p190_p2)  ;;  %v935_v45 = vmov (!%p190_p2), 0  }
   0x6   : > { %193 = sbr.rel (%p190_p2) target bundleno = 289 (0x121), region = 40  ;;  %v888_v1 = vld [vmem:[%s1132_s1] sm:$0xff] (!%p190_p2)   ;;  %801 = vmatprep.subr.bf16.mxu0 (!%p190_p2), %v887_v0  ;;  %v891_v4 = vld [vmem:[%s1132_s1 + $0x8] sm:$0xff] (!%p190_p2)   ;;  %v894_v7 = vld [vmem:[%s1132_s1 + $0x10] sm:$0xff] (!%p190_p2)   ;;  %p219_p3 = scmp.lt.s32.totalorder (!%p190_p2), %s757_s11, 15 }
   0x7   : > { %v889_v2 = vld [vmem:[%s1132_s1 + $0x80] sm:$0xff] (!%p190_p2)   ;;  %802 = vmatpush3.bf16.msra.mxu0 (!%p190_p2), %v888_v1  ;;  %v892_v5 = vld [vmem:[%s1132_s1 + $0x88] sm:$0xff] (!%p190_p2)   ;;  %v895_v8 = vld [vmem:[%s1132_s1 + $0x90] sm:$0xff] (!%p190_p2)   ;;  %v676_v38 = vshrl.u32 (!%p190_p2), %v675_v36, 7 }
   0x8   : > { %853 = vmatprep.subr.bf16.mxu1 (!%p190_p2), %v889_v2  ;;  %803 = vmatprep.subr.bf16.mxu0 (!%p190_p2), %v890_v3  ;;  %v896_v9 = vld [vmem:[%s1132_s1 + $0x58] sm:$0xff] (!%p190_p2)   ;;  %v899_v12 = vld [vmem:[%s1132_s1 + $0x60] sm:$0xff] (!%p190_p2)   ;;  %v902_v15 = vld [vmem:[%s1132_s1 + $0x68] sm:$0xff] (!%p190_p2)  }
   0x9   : > { %854 = vmatpush3.bf16.msra.mxu1 (!%p190_p2), %v889_v2  ;;  %v897_v10 = vld [vmem:[%s1132_s1 + $0x18] sm:$0xff] (!%p190_p2)   ;;  %v901_v13 = vld [vmem:[%s1132_s1 + $0xa0] sm:$0xff] (!%p190_p2)   ;;  %v904_v16 = vld [vmem:[%s1132_s1 + $0xa8] sm:$0xff] (!%p190_p2)   ;;  %v677_v41 = vsub.s32 (!%p190_p2), 0, %v676_v38 }
   0xa   : > { %855 = vmatprep.subr.bf16.mxu1 (!%p190_p2), %v892_v5  ;;  %v898_v11 = vld [vmem:[%s1132_s1 + $0x98] sm:$0xff] (!%p190_p2)   ;;  %v900_v14 = vld [vmem:[%s1132_s1 + $0x20] sm:$0xff] (!%p190_p2)   ;;  %v903_v17 = vld [vmem:[%s1132_s1 + $0x28] sm:$0xff] (!%p190_p2)  }
   0xb   : > { %804 = vmatpush3.bf16.msra.mxu0 (!%p190_p2), %v891_v4  ;;  %v905_v18 = vld [vmem:[%s1132_s1 + $0x70] sm:$0xff] (!%p190_p2)   ;;  %v908_v21 = vld [vmem:[%s1132_s1 + $0x78] sm:$0xff] (!%p190_p2)   ;;  %v664_v37 = vld [vmem:[%s1135_s4] sm:$0x1] (!%p190_p2) }
   0xc   : > { %805 = vmatprep.subr.bf16.mxu0 (!%p190_p2), %v893_v6  ;;  %v906_v19 = vld [vmem:[%s1132_s1 + $0x30] sm:$0xff] (!%p190_p2)   ;;  %v910_v22 = vld [vmem:[%s1132_s1 + $0xb8] sm:$0xff] (!%p190_p2)   ;;  %vm665_vm0 = vcmp.gt.f32.partialorder (!%p190_p2), %v664_v37, 0.0  ;;  %v1072_v49 = vld [vmem:[%s1133_s2] ss:$0 sm:$0xff] (!%p190_p2) }
   0xd   : > { %856 = vmatpush3.bf16.msra.mxu1 %v892_v5  ;;  %s1138_s11 = smov (!%p219_p3, %s757_s11), 15  ;;  %v907_v20 = vld [vmem:[%s1132_s1 + $0xb0] sm:$0xff]   ;;  %v909_v25 = vld [vmem:[%s1132_s1 + $0x38] sm:$0xff]   ;;  %v674_v46 = vsel %vm665_vm0, 1, %v935_v45  ;;  %v1077_v53 = vld [vmem:[%s1134_s3] ss:$0 sm:$0xff] }
   0xe   : > { %857 = vmatprep.subr.bf16.mxu1 %v895_v8  ;;  %s877_s6 = smul.u32 12, %s1138_s11  ;;  %v1079_v54 = vrot.slane %v674_v46, %v677_v41  ;;  %s760_s7 = sshll.u32 %s1138_s11, 3 }
   0xf   : > { %806 = vmatpush3.bf16.msra.mxu0 %v894_v7  ;;  %s1089_s10 = scalar_lea.vmem %s1136_s5, %s760_s7 }
  0x10   : > { %807 = vmatprep.subr.bf16.mxu0 %v896_v9  ;;  %s1043_s20 = scalar_lea.vmem %s1131_s0, %s877_s6  ;;  %vm679_vm1 = vcmp.eq.s32.totalorder %v1079_v54, 1 }
  0x11   : > { %858 = vmatpush3.bf16.msra.mxu1 %v895_v8  ;;  %v913_v23 = vld [vmem:[%s1043_s20 + $0x4] ss:$12 sps:$4 sm:$0xff]   ;;  %v914_v24 = vld [vmem:[%s1043_s20 + $0x8] ss:$12 sps:$4 sm:$0xff]   ;;  %v911_v26 = vld [vmem:[%s1043_s20] ss:$12 sps:$4 sm:$0xff]  }
  0x12   : > { %859 = vmatprep.subr.bf16.mxu1 %v898_v11  ;;  %536 = vmatprep.mubr.bf16.mxu0 %v913_v23  ;;  %v916_v27 = vld [vmem:[%s1043_s20 + $0x1c] ss:$12 sps:$4 sm:$0xff]   ;;  %v915_v28 = vld [vmem:[%s1043_s20 + $0x20] ss:$12 sps:$4 sm:$0xff]   ;;  %v922_v29 = vld [vmem:[%s1043_s20 + $0x38] ss:$12 sps:$4 sm:$0xff]  }
  0x13   : > { %808 = vmatpush3.bf16.msra.mxu0 %v897_v10  ;;  %869 = vmatprep.mubr.bf16.mxu1 %v914_v24  ;;  %v918_v30 = vld [vmem:[%s1043_s20 + $0x18] ss:$12 sps:$4 sm:$0xff]   ;;  %v919_v31 = vld [vmem:[%s1043_s20 + $0x34] ss:$12 sps:$4 sm:$0xff]   ;;  %v923_v32 = vld [vmem:[%s1043_s20 + $0x50] ss:$12 sps:$4 sm:$0xff]  }
  0x14   : > { %809 = vmatprep.subr.bf16.mxu0 %v899_v12  ;;  %v921_v33 = vld [vmem:[%s1043_s20 + $0x30] ss:$12 sps:$4 sm:$0xff]   ;;  %v924_v34 = vld [vmem:[%s1043_s20 + $0x4c] ss:$12 sps:$4 sm:$0xff]   ;;  %v926_v35 = vld [vmem:[%s1043_s20 + $0x48] ss:$12 sps:$4 sm:$0xff]  }
  0x15   : > { %860 = vmatpush3.bf16.msra.mxu1 %v898_v11 }
  0x16   : > { %861 = vmatprep.subr.bf16.mxu1 %v901_v13 }
  0x17   : > { %810 = vmatpush3.bf16.msra.mxu0 %v900_v14 }
  0x18   : > { %811 = vmatprep.subr.bf16.mxu0 %v902_v15 }
  0x19   : > { %862 = vmatpush3.bf16.msra.mxu1 %v901_v13 }
  0x1a   : > { %863 = vmatprep.subr.bf16.mxu1 %v904_v16 }
  0x1b   : > { %812 = vmatpush3.bf16.msra.mxu0 %v903_v17 }
  0x1c   : > { %813 = vmatprep.subr.bf16.mxu0 %v905_v18 }
  0x1d   : > { %864 = vmatpush3.bf16.msra.mxu1 %v904_v16 }
  0x1e   : > { %865 = vmatprep.subr.bf16.mxu1 %v907_v20 }
  0x1f   : > { %814 = vmatpush3.bf16.msra.mxu0 %v906_v19 }
  0x20   : > { %815 = vmatprep.subr.bf16.mxu0 %v908_v21 }
  0x21   : > { %866 = vmatpush3.bf16.msra.mxu1 %v907_v20 }
  0x22   : > { %867 = vmatprep.subr.bf16.mxu1 %v910_v22 }
  0x23   : > { %816 = vmatpush3.bf16.msra.mxu0 %v909_v25 }
  0x25   : > { %868 = vmatpush3.bf16.msra.mxu1 %v910_v22 }
  0x26   : > { %537 = vmatmul.mubr.bf16.vlgmr.msra.gmra.mrb[0].mxu0 %v911_v26 }
  0x27   : > { %544 = vmatprep.mubr.bf16.mxu0 %v916_v27 }
  0x28   : > { %870 = vmatmul.mubr.bf16.vlgmr.msra.gmra.mrb[0].mxu1 %v915_v28 }
  0x29   : > { %873 = vmatprep.mubr.bf16.mxu1 %v922_v29 }
  0x2e   : > { %545 = vmatmul.mubr.bf16.gmra.mrb[4].mxu0 %v918_v30 }
  0x2f   : > { %552 = vmatprep.mubr.bf16.mxu0 %v919_v31 }
  0x30   : > { %874 = vmatmul.mubr.bf16.gmra.mrb[4].mxu1 %v923_v32 }
  0x36   : > { %553 = vmatmul.mubr.bf16.gmra.mrb[8].mxu0 %v921_v33 }
  0x37   : > { %560 = vmatprep.mubr.bf16.mxu0 %v924_v34 }
  0x3e   : > { %561 = vmatmul.mubr.bf16.gmra.mrb[12].mxu0 %v926_v35 }
  0xf9   : > { %v817_v39 = vpop.f32.mrb[0].mxu0 }
  0xfa   : > { %v818_v40 = vpop.f32.mrb[1].mxu0 }
  0xfb   : > { %v819_v42 = vadd.f32 %v818_v40, %v817_v39  ;;  %v820_v43 = vpop.f32.mrb[2].mxu0  ;;  %v871_v44 = vpop.f32.mrb[0].mxu1 }
  0xfc   : > { %v821_v47 = vpop.f32.mrb[3].mxu0  ;;  %v603_v48 = vpop.f32.mrb[1].mxu1 }
  0xfd   : > { %v822_v50 = vadd.f32 %v821_v47, %v820_v43  ;;  %v604_v51 = vadd.f32 %v819_v42, %v603_v48  ;;  %v872_v52 = vpop.f32.mrb[2].mxu1 }
  0xfe   : > { %v606_v55 = vpop.f32.mrb[3].mxu1 }
  0xff   : > { %v641_v56 = vmul.f32 %v1072_v49, %v604_v51  ;;  %v607_v57 = vadd.f32 %v822_v50, %v606_v55 }
 0x101   : > { %v656_v58 = vadd.f32 %v1077_v53, %v641_v56  ;;  %v642_v59 = vmul.f32 %v1072_v49, %v607_v57  ;;  %v823_v60 = vpop.f32.mrb[4].mxu0 }
 0x102   : > { %v824_v61 = vpop.f32.mrb[5].mxu0 }
 0x103   : > { %v666_v62 = vmax.f32 %v656_v58, 0.0  ;;  %v657_v63 = vadd.f32 %v1077_v53, %v642_v59  ;;  %v825_v0 = vadd.f32 %v824_v61, %v823_v60  ;;  %v826_v1 = vpop.f32.mrb[6].mxu0  ;;  %v875_v2 = vpop.f32.mrb[4].mxu1 }
 0x104   : > { %v827_v3 = vpop.f32.mrb[7].mxu0  ;;  %v619_v4 = vpop.f32.mrb[5].mxu1 }
 0x105   : > { %v680_v5 = vsel %vm679_vm1, %v666_v62, %v656_v58  ;;  %v667_v6 = vmax.f32 %v657_v63, 0.0  ;;  %v612_v7 = vadd.f32 %v871_v44, %v825_v0  ;;  %v828_v8 = vadd.f32 %v827_v3, %v826_v1  ;;  %v876_v9 = vpop.f32.mrb[6].mxu1 }
 0x106   : > { %688 = vst [vmem:[%s1089_s10] sm:$0xff] %v680_v5  ;;  %v622_v10 = vpop.f32.mrb[7].mxu1 }
 0x107   : > { %v681_v11 = vsel %vm679_vm1, %v667_v6, %v657_v63  ;;  %v643_v12 = vmul.f32 %v1072_v49, %v612_v7  ;;  %v615_v13 = vadd.f32 %v872_v52, %v828_v8 }
 0x108   : > { %689 = vst [vmem:[%s1089_s10 + $0x8] sm:$0xff] %v681_v11 }
 0x109   : > { %v658_v14 = vadd.f32 %v1077_v53, %v643_v12  ;;  %v644_v15 = vmul.f32 %v1072_v49, %v615_v13  ;;  %v829_v16 = vpop.f32.mrb[8].mxu0 }
 0x10a   : > { %v830_v17 = vpop.f32.mrb[9].mxu0 }
 0x10b   : > { %v668_v18 = vmax.f32 %v658_v14, 0.0  ;;  %v659_v19 = vadd.f32 %v1077_v53, %v644_v15  ;;  %v831_v20 = vadd.f32 %v830_v17, %v829_v16  ;;  %v832_v21 = vpop.f32.mrb[10].mxu0 }
 0x10c   : > { %v833_v22 = vpop.f32.mrb[11].mxu0 }
 0x10d   : > { %v682_v23 = vsel %vm679_vm1, %v668_v18, %v658_v14  ;;  %v669_v24 = vmax.f32 %v659_v19, 0.0  ;;  %v834_v25 = vadd.f32 %v833_v22, %v832_v21  ;;  %v620_v26 = vadd.f32 %v831_v20, %v619_v4 }
 0x10e   : > { %690 = vst [vmem:[%s1089_s10 + $0x10] sm:$0xff] %v682_v23 }
 0x10f   : > { %v683_v27 = vsel %vm679_vm1, %v669_v24, %v659_v19  ;;  %v645_v28 = vmul.f32 %v1072_v49, %v620_v26  ;;  %v623_v29 = vadd.f32 %v834_v25, %v622_v10 }
 0x110   : > { %691 = vst [vmem:[%s1089_s10 + $0x18] sm:$0xff] %v683_v27 }
 0x111   : > { %v660_v30 = vadd.f32 %v1077_v53, %v645_v28  ;;  %v646_v31 = vmul.f32 %v1072_v49, %v623_v29  ;;  %v835_v32 = vpop.f32.mrb[12].mxu0 }
 0x112   : > { %v836_v33 = vpop.f32.mrb[13].mxu0 }
 0x113   : > { %v670_v34 = vmax.f32 %v660_v30, 0.0  ;;  %v661_v35 = vadd.f32 %v1077_v53, %v646_v31  ;;  %v837_v36 = vadd.f32 %v836_v33, %v835_v32  ;;  %v838_v37 = vpop.f32.mrb[14].mxu0 }
 0x114   : > { %v839_v38 = vpop.f32.mrb[15].mxu0 }
 0x115   : > { %v684_v39 = vsel %vm679_vm1, %v670_v34, %v660_v30  ;;  %v671_v40 = vmax.f32 %v661_v35, 0.0  ;;  %v628_v41 = vadd.f32 %v875_v2, %v837_v36  ;;  %v840_v42 = vadd.f32 %v839_v38, %v838_v37 }
 0x116   : > { %692 = vst [vmem:[%s1089_s10 + $0x20] sm:$0xff] %v684_v39 }
 0x117   : > { %v685_v43 = vsel %vm679_vm1, %v671_v40, %v661_v35  ;;  %v647_v44 = vmul.f32 %v1072_v49, %v628_v41  ;;  %v631_v45 = vadd.f32 %v876_v9, %v840_v42 }
 0x118   : > { %693 = vst [vmem:[%s1089_s10 + $0x28] sm:$0xff] %v685_v43 }
 0x119   : > { %v662_v46 = vadd.f32 %v1077_v53, %v647_v44  ;;  %v648_v47 = vmul.f32 %v1072_v49, %v631_v45 }
 0x11b   : > { %v672_v48 = vmax.f32 %v662_v46, 0.0  ;;  %v663_v50 = vadd.f32 %v1077_v53, %v648_v47 }
 0x11d   : > { %v686_v51 = vsel %vm679_vm1, %v672_v48, %v662_v46  ;;  %v673_v52 = vmax.f32 %v663_v50, 0.0 }
 0x11e   : > { %694 = vst [vmem:[%s1089_s10 + $0x30] sm:$0xff] %v686_v51 }
 0x11f   : > { %v687_v55 = vsel %vm679_vm1, %v673_v52, %v663_v50 }
 0x120   : > { %695 = vst [vmem:[%s1089_s10 + $0x38] sm:$0xff] %v687_v55 }
 0x121 PF: > { %s15_s18 = sadd.s32 1, %s933_s18  }
 0x122   : > { %p12_p4 = scmp.ge.s32.totalorder %s15_s18, 4  }
 0x124   :  { %14 = sbr.rel (!%p12_p4) target bundleno = 1 (0x1), region = 70 }

// kernel: resnet_forward.13
= control target key start
LH: loop header
LB: loop body
LE: loop exit
PB: predicated region body
PF: predicated region fallthrough
CT: control target
= control target key end

     0   :  { %s2153_s0 = inlined_call_operand.vmem [shape: bf16[128,640], index: 0, kind: input, shape index: {}]   ;;  %s2154_s1 = inlined_call_operand.vmem [shape: bf16[640,64], index: 1, kind: input, shape index: {}]   ;;  %s2155_s2 = inlined_call_operand.vmem [shape: f32[1,64], index: 2, kind: input, shape index: {}]   ;;  %s2156_s3 = inlined_call_operand.vmem [shape: f32[1,64], index: 3, kind: input, shape index: {}]   ;;  %s2157_s4 = inlined_call_operand.vmem [shape: f32[128,64], index: 4, kind: input, shape index: {}]   ;;  %s2158_s5 = inlined_call_operand.vmem [shape: f32[2,128], index: 5, kind: input, shape index: {}]   ;;  %s2159_s6 = inlined_call_operand.vmem [shape: f32[64,10], index: 6, kind: input, shape index: {}]   ;;  %s2160_s7 = inlined_call_operand.vmem [shape: f32[1,10], index: 7, kind: input, shape index: {}]   ;;  %s2161_s8 = inlined_call_operand.hbm [shape: f32[2,10], index: 8, kind: output, shape index: {}]  }
   0x1   :  { %v1548_v0 = vld [vmem:[%s2154_s1 + $0x40] sm:$0xff]   ;;  %v1552_v4 = vld [vmem:[%s2154_s1 + $0x48] sm:$0xff]   ;;  %v1556_v8 = vld [vmem:[%s2154_s1 + $0x50] sm:$0xff]  }
   0x2   :  { %v1549_v1 = vld [vmem:[%s2154_s1 + $0xc0] sm:$0xff]   ;;  %1252 = vmatprep.subr.bf16.mxu0 %v1548_v0  ;;  %v1553_v5 = vld [vmem:[%s2154_s1 + $0xc8] sm:$0xff]   ;;  %v1557_v9 = vld [vmem:[%s2154_s1 + $0xd0] sm:$0xff]  }
   0x3   :  { %v1550_v2 = vld [vmem:[%s2154_s1] sm:$0xff]   ;;  %1316 = vmatprep.subr.bf16.mxu1 %v1549_v1  ;;  %v1554_v6 = vld [vmem:[%s2154_s1 + $0x8] sm:$0xff]   ;;  %v1558_v10 = vld [vmem:[%s2154_s1 + $0x10] sm:$0xff]  }
   0x4   :  { %v1551_v3 = vld [vmem:[%s2154_s1 + $0x80] sm:$0xff]   ;;  %1253 = vmatpush3.bf16.msra.mxu0 %v1550_v2  ;;  %v1555_v7 = vld [vmem:[%s2154_s1 + $0x88] sm:$0xff]   ;;  %v1559_v11 = vld [vmem:[%s2154_s1 + $0x90] sm:$0xff]  }
   0x5   :  { %1317 = vmatpush3.bf16.msra.mxu1 %v1551_v3  ;;  %1254 = vmatprep.subr.bf16.mxu0 %v1552_v4  ;;  %v1560_v12 = vld [vmem:[%s2154_s1 + $0x58] sm:$0xff]   ;;  %v1564_v16 = vld [vmem:[%s2154_s1 + $0x60] sm:$0xff]   ;;  %v1568_v20 = vld [vmem:[%s2154_s1 + $0x68] sm:$0xff]  }
   0x6   :  { %1318 = vmatprep.subr.bf16.mxu1 %v1553_v5  ;;  %v1561_v13 = vld [vmem:[%s2154_s1 + $0xd8] sm:$0xff]   ;;  %v1565_v17 = vld [vmem:[%s2154_s1 + $0xe0] sm:$0xff]   ;;  %v1569_v21 = vld [vmem:[%s2154_s1 + $0xe8] sm:$0xff]  }
   0x7   :  { %v1562_v14 = vld [vmem:[%s2154_s1 + $0x18] sm:$0xff]   ;;  %v1566_v18 = vld [vmem:[%s2154_s1 + $0x20] sm:$0xff]   ;;  %v1570_v22 = vld [vmem:[%s2154_s1 + $0x28] sm:$0xff]  }
   0x8   :  { %1255 = vmatpush3.bf16.msra.mxu0 %v1554_v6  ;;  %v1563_v15 = vld [vmem:[%s2154_s1 + $0x98] sm:$0xff]   ;;  %v1567_v19 = vld [vmem:[%s2154_s1 + $0xa0] sm:$0xff]   ;;  %v1571_v23 = vld [vmem:[%s2154_s1 + $0xa8] sm:$0xff]  }
   0x9   :  { %1319 = vmatpush3.bf16.msra.mxu1 %v1555_v7  ;;  %1256 = vmatprep.subr.bf16.mxu0 %v1556_v8  ;;  %v1572_v24 = vld [vmem:[%s2154_s1 + $0x70] sm:$0xff]   ;;  %v1576_v28 = vld [vmem:[%s2154_s1 + $0x78] sm:$0xff]   ;;  %v1585_v35 = vld [vmem:[%s2153_s0 + $0xc] ss:$20 sps:$4 sm:$0xff]  }
   0xa   :  { %1320 = vmatprep.subr.bf16.mxu1 %v1557_v9  ;;  %v1573_v25 = vld [vmem:[%s2154_s1 + $0xf0] sm:$0xff]   ;;  %v1577_v29 = vld [vmem:[%s2154_s1 + $0xf8] sm:$0xff]   ;;  %v1586_v36 = vld [vmem:[%s2153_s0 + $0x2c] ss:$20 sps:$4 sm:$0xff]   ;;  %736 = vmatprep.mubr.bf16.mxu1 %v1585_v35 }
   0xb   :  { %v1574_v26 = vld [vmem:[%s2154_s1 + $0x30] sm:$0xff]   ;;  %v1578_v30 = vld [vmem:[%s2154_s1 + $0x38] sm:$0xff]   ;;  %v1610_v42 = vld [vmem:[%s2154_s1 + $0x100] sm:$0xff]  }
   0xc   :  { %1257 = vmatpush3.bf16.msra.mxu0 %v1558_v10  ;;  %v1575_v27 = vld [vmem:[%s2154_s1 + $0xb0] sm:$0xff]   ;;  %v1579_v31 = vld [vmem:[%s2154_s1 + $0xb8] sm:$0xff]   ;;  %v1611_v43 = vld [vmem:[%s2154_s1 + $0x108] sm:$0xff]  }
   0xd   :  { %1321 = vmatpush3.bf16.msra.mxu1 %v1559_v11  ;;  %1258 = vmatprep.subr.bf16.mxu0 %v1560_v12  ;;  %v1580_v32 = vld [vmem:[%s2153_s0] ss:$20 sps:$4 sm:$0xff]   ;;  %v1582_v33 = vld [vmem:[%s2153_s0 + $0x4] ss:$20 sps:$4 sm:$0xff]   ;;  %v1583_v34 = vld [vmem:[%s2153_s0 + $0x8] ss:$20 sps:$4 sm:$0xff]  }
   0xe   :  { %1322 = vmatprep.subr.bf16.mxu1 %v1561_v13  ;;  %639 = vmatprep.mubr.bf16.mxu0 %v1582_v33  ;;  %v1588_v37 = vld [vmem:[%s2153_s0 + $0x34] ss:$20 sps:$4 sm:$0xff]   ;;  %v1591_v39 = vld [vmem:[%s2153_s0 + $0x30] ss:$20 sps:$4 sm:$0xff]   ;;  %v1597_v45 = vld [vmem:[%s2153_s0 + $0x58] ss:$20 sps:$4 sm:$0xff]  }
   0xf   :  { %v1590_v38 = vld [vmem:[%s2153_s0 + $0x28] ss:$20 sps:$4 sm:$0xff]   ;;  %v1596_v44 = vld [vmem:[%s2153_s0 + $0x50] ss:$20 sps:$4 sm:$0xff]   ;;  %v1602_v49 = vld [vmem:[%s2153_s0 + $0x78] ss:$20 sps:$4 sm:$0xff]  }
  0x10   :  { %1259 = vmatpush3.bf16.msra.mxu0 %v1562_v14  ;;  %v1592_v40 = vld [vmem:[%s2153_s0 + $0x54] ss:$20 sps:$4 sm:$0xff]   ;;  %v1594_v41 = vld [vmem:[%s2153_s0 + $0x5c] ss:$20 sps:$4 sm:$0xff]   ;;  %v1600_v47 = vld [vmem:[%s2153_s0 + $0x84] ss:$20 sps:$4 sm:$0xff]  }
  0x11   :  { %1323 = vmatpush3.bf16.msra.mxu1 %v1563_v15  ;;  %1260 = vmatprep.subr.bf16.mxu0 %v1564_v16  ;;  %v1598_v46 = vld [vmem:[%s2153_s0 + $0x7c] ss:$20 sps:$4 sm:$0xff]   ;;  %v1603_v51 = vld [vmem:[%s2153_s0 + $0x80] ss:$20 sps:$4 sm:$0xff]   ;;  %v1604_v52 = vld [vmem:[%s2153_s0 + $0xa4] ss:$20 sps:$4 sm:$0xff]  }
  0x12   :  { %1324 = vmatprep.subr.bf16.mxu1 %v1565_v17  ;;  %v1618_v48 = vld [vmem:[%s2154_s1 + $0x110] sm:$0xff]   ;;  %v1619_v50 = vld [vmem:[%s2154_s1 + $0x118] sm:$0xff]   ;;  %v1606_v53 = vld [vmem:[%s2153_s0 + $0xac] ss:$20 sps:$4 sm:$0xff]  }
  0x13   :  { %v1626_v54 = vld [vmem:[%s2154_s1 + $0x120] sm:$0xff]   ;;  %v1627_v56 = vld [vmem:[%s2154_s1 + $0x128] sm:$0xff]   ;;  %v1634_v60 = vld [vmem:[%s2154_s1 + $0x130] sm:$0xff]  }
  0x14   :  { %1261 = vmatpush3.bf16.msra.mxu0 %v1566_v18  ;;  %v1608_v55 = vld [vmem:[%s2153_s0 + $0xa0] ss:$20 sps:$4 sm:$0xff]   ;;  %v1609_v57 = vld [vmem:[%s2153_s0 + $0xa8] ss:$20 sps:$4 sm:$0xff]  }
  0x15   :  { %1325 = vmatpush3.bf16.msra.mxu1 %v1567_v19  ;;  %1262 = vmatprep.subr.bf16.mxu0 %v1568_v20  ;;  %v1612_v58 = vld [vmem:[%s2153_s0 + $0xcc] ss:$20 sps:$4 sm:$0xff]   ;;  %v1614_v59 = vld [vmem:[%s2153_s0 + $0xd4] ss:$20 sps:$4 sm:$0xff]  }
  0x16   :  { %1326 = vmatprep.subr.bf16.mxu1 %v1569_v21 }
  0x18   :  { %1263 = vmatpush3.bf16.msra.mxu0 %v1570_v22 }
  0x19   :  { %1327 = vmatpush3.bf16.msra.mxu1 %v1571_v23  ;;  %1264 = vmatprep.subr.bf16.mxu0 %v1572_v24 }
  0x1a   :  { %1328 = vmatprep.subr.bf16.mxu1 %v1573_v25 }
  0x1c   :  { %1265 = vmatpush3.bf16.msra.mxu0 %v1574_v26 }
  0x1d   :  { %1329 = vmatpush3.bf16.msra.mxu1 %v1575_v27  ;;  %1266 = vmatprep.subr.bf16.mxu0 %v1576_v28 }
  0x1e   :  { %1330 = vmatprep.subr.bf16.mxu1 %v1577_v29 }
  0x20   :  { %1267 = vmatpush3.bf16.msra.mxu0 %v1578_v30 }
  0x21   :  { %1331 = vmatpush3.bf16.msra.mxu1 %v1579_v31  ;;  %1422 = vmatprep.subr.bf16.mxu0 %v1610_v42 }
  0x23   :  { %640 = vmatmul.mubr.bf16.vlgmr.msra.gmra.mrb[0].mxu0 %v1580_v32 }
  0x24   :  { %737 = vmatmul.mubr.bf16.vlgmr.msra.gmra.mrb[0].mxu1 %v1583_v34  ;;  %647 = vmatprep.mubr.bf16.mxu0 %v1586_v36 }
  0x25   :  { %744 = vmatprep.mubr.bf16.mxu1 %v1588_v37  ;;  %1423 = vmatpush3.bf16.msra.mxu0 %v1610_v42 }
  0x26   :  { %1424 = vmatprep.subr.bf16.mxu0 %v1611_v43 }
  0x29   :  { %1425 = vmatpush3.bf16.msra.mxu0 %v1611_v43 }
  0x2a   :  { %1426 = vmatprep.subr.bf16.mxu0 %v1618_v48 }
  0x2b   :  { %648 = vmatmul.mubr.bf16.gmra.mrb[4].mxu0 %v1590_v38 }
  0x2c   :  { %745 = vmatmul.mubr.bf16.gmra.mrb[4].mxu1 %v1591_v39  ;;  %655 = vmatprep.mubr.bf16.mxu0 %v1592_v40 }
  0x2d   :  { %752 = vmatprep.mubr.bf16.mxu1 %v1594_v41  ;;  %1427 = vmatpush3.bf16.msra.mxu0 %v1618_v48 }
  0x2e   :  { %1428 = vmatprep.subr.bf16.mxu0 %v1619_v50 }
  0x31   :  { %1429 = vmatpush3.bf16.msra.mxu0 %v1619_v50 }
  0x32   :  { %1430 = vmatprep.subr.bf16.mxu0 %v1626_v54 }
  0x33   :  { %656 = vmatmul.mubr.bf16.gmra.mrb[8].mxu0 %v1596_v44 }
  0x34   :  { %753 = vmatmul.mubr.bf16.gmra.mrb[8].mxu1 %v1597_v45  ;;  %663 = vmatprep.mubr.bf16.mxu0 %v1598_v46 }
  0x35   :  { %760 = vmatprep.mubr.bf16.mxu1 %v1600_v47  ;;  %1431 = vmatpush3.bf16.msra.mxu0 %v1626_v54 }
  0x36   :  { %1432 = vmatprep.subr.bf16.mxu0 %v1627_v56 }
  0x3b   :  { %664 = vmatmul.mubr.bf16.gmra.mrb[12].mxu0 %v1602_v49 }
  0x3c   :  { %761 = vmatmul.mubr.bf16.gmra.mrb[12].mxu1 %v1603_v51  ;;  %671 = vmatprep.mubr.bf16.mxu0 %v1604_v52 }
  0x3d   :  { %768 = vmatprep.mubr.bf16.mxu1 %v1606_v53 }
  0x43   :  { %672 = vmatmul.mubr.bf16.gmra.mrb[16].mxu0 %v1608_v55 }
  0x44   :  { %769 = vmatmul.mubr.bf16.gmra.mrb[16].mxu1 %v1609_v57  ;;  %679 = vmatprep.mubr.bf16.mxu0 %v1612_v58 }
  0x45   :  { %13 = vsyncpa [#allocation3], 0  ;;  %776 = vmatprep.mubr.bf16.mxu1 %v1614_v59  ;;  %1433 = vmatpush3.bf16.msra.mxu0 %v1627_v56  ;;  %v1635_v61 = vld [vmem:[%s2154_s1 + $0x138] sm:$0xff]   ;;  %v1617_v63 = vld [vmem:[%s2153_s0 + $0xd0] ss:$20 sps:$4 sm:$0xff]   ;;  %v1668_v16 = vmov 0.0|0.0  }
  0x46   :  { %1434 = vmatprep.subr.bf16.mxu0 %v1634_v60  ;;  %v1616_v62 = vld [vmem:[%s2153_s0 + $0xc8] ss:$20 sps:$4 sm:$0xff]   ;;  %v1624_v2 = vld [vmem:[%s2153_s0 + $0xf0] ss:$20 sps:$4 sm:$0xff]   ;;  %v1625_v3 = vld [vmem:[%s2153_s0 + $0xf8] ss:$20 sps:$4 sm:$0xff]   ;;  %1508 = vmatprep.subr.bf16.mxu1 %v1668_v16 }
  0x47   :  { %v1620_v0 = vld [vmem:[%s2153_s0 + $0xf4] ss:$20 sps:$4 sm:$0xff]   ;;  %v1622_v1 = vld [vmem:[%s2153_s0 + $0xfc] ss:$20 sps:$4 sm:$0xff]   ;;  %v1630_v5 = vld [vmem:[%s2153_s0 + $0x124] ss:$20 sps:$4 sm:$0xff]  }
  0x48   :  { %v1628_v4 = vld [vmem:[%s2153_s0 + $0x11c] ss:$20 sps:$4 sm:$0xff]   ;;  %v1632_v6 = vld [vmem:[%s2153_s0 + $0x118] ss:$20 sps:$4 sm:$0xff]   ;;  %v1633_v7 = vld [vmem:[%s2153_s0 + $0x120] ss:$20 sps:$4 sm:$0xff]  }
  0x49   :  { %1435 = vmatpush3.bf16.msra.mxu0 %v1634_v60  ;;  %v1636_v8 = vld [vmem:[%s2153_s0 + $0x10] ss:$20 sps:$4 sm:$0xff]   ;;  %v1637_v9 = vld [vmem:[%s2153_s0 + $0x38] ss:$20 sps:$4 sm:$0xff]   ;;  %v1638_v10 = vld [vmem:[%s2153_s0 + $0x60] ss:$20 sps:$4 sm:$0xff]  }
  0x4a   :  { %1436 = vmatprep.subr.bf16.mxu0 %v1635_v61  ;;  %v1639_v11 = vld [vmem:[%s2153_s0 + $0x88] ss:$20 sps:$4 sm:$0xff]   ;;  %v1640_v12 = vld [vmem:[%s2153_s0 + $0xb0] ss:$20 sps:$4 sm:$0xff]   ;;  %v1641_v13 = vld [vmem:[%s2153_s0 + $0xd8] ss:$20 sps:$4 sm:$0xff]  }
  0x4b   :  { %680 = vmatmul.mubr.bf16.gmra.mrb[20].mxu0 %v1616_v62  ;;  %v1642_v14 = vld [vmem:[%s2153_s0 + $0x100] ss:$20 sps:$4 sm:$0xff]   ;;  %v1643_v15 = vld [vmem:[%s2153_s0 + $0x128] ss:$20 sps:$4 sm:$0xff]   ;;  %vm1669_vm0 = vmmov 0   ;;  %v1670_v17 = vmov 0.0  }
  0x4c   :  { %777 = vmatmul.mubr.bf16.gmra.mrb[20].mxu1 %v1617_v63  ;;  %687 = vmatprep.mubr.bf16.mxu0 %v1620_v0  ;;  %vm1078_vm1 = vcmask 523264   ;;  %s1671_s10 = smov [#allocation2]   ;;  %vm1152_vm2 = vcmask 74752  }
  0x4d   :  { %784 = vmatprep.mubr.bf16.mxu1 %v1622_v1  ;;  %1437 = vmatpush3.bf16.msra.mxu0 %v1635_v61  ;;  %s1160_s11 = sshll.u32 %s1671_s10, 4  ;;  %s1161_s11 = int_to_ptr.vmem [resolvable:$true] %s1160_s11 }
  0x4e   :  { %p1649_p1 = scmp.lt.s32.totalorder %s1161_s11, %s1161_s11 }
  0x53   :  { %688 = vmatmul.mubr.bf16.gmra.mrb[24].mxu0 %v1624_v2 }
  0x54   :  { %785 = vmatmul.mubr.bf16.gmra.mrb[24].mxu1 %v1625_v3  ;;  %695 = vmatprep.mubr.bf16.mxu0 %v1628_v4 }
  0x55   :  { %792 = vmatprep.mubr.bf16.mxu1 %v1630_v5 }
  0x5b   :  { %696 = vmatmul.mubr.bf16.gmra.mrb[28].mxu0 %v1632_v6 }
  0x5c   :  { %793 = vmatmul.mubr.bf16.gmra.mrb[28].mxu1 %v1633_v7  ;;  %1438 = vmatprep.mubr.bf16.mxu0 %v1636_v8 }
  0x5d   :  { %1486 = vmatprep.mubr.msk.f32.mxu1 %vm1669_vm0, %v1670_v17 }
  0x63   :  { %1439 = vmatmul.mubr.bf16.vlgmr.msra.gmra.mrb[32].mxu0 %v1637_v9 }
  0x64   :  { %1442 = vmatprep.mubr.bf16.mxu0 %v1638_v10 }
  0x6b   :  { %1443 = vmatmul.mubr.bf16.gmra.mrb[36].mxu0 %v1639_v11 }
  0x6c   :  { %1446 = vmatprep.mubr.bf16.mxu0 %v1640_v12 }
  0x73   :  { %1447 = vmatmul.mubr.bf16.gmra.mrb[40].mxu0 %v1641_v13 }
  0x74   :  { %1450 = vmatprep.mubr.bf16.mxu0 %v1642_v14 }
  0x7b   :  { %1451 = vmatmul.mubr.bf16.gmra.mrb[44].mxu0 %v1643_v15 }
  0xf6   :  { %v1268_v18 = vpop.f32.mrb[0].mxu0 }
  0xf7   :  { %v1332_v19 = vpop.f32.mrb[0].mxu1  ;;  %v1269_v20 = vpop.f32.mrb[1].mxu0 }
  0xf8   :  { %v1270_v21 = vadd.f32 %v1269_v20, %v1268_v18  ;;  %v1333_v22 = vpop.f32.mrb[1].mxu1  ;;  %v1271_v23 = vpop.f32.mrb[2].mxu0 }
  0xf9   :  { %v1334_v24 = vadd.f32 %v1333_v22, %v1332_v19  ;;  %v1335_v25 = vpop.f32.mrb[2].mxu1  ;;  %v1272_v26 = vpop.f32.mrb[3].mxu0 }
  0xfa   :  { %v1273_v27 = vadd.f32 %v1272_v26, %v1271_v23  ;;  %v1336_v28 = vpop.f32.mrb[3].mxu1 }
  0xfb   :  { %v1337_v29 = vadd.f32 %v1336_v28, %v1335_v25  ;;  %v1960_v30 = vadd.f32 %v1334_v24, %v1270_v21 }
  0xfd   :  { %v1962_v31 = vadd.f32 %v1337_v29, %v1273_v27 }
  0xfe   :  { %v1274_v32 = vpop.f32.mrb[4].mxu0 }
  0xff   :  { %v1338_v33 = vpop.f32.mrb[4].mxu1  ;;  %v1275_v34 = vpop.f32.mrb[5].mxu0 }
 0x100   :  { %v1276_v35 = vadd.f32 %v1275_v34, %v1274_v32  ;;  %v1339_v36 = vpop.f32.mrb[5].mxu1  ;;  %v1277_v37 = vpop.f32.mrb[6].mxu0 }
 0x101   :  { %v1340_v38 = vadd.f32 %v1339_v36, %v1338_v33  ;;  %v1341_v39 = vpop.f32.mrb[6].mxu1  ;;  %v1278_v40 = vpop.f32.mrb[7].mxu0 }
 0x102   :  { %v1279_v41 = vadd.f32 %v1278_v40, %v1277_v37  ;;  %v1342_v42 = vpop.f32.mrb[7].mxu1 }
 0x103   :  { %v1343_v43 = vadd.f32 %v1342_v42, %v1341_v39  ;;  %v1964_v44 = vadd.f32 %v1340_v38, %v1276_v35 }
 0x105   :  { %v1966_v45 = vadd.f32 %v1343_v43, %v1279_v41 }
 0x106   :  { %v1280_v46 = vpop.f32.mrb[8].mxu0 }
 0x107   :  { %v1344_v47 = vpop.f32.mrb[8].mxu1  ;;  %v1281_v48 = vpop.f32.mrb[9].mxu0 }
 0x108   :  { %v1282_v49 = vadd.f32 %v1281_v48, %v1280_v46  ;;  %v1345_v50 = vpop.f32.mrb[9].mxu1  ;;  %v1283_v51 = vpop.f32.mrb[10].mxu0 }
 0x109   :  { %v1346_v52 = vadd.f32 %v1345_v50, %v1344_v47  ;;  %v1347_v53 = vpop.f32.mrb[10].mxu1  ;;  %v1284_v54 = vpop.f32.mrb[11].mxu0 }
 0x10a   :  { %v1285_v55 = vadd.f32 %v1284_v54, %v1283_v51  ;;  %v1348_v56 = vpop.f32.mrb[11].mxu1 }
 0x10b   :  { %v1349_v57 = vadd.f32 %v1348_v56, %v1347_v53  ;;  %v1968_v58 = vadd.f32 %v1346_v52, %v1282_v49 }
 0x10d   :  { %v1970_v59 = vadd.f32 %v1349_v57, %v1285_v55 }
 0x10e   :  { %v1286_v60 = vpop.f32.mrb[12].mxu0 }
 0x10f   :  { %v1350_v61 = vpop.f32.mrb[12].mxu1  ;;  %v1287_v62 = vpop.f32.mrb[13].mxu0 }
 0x110   :  { %v1288_v63 = vadd.f32 %v1287_v62, %v1286_v60  ;;  %v1351_v0 = vpop.f32.mrb[13].mxu1  ;;  %v1289_v1 = vpop.f32.mrb[14].mxu0 }
 0x111   :  { %v1352_v2 = vadd.f32 %v1351_v0, %v1350_v61  ;;  %v1353_v3 = vpop.f32.mrb[14].mxu1  ;;  %v1290_v4 = vpop.f32.mrb[15].mxu0 }
 0x112   :  { %v1291_v5 = vadd.f32 %v1290_v4, %v1289_v1  ;;  %v1354_v6 = vpop.f32.mrb[15].mxu1 }
 0x113   :  { %v1355_v7 = vadd.f32 %v1354_v6, %v1353_v3  ;;  %v1972_v8 = vadd.f32 %v1352_v2, %v1288_v63 }
 0x115   :  { %v1974_v9 = vadd.f32 %v1355_v7, %v1291_v5 }
 0x116   :  { %v1292_v10 = vpop.f32.mrb[16].mxu0 }
 0x117   :  { %v1356_v11 = vpop.f32.mrb[16].mxu1  ;;  %v1293_v12 = vpop.f32.mrb[17].mxu0 }
 0x118   :  { %v1294_v13 = vadd.f32 %v1293_v12, %v1292_v10  ;;  %v1357_v14 = vpop.f32.mrb[17].mxu1  ;;  %v1295_v15 = vpop.f32.mrb[18].mxu0 }
 0x119   :  { %v1358_v18 = vadd.f32 %v1357_v14, %v1356_v11  ;;  %v1359_v19 = vpop.f32.mrb[18].mxu1  ;;  %v1296_v20 = vpop.f32.mrb[19].mxu0 }
 0x11a   :  { %v1297_v21 = vadd.f32 %v1296_v20, %v1295_v15  ;;  %v1360_v22 = vpop.f32.mrb[19].mxu1 }
 0x11b   :  { %v1361_v23 = vadd.f32 %v1360_v22, %v1359_v19  ;;  %v1976_v24 = vadd.f32 %v1358_v18, %v1294_v13  ;;  %v1995_v13 = vld [vmem:[%s2155_s2] ss:$0 sm:$0xff] }
 0x11c   :  { %v2001_v18 = vld [vmem:[%s2156_s3] ss:$0 sm:$0xff] }
 0x11d   :  { %v1978_v25 = vadd.f32 %v1361_v23, %v1297_v21 }
 0x11e   :  { %v1298_v26 = vpop.f32.mrb[20].mxu0 }
 0x11f   :  { %v1362_v27 = vpop.f32.mrb[20].mxu1  ;;  %v1299_v28 = vpop.f32.mrb[21].mxu0 }
 0x120   :  { %v1300_v29 = vadd.f32 %v1299_v28, %v1298_v26  ;;  %v1363_v32 = vpop.f32.mrb[21].mxu1  ;;  %v1301_v33 = vpop.f32.mrb[22].mxu0  ;;  %v946_v26 = vld [vmem:[%s2157_s4 + $0x10] sm:$0xff] }
 0x121   :  { %v1364_v34 = vadd.f32 %v1363_v32, %v1362_v27  ;;  %v1365_v35 = vpop.f32.mrb[22].mxu1  ;;  %v1302_v36 = vpop.f32.mrb[23].mxu0 }
 0x122   :  { %v1303_v37 = vadd.f32 %v1302_v36, %v1301_v33  ;;  %v1366_v38 = vpop.f32.mrb[23].mxu1 }
 0x123   :  { %v1367_v39 = vadd.f32 %v1366_v38, %v1365_v35  ;;  %v1980_v40 = vadd.f32 %v1364_v34, %v1300_v29 }
 0x125   :  { %v1982_v41 = vadd.f32 %v1367_v39, %v1303_v37 }
 0x126   :  { %v1304_v42 = vpop.f32.mrb[24].mxu0 }
 0x127   :  { %v1368_v43 = vpop.f32.mrb[24].mxu1  ;;  %v1305_v46 = vpop.f32.mrb[25].mxu0 }
 0x128   :  { %v1306_v47 = vadd.f32 %v1305_v46, %v1304_v42  ;;  %v1369_v48 = vpop.f32.mrb[25].mxu1  ;;  %v1307_v49 = vpop.f32.mrb[26].mxu0 }
 0x129   :  { %v1370_v50 = vadd.f32 %v1369_v48, %v1368_v43  ;;  %v1371_v51 = vpop.f32.mrb[26].mxu1  ;;  %v1308_v52 = vpop.f32.mrb[27].mxu0 }
 0x12a   :  { %v1309_v53 = vadd.f32 %v1308_v52, %v1307_v49  ;;  %v1372_v54 = vpop.f32.mrb[27].mxu1 }
 0x12b   :  { %v1373_v55 = vadd.f32 %v1372_v54, %v1371_v51  ;;  %v1984_v56 = vadd.f32 %v1370_v50, %v1306_v47 }
 0x12d   :  { %v1986_v57 = vadd.f32 %v1373_v55, %v1309_v53 }
 0x12e   :  { %v1310_v60 = vpop.f32.mrb[28].mxu0 }
 0x12f   :  { %v1374_v61 = vpop.f32.mrb[28].mxu1  ;;  %v1311_v62 = vpop.f32.mrb[29].mxu0 }
 0x130   :  { %v1312_v63 = vadd.f32 %v1311_v62, %v1310_v60  ;;  %v1375_v0 = vpop.f32.mrb[29].mxu1  ;;  %v1313_v1 = vpop.f32.mrb[30].mxu0  ;;  %v950_v60 = vld [vmem:[%s2157_s4 + $0x30] sm:$0xff]  ;;  %v948_v62 = vld [vmem:[%s2157_s4 + $0x20] sm:$0xff] }
 0x131   :  { %v1376_v2 = vadd.f32 %v1375_v0, %v1374_v61  ;;  %v1377_v3 = vpop.f32.mrb[30].mxu1  ;;  %v1314_v4 = vpop.f32.mrb[31].mxu0 }
 0x132   :  { %v1315_v5 = vadd.f32 %v1314_v4, %v1313_v1  ;;  %v1378_v6 = vpop.f32.mrb[31].mxu1  ;;  %v951_v1 = vld [vmem:[%s2157_s4 + $0x38] sm:$0xff] }
 0x133   :  { %v1379_v7 = vadd.f32 %v1378_v6, %v1377_v3  ;;  %v1988_v10 = vadd.f32 %v1376_v2, %v1312_v63 }
 0x135   :  { %v1990_v11 = vadd.f32 %v1379_v7, %v1315_v5  ;;  %v949_v5 = vld [vmem:[%s2157_s4 + $0x28] sm:$0xff] }
 0x136   :  { %v1440_v12 = vpop.f32.mrb[32].mxu0 }
 0x137   :  { %v844_v14 = vadd.f32 %v1440_v12, %v1964_v44  ;;  %v835_v15 = vpop.f32.mrb[33].mxu0 }
 0x138   :  { %v836_v19 = vadd.f32 %v835_v15, %v1960_v30  ;;  %v1441_v20 = vpop.f32.mrb[34].mxu0  ;;  %v944_v30 = vld [vmem:[%s2157_s4] sm:$0xff] }
 0x139   :  { %v907_v21 = vmul.f32 %v1995_v13, %v844_v14  ;;  %v847_v22 = vadd.f32 %v1441_v20, %v1966_v45  ;;  %v838_v23 = vpop.f32.mrb[35].mxu0  ;;  %v947_v45 = vld [vmem:[%s2157_s4 + $0x18] sm:$0xff] }
 0x13a   :  { %v905_v44 = vmul.f32 %v1995_v13, %v836_v19  ;;  %v839_v27 = vadd.f32 %v838_v23, %v1962_v31  ;;  %v945_v31 = vld [vmem:[%s2157_s4 + $0x8] sm:$0xff] }
 0x13b   :  { %v930_v28 = vadd.f32 %v2001_v18, %v907_v21  ;;  %v908_v29 = vmul.f32 %v1995_v13, %v847_v22 }
 0x13c   :  { %v928_v32 = vadd.f32 %v2001_v18, %v905_v44  ;;  %v906_v33 = vmul.f32 %v1995_v13, %v839_v27 }
 0x13d   :  { %v962_v34 = vadd.f32 %v946_v26, %v930_v28  ;;  %v931_v35 = vadd.f32 %v2001_v18, %v908_v29 }
 0x13e   :  { %v960_v36 = vadd.f32 %v944_v30, %v928_v32  ;;  %v929_v37 = vadd.f32 %v2001_v18, %v906_v33  ;;  %v1444_v38 = vpop.f32.mrb[36].mxu0  ;;  %v952_v33 = vld [vmem:[%s2157_s4 + $0x40] sm:$0xff] }
 0x13f   :  { %v963_v39 = vadd.f32 %v947_v45, %v931_v35  ;;  %v860_v42 = vadd.f32 %v1444_v38, %v1972_v8  ;;  %v851_v43 = vpop.f32.mrb[37].mxu0  ;;  %v978_v49 = vmax.f32 %v962_v34, 0.0 }
 0x140   :  { %v961_v46 = vadd.f32 %v945_v31, %v929_v37  ;;  %v852_v47 = vadd.f32 %v851_v43, %v1968_v58  ;;  %v1445_v48 = vpop.f32.mrb[38].mxu0  ;;  %v976_v54 = vmax.f32 %v960_v36, 0.0  ;;  %v955_v31 = vld [vmem:[%s2157_s4 + $0x58] sm:$0xff] }
 0x141   :  { %v979_v50 = vmax.f32 %v963_v39, 0.0  ;;  %v911_v51 = vmul.f32 %v1995_v13, %v860_v42  ;;  %v863_v52 = vadd.f32 %v1445_v48, %v1974_v9  ;;  %v854_v53 = vpop.f32.mrb[39].mxu0  ;;  %v953_v39 = vld [vmem:[%s2157_s4 + $0x48] sm:$0xff] }
 0x142   :  { %v977_v55 = vmax.f32 %v961_v46, 0.0  ;;  %v909_v8 = vmul.f32 %v1995_v13, %v852_v47  ;;  %v855_v61 = vadd.f32 %v854_v53, %v1970_v59 }
 0x143   :  { %v934_v58 = vadd.f32 %v2001_v18, %v911_v51  ;;  %v912_v63 = vmul.f32 %v1995_v13, %v863_v52  ;;  %v1512_v9 = vpack.c.bf16 %v979_v50, %v978_v49 }
 0x144   :  { %v932_v0 = vadd.f32 %v2001_v18, %v909_v8  ;;  %v910_v2 = vmul.f32 %v1995_v13, %v855_v61  ;;  %v1509_v3 = vpack.c.bf16 %v977_v55, %v976_v54 }
 0x145   :  { %v966_v4 = vadd.f32 %v950_v60, %v934_v58  ;;  %v935_v59 = vadd.f32 %v2001_v18, %v912_v63 }
 0x146   :  { %v964_v6 = vadd.f32 %v948_v62, %v932_v0  ;;  %v933_v7 = vadd.f32 %v2001_v18, %v910_v2  ;;  %v1448_v12 = vpop.f32.mrb[40].mxu0  ;;  %1510 = vmatpush3.bf16.msra.mxu1 %v1509_v3  ;;  %v959_v2 = vld [vmem:[%s2157_s4 + $0x78] sm:$0xff] }
 0x147   :  { %v967_v14 = vadd.f32 %v951_v1, %v935_v59  ;;  %v876_v15 = vadd.f32 %v1448_v12, %v1980_v40  ;;  %v867_v19 = vpop.f32.mrb[41].mxu0  ;;  %1511 = vmatprep.subr.bf16.mxu1 %v1668_v16  ;;  %v982_v23 = vmax.f32 %v966_v4, 0.0  ;;  %v954_v40 = vld [vmem:[%s2157_s4 + $0x50] sm:$0xff] }
 0x148   :  { %v965_v20 = vadd.f32 %v949_v5, %v933_v7  ;;  %v868_v21 = vadd.f32 %v867_v19, %v1976_v24  ;;  %v1449_v22 = vpop.f32.mrb[42].mxu0  ;;  %v980_v30 = vmax.f32 %v964_v6, 0.0  ;;  %v957_v5 = vld [vmem:[%s2157_s4 + $0x68] sm:$0xff] }
 0x149   :  { %v983_v26 = vmax.f32 %v967_v14, 0.0  ;;  %v915_v44 = vmul.f32 %v1995_v13, %v876_v15  ;;  %v879_v27 = vadd.f32 %v1449_v22, %v1982_v41  ;;  %v870_v28 = vpop.f32.mrb[43].mxu0 }
 0x14a   :  { %v981_v29 = vmax.f32 %v965_v20, 0.0  ;;  %v913_v32 = vmul.f32 %v1995_v13, %v868_v21  ;;  %v871_v45 = vadd.f32 %v870_v28, %v1978_v25  ;;  %1513 = vmatpush3.bf16.msra.mxu1 %v1512_v9  ;;  %v956_v9 = vld [vmem:[%s2157_s4 + $0x60] sm:$0xff]  ;;  %v1066_v28 = vld [vmem:[%s2159_s6 + $0x18] sm:$0xff] }
 0x14b   :  { %v938_v24 = vadd.f32 %v2001_v18, %v915_v44  ;;  %v916_v41 = vmul.f32 %v1995_v13, %v879_v27  ;;  %1514 = vmatprep.subr.bf16.mxu1 %v1668_v16  ;;  %v1518_v34 = vpack.c.bf16 %v983_v26, %v982_v23  ;;  %v1064_v23 = vld [vmem:[%s2159_s6 + $0x8] sm:$0xff]  ;;  %v992_v26 = vld [vmem:[%s2158_s5] sm:$0x3]  ;;  %v1065_v27 = vld [vmem:[%s2159_s6 + $0x10] sm:$0xff] }
 0x14c   :  { %v936_v35 = vadd.f32 %v2001_v18, %v913_v32  ;;  %v914_v25 = vmul.f32 %v1995_v13, %v871_v45  ;;  %v1515_v36 = vpack.c.bf16 %v981_v29, %v980_v30  ;;  %v1536_v30 = vpack.c.bf16 %v1066_v28, %v1065_v27  ;;  %v1067_v29 = vld [vmem:[%s2159_s6 + $0x20] sm:$0xff]  ;;  %v1069_v45 = vld [vmem:[%s2159_s6 + $0x30] sm:$0xff] }
 0x14d   :  { %v970_v37 = vadd.f32 %v954_v40, %v938_v24  ;;  %v939_v38 = vadd.f32 %v2001_v18, %v916_v41  ;;  %v1068_v40 = vld [vmem:[%s2159_s6 + $0x28] sm:$0xff] }
 0x14e   :  { %v968_v42 = vadd.f32 %v952_v33, %v936_v35  ;;  %v937_v43 = vadd.f32 %v2001_v18, %v914_v25  ;;  %v1452_v46 = vpop.f32.mrb[44].mxu0  ;;  %1516 = vmatpush3.bf16.msra.mxu1 %v1515_v36  ;;  %v1539_v32 = vpack.c.bf16 %v1068_v40, %v1067_v29 }
 0x14f   :  { %v971_v47 = vadd.f32 %v955_v31, %v939_v38  ;;  %v892_v48 = vadd.f32 %v1452_v46, %v1988_v10  ;;  %v883_v49 = vpop.f32.mrb[45].mxu0  ;;  %1517 = vmatprep.subr.bf16.mxu1 %v1668_v16  ;;  %v986_v53 = vmax.f32 %v970_v37, 0.0  ;;  %v958_v10 = vld [vmem:[%s2157_s4 + $0x70] sm:$0xff] }
 0x150   :  { %v969_v50 = vadd.f32 %v953_v39, %v937_v43  ;;  %v884_v51 = vadd.f32 %v883_v49, %v1984_v56  ;;  %v1453_v52 = vpop.f32.mrb[46].mxu0  ;;  %v984_v61 = vmax.f32 %v968_v42, 0.0 }
 0x151   :  { %v987_v54 = vmax.f32 %v971_v47, 0.0  ;;  %v919_v55 = vmul.f32 %v1995_v13, %v892_v48  ;;  %v895_v60 = vadd.f32 %v1453_v52, %v1990_v11  ;;  %v886_v8 = vpop.f32.mrb[47].mxu0 }
 0x152   :  { %v985_v58 = vmax.f32 %v969_v50, 0.0  ;;  %v917_v62 = vmul.f32 %v1995_v13, %v884_v51  ;;  %v887_v63 = vadd.f32 %v886_v8, %v1986_v57  ;;  %1519 = vmatpush3.bf16.msra.mxu1 %v1518_v34  ;;  %v1250_v34 = vld [vmem:[%s2160_s7] ss:$0 sm:$0xff] }
 0x153   :  { %v942_v56 = vadd.f32 %v2001_v18, %v919_v55  ;;  %v920_v11 = vmul.f32 %v1995_v13, %v895_v60  ;;  %1520 = vmatprep.subr.bf16.mxu1 %v1668_v16  ;;  %v1524_v0 = vpack.c.bf16 %v987_v54, %v986_v53 }
 0x154   :  { %v940_v1 = vadd.f32 %v2001_v18, %v917_v62  ;;  %v918_v57 = vmul.f32 %v1995_v13, %v887_v63  ;;  %v1521_v3 = vpack.c.bf16 %v985_v58, %v984_v61 }
 0x155   :  { %v974_v4 = vadd.f32 %v958_v10, %v942_v56  ;;  %v943_v59 = vadd.f32 %v2001_v18, %v920_v11 }
 0x156   :  { %v972_v6 = vadd.f32 %v956_v9, %v940_v1  ;;  %v941_v7 = vadd.f32 %v2001_v18, %v918_v57  ;;  %1522 = vmatpush3.bf16.msra.mxu1 %v1521_v3  ;;  %v1063_v18 = vld [vmem:[%s2159_s6] sm:$0xff] }
 0x157   :  { %v975_v12 = vadd.f32 %v959_v2, %v943_v59  ;;  %1523 = vmatprep.subr.bf16.mxu1 %v1668_v16  ;;  %v990_v15 = vmax.f32 %v974_v4, 0.0  ;;  %v1533_v44 = vpack.c.bf16 %v1064_v23, %v1063_v18 }
 0x158   :  { %v973_v14 = vadd.f32 %v957_v5, %v941_v7  ;;  %v988_v20 = vmax.f32 %v972_v6, 0.0 }
 0x159   :  { %v991_v19 = vmax.f32 %v975_v12, 0.0 }
 0x15a   :  { %v989_v13 = vmax.f32 %v973_v14, 0.0  ;;  %1525 = vmatpush3.bf16.msra.mxu1 %v1524_v0 }
 0x15b   :  { %1526 = vmatprep.subr.bf16.mxu1 %v1668_v16  ;;  %v1530_v21 = vpack.c.bf16 %v991_v19, %v990_v15 }
 0x15c   :  { %v1527_v22 = vpack.c.bf16 %v989_v13, %v988_v20 }
 0x15e   :  { %1528 = vmatpush3.bf16.msra.mxu1 %v1527_v22 }
 0x15f   :  { %1529 = vmatprep.subr.bf16.mxu1 %v1668_v16 }
 0x162   :  { %1531 = vmatpush3.bf16.msra.mxu1 %v1530_v21 }
 0x163   :  { %1532 = vmatprep.subr.bf16.mxu1 %v1668_v16 }
 0x165   :  { %1487 = vmatmul.mubr.f32.vlgmr.msra.gmra.mrb[32].mxu1 %v992_v26 }
 0x166   :  { %1534 = vmatpush3.bf16.msra.mxu1 %v1533_v44  ;;  %1505 = vmatprep.mubr.msk.f32.mxu1 %vm1669_vm0, %v1670_v17  ;;  %v1070_v17 = vld [vmem:[%s2159_s6 + $0x38] sm:$0xff]  ;;  %s1644_s6 = scalar_lea.vmem %s1161_s11, 32 }
 0x167   :  { %1535 = vmatprep.subr.bf16.mxu1 %v1668_v16  ;;  %v1542_v24 = vpack.c.bf16 %v1070_v17, %v1069_v45  ;;  %p1645_p0 = scmp.ne.s32.totalorder %s1161_s11, %s1644_s6  ;;  %p1650_p2 = scmp.lt.s32.totalorder %s1644_s6, %s1644_s6 }
 0x169   :  { %p1651_p3 = por %p1650_p2, %p1649_p1 }
 0x16a   :  { %1537 = vmatpush3.bf16.msra.mxu1 %v1536_v30 }
 0x16b   :  { %1538 = vmatprep.subr.bf16.mxu1 %v1668_v16  ;;  %p1652_p4 = pnand %p1651_p3, %p1645_p0 }
 0x16e   :  { %1540 = vmatpush3.bf16.msra.mxu1 %v1539_v32 }
 0x16f   :  { %1541 = vmatprep.subr.bf16.mxu1 %v1668_v16 }
 0x172   :  { %1543 = vmatpush3.bf16.msra.mxu1 %v1542_v24 }
 0x238   :  { %v1059_v33 = vpop.f32.mrb[32].mxu1 }
 0x239   :  { %v1488_v41 = vpop.f32.mrb[33].mxu1  ;;  %1506 = vmatmul.mubr.msk.f32.vlgmr.msra.gmra.mrb[34].mxu1 %vm1078_vm1, %v1059_v33 }
 0x30c   :  { %v1148_v35 = vpop.f32.mrb[34].mxu1 }
 0x30d   :  { %v1149_v31 = vadd.f32 %v1250_v34, %v1148_v35  ;;  %v1507_v25 = vpop.f32.mrb[35].mxu1 }
 0x30f   :  { %1153 = vst.msk [vmem:[#allocation2] sm:$0x3] %vm1152_vm2, %v1149_v31 }
 0x310   :  { %1655 = shalt.err (!%p1652_p4)
}
 0x311   :  { %s1656_s2 = scalar_lea.hbm %s2161_s8, 32 }
 0x312   :  { %p1657_p5 = scmp.ne.s32.totalorder %s2161_s8, %s1656_s2  ;;  %p1660_p6 = scmp.lt.u32.totalorder %s1656_s2, %s2161_s8 }
 0x314   :  { %p1662_p7 = pnand %p1660_p6, %p1657_p5 }
 0x316   :  { %1665 = shalt.err (!%p1662_p7)
}
 0x317   :  { %1163 = dma.vmem_to_hbm [thread:$0]  %s1161_s11, 32, %s2161_s8, [#allocation3]  }
 0x318   :  { %1666 = dma.done.wait [#allocation3], 32  }
 0x319   :  { %1667 = vsyncadd [#allocation3], 4294967264 }
 0x31a   :  { %1167 = vsyncpa [#allocation3], 1 }

</bundles_post_ra>
